<compile_context>
chip_gen: v7x
topology: tpu7x:2x2x1
jax: 0.10.0
libtpu: 0.0.40
codegen_flags: <defaults>
</compile_context>

<pallas_src>
import math
from functools import partial

import jax
import jax.numpy as jnp
from jax import lax
from jax.experimental import pallas as pl
from jax.experimental.pallas import tpu as pltpu

F32 = jnp.float32
BF16 = jnp.bfloat16              # MXU-native operand dtype + HBM activation dtype
EPS_LN = 1e-5


# ----------------------------------------------------------------------------
# generation-aware sizing (v5e/v6e: 128 MiB VMEM, v7x: 64 MiB)
# ----------------------------------------------------------------------------
def _vmem_capacity_bytes():
    try:
        return int(pltpu.get_tpu_info().vmem_capacity_bytes)
    except Exception:
        return 64 * 1024 * 1024                       # conservative (v7x-sized) fallback


_VMEM_CAP = _vmem_capacity_bytes()
VMEM_LIMIT = min(_VMEM_CAP * 3 // 4, 100 * 1024 * 1024)   # headroom for internal scratch
ROW_TILE = 1024 if _VMEM_CAP >= (96 << 20) else 512       # bigger tiles on 128-MiB parts
SEQ_L_TILE = 256                  # residue-length tile for the seq-pooling kernel
SEQ_S_TILE = 16                   # MSA-depth tile (S is an 'arbitrary' accumulation axis)


# ----------------------------------------------------------------------------
# small helpers used inside kernels (all f32 internally)
# ----------------------------------------------------------------------------
def _ln(x, w, b):
    """torch.nn.LayerNorm semantics (biased variance, eps=1e-5), rsqrt on the EUP."""
    mu = jnp.mean(x, axis=-1, keepdims=True)
    xc = x - mu
    var = jnp.mean(xc * xc, axis=-1, keepdims=True)
    return xc * lax.rsqrt(var + EPS_LN) * w + b


def _gelu(x):
    # tanh-approx GELU (EUP tanh); matches torch's exact-erf GELU to ~1e-3.
    c = 0.7978845608028654  # sqrt(2/pi)
    return 0.5 * x * (1.0 + jnp.tanh(c * (x + 0.044715 * x * x * x)))


def _sigmoid(x):
    return pl.reciprocal(1.0 + jnp.exp(-x), approx=True)


def _softmax_last(x):
    m = jnp.max(x, axis=-1, keepdims=True)
    e = jnp.exp(x - m)
    return e * pl.reciprocal(jnp.sum(e, axis=-1, keepdims=True), approx=True)


# ----------------------------------------------------------------------------
# pallas_call plumbing
# ----------------------------------------------------------------------------
def _cparams(*sem):
    return pltpu.CompilerParams(dimension_semantics=tuple(sem),
                                vmem_limit_bytes=VMEM_LIMIT)


def _full_spec(a):
    nd = a.ndim
    return pl.BlockSpec(a.shape, lambda *_: (0,) * nd)


def _row_spec(a, tr):
    nd = a.ndim
    return pl.BlockSpec((tr,) + a.shape[1:], lambda i: (i,) + (0,) * (nd - 1))


def _row_call(kernel, tiled, fulls, out_feats, *, out_dtype=BF16, tr=None):
    """Row-tiled pallas_call: `tiled` args share the row axis (dim 0), `fulls` are resident."""
    rows = tiled[0].shape[0]
    tr = min(tr if tr is not None else ROW_TILE, rows)
    grid = (pl.cdiv(rows, tr),)
    in_specs = [_row_spec(a, tr) for a in tiled] + [_full_spec(a) for a in fulls]
    return pl.pallas_call(
        kernel,
        out_shape=jax.ShapeDtypeStruct((rows, out_feats), out_dtype),
        grid=grid,
        in_specs=in_specs,
        out_specs=pl.BlockSpec((tr, out_feats), lambda i: (i, 0)),
        compiler_params=_cparams("parallel"),
    )(*tiled, *fulls)


# ----------------------------------------------------------------------------
# kernels
# ----------------------------------------------------------------------------
def linear_kernel(x_ref, w_ref, b_ref, o_ref):
    x = x_ref[...].astype(BF16)
    o_ref[...] = (jnp.dot(x, w_ref[...], preferred_element_type=F32)
                  + b_ref[...]).astype(o_ref.dtype)


def masked_ln_kernel(x_ref, padf_ref, w_ref, b_ref, o_ref):
    # x.masked_fill(pad, 0) followed by LayerNorm  (AFNO head).  f32 out (feeds the FFT).
    xm = x_ref[...].astype(F32) * (1.0 - padf_ref[...])
    o_ref[...] = _ln(xm, w_ref[...], b_ref[...]).astype(o_ref.dtype)


def afno_freq_kernel(zr_ref, zi_ref, w1_ref, b1_ref, w2_ref, b2_ref,
                     or_ref, oi_ref, *, lam):
    # Complex block-diagonal 2-layer MLP, packed as real|imag along the feature axis:
    #   [zr|zi] @ [[Wr, Wi], [-Wi, Wr]] + [br|bi] == [o_r | o_i]
    # followed by complex soft-shrink  z * relu(|z| - lam) / (|z| + 1e-9).
    d = or_ref.shape[-1]
    zp = jnp.concatenate([zr_ref[...], zi_ref[...]], axis=-1).astype(BF16)     # [tr, 2D]
    o1 = _gelu(jnp.dot(zp, w1_ref[...], preferred_element_type=F32) + b1_ref[...])
    o2 = jnp.dot(o1.astype(BF16), w2_ref[...], preferred_element_type=F32) + b2_ref[...]
    o2r, o2i = o2[:, :d], o2[:, d:]
    mag = jnp.sqrt(o2r * o2r + o2i * o2i)
    fac = jnp.maximum(mag - lam, 0.0) * pl.reciprocal(mag + 1e-9, approx=True)
    or_ref[...] = (o2r * fac).astype(or_ref.dtype)
    oi_ref[...] = (o2i * fac).astype(oi_ref.dtype)


def mix_ffn_kernel(xn_ref, y_ref, padf_ref, gamma_ref, nw_ref, nb_ref,
                   w1_ref, b1_ref, w2_ref, b2_ref, o_ref):
    # Fused: AFNO residual  t = xn + gamma * masked(irfft2)   +   msa_transition FFN
    #        out = t + W2 GELU(W1 LN(t) + b1) + b2
    t = xn_ref[...].astype(F32) + gamma_ref[...] * (y_ref[...].astype(F32)
                                                    * (1.0 - padf_ref[...]))
    tn = _ln(t, nw_ref[...], nb_ref[...]).astype(BF16)
    h = _gelu(jnp.dot(tn, w1_ref[...], preferred_element_type=F32) + b1_ref[...]).astype(BF16)
    o_ref[...] = (t + jnp.dot(h, w2_ref[...], preferred_element_type=F32)
                  + b2_ref[...]).astype(o_ref.dtype)


def seq_pool_update_kernel(msa_ref, sm_ref, valid_ref, res_ref, nw_ref, nb_ref,
                           wog_ref, bog_ref, o_ref, acc_ref, *, d, s_total, ts):
    # Masked mean over MSA depth (S tiled as the innermost 'arbitrary' grid axis,
    # f32 VMEM accumulator) fused with the gated sequence->residue update.
    s_idx = pl.program_id(2)

    @pl.when(s_idx == 0)
    def _():
        acc_ref[...] = jnp.zeros_like(acc_ref)

    m = msa_ref[0].astype(F32)                              # [TS, TL, D]
    w = sm_ref[0]                                           # [TS, 1, 1]  (1.0 = valid row)
    row = lax.broadcasted_iota(jnp.int32, (ts, 1, 1), 0) + s_idx * ts
    contrib = jnp.where(row < s_total, m * w, 0.0)          # guard partial S tiles
    acc_ref[...] += jnp.sum(contrib, axis=0)                # [TL, D]

    @pl.when(s_idx == pl.num_programs(2) - 1)
    def _():
        mean = acc_ref[...] / valid_ref[0]                  # matches torch (no clamp)
        sn = _ln(mean, nw_ref[...], nb_ref[...]).astype(BF16)
        ug = jnp.dot(sn, wog_ref[...], preferred_element_type=F32) + bog_ref[...]  # [TL,2D]
        upd = _sigmoid(ug[:, d:]) * ug[:, :d]
        o_ref[0] = (res_ref[0].astype(F32) + upd).astype(o_ref.dtype)


def res_attn_kernel(x_ref, km_ref, n1w, n1b, wqkv, bqkv, wo, bo,
                    n2w, n2b, f1w, f1b, f2w, f2b, o_ref, *, n_heads, scale):
    # _ResidueSelfAttention: x = LN(x); x = x + MHA(x); out = x + FFN(LN2(x)).
    # LN and the packed QKV projection run once; heads are a static in-kernel loop;
    # contexts are concatenated for a single dense out-projection.
    # TODO(synk): for large L, tile the key axis flash-attention style and add a
    # query-tile 'parallel' grid axis (v7x megacore when B == 1).
    D = o_ref.shape[-1]
    hd = D // n_heads
    x = x_ref[0].astype(F32)                                             # [L, D]
    xn = _ln(x, n1w[...], n1b[...])
    qkv = jnp.dot(xn.astype(BF16), wqkv[...], preferred_element_type=F32) + bqkv[...]
    neg = jnp.where(km_ref[0] > 0.5, -1e30, 0.0)                         # [1, L] key mask

    ctx_parts = []
    for h in range(n_heads):
        q = qkv[:, h * hd:(h + 1) * hd].astype(BF16)
        k = qkv[:, D + h * hd:D + (h + 1) * hd].astype(BF16)
        v = qkv[:, 2 * D + h * hd:2 * D + (h + 1) * hd].astype(BF16)
        s = lax.dot_general(q, k, (((1,), (1,)), ((), ())),
                            preferred_element_type=F32) * scale + neg    # [L, L]
        a = _softmax_last(s).astype(BF16)
        ctx_parts.append(jnp.dot(a, v, preferred_element_type=F32))      # [L, hd]
    ctx = jnp.concatenate(ctx_parts, axis=-1).astype(BF16)               # [L, D]

    attn = jnp.dot(ctx, wo[...], preferred_element_type=F32) + bo[...]
    y = xn + attn                      # residual base is LN(x), per the module
    yn = _ln(y, n2w[...], n2b[...]).astype(BF16)
    hmid = _gelu(jnp.dot(yn, f1w[...], preferred_element_type=F32) + f1b[...]).astype(BF16)
    o_ref[0] = (y + jnp.dot(hmid, f2w[...], preferred_element_type=F32)
                + f2b[...]).astype(o_ref.dtype)


# ----------------------------------------------------------------------------
# model pieces (wrappers)
# ----------------------------------------------------------------------------
def _afno_call(zr, zi, p):
    rows, D = zr.shape
    tr = min(ROW_TILE, rows)
    out_spec = pl.BlockSpec((tr, D), lambda i: (i, 0))
    return pl.pallas_call(
        partial(afno_freq_kernel, lam=0.01),
        out_shape=[jax.ShapeDtypeStruct((rows, D), F32),
                   jax.ShapeDtypeStruct((rows, D), F32)],
        grid=(pl.cdiv(rows, tr),),
        in_specs=[_row_spec(zr, tr), _row_spec(zi, tr),
                  _full_spec(p['w1c']), _full_spec(p['b1c']),
                  _full_spec(p['w2c']), _full_spec(p['b2c'])],
        out_specs=[out_spec, out_spec],
        compiler_params=_cparams("parallel"),
    )(zr, zi, p['w1c'], p['b1c'], p['w2c'], p['b2c'])


def afno_mix_and_transition(msa, padr, p):
    """AFNOMix2D.forward + msa_transition FFN (eval mode), fused residual/FFN tail."""
    B, S, L, D = msa.shape
    rows = B * S * L
    xn = _row_call(masked_ln_kernel, [msa.reshape(rows, D), padr],
                   [p['mix_norm_w'], p['mix_norm_b']], D, out_dtype=F32)
    xn4 = xn.reshape(B, S, L, D)

    # TODO(synk): rfft2/irfft2 have no Pallas TPU primitive; computed with jnp.fft
    # between the Pallas kernels (could be folded in as DFT matmuls for small S,L).
    z = jnp.fft.rfft2(xn4, axes=(1, 2), norm='ortho')          # [B,S,L//2+1,D] complex64
    Lh = L // 2 + 1
    nf = B * S * Lh
    zr = jnp.real(z).reshape(nf, D)
    zi = jnp.imag(z).reshape(nf, D)

    o_r, o_i = _afno_call(zr, zi, p)
    zc = lax.complex(o_r, o_i).reshape(B, S, Lh, D)
    y = jnp.fft.irfft2(zc, s=(S, L), axes=(1, 2), norm='ortho')

    out = _row_call(mix_ffn_kernel, [xn, y.reshape(rows, D), padr],
                    [p['mix_gamma'], p['mt_norm_w'], p['mt_norm_b'],
                     p['mt_w1'], p['mt_b1'], p['mt_w2'], p['mt_b2']], D)
    return out.reshape(B, S, L, D)


def seq_pool_update(msa, smask, valid, residue, p):
    """Masked mean over S (tiled, accumulated) + gated sequence->residue update."""
    B, S, L, D = msa.shape
    TL = min(L, SEQ_L_TILE)
    TS = min(S, SEQ_S_TILE)
    return pl.pallas_call(
        partial(seq_pool_update_kernel, d=D, s_total=S, ts=TS),
        out_shape=jax.ShapeDtypeStruct((B, L, D), BF16),
        grid=(B, pl.cdiv(L, TL), pl.cdiv(S, TS)),
        in_specs=[
            pl.BlockSpec((1, TS, TL, D), lambda b, l, s: (b, s, l, 0)),
            pl.BlockSpec((1, TS, 1, 1), lambda b, l, s: (b, s, 0, 0)),
            pl.BlockSpec((1, 1, 1), lambda b, l, s: (b, 0, 0)),
            pl.BlockSpec((1, TL, D), lambda b, l, s: (b, l, 0)),
            _full_spec(p['seq_norm_w']), _full_spec(p['seq_norm_b']),
            _full_spec(p['seq_wog']), _full_spec(p['seq_bog']),
        ],
        out_specs=pl.BlockSpec((1, TL, D), lambda b, l, s: (b, l, 0)),
        scratch_shapes=[pltpu.VMEM((TL, D), F32)],
        compiler_params=_cparams("parallel", "parallel", "arbitrary"),
    )(msa, smask, valid, residue,
      p['seq_norm_w'], p['seq_norm_b'], p['seq_wog'], p['seq_bog'])


def residue_attention(residue, km, p, n_heads):
    """_ResidueSelfAttention (attention + FFN) fused, one grid step per batch element."""
    B, L, D = residue.shape
    scale = 1.0 / math.sqrt(D // n_heads)
    return pl.pallas_call(
        partial(res_attn_kernel, n_heads=n_heads, scale=scale),
        out_shape=jax.ShapeDtypeStruct((B, L, D), BF16),
        grid=(B,),
        in_specs=[
            pl.BlockSpec((1, L, D), lambda b: (b, 0, 0)),
            pl.BlockSpec((1, 1, L), lambda b: (b, 0, 0)),
            _full_spec(p['ra_norm_w']), _full_spec(p['ra_norm_b']),
            _full_spec(p['ra_wqkv']), _full_spec(p['ra_bqkv']),
            _full_spec(p['ra_wo']), _full_spec(p['ra_bo']),
            _full_spec(p['rf_norm_w']), _full_spec(p['rf_norm_b']),
            _full_spec(p['rf_w1']), _full_spec(p['rf_b1']),
            _full_spec(p['rf_w2']), _full_spec(p['rf_b2']),
        ],
        out_specs=pl.BlockSpec((1, L, D), lambda b: (b, 0, 0)),
        compiler_params=_cparams("parallel"),
    )(residue, km, p['ra_norm_w'], p['ra_norm_b'],
      p['ra_wqkv'], p['ra_bqkv'], p['ra_wo'], p['ra_bo'],
      p['rf_norm_w'], p['rf_norm_b'], p['rf_w1'], p['rf_b1'], p['rf_w2'], p['rf_b2'])


def evoformer_block(msa, residue, padr, km, smask, valid, p, n_heads):
    msa = afno_mix_and_transition(msa, padr, p)
    residue = seq_pool_update(msa, smask, valid, residue, p)
    residue = residue_attention(residue, km, p, n_heads)
    return msa, residue


def evoformer_lite_msa_seq(params, msa_in, residue_in, pad_mask, seq_pad_mask, n_heads):
    B, S, L, d_msa = msa_in.shape
    D = params['msa_proj_w'].shape[1]
    assert D % n_heads == 0
    pad_mask_f = pad_mask.astype(F32)              # [B, L]   1.0 = PAD residue
    seq_pad_f = seq_pad_mask.astype(F32)           # [B, S]   1.0 = PAD MSA row

    # input projections (Dropout = identity in eval); activation streams live in bf16.
    msa = _row_call(linear_kernel, [msa_in.reshape(B * S * L, d_msa)],
                    [params['msa_proj_w'], params['msa_proj_b']], D).reshape(B, S, L, D)
    residue = _row_call(linear_kernel, [residue_in.reshape(B * L, residue_in.shape[-1])],
                        [params['esm_proj_w'], params['esm_proj_b']], D).reshape(B, L, D)

    # pad = seq_pad_mask[:, :, None] | pad_mask[:, None, :]
    padf = jnp.maximum(seq_pad_f[:, :, None], pad_mask_f[:, None, :])    # [B, S, L]
    padr = padf.reshape(B * S * L, 1)
    km = pad_mask_f.reshape(B, 1, L)                                     # attention key mask
    smask = (1.0 - seq_pad_f).reshape(B, S, 1, 1)                        # 1.0 = valid MSA row
    valid = jnp.sum(smask, axis=1)                                       # [B, 1, 1]

    for p in params['blocks']:
        msa, residue = evoformer_block(msa, residue, padr, km, smask, valid, p, n_heads)
    return residue.astype(F32)


# ----------------------------------------------------------------------------
# deterministic parameter init (synthetic weights; shapes follow the module, then packed)
# ----------------------------------------------------------------------------
def init_params(key, d_msa, d_model, n_blocks, n_heads):
    D = d_model
    nb_afno, hf = 8, 1
    bs = D // nb_afno
    keys = iter(jax.random.split(key, 256))

    def nrm(shape, scale=0.02):
        return (scale * jax.random.normal(next(keys), shape)).astype(F32)

    bf = lambda a: a.astype(BF16)
    bd = lambda w: jax.scipy.linalg.block_diag(*[w[i] for i in range(w.shape[0])]).astype(F32)

    params = {
        'msa_proj_w': bf(nrm((d_msa, D))), 'msa_proj_b': nrm((1, D)),
        'esm_proj_w': bf(nrm((1152, D))), 'esm_proj_b': nrm((1, D)),
        'blocks': [],
    }
    for _ in range(n_blocks):
        # AFNO block weights, packed real|imag into one lane-dense matrix per layer.
        w1 = nrm((2, nb_afno, bs, bs * hf)); b1 = nrm((2, nb_afno, bs * hf))
        w2 = nrm((2, nb_afno, bs * hf, bs)); b2 = nrm((2, nb_afno, bs))
        W1r, W1i, W2r, W2i = bd(w1[0]), bd(w1[1]), bd(w2[0]), bd(w2[1])
        w1c = jnp.concatenate([jnp.concatenate([W1r, W1i], axis=1),
                               jnp.concatenate([-W1i, W1r], axis=1)], axis=0)
        w2c = jnp.concatenate([jnp.concatenate([W2r, W2i], axis=1),
                               jnp.concatenate([-W2i, W2r], axis=1)], axis=0)
        b1c = jnp.concatenate([b1[0].reshape(1, -1), b1[1].reshape(1, -1)], axis=-1)
        b2c = jnp.concatenate([b2[0].reshape(1, -1), b2[1].reshape(1, -1)], axis=-1)

        blk = {
            # AFNOMix2D
            'mix_norm_w': jnp.ones((1, D), F32), 'mix_norm_b': jnp.zeros((1, D), F32),
            'mix_gamma': jnp.full((1, D), 0.1, F32),
            'w1c': bf(w1c), 'b1c': b1c, 'w2c': bf(w2c), 'b2c': b2c,
            # msa_transition FFN
            'mt_norm_w': jnp.ones((1, D), F32), 'mt_norm_b': jnp.zeros((1, D), F32),
            'mt_w1': bf(nrm((D, 4 * D))), 'mt_b1': nrm((1, 4 * D)),
            'mt_w2': bf(nrm((4 * D, D))), 'mt_b2': nrm((1, D)),
            # seq pooling / gating (module zero-inits weights, gate bias = 1; out|gate packed)
            'seq_norm_w': jnp.ones((1, D), F32), 'seq_norm_b': jnp.zeros((1, D), F32),
            'seq_wog': jnp.zeros((D, 2 * D), BF16),
            'seq_bog': jnp.concatenate([jnp.zeros((1, D), F32), jnp.ones((1, D), F32)], axis=-1),
            # residue self-attention (QKV packed [D, 3D], dense out-proj [D, D])
            'ra_norm_w': jnp.ones((1, D), F32), 'ra_norm_b': jnp.zeros((1, D), F32),
            'ra_wqkv': bf(nrm((D, 3 * D))), 'ra_bqkv': nrm((1, 3 * D)),
            'ra_wo': bf(nrm((D, D))), 'ra_bo': nrm((1, D)),
            # residue FFN
            'rf_norm_w': jnp.ones((1, D), F32), 'rf_norm_b': jnp.zeros((1, D), F32),
            'rf_w1': bf(nrm((D, 4 * D))), 'rf_b1': nrm((1, 4 * D)),
            'rf_w2': bf(nrm((4 * D, D))), 'rf_b2': nrm((1, D)),
        }
        params['blocks'].append(blk)
    return params


# ----------------------------------------------------------------------------
if __name__ == "__main__":
    B, S, L = 2, 8, 16
    d_msa, d_model, n_blocks, n_heads = 24, 32, 2, 4

    key = jax.random.PRNGKey(0)
    kp, k_msa, k_res = jax.random.split(key, 3)
    params = init_params(kp, d_msa, d_model, n_blocks, n_heads)

    msa = jax.random.normal(k_msa, (B, S, L, d_msa), dtype=F32)
    residue = jax.random.normal(k_res, (B, L, 1152), dtype=F32)
    pad_mask = jnp.zeros((B, L), dtype=bool).at[1, L - 3:].set(True)       # padded residues
    seq_pad_mask = jnp.zeros((B, S), dtype=bool).at[1, S - 2:].set(True)   # padded MSA rows

    fwd = jax.jit(partial(evoformer_lite_msa_seq, n_heads=n_heads))
    out = fwd(params, msa, residue, pad_mask, seq_pad_mask)
    out = jax.block_until_ready(out)
    assert out.shape == (B, L, d_model)
    assert out.dtype == F32
    assert bool(jnp.all(jnp.isfinite(out)))
    print("KERNEL_OK")
</pallas_src>

<mosaic_0001>
module attributes {stable_mosaic.version = 11 : i64} {
  func.func @masked_ln_kernel(%arg0: i32, %arg1: memref<256x32xbf16, #tpu.memory_space<vmem>>, %arg2: memref<256x1xf32, #tpu.memory_space<vmem>>, %arg3: memref<1x32xf32, #tpu.memory_space<vmem>>, %arg4: memref<1x32xf32, #tpu.memory_space<vmem>>, %arg5: memref<256x32xf32, #tpu.memory_space<vmem>>) attributes {dimension_semantics = [#tpu.dimension_semantics<parallel>], iteration_bounds = array<i64: 1>, scalar_prefetch = 0 : i64, scratch_operands = 0 : i64, tpu.core_type = #tpu.core_type<tc>, window_params = [{transform_indices = @transform_0, window_bounds = array<i64: 256, 32>}, {transform_indices = @transform_1, window_bounds = array<i64: 256, 1>}, {pipeline_mode = #tpu.pipeline_mode<synchronous>, transform_indices = @transform_2, window_bounds = array<i64: 1, 32>}, {pipeline_mode = #tpu.pipeline_mode<synchronous>, transform_indices = @transform_3, window_bounds = array<i64: 1, 32>}, {transform_indices = @transform_4, window_bounds = array<i64: 256, 32>}]} {
    %c0 = arith.constant 0 : index
    %c0_0 = arith.constant 0 : index
    %0 = vector.load %arg1[%c0, %c0_0] : memref<256x32xbf16, #tpu.memory_space<vmem>>, vector<256x32xbf16>
    %1 = arith.extf %0 : vector<256x32xbf16> to vector<256x32xf32>
    %c0_1 = arith.constant 0 : index
    %c0_2 = arith.constant 0 : index
    %2 = vector.load %arg2[%c0_1, %c0_2] : memref<256x1xf32, #tpu.memory_space<vmem>>, vector<256x1xf32>
    %cst = arith.constant 1.000000e+00 : f32
    %3 = vector.broadcast %cst : f32 to vector<256x1xf32>
    %4 = arith.subf %3, %2 : vector<256x1xf32>
    %5 = vector.broadcast %4 : vector<256x1xf32> to vector<256x32xf32>
    %6 = arith.mulf %1, %5 : vector<256x32xf32>
    %c0_3 = arith.constant 0 : index
    %c0_4 = arith.constant 0 : index
    %7 = vector.load %arg3[%c0_3, %c0_4] : memref<1x32xf32, #tpu.memory_space<vmem>>, vector<1x32xf32>
    %c0_5 = arith.constant 0 : index
    %c0_6 = arith.constant 0 : index
    %8 = vector.load %arg4[%c0_5, %c0_6] : memref<1x32xf32, #tpu.memory_space<vmem>>, vector<1x32xf32>
    %cst_7 = arith.constant dense<0.000000e+00> : vector<256xf32>
    %9 = vector.multi_reduction <add>, %6, %cst_7 [1] : vector<256x32xf32> to vector<256xf32>
    %10 = vector.shape_cast %9 : vector<256xf32> to vector<256x1xf32>
    %cst_8 = arith.constant 3.200000e+01 : f32
    %11 = vector.broadcast %cst_8 : f32 to vector<256x1xf32>
    %12 = arith.divf %10, %11 : vector<256x1xf32>
    %13 = vector.broadcast %12 : vector<256x1xf32> to vector<256x32xf32>
    %14 = arith.subf %6, %13 : vector<256x32xf32>
    %15 = arith.mulf %14, %14 : vector<256x32xf32>
    %cst_9 = arith.constant dense<0.000000e+00> : vector<256xf32>
    %16 = vector.multi_reduction <add>, %15, %cst_9 [1] : vector<256x32xf32> to vector<256xf32>
    %17 = vector.shape_cast %16 : vector<256xf32> to vector<256x1xf32>
    %cst_10 = arith.constant 3.200000e+01 : f32
    %18 = vector.broadcast %cst_10 : f32 to vector<256x1xf32>
    %19 = arith.divf %17, %18 : vector<256x1xf32>
    %cst_11 = arith.constant 9.99999974E-6 : f32
    %20 = vector.broadcast %cst_11 : f32 to vector<256x1xf32>
    %21 = arith.addf %19, %20 : vector<256x1xf32>
    %22 = math.rsqrt %21 : vector<256x1xf32>
    %23 = vector.broadcast %22 : vector<256x1xf32> to vector<256x32xf32>
    %24 = arith.mulf %14, %23 : vector<256x32xf32>
    %25 = vector.broadcast %7 : vector<1x32xf32> to vector<256x32xf32>
    %26 = arith.mulf %24, %25 : vector<256x32xf32>
    %27 = vector.broadcast %8 : vector<1x32xf32> to vector<256x32xf32>
    %28 = arith.addf %26, %27 : vector<256x32xf32>
    %c0_12 = arith.constant 0 : index
    %c0_13 = arith.constant 0 : index
    %29 = vector.load %arg5[%c0_12, %c0_13] : memref<256x32xf32, #tpu.memory_space<vmem>>, vector<256x32xf32>
    tpu.vector_store %arg5[%c0_12, %c0_13], %28 {strides = array<i32>} : memref<256x32xf32, #tpu.memory_space<vmem>>, vector<256x32xf32>,
    return
  }
  func.func @transform_0(%arg0: i32) -> (i32, i32) {
    %c0_i32 = arith.constant 0 : i32
    %c0_i32_0 = arith.constant 0 : i32
    return %arg0, %c0_i32 : i32, i32
  }
  func.func @transform_1(%arg0: i32) -> (i32, i32) {
    %c0_i32 = arith.constant 0 : i32
    %c0_i32_0 = arith.constant 0 : i32
    return %arg0, %c0_i32 : i32, i32
  }
  func.func @transform_2(%arg0: i32) -> (i32, i32) {
    %c0_i32 = arith.constant 0 : i32
    %c0_i32_0 = arith.constant 0 : i32
    %c0_i32_1 = arith.constant 0 : i32
    return %c0_i32, %c0_i32_0 : i32, i32
  }
  func.func @transform_3(%arg0: i32) -> (i32, i32) {
    %c0_i32 = arith.constant 0 : i32
    %c0_i32_0 = arith.constant 0 : i32
    %c0_i32_1 = arith.constant 0 : i32
    return %c0_i32, %c0_i32_0 : i32, i32
  }
  func.func @transform_4(%arg0: i32) -> (i32, i32) {
    %c0_i32 = arith.constant 0 : i32
    %c0_i32_0 = arith.constant 0 : i32
    return %arg0, %c0_i32 : i32, i32
  }
}

module attributes {stable_mosaic.version = 11 : i64} {
  func.func @linear_kernel(%arg0: i32, %arg1: memref<256x24xf32, #tpu.memory_space<vmem>>, %arg2: memref<24x32xbf16, #tpu.memory_space<vmem>>, %arg3: memref<1x32xf32, #tpu.memory_space<vmem>>, %arg4: memref<256x32xbf16, #tpu.memory_space<vmem>>) attributes {dimension_semantics = [#tpu.dimension_semantics<parallel>], iteration_bounds = array<i64: 1>, scalar_prefetch = 0 : i64, scratch_operands = 0 : i64, tpu.core_type = #tpu.core_type<tc>, window_params = [{transform_indices = @transform_0, window_bounds = array<i64: 256, 24>}, {pipeline_mode = #tpu.pipeline_mode<synchronous>, transform_indices = @transform_1, window_bounds = array<i64: 24, 32>}, {pipeline_mode = #tpu.pipeline_mode<synchronous>, transform_indices = @transform_2, window_bounds = array<i64: 1, 32>}, {transform_indices = @transform_3, window_bounds = array<i64: 256, 32>}]} {
    %c0 = arith.constant 0 : index
    %c0_0 = arith.constant 0 : index
    %0 = vector.load %arg1[%c0, %c0_0] : memref<256x24xf32, #tpu.memory_space<vmem>>, vector<256x24xf32>
    %1 = arith.truncf %0 : vector<256x24xf32> to vector<256x24xbf16>
    %c0_1 = arith.constant 0 : index
    %c0_2 = arith.constant 0 : index
    %2 = vector.load %arg2[%c0_1, %c0_2] : memref<24x32xbf16, #tpu.memory_space<vmem>>, vector<24x32xbf16>
    %cst = arith.constant dense<0.000000e+00> : vector<256x32xf32>
    %3 = tpu.matmul %1, %2, %cst {dimension_numbers = #tpu.dot_dimension_numbers<[1], [0], [0], [1], [0, 0, 1, 1], [], []>} : vector<256x24xbf16>, vector<24x32xbf16>, vector<256x32xf32> -> vector<256x32xf32>
    %c0_3 = arith.constant 0 : index
    %c0_4 = arith.constant 0 : index
    %4 = vector.load %arg3[%c0_3, %c0_4] : memref<1x32xf32, #tpu.memory_space<vmem>>, vector<1x32xf32>
    %5 = vector.broadcast %4 : vector<1x32xf32> to vector<256x32xf32>
    %6 = arith.addf %3, %5 : vector<256x32xf32>
    %7 = arith.truncf %6 : vector<256x32xf32> to vector<256x32xbf16>
    %c0_5 = arith.constant 0 : index
    %c0_6 = arith.constant 0 : index
    %8 = vector.load %arg4[%c0_5, %c0_6] : memref<256x32xbf16, #tpu.memory_space<vmem>>, vector<256x32xbf16>
    tpu.vector_store %arg4[%c0_5, %c0_6], %7 {strides = array<i32>} : memref<256x32xbf16, #tpu.memory_space<vmem>>, vector<256x32xbf16>,
    return
  }
  func.func @transform_0(%arg0: i32) -> (i32, i32) {
    %c0_i32 = arith.constant 0 : i32
    %c0_i32_0 = arith.constant 0 : i32
    return %arg0, %c0_i32 : i32, i32
  }
  func.func @transform_1(%arg0: i32) -> (i32, i32) {
    %c0_i32 = arith.constant 0 : i32
    %c0_i32_0 = arith.constant 0 : i32
    %c0_i32_1 = arith.constant 0 : i32
    return %c0_i32, %c0_i32_0 : i32, i32
  }
  func.func @transform_2(%arg0: i32) -> (i32, i32) {
    %c0_i32 = arith.constant 0 : i32
    %c0_i32_0 = arith.constant 0 : i32
    %c0_i32_1 = arith.constant 0 : i32
    return %c0_i32, %c0_i32_0 : i32, i32
  }
  func.func @transform_3(%arg0: i32) -> (i32, i32) {
    %c0_i32 = arith.constant 0 : i32
    %c0_i32_0 = arith.constant 0 : i32
    return %arg0, %c0_i32 : i32, i32
  }
}

module attributes {stable_mosaic.version = 11 : i64} {
  func.func @afno_freq_kernel(%arg0: i32, %arg1: memref<144x32xf32, #tpu.memory_space<vmem>>, %arg2: memref<144x32xf32, #tpu.memory_space<vmem>>, %arg3: memref<64x64xbf16, #tpu.memory_space<vmem>>, %arg4: memref<1x64xf32, #tpu.memory_space<vmem>>, %arg5: memref<64x64xbf16, #tpu.memory_space<vmem>>, %arg6: memref<1x64xf32, #tpu.memory_space<vmem>>, %arg7: memref<144x32xf32, #tpu.memory_space<vmem>>, %arg8: memref<144x32xf32, #tpu.memory_space<vmem>>) attributes {dimension_semantics = [#tpu.dimension_semantics<parallel>], iteration_bounds = array<i64: 1>, scalar_prefetch = 0 : i64, scratch_operands = 0 : i64, tpu.core_type = #tpu.core_type<tc>, window_params = [{transform_indices = @transform_0, window_bounds = array<i64: 144, 32>}, {transform_indices = @transform_1, window_bounds = array<i64: 144, 32>}, {pipeline_mode = #tpu.pipeline_mode<synchronous>, transform_indices = @transform_2, window_bounds = array<i64: 64, 64>}, {pipeline_mode = #tpu.pipeline_mode<synchronous>, transform_indices = @transform_3, window_bounds = array<i64: 1, 64>}, {pipeline_mode = #tpu.pipeline_mode<synchronous>, transform_indices = @transform_4, window_bounds = array<i64: 64, 64>}, {pipeline_mode = #tpu.pipeline_mode<synchronous>, transform_indices = @transform_5, window_bounds = array<i64: 1, 64>}, {transform_indices = @transform_6, window_bounds = array<i64: 144, 32>}, {transform_indices = @transform_7, window_bounds = array<i64: 144, 32>}]} {
    %c0 = arith.constant 0 : index
    %c0_0 = arith.constant 0 : index
    %0 = vector.load %arg1[%c0, %c0_0] : memref<144x32xf32, #tpu.memory_space<vmem>>, vector<144x32xf32>
    %c0_1 = arith.constant 0 : index
    %c0_2 = arith.constant 0 : index
    %1 = vector.load %arg2[%c0_1, %c0_2] : memref<144x32xf32, #tpu.memory_space<vmem>>, vector<144x32xf32>
    %2 = tpu.concatenate %0, %1 in 1 : vector<144x32xf32>, vector<144x32xf32> -> vector<144x64xf32>
    %3 = arith.truncf %2 : vector<144x64xf32> to vector<144x64xbf16>
    %c0_3 = arith.constant 0 : index
    %c0_4 = arith.constant 0 : index
    %4 = vector.load %arg3[%c0_3, %c0_4] : memref<64x64xbf16, #tpu.memory_space<vmem>>, vector<64x64xbf16>
    %cst = arith.constant dense<0.000000e+00> : vector<144x64xf32>
    %5 = tpu.matmul %3, %4, %cst {dimension_numbers = #tpu.dot_dimension_numbers<[1], [0], [0], [1], [0, 0, 1, 1], [], []>} : vector<144x64xbf16>, vector<64x64xbf16>, vector<144x64xf32> -> vector<144x64xf32>
    %c0_5 = arith.constant 0 : index
    %c0_6 = arith.constant 0 : index
    %6 = vector.load %arg4[%c0_5, %c0_6] : memref<1x64xf32, #tpu.memory_space<vmem>>, vector<1x64xf32>
    %7 = vector.broadcast %6 : vector<1x64xf32> to vector<144x64xf32>
    %8 = arith.addf %5, %7 : vector<144x64xf32>
    %cst_7 = arith.constant 5.000000e-01 : f32
    %9 = vector.broadcast %cst_7 : f32 to vector<144x64xf32>
    %10 = arith.mulf %9, %8 : vector<144x64xf32>
    %cst_8 = arith.constant 4.471500e-02 : f32
    %11 = vector.broadcast %cst_8 : f32 to vector<144x64xf32>
    %12 = arith.mulf %11, %8 : vector<144x64xf32>
    %13 = arith.mulf %12, %8 : vector<144x64xf32>
    %14 = arith.mulf %13, %8 : vector<144x64xf32>
    %15 = arith.addf %8, %14 : vector<144x64xf32>
    %cst_9 = arith.constant 0.797884583 : f32
    %16 = vector.broadcast %cst_9 : f32 to vector<144x64xf32>
    %17 = arith.mulf %16, %15 : vector<144x64xf32>
    %18 = math.tanh %17 : vector<144x64xf32>
    %cst_10 = arith.constant 1.000000e+00 : f32
    %19 = vector.broadcast %cst_10 : f32 to vector<144x64xf32>
    %20 = arith.addf %19, %18 : vector<144x64xf32>
    %21 = arith.mulf %10, %20 : vector<144x64xf32>
    %22 = arith.truncf %21 : vector<144x64xf32> to vector<144x64xbf16>
    %c0_11 = arith.constant 0 : index
    %c0_12 = arith.constant 0 : index
    %23 = vector.load %arg5[%c0_11, %c0_12] : memref<64x64xbf16, #tpu.memory_space<vmem>>, vector<64x64xbf16>
    %cst_13 = arith.constant dense<0.000000e+00> : vector<144x64xf32>
    %24 = tpu.matmul %22, %23, %cst_13 {dimension_numbers = #tpu.dot_dimension_numbers<[1], [0], [0], [1], [0, 0, 1, 1], [], []>} : vector<144x64xbf16>, vector<64x64xbf16>, vector<144x64xf32> -> vector<144x64xf32>
    %c0_14 = arith.constant 0 : index
    %c0_15 = arith.constant 0 : index
    %25 = vector.load %arg6[%c0_14, %c0_15] : memref<1x64xf32, #tpu.memory_space<vmem>>, vector<1x64xf32>
    %26 = vector.broadcast %25 : vector<1x64xf32> to vector<144x64xf32>
    %27 = arith.addf %24, %26 : vector<144x64xf32>
    %28 = vector.extract_strided_slice %27 {offsets = [0, 0], sizes = [144, 32], strides = [1, 1]} : vector<144x64xf32> to vector<144x32xf32>
    %29 = vector.extract_strided_slice %27 {offsets = [0, 32], sizes = [144, 32], strides = [1, 1]} : vector<144x64xf32> to vector<144x32xf32>
    %30 = arith.mulf %28, %28 : vector<144x32xf32>
    %31 = arith.mulf %29, %29 : vector<144x32xf32>
    %32 = arith.addf %30, %31 : vector<144x32xf32>
    %33 = math.sqrt %32 : vector<144x32xf32>
    %cst_16 = arith.constant 0.00999999977 : f32
    %34 = vector.broadcast %cst_16 : f32 to vector<144x32xf32>
    %35 = arith.subf %33, %34 : vector<144x32xf32>
    %cst_17 = arith.constant 0.000000e+00 : f32
    %36 = vector.broadcast %cst_17 : f32 to vector<144x32xf32>
    %37 = arith.maximumf %35, %36 : vector<144x32xf32>
    %cst_18 = arith.constant 9.99999971E-10 : f32
    %38 = vector.broadcast %cst_18 : f32 to vector<144x32xf32>
    %39 = arith.addf %33, %38 : vector<144x32xf32>
    %40 = tpu.reciprocal %39 {approx = true} : vector<144x32xf32> -> vector<144x32xf32>
    %41 = arith.mulf %37, %40 : vector<144x32xf32>
    %42 = arith.mulf %28, %41 : vector<144x32xf32>
    %c0_19 = arith.constant 0 : index
    %c0_20 = arith.constant 0 : index
    %43 = vector.load %arg7[%c0_19, %c0_20] : memref<144x32xf32, #tpu.memory_space<vmem>>, vector<144x32xf32>
    tpu.vector_store %arg7[%c0_19, %c0_20], %42 {strides = array<i32>} : memref<144x32xf32, #tpu.memory_space<vmem>>, vector<144x32xf32>,
    %44 = arith.mulf %29, %41 : vector<144x32xf32>
    %c0_21 = arith.constant 0 : index
    %c0_22 = arith.constant 0 : index
    %45 = vector.load %arg8[%c0_21, %c0_22] : memref<144x32xf32, #tpu.memory_space<vmem>>, vector<144x32xf32>
    tpu.vector_store %arg8[%c0_21, %c0_22], %44 {strides = array<i32>} : memref<144x32xf32, #tpu.memory_space<vmem>>, vector<144x32xf32>,
    return
  }
  func.func @transform_0(%arg0: i32) -> (i32, i32) {
    %c0_i32 = arith.constant 0 : i32
    %c0_i32_0 = arith.constant 0 : i32
    return %arg0, %c0_i32 : i32, i32
  }
  func.func @transform_1(%arg0: i32) -> (i32, i32) {
    %c0_i32 = arith.constant 0 : i32
    %c0_i32_0 = arith.constant 0 : i32
    return %arg0, %c0_i32 : i32, i32
  }
  func.func @transform_2(%arg0: i32) -> (i32, i32) {
    %c0_i32 = arith.constant 0 : i32
    %c0_i32_0 = arith.constant 0 : i32
    %c0_i32_1 = arith.constant 0 : i32
    return %c0_i32, %c0_i32_0 : i32, i32
  }
  func.func @transform_3(%arg0: i32) -> (i32, i32) {
    %c0_i32 = arith.constant 0 : i32
    %c0_i32_0 = arith.constant 0 : i32
    %c0_i32_1 = arith.constant 0 : i32
    return %c0_i32, %c0_i32_0 : i32, i32
  }
  func.func @transform_4(%arg0: i32) -> (i32, i32) {
    %c0_i32 = arith.constant 0 : i32
    %c0_i32_0 = arith.constant 0 : i32
    %c0_i32_1 = arith.constant 0 : i32
    return %c0_i32, %c0_i32_0 : i32, i32
  }
  func.func @transform_5(%arg0: i32) -> (i32, i32) {
    %c0_i32 = arith.constant 0 : i32
    %c0_i32_0 = arith.constant 0 : i32
    %c0_i32_1 = arith.constant 0 : i32
    return %c0_i32, %c0_i32_0 : i32, i32
  }
  func.func @transform_6(%arg0: i32) -> (i32, i32) {
    %c0_i32 = arith.constant 0 : i32
    %c0_i32_0 = arith.constant 0 : i32
    return %arg0, %c0_i32 : i32, i32
  }
  func.func @transform_7(%arg0: i32) -> (i32, i32) {
    %c0_i32 = arith.constant 0 : i32
    %c0_i32_0 = arith.constant 0 : i32
    return %arg0, %c0_i32 : i32, i32
  }
}

module attributes {stable_mosaic.version = 11 : i64} {
  func.func @mix_ffn_kernel(%arg0: i32, %arg1: memref<256x32xf32, #tpu.memory_space<vmem>>, %arg2: memref<256x32xf32, #tpu.memory_space<vmem>>, %arg3: memref<256x1xf32, #tpu.memory_space<vmem>>, %arg4: memref<1x32xf32, #tpu.memory_space<vmem>>, %arg5: memref<1x32xf32, #tpu.memory_space<vmem>>, %arg6: memref<1x32xf32, #tpu.memory_space<vmem>>, %arg7: memref<32x128xbf16, #tpu.memory_space<vmem>>, %arg8: memref<1x128xf32, #tpu.memory_space<vmem>>, %arg9: memref<128x32xbf16, #tpu.memory_space<vmem>>, %arg10: memref<1x32xf32, #tpu.memory_space<vmem>>, %arg11: memref<256x32xbf16, #tpu.memory_space<vmem>>) attributes {dimension_semantics = [#tpu.dimension_semantics<parallel>], iteration_bounds = array<i64: 1>, scalar_prefetch = 0 : i64, scratch_operands = 0 : i64, tpu.core_type = #tpu.core_type<tc>, window_params = [{transform_indices = @transform_0, window_bounds = array<i64: 256, 32>}, {transform_indices = @transform_1, window_bounds = array<i64: 256, 32>}, {transform_indices = @transform_2, window_bounds = array<i64: 256, 1>}, {pipeline_mode = #tpu.pipeline_mode<synchronous>, transform_indices = @transform_3, window_bounds = array<i64: 1, 32>}, {pipeline_mode = #tpu.pipeline_mode<synchronous>, transform_indices = @transform_4, window_bounds = array<i64: 1, 32>}, {pipeline_mode = #tpu.pipeline_mode<synchronous>, transform_indices = @transform_5, window_bounds = array<i64: 1, 32>}, {pipeline_mode = #tpu.pipeline_mode<synchronous>, transform_indices = @transform_6, window_bounds = array<i64: 32, 128>}, {pipeline_mode = #tpu.pipeline_mode<synchronous>, transform_indices = @transform_7, window_bounds = array<i64: 1, 128>}, {pipeline_mode = #tpu.pipeline_mode<synchronous>, transform_indices = @transform_8, window_bounds = array<i64: 128, 32>}, {pipeline_mode = #tpu.pipeline_mode<synchronous>, transform_indices = @transform_9, window_bounds = array<i64: 1, 32>}, {transform_indices = @transform_10, window_bounds = array<i64: 256, 32>}]} {
    %c0 = arith.constant 0 : index
    %c0_0 = arith.constant 0 : index
    %0 = vector.load %arg1[%c0, %c0_0] : memref<256x32xf32, #tpu.memory_space<vmem>>, vector<256x32xf32>
    %c0_1 = arith.constant 0 : index
    %c0_2 = arith.constant 0 : index
    %1 = vector.load %arg4[%c0_1, %c0_2] : memref<1x32xf32, #tpu.memory_space<vmem>>, vector<1x32xf32>
    %c0_3 = arith.constant 0 : index
    %c0_4 = arith.constant 0 : index
    %2 = vector.load %arg2[%c0_3, %c0_4] : memref<256x32xf32, #tpu.memory_space<vmem>>, vector<256x32xf32>
    %c0_5 = arith.constant 0 : index
    %c0_6 = arith.constant 0 : index
    %3 = vector.load %arg3[%c0_5, %c0_6] : memref<256x1xf32, #tpu.memory_space<vmem>>, vector<256x1xf32>
    %cst = arith.constant 1.000000e+00 : f32
    %4 = vector.broadcast %cst : f32 to vector<256x1xf32>
    %5 = arith.subf %4, %3 : vector<256x1xf32>
    %6 = vector.broadcast %5 : vector<256x1xf32> to vector<256x32xf32>
    %7 = arith.mulf %2, %6 : vector<256x32xf32>
    %8 = vector.broadcast %1 : vector<1x32xf32> to vector<256x32xf32>
    %9 = arith.mulf %8, %7 : vector<256x32xf32>
    %10 = arith.addf %0, %9 : vector<256x32xf32>
    %c0_7 = arith.constant 0 : index
    %c0_8 = arith.constant 0 : index
    %11 = vector.load %arg5[%c0_7, %c0_8] : memref<1x32xf32, #tpu.memory_space<vmem>>, vector<1x32xf32>
    %c0_9 = arith.constant 0 : index
    %c0_10 = arith.constant 0 : index
    %12 = vector.load %arg6[%c0_9, %c0_10] : memref<1x32xf32, #tpu.memory_space<vmem>>, vector<1x32xf32>
    %cst_11 = arith.constant dense<0.000000e+00> : vector<256xf32>
    %13 = vector.multi_reduction <add>, %10, %cst_11 [1] : vector<256x32xf32> to vector<256xf32>
    %14 = vector.shape_cast %13 : vector<256xf32> to vector<256x1xf32>
    %cst_12 = arith.constant 3.200000e+01 : f32
    %15 = vector.broadcast %cst_12 : f32 to vector<256x1xf32>
    %16 = arith.divf %14, %15 : vector<256x1xf32>
    %17 = vector.broadcast %16 : vector<256x1xf32> to vector<256x32xf32>
    %18 = arith.subf %10, %17 : vector<256x32xf32>
    %19 = arith.mulf %18, %18 : vector<256x32xf32>
    %cst_13 = arith.constant dense<0.000000e+00> : vector<256xf32>
    %20 = vector.multi_reduction <add>, %19, %cst_13 [1] : vector<256x32xf32> to vector<256xf32>
    %21 = vector.shape_cast %20 : vector<256xf32> to vector<256x1xf32>
    %cst_14 = arith.constant 3.200000e+01 : f32
    %22 = vector.broadcast %cst_14 : f32 to vector<256x1xf32>
    %23 = arith.divf %21, %22 : vector<256x1xf32>
    %cst_15 = arith.constant 9.99999974E-6 : f32
    %24 = vector.broadcast %cst_15 : f32 to vector<256x1xf32>
    %25 = arith.addf %23, %24 : vector<256x1xf32>
    %26 = math.rsqrt %25 : vector<256x1xf32>
    %27 = vector.broadcast %26 : vector<256x1xf32> to vector<256x32xf32>
    %28 = arith.mulf %18, %27 : vector<256x32xf32>
    %29 = vector.broadcast %11 : vector<1x32xf32> to vector<256x32xf32>
    %30 = arith.mulf %28, %29 : vector<256x32xf32>
    %31 = vector.broadcast %12 : vector<1x32xf32> to vector<256x32xf32>
    %32 = arith.addf %30, %31 : vector<256x32xf32>
    %33 = arith.truncf %32 : vector<256x32xf32> to vector<256x32xbf16>
    %c0_16 = arith.constant 0 : index
    %c0_17 = arith.constant 0 : index
    %34 = vector.load %arg7[%c0_16, %c0_17] : memref<32x128xbf16, #tpu.memory_space<vmem>>, vector<32x128xbf16>
    %cst_18 = arith.constant dense<0.000000e+00> : vector<256x128xf32>
    %35 = tpu.matmul %33, %34, %cst_18 {dimension_numbers = #tpu.dot_dimension_numbers<[1], [0], [0], [1], [0, 0, 1, 1], [], []>} : vector<256x32xbf16>, vector<32x128xbf16>, vector<256x128xf32> -> vector<256x128xf32>
    %c0_19 = arith.constant 0 : index
    %c0_20 = arith.constant 0 : index
    %36 = vector.load %arg8[%c0_19, %c0_20] : memref<1x128xf32, #tpu.memory_space<vmem>>, vector<1x128xf32>
    %37 = vector.broadcast %36 : vector<1x128xf32> to vector<256x128xf32>
    %38 = arith.addf %35, %37 : vector<256x128xf32>
    %cst_21 = arith.constant 5.000000e-01 : f32
    %39 = vector.broadcast %cst_21 : f32 to vector<256x128xf32>
    %40 = arith.mulf %39, %38 : vector<256x128xf32>
    %cst_22 = arith.constant 4.471500e-02 : f32
    %41 = vector.broadcast %cst_22 : f32 to vector<256x128xf32>
    %42 = arith.mulf %41, %38 : vector<256x128xf32>
    %43 = arith.mulf %42, %38 : vector<256x128xf32>
    %44 = arith.mulf %43, %38 : vector<256x128xf32>
    %45 = arith.addf %38, %44 : vector<256x128xf32>
    %cst_23 = arith.constant 0.797884583 : f32
    %46 = vector.broadcast %cst_23 : f32 to vector<256x128xf32>
    %47 = arith.mulf %46, %45 : vector<256x128xf32>
    %48 = math.tanh %47 : vector<256x128xf32>
    %cst_24 = arith.constant 1.000000e+00 : f32
    %49 = vector.broadcast %cst_24 : f32 to vector<256x128xf32>
    %50 = arith.addf %49, %48 : vector<256x128xf32>
    %51 = arith.mulf %40, %50 : vector<256x128xf32>
    %52 = arith.truncf %51 : vector<256x128xf32> to vector<256x128xbf16>
    %c0_25 = arith.constant 0 : index
    %c0_26 = arith.constant 0 : index
    %53 = vector.load %arg9[%c0_25, %c0_26] : memref<128x32xbf16, #tpu.memory_space<vmem>>, vector<128x32xbf16>
    %cst_27 = arith.constant dense<0.000000e+00> : vector<256x32xf32>
    %54 = tpu.matmul %52, %53, %cst_27 {dimension_numbers = #tpu.dot_dimension_numbers<[1], [0], [0], [1], [0, 0, 1, 1], [], []>} : vector<256x128xbf16>, vector<128x32xbf16>, vector<256x32xf32> -> vector<256x32xf32>
    %55 = arith.addf %10, %54 : vector<256x32xf32>
    %c0_28 = arith.constant 0 : index
    %c0_29 = arith.constant 0 : index
    %56 = vector.load %arg10[%c0_28, %c0_29] : memref<1x32xf32, #tpu.memory_space<vmem>>, vector<1x32xf32>
    %57 = vector.broadcast %56 : vector<1x32xf32> to vector<256x32xf32>
    %58 = arith.addf %55, %57 : vector<256x32xf32>
    %59 = arith.truncf %58 : vector<256x32xf32> to vector<256x32xbf16>
    %c0_30 = arith.constant 0 : index
    %c0_31 = arith.constant 0 : index
    %60 = vector.load %arg11[%c0_30, %c0_31] : memref<256x32xbf16, #tpu.memory_space<vmem>>, vector<256x32xbf16>
    tpu.vector_store %arg11[%c0_30, %c0_31], %59 {strides = array<i32>} : memref<256x32xbf16, #tpu.memory_space<vmem>>, vector<256x32xbf16>,
    return
  }
  func.func @transform_0(%arg0: i32) -> (i32, i32) {
    %c0_i32 = arith.constant 0 : i32
    %c0_i32_0 = arith.constant 0 : i32
    return %arg0, %c0_i32 : i32, i32
  }
  func.func @transform_1(%arg0: i32) -> (i32, i32) {
    %c0_i32 = arith.constant 0 : i32
    %c0_i32_0 = arith.constant 0 : i32
    return %arg0, %c0_i32 : i32, i32
  }
  func.func @transform_2(%arg0: i32) -> (i32, i32) {
    %c0_i32 = arith.constant 0 : i32
    %c0_i32_0 = arith.constant 0 : i32
    return %arg0, %c0_i32 : i32, i32
  }
  func.func @transform_3(%arg0: i32) -> (i32, i32) {
    %c0_i32 = arith.constant 0 : i32
    %c0_i32_0 = arith.constant 0 : i32
    %c0_i32_1 = arith.constant 0 : i32
    return %c0_i32, %c0_i32_0 : i32, i32
  }
  func.func @transform_4(%arg0: i32) -> (i32, i32) {
    %c0_i32 = arith.constant 0 : i32
    %c0_i32_0 = arith.constant 0 : i32
    %c0_i32_1 = arith.constant 0 : i32
    return %c0_i32, %c0_i32_0 : i32, i32
  }
  func.func @transform_5(%arg0: i32) -> (i32, i32) {
    %c0_i32 = arith.constant 0 : i32
    %c0_i32_0 = arith.constant 0 : i32
    %c0_i32_1 = arith.constant 0 : i32
    return %c0_i32, %c0_i32_0 : i32, i32
  }
  func.func @transform_6(%arg0: i32) -> (i32, i32) {
    %c0_i32 = arith.constant 0 : i32
    %c0_i32_0 = arith.constant 0 : i32
    %c0_i32_1 = arith.constant 0 : i32
    return %c0_i32, %c0_i32_0 : i32, i32
  }
  func.func @transform_7(%arg0: i32) -> (i32, i32) {
    %c0_i32 = arith.constant 0 : i32
    %c0_i32_0 = arith.constant 0 : i32
    %c0_i32_1 = arith.constant 0 : i32
    return %c0_i32, %c0_i32_0 : i32, i32
  }
  func.func @transform_8(%arg0: i32) -> (i32, i32) {
    %c0_i32 = arith.constant 0 : i32
    %c0_i32_0 = arith.constant 0 : i32
    %c0_i32_1 = arith.constant 0 : i32
    return %c0_i32, %c0_i32_0 : i32, i32
  }
  func.func @transform_9(%arg0: i32) -> (i32, i32) {
    %c0_i32 = arith.constant 0 : i32
    %c0_i32_0 = arith.constant 0 : i32
    %c0_i32_1 = arith.constant 0 : i32
    return %c0_i32, %c0_i32_0 : i32, i32
  }
  func.func @transform_10(%arg0: i32) -> (i32, i32) {
    %c0_i32 = arith.constant 0 : i32
    %c0_i32_0 = arith.constant 0 : i32
    return %arg0, %c0_i32 : i32, i32
  }
}

module attributes {stable_mosaic.version = 11 : i64} {
  func.func @linear_kernel(%arg0: i32, %arg1: memref<32x1152xf32, #tpu.memory_space<vmem>>, %arg2: memref<1152x32xbf16, #tpu.memory_space<vmem>>, %arg3: memref<1x32xf32, #tpu.memory_space<vmem>>, %arg4: memref<32x32xbf16, #tpu.memory_space<vmem>>) attributes {dimension_semantics = [#tpu.dimension_semantics<parallel>], iteration_bounds = array<i64: 1>, scalar_prefetch = 0 : i64, scratch_operands = 0 : i64, tpu.core_type = #tpu.core_type<tc>, window_params = [{transform_indices = @transform_0, window_bounds = array<i64: 32, 1152>}, {pipeline_mode = #tpu.pipeline_mode<synchronous>, transform_indices = @transform_1, window_bounds = array<i64: 1152, 32>}, {pipeline_mode = #tpu.pipeline_mode<synchronous>, transform_indices = @transform_2, window_bounds = array<i64: 1, 32>}, {transform_indices = @transform_3, window_bounds = array<i64: 32, 32>}]} {
    %c0 = arith.constant 0 : index
    %c0_0 = arith.constant 0 : index
    %0 = vector.load %arg1[%c0, %c0_0] : memref<32x1152xf32, #tpu.memory_space<vmem>>, vector<32x1152xf32>
    %1 = arith.truncf %0 : vector<32x1152xf32> to vector<32x1152xbf16>
    %c0_1 = arith.constant 0 : index
    %c0_2 = arith.constant 0 : index
    %2 = vector.load %arg2[%c0_1, %c0_2] : memref<1152x32xbf16, #tpu.memory_space<vmem>>, vector<1152x32xbf16>
    %cst = arith.constant dense<0.000000e+00> : vector<32x32xf32>
    %3 = tpu.matmul %1, %2, %cst {dimension_numbers = #tpu.dot_dimension_numbers<[1], [0], [0], [1], [0, 0, 1, 1], [], []>} : vector<32x1152xbf16>, vector<1152x32xbf16>, vector<32x32xf32> -> vector<32x32xf32>
    %c0_3 = arith.constant 0 : index
    %c0_4 = arith.constant 0 : index
    %4 = vector.load %arg3[%c0_3, %c0_4] : memref<1x32xf32, #tpu.memory_space<vmem>>, vector<1x32xf32>
    %5 = vector.broadcast %4 : vector<1x32xf32> to vector<32x32xf32>
    %6 = arith.addf %3, %5 : vector<32x32xf32>
    %7 = arith.truncf %6 : vector<32x32xf32> to vector<32x32xbf16>
    %c0_5 = arith.constant 0 : index
    %c0_6 = arith.constant 0 : index
    %8 = vector.load %arg4[%c0_5, %c0_6] : memref<32x32xbf16, #tpu.memory_space<vmem>>, vector<32x32xbf16>
    tpu.vector_store %arg4[%c0_5, %c0_6], %7 {strides = array<i32>} : memref<32x32xbf16, #tpu.memory_space<vmem>>, vector<32x32xbf16>,
    return
  }
  func.func @transform_0(%arg0: i32) -> (i32, i32) {
    %c0_i32 = arith.constant 0 : i32
    %c0_i32_0 = arith.constant 0 : i32
    return %arg0, %c0_i32 : i32, i32
  }
  func.func @transform_1(%arg0: i32) -> (i32, i32) {
    %c0_i32 = arith.constant 0 : i32
    %c0_i32_0 = arith.constant 0 : i32
    %c0_i32_1 = arith.constant 0 : i32
    return %c0_i32, %c0_i32_0 : i32, i32
  }
  func.func @transform_2(%arg0: i32) -> (i32, i32) {
    %c0_i32 = arith.constant 0 : i32
    %c0_i32_0 = arith.constant 0 : i32
    %c0_i32_1 = arith.constant 0 : i32
    return %c0_i32, %c0_i32_0 : i32, i32
  }
  func.func @transform_3(%arg0: i32) -> (i32, i32) {
    %c0_i32 = arith.constant 0 : i32
    %c0_i32_0 = arith.constant 0 : i32
    return %arg0, %c0_i32 : i32, i32
  }
}

module attributes {stable_mosaic.version = 11 : i64} {
  func.func @seq_pool_update_kernel(%arg0: i32, %arg1: i32, %arg2: i32, %arg3: memref<1x8x16x32xbf16, #tpu.memory_space<vmem>>, %arg4: memref<1x8x1x1xf32, #tpu.memory_space<vmem>>, %arg5: memref<1x1x1xf32, #tpu.memory_space<vmem>>, %arg6: memref<1x16x32xbf16, #tpu.memory_space<vmem>>, %arg7: memref<1x32xf32, #tpu.memory_space<vmem>>, %arg8: memref<1x32xf32, #tpu.memory_space<vmem>>, %arg9: memref<32x64xbf16, #tpu.memory_space<vmem>>, %arg10: memref<1x64xf32, #tpu.memory_space<vmem>>, %arg11: memref<1x16x32xbf16, #tpu.memory_space<vmem>>, %arg12: memref<16x32xf32, #tpu.memory_space<vmem>>) attributes {dimension_semantics = [#tpu.dimension_semantics<parallel>, #tpu.dimension_semantics<parallel>, #tpu.dimension_semantics<arbitrary>], iteration_bounds = array<i64: 2, 1, 1>, scalar_prefetch = 0 : i64, scratch_operands = 1 : i64, tpu.core_type = #tpu.core_type<tc>, window_params = [{transform_indices = @transform_0, window_bounds = array<i64: 1, 8, 16, 32>}, {transform_indices = @transform_1, window_bounds = array<i64: 1, 8, 1, 1>}, {transform_indices = @transform_2, window_bounds = array<i64: 1, 1, 1>}, {transform_indices = @transform_3, window_bounds = array<i64: 1, 16, 32>}, {pipeline_mode = #tpu.pipeline_mode<synchronous>, transform_indices = @transform_4, window_bounds = array<i64: 1, 32>}, {pipeline_mode = #tpu.pipeline_mode<synchronous>, transform_indices = @transform_5, window_bounds = array<i64: 1, 32>}, {pipeline_mode = #tpu.pipeline_mode<synchronous>, transform_indices = @transform_6, window_bounds = array<i64: 32, 64>}, {pipeline_mode = #tpu.pipeline_mode<synchronous>, transform_indices = @transform_7, window_bounds = array<i64: 1, 64>}, {transform_indices = @transform_8, window_bounds = array<i64: 1, 16, 32>}]} {
    %c0_i32 = arith.constant 0 : i32
    %0 = arith.cmpi eq, %arg2, %c0_i32 : i32
    %1 = arith.extui %0 : i1 to i32
    %c0_i32_0 = arith.constant 0 : i32
    %2 = arith.cmpi ne, %1, %c0_i32_0 : i32
    scf.if %2 {
      %cst_16 = arith.constant 0.000000e+00 : f32
      %27 = vector.broadcast %cst_16 : f32 to vector<16x32xf32>
      %c0_17 = arith.constant 0 : index
      %c0_18 = arith.constant 0 : index
      %28 = vector.load %arg12[%c0_17, %c0_18] : memref<16x32xf32, #tpu.memory_space<vmem>>, vector<16x32xf32>
      tpu.vector_store %arg12[%c0_17, %c0_18], %27 {strides = array<i32>} : memref<16x32xf32, #tpu.memory_space<vmem>>, vector<16x32xf32>,
    } else {
    }
    %c0 = arith.constant 0 : index
    %c0_1 = arith.constant 0 : index
    %c0_2 = arith.constant 0 : index
    %c0_3 = arith.constant 0 : index
    %3 = vector.load %arg3[%c0, %c0_1, %c0_2, %c0_3] : memref<1x8x16x32xbf16, #tpu.memory_space<vmem>>, vector<1x8x16x32xbf16>
    %4 = vector.shape_cast %3 : vector<1x8x16x32xbf16> to vector<8x16x32xbf16>
    %5 = arith.extf %4 : vector<8x16x32xbf16> to vector<8x16x32xf32>
    %c0_4 = arith.constant 0 : index
    %c0_5 = arith.constant 0 : index
    %c0_6 = arith.constant 0 : index
    %c0_7 = arith.constant 0 : index
    %6 = vector.load %arg4[%c0_4, %c0_5, %c0_6, %c0_7] : memref<1x8x1x1xf32, #tpu.memory_space<vmem>>, vector<1x8x1x1xf32>
    %7 = vector.shape_cast %6 : vector<1x8x1x1xf32> to vector<8x1x1xf32>
    %8 = tpu.iota {dimensions = array<i32: 0>} : vector<8x1x1xi32>
    %c8_i32 = arith.constant 8 : i32
    %9 = arith.muli %arg2, %c8_i32 : i32
    %10 = vector.broadcast %9 : i32 to vector<8x1x1xi32>
    %11 = arith.addi %8, %10 : vector<8x1x1xi32>
    %c8_i32_8 = arith.constant 8 : i32
    %12 = vector.broadcast %c8_i32_8 : i32 to vector<8x1x1xi32>
    %13 = arith.cmpi slt, %11, %12 : vector<8x1x1xi32>
    %14 = vector.broadcast %7 : vector<8x1x1xf32> to vector<8x16x32xf32>
    %15 = arith.mulf %5, %14 : vector<8x16x32xf32>
    %cst = arith.constant 0.000000e+00 : f32
    %16 = vector.shape_cast %13 : vector<8x1x1xi1> to vector<8x1x1xi1>
    %17 = vector.broadcast %16 : vector<8x1x1xi1> to vector<8x16x32xi1>
    %18 = vector.broadcast %cst : f32 to vector<8x16x32xf32>
    %19 = arith.select %17, %15, %18 : vector<8x16x32xi1>, vector<8x16x32xf32>
    %c0_9 = arith.constant 0 : index
    %c0_10 = arith.constant 0 : index
    %20 = vector.load %arg12[%c0_9, %c0_10] : memref<16x32xf32, #tpu.memory_space<vmem>>, vector<16x32xf32>
    %cst_11 = arith.constant dense<0.000000e+00> : vector<16x32xf32>
    %21 = vector.multi_reduction <add>, %19, %cst_11 [0] : vector<8x16x32xf32> to vector<16x32xf32>
    %22 = arith.addf %20, %21 : vector<16x32xf32>
    %c0_12 = arith.constant 0 : index
    %c0_13 = arith.constant 0 : index
    %23 = vector.load %arg12[%c0_12, %c0_13] : memref<16x32xf32, #tpu.memory_space<vmem>>, vector<16x32xf32>
    tpu.vector_store %arg12[%c0_12, %c0_13], %22 {strides = array<i32>} : memref<16x32xf32, #tpu.memory_space<vmem>>, vector<16x32xf32>,
    %c0_i32_14 = arith.constant 0 : i32
    %24 = arith.cmpi eq, %arg2, %c0_i32_14 : i32
    %25 = arith.extui %24 : i1 to i32
    %c0_i32_15 = arith.constant 0 : i32
    %26 = arith.cmpi ne, %25, %c0_i32_15 : i32
    scf.if %26 {
      %c0_16 = arith.constant 0 : index
      %c0_17 = arith.constant 0 : index
      %27 = vector.load %arg12[%c0_16, %c0_17] : memref<16x32xf32, #tpu.memory_space<vmem>>, vector<16x32xf32>
      %c0_18 = arith.constant 0 : index
      %c0_19 = arith.constant 0 : index
      %c0_20 = arith.constant 0 : index
      %28 = vector.load %arg5[%c0_18, %c0_19, %c0_20] : memref<1x1x1xf32, #tpu.memory_space<vmem>>, vector<1x1x1xf32>
      %29 = vector.shape_cast %28 : vector<1x1x1xf32> to vector<1x1xf32>
      %30 = vector.broadcast %29 : vector<1x1xf32> to vector<16x32xf32>
      %31 = arith.divf %27, %30 : vector<16x32xf32>
      %c0_21 = arith.constant 0 : index
      %c0_22 = arith.constant 0 : index
      %32 = vector.load %arg7[%c0_21, %c0_22] : memref<1x32xf32, #tpu.memory_space<vmem>>, vector<1x32xf32>
      %c0_23 = arith.constant 0 : index
      %c0_24 = arith.constant 0 : index
      %33 = vector.load %arg8[%c0_23, %c0_24] : memref<1x32xf32, #tpu.memory_space<vmem>>, vector<1x32xf32>
      %cst_25 = arith.constant dense<0.000000e+00> : vector<16xf32>
      %34 = vector.multi_reduction <add>, %31, %cst_25 [1] : vector<16x32xf32> to vector<16xf32>
      %35 = vector.shape_cast %34 : vector<16xf32> to vector<16x1xf32>
      %cst_26 = arith.constant 3.200000e+01 : f32
      %36 = vector.broadcast %cst_26 : f32 to vector<16x1xf32>
      %37 = arith.divf %35, %36 : vector<16x1xf32>
      %38 = vector.broadcast %37 : vector<16x1xf32> to vector<16x32xf32>
      %39 = arith.subf %31, %38 : vector<16x32xf32>
      %40 = arith.mulf %39, %39 : vector<16x32xf32>
      %cst_27 = arith.constant dense<0.000000e+00> : vector<16xf32>
      %41 = vector.multi_reduction <add>, %40, %cst_27 [1] : vector<16x32xf32> to vector<16xf32>
      %42 = vector.shape_cast %41 : vector<16xf32> to vector<16x1xf32>
      %cst_28 = arith.constant 3.200000e+01 : f32
      %43 = vector.broadcast %cst_28 : f32 to vector<16x1xf32>
      %44 = arith.divf %42, %43 : vector<16x1xf32>
      %cst_29 = arith.constant 9.99999974E-6 : f32
      %45 = vector.broadcast %cst_29 : f32 to vector<16x1xf32>
      %46 = arith.addf %44, %45 : vector<16x1xf32>
      %47 = math.rsqrt %46 : vector<16x1xf32>
      %48 = vector.broadcast %47 : vector<16x1xf32> to vector<16x32xf32>
      %49 = arith.mulf %39, %48 : vector<16x32xf32>
      %50 = vector.broadcast %32 : vector<1x32xf32> to vector<16x32xf32>
      %51 = arith.mulf %49, %50 : vector<16x32xf32>
      %52 = vector.broadcast %33 : vector<1x32xf32> to vector<16x32xf32>
      %53 = arith.addf %51, %52 : vector<16x32xf32>
      %54 = arith.truncf %53 : vector<16x32xf32> to vector<16x32xbf16>
      %c0_30 = arith.constant 0 : index
      %c0_31 = arith.constant 0 : index
      %55 = vector.load %arg9[%c0_30, %c0_31] : memref<32x64xbf16, #tpu.memory_space<vmem>>, vector<32x64xbf16>
      %cst_32 = arith.constant dense<0.000000e+00> : vector<16x64xf32>
      %56 = tpu.matmul %54, %55, %cst_32 {dimension_numbers = #tpu.dot_dimension_numbers<[1], [0], [0], [1], [0, 0, 1, 1], [], []>} : vector<16x32xbf16>, vector<32x64xbf16>, vector<16x64xf32> -> vector<16x64xf32>
      %c0_33 = arith.constant 0 : index
      %c0_34 = arith.constant 0 : index
      %57 = vector.load %arg10[%c0_33, %c0_34] : memref<1x64xf32, #tpu.memory_space<vmem>>, vector<1x64xf32>
      %58 = vector.broadcast %57 : vector<1x64xf32> to vector<16x64xf32>
      %59 = arith.addf %56, %58 : vector<16x64xf32>
      %60 = vector.extract_strided_slice %59 {offsets = [0, 32], sizes = [16, 32], strides = [1, 1]} : vector<16x64xf32> to vector<16x32xf32>
      %cst_35 = arith.constant 0.000000e+00 : f32
      %61 = vector.broadcast %cst_35 : f32 to vector<16x32xf32>
      %62 = arith.subf %61, %60 : vector<16x32xf32>
      %63 = math.exp %62 : vector<16x32xf32>
      %cst_36 = arith.constant 1.000000e+00 : f32
      %64 = vector.broadcast %cst_36 : f32 to vector<16x32xf32>
      %65 = arith.addf %64, %63 : vector<16x32xf32>
      %66 = tpu.reciprocal %65 {approx = true} : vector<16x32xf32> -> vector<16x32xf32>
      %67 = vector.extract_strided_slice %59 {offsets = [0, 0], sizes = [16, 32], strides = [1, 1]} : vector<16x64xf32> to vector<16x32xf32>
      %68 = arith.mulf %66, %67 : vector<16x32xf32>
      %c0_37 = arith.constant 0 : index
      %c0_38 = arith.constant 0 : index
      %c0_39 = arith.constant 0 : index
      %69 = vector.load %arg6[%c0_37, %c0_38, %c0_39] : memref<1x16x32xbf16, #tpu.memory_space<vmem>>, vector<1x16x32xbf16>
      %70 = vector.shape_cast %69 : vector<1x16x32xbf16> to vector<16x32xbf16>
      %71 = arith.extf %70 : vector<16x32xbf16> to vector<16x32xf32>
      %72 = arith.addf %71, %68 : vector<16x32xf32>
      %73 = arith.truncf %72 : vector<16x32xf32> to vector<16x32xbf16>
      %c0_40 = arith.constant 0 : index
      %c0_41 = arith.constant 0 : index
      %c0_42 = arith.constant 0 : index
      %74 = vector.load %arg11[%c0_40, %c0_41, %c0_42] : memref<1x16x32xbf16, #tpu.memory_space<vmem>>, vector<1x16x32xbf16>
      %75 = vector.shape_cast %74 : vector<1x16x32xbf16> to vector<16x32xbf16>
      %76 = vector.shape_cast %73 : vector<16x32xbf16> to vector<1x16x32xbf16>
      tpu.vector_store %arg11[%c0_40, %c0_41, %c0_42], %76 {strides = array<i32>} : memref<1x16x32xbf16, #tpu.memory_space<vmem>>, vector<1x16x32xbf16>,
    } else {
    }
    return
  }
  func.func @transform_0(%arg0: i32, %arg1: i32, %arg2: i32) -> (i32, i32, i32, i32) {
    %c0_i32 = arith.constant 0 : i32
    %c0_i32_0 = arith.constant 0 : i32
    return %arg0, %arg2, %arg1, %c0_i32 : i32, i32, i32, i32
  }
  func.func @transform_1(%arg0: i32, %arg1: i32, %arg2: i32) -> (i32, i32, i32, i32) {
    %c0_i32 = arith.constant 0 : i32
    %c0_i32_0 = arith.constant 0 : i32
    %c0_i32_1 = arith.constant 0 : i32
    return %arg0, %arg2, %c0_i32, %c0_i32_0 : i32, i32, i32, i32
  }
  func.func @transform_2(%arg0: i32, %arg1: i32, %arg2: i32) -> (i32, i32, i32) {
    %c0_i32 = arith.constant 0 : i32
    %c0_i32_0 = arith.constant 0 : i32
    %c0_i32_1 = arith.constant 0 : i32
    return %arg0, %c0_i32, %c0_i32_0 : i32, i32, i32
  }
  func.func @transform_3(%arg0: i32, %arg1: i32, %arg2: i32) -> (i32, i32, i32) {
    %c0_i32 = arith.constant 0 : i32
    %c0_i32_0 = arith.constant 0 : i32
    return %arg0, %arg1, %c0_i32 : i32, i32, i32
  }
  func.func @transform_4(%arg0: i32, %arg1: i32, %arg2: i32) -> (i32, i32) {
    %c0_i32 = arith.constant 0 : i32
    %c0_i32_0 = arith.constant 0 : i32
    %c0_i32_1 = arith.constant 0 : i32
    return %c0_i32, %c0_i32_0 : i32, i32
  }
  func.func @transform_5(%arg0: i32, %arg1: i32, %arg2: i32) -> (i32, i32) {
    %c0_i32 = arith.constant 0 : i32
    %c0_i32_0 = arith.constant 0 : i32
    %c0_i32_1 = arith.constant 0 : i32
    return %c0_i32, %c0_i32_0 : i32, i32
  }
  func.func @transform_6(%arg0: i32, %arg1: i32, %arg2: i32) -> (i32, i32) {
    %c0_i32 = arith.constant 0 : i32
    %c0_i32_0 = arith.constant 0 : i32
    %c0_i32_1 = arith.constant 0 : i32
    return %c0_i32, %c0_i32_0 : i32, i32
  }
  func.func @transform_7(%arg0: i32, %arg1: i32, %arg2: i32) -> (i32, i32) {
    %c0_i32 = arith.constant 0 : i32
    %c0_i32_0 = arith.constant 0 : i32
    %c0_i32_1 = arith.constant 0 : i32
    return %c0_i32, %c0_i32_0 : i32, i32
  }
  func.func @transform_8(%arg0: i32, %arg1: i32, %arg2: i32) -> (i32, i32, i32) {
    %c0_i32 = arith.constant 0 : i32
    %c0_i32_0 = arith.constant 0 : i32
    return %arg0, %arg1, %c0_i32 : i32, i32, i32
  }
}

module attributes {stable_mosaic.version = 11 : i64} {
  func.func @res_attn_kernel(%arg0: i32, %arg1: memref<1x16x32xbf16, #tpu.memory_space<vmem>>, %arg2: memref<1x1x16xf32, #tpu.memory_space<vmem>>, %arg3: memref<1x32xf32, #tpu.memory_space<vmem>>, %arg4: memref<1x32xf32, #tpu.memory_space<vmem>>, %arg5: memref<32x96xbf16, #tpu.memory_space<vmem>>, %arg6: memref<1x96xf32, #tpu.memory_space<vmem>>, %arg7: memref<32x32xbf16, #tpu.memory_space<vmem>>, %arg8: memref<1x32xf32, #tpu.memory_space<vmem>>, %arg9: memref<1x32xf32, #tpu.memory_space<vmem>>, %arg10: memref<1x32xf32, #tpu.memory_space<vmem>>, %arg11: memref<32x128xbf16, #tpu.memory_space<vmem>>, %arg12: memref<1x128xf32, #tpu.memory_space<vmem>>, %arg13: memref<128x32xbf16, #tpu.memory_space<vmem>>, %arg14: memref<1x32xf32, #tpu.memory_space<vmem>>, %arg15: memref<1x16x32xbf16, #tpu.memory_space<vmem>>) attributes {dimension_semantics = [#tpu.dimension_semantics<parallel>], iteration_bounds = array<i64: 2>, scalar_prefetch = 0 : i64, scratch_operands = 0 : i64, tpu.core_type = #tpu.core_type<tc>, window_params = [{transform_indices = @transform_0, window_bounds = array<i64: 1, 16, 32>}, {transform_indices = @transform_1, window_bounds = array<i64: 1, 1, 16>}, {pipeline_mode = #tpu.pipeline_mode<synchronous>, transform_indices = @transform_2, window_bounds = array<i64: 1, 32>}, {pipeline_mode = #tpu.pipeline_mode<synchronous>, transform_indices = @transform_3, window_bounds = array<i64: 1, 32>}, {pipeline_mode = #tpu.pipeline_mode<synchronous>, transform_indices = @transform_4, window_bounds = array<i64: 32, 96>}, {pipeline_mode = #tpu.pipeline_mode<synchronous>, transform_indices = @transform_5, window_bounds = array<i64: 1, 96>}, {pipeline_mode = #tpu.pipeline_mode<synchronous>, transform_indices = @transform_6, window_bounds = array<i64: 32, 32>}, {pipeline_mode = #tpu.pipeline_mode<synchronous>, transform_indices = @transform_7, window_bounds = array<i64: 1, 32>}, {pipeline_mode = #tpu.pipeline_mode<synchronous>, transform_indices = @transform_8, window_bounds = array<i64: 1, 32>}, {pipeline_mode = #tpu.pipeline_mode<synchronous>, transform_indices = @transform_9, window_bounds = array<i64: 1, 32>}, {pipeline_mode = #tpu.pipeline_mode<synchronous>, transform_indices = @transform_10, window_bounds = array<i64: 32, 128>}, {pipeline_mode = #tpu.pipeline_mode<synchronous>, transform_indices = @transform_11, window_bounds = array<i64: 1, 128>}, {pipeline_mode = #tpu.pipeline_mode<synchronous>, transform_indices = @transform_12, window_bounds = array<i64: 128, 32>}, {pipeline_mode = #tpu.pipeline_mode<synchronous>, transform_indices = @transform_13, window_bounds = array<i64: 1, 32>}, {transform_indices = @transform_14, window_bounds = array<i64: 1, 16, 32>}]} {
    %c0 = arith.constant 0 : index
    %c0_0 = arith.constant 0 : index
    %c0_1 = arith.constant 0 : index
    %0 = vector.load %arg1[%c0, %c0_0, %c0_1] : memref<1x16x32xbf16, #tpu.memory_space<vmem>>, vector<1x16x32xbf16>
    %1 = vector.shape_cast %0 : vector<1x16x32xbf16> to vector<16x32xbf16>
    %2 = arith.extf %1 : vector<16x32xbf16> to vector<16x32xf32>
    %c0_2 = arith.constant 0 : index
    %c0_3 = arith.constant 0 : index
    %3 = vector.load %arg3[%c0_2, %c0_3] : memref<1x32xf32, #tpu.memory_space<vmem>>, vector<1x32xf32>
    %c0_4 = arith.constant 0 : index
    %c0_5 = arith.constant 0 : index
    %4 = vector.load %arg4[%c0_4, %c0_5] : memref<1x32xf32, #tpu.memory_space<vmem>>, vector<1x32xf32>
    %cst = arith.constant dense<0.000000e+00> : vector<16xf32>
    %5 = vector.multi_reduction <add>, %2, %cst [1] : vector<16x32xf32> to vector<16xf32>
    %6 = vector.shape_cast %5 : vector<16xf32> to vector<16x1xf32>
    %cst_6 = arith.constant 3.200000e+01 : f32
    %7 = vector.broadcast %cst_6 : f32 to vector<16x1xf32>
    %8 = arith.divf %6, %7 : vector<16x1xf32>
    %9 = vector.broadcast %8 : vector<16x1xf32> to vector<16x32xf32>
    %10 = arith.subf %2, %9 : vector<16x32xf32>
    %11 = arith.mulf %10, %10 : vector<16x32xf32>
    %cst_7 = arith.constant dense<0.000000e+00> : vector<16xf32>
    %12 = vector.multi_reduction <add>, %11, %cst_7 [1] : vector<16x32xf32> to vector<16xf32>
    %13 = vector.shape_cast %12 : vector<16xf32> to vector<16x1xf32>
    %cst_8 = arith.constant 3.200000e+01 : f32
    %14 = vector.broadcast %cst_8 : f32 to vector<16x1xf32>
    %15 = arith.divf %13, %14 : vector<16x1xf32>
    %cst_9 = arith.constant 9.99999974E-6 : f32
    %16 = vector.broadcast %cst_9 : f32 to vector<16x1xf32>
    %17 = arith.addf %15, %16 : vector<16x1xf32>
    %18 = math.rsqrt %17 : vector<16x1xf32>
    %19 = vector.broadcast %18 : vector<16x1xf32> to vector<16x32xf32>
    %20 = arith.mulf %10, %19 : vector<16x32xf32>
    %21 = vector.broadcast %3 : vector<1x32xf32> to vector<16x32xf32>
    %22 = arith.mulf %20, %21 : vector<16x32xf32>
    %23 = vector.broadcast %4 : vector<1x32xf32> to vector<16x32xf32>
    %24 = arith.addf %22, %23 : vector<16x32xf32>
    %25 = arith.truncf %24 : vector<16x32xf32> to vector<16x32xbf16>
    %c0_10 = arith.constant 0 : index
    %c0_11 = arith.constant 0 : index
    %26 = vector.load %arg5[%c0_10, %c0_11] : memref<32x96xbf16, #tpu.memory_space<vmem>>, vector<32x96xbf16>
    %cst_12 = arith.constant dense<0.000000e+00> : vector<16x96xf32>
    %27 = tpu.matmul %25, %26, %cst_12 {dimension_numbers = #tpu.dot_dimension_numbers<[1], [0], [0], [1], [0, 0, 1, 1], [], []>} : vector<16x32xbf16>, vector<32x96xbf16>, vector<16x96xf32> -> vector<16x96xf32>
    %c0_13 = arith.constant 0 : index
    %c0_14 = arith.constant 0 : index
    %28 = vector.load %arg6[%c0_13, %c0_14] : memref<1x96xf32, #tpu.memory_space<vmem>>, vector<1x96xf32>
    %29 = vector.broadcast %28 : vector<1x96xf32> to vector<16x96xf32>
    %30 = arith.addf %27, %29 : vector<16x96xf32>
    %c0_15 = arith.constant 0 : index
    %c0_16 = arith.constant 0 : index
    %c0_17 = arith.constant 0 : index
    %31 = vector.load %arg2[%c0_15, %c0_16, %c0_17] : memref<1x1x16xf32, #tpu.memory_space<vmem>>, vector<1x1x16xf32>
    %32 = vector.shape_cast %31 : vector<1x1x16xf32> to vector<1x16xf32>
    %cst_18 = arith.constant 5.000000e-01 : f32
    %33 = vector.broadcast %cst_18 : f32 to vector<1x16xf32>
    %34 = arith.cmpf ogt, %32, %33 : vector<1x16xf32>
    %cst_19 = arith.constant -1.000000e+30 : f32
    %cst_20 = arith.constant 0.000000e+00 : f32
    %35 = vector.broadcast %cst_19 : f32 to vector<1x16xf32>
    %36 = vector.broadcast %cst_20 : f32 to vector<1x16xf32>
    %37 = arith.select %34, %35, %36 : vector<1x16xi1>, vector<1x16xf32>
    %38 = vector.extract_strided_slice %30 {offsets = [0, 0], sizes = [16, 8], strides = [1, 1]} : vector<16x96xf32> to vector<16x8xf32>
    %39 = arith.truncf %38 : vector<16x8xf32> to vector<16x8xbf16>
    %40 = vector.extract_strided_slice %30 {offsets = [0, 32], sizes = [16, 8], strides = [1, 1]} : vector<16x96xf32> to vector<16x8xf32>
    %41 = arith.truncf %40 : vector<16x8xf32> to vector<16x8xbf16>
    %42 = vector.extract_strided_slice %30 {offsets = [0, 64], sizes = [16, 8], strides = [1, 1]} : vector<16x96xf32> to vector<16x8xf32>
    %43 = arith.truncf %42 : vector<16x8xf32> to vector<16x8xbf16>
    %cst_21 = arith.constant dense<0.000000e+00> : vector<16x16xf32>
    %44 = tpu.matmul %39, %41, %cst_21 {dimension_numbers = #tpu.dot_dimension_numbers<[1], [1], [0], [0], [0, 0, 1, 0], [], []>} : vector<16x8xbf16>, vector<16x8xbf16>, vector<16x16xf32> -> vector<16x16xf32>
    %cst_22 = arith.constant 0.353553385 : f32
    %45 = vector.broadcast %cst_22 : f32 to vector<16x16xf32>
    %46 = arith.mulf %44, %45 : vector<16x16xf32>
    %47 = vector.broadcast %37 : vector<1x16xf32> to vector<16x16xf32>
    %48 = arith.addf %46, %47 : vector<16x16xf32>
    %cst_23 = arith.constant dense<0xFF800000> : vector<16xf32>
    %49 = vector.multi_reduction <maximumf>, %48, %cst_23 [1] : vector<16x16xf32> to vector<16xf32>
    %50 = vector.shape_cast %49 : vector<16xf32> to vector<16x1xf32>
    %51 = vector.broadcast %50 : vector<16x1xf32> to vector<16x16xf32>
    %52 = arith.subf %48, %51 : vector<16x16xf32>
    %53 = math.exp %52 : vector<16x16xf32>
    %cst_24 = arith.constant dense<0.000000e+00> : vector<16xf32>
    %54 = vector.multi_reduction <add>, %53, %cst_24 [1] : vector<16x16xf32> to vector<16xf32>
    %55 = vector.shape_cast %54 : vector<16xf32> to vector<16x1xf32>
    %56 = tpu.reciprocal %55 {approx = true} : vector<16x1xf32> -> vector<16x1xf32>
    %57 = vector.broadcast %56 : vector<16x1xf32> to vector<16x16xf32>
    %58 = arith.mulf %53, %57 : vector<16x16xf32>
    %59 = arith.truncf %58 : vector<16x16xf32> to vector<16x16xbf16>
    %cst_25 = arith.constant dense<0.000000e+00> : vector<16x8xf32>
    %60 = tpu.matmul %59, %43, %cst_25 {dimension_numbers = #tpu.dot_dimension_numbers<[1], [0], [0], [1], [0, 0, 1, 1], [], []>} : vector<16x16xbf16>, vector<16x8xbf16>, vector<16x8xf32> -> vector<16x8xf32>
    %61 = vector.extract_strided_slice %30 {offsets = [0, 8], sizes = [16, 8], strides = [1, 1]} : vector<16x96xf32> to vector<16x8xf32>
    %62 = arith.truncf %61 : vector<16x8xf32> to vector<16x8xbf16>
    %63 = vector.extract_strided_slice %30 {offsets = [0, 40], sizes = [16, 8], strides = [1, 1]} : vector<16x96xf32> to vector<16x8xf32>
    %64 = arith.truncf %63 : vector<16x8xf32> to vector<16x8xbf16>
    %65 = vector.extract_strided_slice %30 {offsets = [0, 72], sizes = [16, 8], strides = [1, 1]} : vector<16x96xf32> to vector<16x8xf32>
    %66 = arith.truncf %65 : vector<16x8xf32> to vector<16x8xbf16>
    %cst_26 = arith.constant dense<0.000000e+00> : vector<16x16xf32>
    %67 = tpu.matmul %62, %64, %cst_26 {dimension_numbers = #tpu.dot_dimension_numbers<[1], [1], [0], [0], [0, 0, 1, 0], [], []>} : vector<16x8xbf16>, vector<16x8xbf16>, vector<16x16xf32> -> vector<16x16xf32>
    %cst_27 = arith.constant 0.353553385 : f32
    %68 = vector.broadcast %cst_27 : f32 to vector<16x16xf32>
    %69 = arith.mulf %67, %68 : vector<16x16xf32>
    %70 = vector.broadcast %37 : vector<1x16xf32> to vector<16x16xf32>
    %71 = arith.addf %69, %70 : vector<16x16xf32>
    %cst_28 = arith.constant dense<0xFF800000> : vector<16xf32>
    %72 = vector.multi_reduction <maximumf>, %71, %cst_28 [1] : vector<16x16xf32> to vector<16xf32>
    %73 = vector.shape_cast %72 : vector<16xf32> to vector<16x1xf32>
    %74 = vector.broadcast %73 : vector<16x1xf32> to vector<16x16xf32>
    %75 = arith.subf %71, %74 : vector<16x16xf32>
    %76 = math.exp %75 : vector<16x16xf32>
    %cst_29 = arith.constant dense<0.000000e+00> : vector<16xf32>
    %77 = vector.multi_reduction <add>, %76, %cst_29 [1] : vector<16x16xf32> to vector<16xf32>
    %78 = vector.shape_cast %77 : vector<16xf32> to vector<16x1xf32>
    %79 = tpu.reciprocal %78 {approx = true} : vector<16x1xf32> -> vector<16x1xf32>
    %80 = vector.broadcast %79 : vector<16x1xf32> to vector<16x16xf32>
    %81 = arith.mulf %76, %80 : vector<16x16xf32>
    %82 = arith.truncf %81 : vector<16x16xf32> to vector<16x16xbf16>
    %cst_30 = arith.constant dense<0.000000e+00> : vector<16x8xf32>
    %83 = tpu.matmul %82, %66, %cst_30 {dimension_numbers = #tpu.dot_dimension_numbers<[1], [0], [0], [1], [0, 0, 1, 1], [], []>} : vector<16x16xbf16>, vector<16x8xbf16>, vector<16x8xf32> -> vector<16x8xf32>
    %84 = vector.extract_strided_slice %30 {offsets = [0, 16], sizes = [16, 8], strides = [1, 1]} : vector<16x96xf32> to vector<16x8xf32>
    %85 = arith.truncf %84 : vector<16x8xf32> to vector<16x8xbf16>
    %86 = vector.extract_strided_slice %30 {offsets = [0, 48], sizes = [16, 8], strides = [1, 1]} : vector<16x96xf32> to vector<16x8xf32>
    %87 = arith.truncf %86 : vector<16x8xf32> to vector<16x8xbf16>
    %88 = vector.extract_strided_slice %30 {offsets = [0, 80], sizes = [16, 8], strides = [1, 1]} : vector<16x96xf32> to vector<16x8xf32>
    %89 = arith.truncf %88 : vector<16x8xf32> to vector<16x8xbf16>
    %cst_31 = arith.constant dense<0.000000e+00> : vector<16x16xf32>
    %90 = tpu.matmul %85, %87, %cst_31 {dimension_numbers = #tpu.dot_dimension_numbers<[1], [1], [0], [0], [0, 0, 1, 0], [], []>} : vector<16x8xbf16>, vector<16x8xbf16>, vector<16x16xf32> -> vector<16x16xf32>
    %cst_32 = arith.constant 0.353553385 : f32
    %91 = vector.broadcast %cst_32 : f32 to vector<16x16xf32>
    %92 = arith.mulf %90, %91 : vector<16x16xf32>
    %93 = vector.broadcast %37 : vector<1x16xf32> to vector<16x16xf32>
    %94 = arith.addf %92, %93 : vector<16x16xf32>
    %cst_33 = arith.constant dense<0xFF800000> : vector<16xf32>
    %95 = vector.multi_reduction <maximumf>, %94, %cst_33 [1] : vector<16x16xf32> to vector<16xf32>
    %96 = vector.shape_cast %95 : vector<16xf32> to vector<16x1xf32>
    %97 = vector.broadcast %96 : vector<16x1xf32> to vector<16x16xf32>
    %98 = arith.subf %94, %97 : vector<16x16xf32>
    %99 = math.exp %98 : vector<16x16xf32>
    %cst_34 = arith.constant dense<0.000000e+00> : vector<16xf32>
    %100 = vector.multi_reduction <add>, %99, %cst_34 [1] : vector<16x16xf32> to vector<16xf32>
    %101 = vector.shape_cast %100 : vector<16xf32> to vector<16x1xf32>
    %102 = tpu.reciprocal %101 {approx = true} : vector<16x1xf32> -> vector<16x1xf32>
    %103 = vector.broadcast %102 : vector<16x1xf32> to vector<16x16xf32>
    %104 = arith.mulf %99, %103 : vector<16x16xf32>
    %105 = arith.truncf %104 : vector<16x16xf32> to vector<16x16xbf16>
    %cst_35 = arith.constant dense<0.000000e+00> : vector<16x8xf32>
    %106 = tpu.matmul %105, %89, %cst_35 {dimension_numbers = #tpu.dot_dimension_numbers<[1], [0], [0], [1], [0, 0, 1, 1], [], []>} : vector<16x16xbf16>, vector<16x8xbf16>, vector<16x8xf32> -> vector<16x8xf32>
    %107 = vector.extract_strided_slice %30 {offsets = [0, 24], sizes = [16, 8], strides = [1, 1]} : vector<16x96xf32> to vector<16x8xf32>
    %108 = arith.truncf %107 : vector<16x8xf32> to vector<16x8xbf16>
    %109 = vector.extract_strided_slice %30 {offsets = [0, 56], sizes = [16, 8], strides = [1, 1]} : vector<16x96xf32> to vector<16x8xf32>
    %110 = arith.truncf %109 : vector<16x8xf32> to vector<16x8xbf16>
    %111 = vector.extract_strided_slice %30 {offsets = [0, 88], sizes = [16, 8], strides = [1, 1]} : vector<16x96xf32> to vector<16x8xf32>
    %112 = arith.truncf %111 : vector<16x8xf32> to vector<16x8xbf16>
    %cst_36 = arith.constant dense<0.000000e+00> : vector<16x16xf32>
    %113 = tpu.matmul %108, %110, %cst_36 {dimension_numbers = #tpu.dot_dimension_numbers<[1], [1], [0], [0], [0, 0, 1, 0], [], []>} : vector<16x8xbf16>, vector<16x8xbf16>, vector<16x16xf32> -> vector<16x16xf32>
    %cst_37 = arith.constant 0.353553385 : f32
    %114 = vector.broadcast %cst_37 : f32 to vector<16x16xf32>
    %115 = arith.mulf %113, %114 : vector<16x16xf32>
    %116 = vector.broadcast %37 : vector<1x16xf32> to vector<16x16xf32>
    %117 = arith.addf %115, %116 : vector<16x16xf32>
    %cst_38 = arith.constant dense<0xFF800000> : vector<16xf32>
    %118 = vector.multi_reduction <maximumf>, %117, %cst_38 [1] : vector<16x16xf32> to vector<16xf32>
    %119 = vector.shape_cast %118 : vector<16xf32> to vector<16x1xf32>
    %120 = vector.broadcast %119 : vector<16x1xf32> to vector<16x16xf32>
    %121 = arith.subf %117, %120 : vector<16x16xf32>
    %122 = math.exp %121 : vector<16x16xf32>
    %cst_39 = arith.constant dense<0.000000e+00> : vector<16xf32>
    %123 = vector.multi_reduction <add>, %122, %cst_39 [1] : vector<16x16xf32> to vector<16xf32>
    %124 = vector.shape_cast %123 : vector<16xf32> to vector<16x1xf32>
    %125 = tpu.reciprocal %124 {approx = true} : vector<16x1xf32> -> vector<16x1xf32>
    %126 = vector.broadcast %125 : vector<16x1xf32> to vector<16x16xf32>
    %127 = arith.mulf %122, %126 : vector<16x16xf32>
    %128 = arith.truncf %127 : vector<16x16xf32> to vector<16x16xbf16>
    %cst_40 = arith.constant dense<0.000000e+00> : vector<16x8xf32>
    %129 = tpu.matmul %128, %112, %cst_40 {dimension_numbers = #tpu.dot_dimension_numbers<[1], [0], [0], [1], [0, 0, 1, 1], [], []>} : vector<16x16xbf16>, vector<16x8xbf16>, vector<16x8xf32> -> vector<16x8xf32>
    %130 = tpu.concatenate %60, %83, %106, %129 in 1 : vector<16x8xf32>, vector<16x8xf32>, vector<16x8xf32>, vector<16x8xf32> -> vector<16x32xf32>
    %131 = arith.truncf %130 : vector<16x32xf32> to vector<16x32xbf16>
    %c0_41 = arith.constant 0 : index
    %c0_42 = arith.constant 0 : index
    %132 = vector.load %arg7[%c0_41, %c0_42] : memref<32x32xbf16, #tpu.memory_space<vmem>>, vector<32x32xbf16>
    %cst_43 = arith.constant dense<0.000000e+00> : vector<16x32xf32>
    %133 = tpu.matmul %131, %132, %cst_43 {dimension_numbers = #tpu.dot_dimension_numbers<[1], [0], [0], [1], [0, 0, 1, 1], [], []>} : vector<16x32xbf16>, vector<32x32xbf16>, vector<16x32xf32> -> vector<16x32xf32>
    %c0_44 = arith.constant 0 : index
    %c0_45 = arith.constant 0 : index
    %134 = vector.load %arg8[%c0_44, %c0_45] : memref<1x32xf32, #tpu.memory_space<vmem>>, vector<1x32xf32>
    %135 = vector.broadcast %134 : vector<1x32xf32> to vector<16x32xf32>
    %136 = arith.addf %133, %135 : vector<16x32xf32>
    %137 = arith.addf %24, %136 : vector<16x32xf32>
    %c0_46 = arith.constant 0 : index
    %c0_47 = arith.constant 0 : index
    %138 = vector.load %arg9[%c0_46, %c0_47] : memref<1x32xf32, #tpu.memory_space<vmem>>, vector<1x32xf32>
    %c0_48 = arith.constant 0 : index
    %c0_49 = arith.constant 0 : index
    %139 = vector.load %arg10[%c0_48, %c0_49] : memref<1x32xf32, #tpu.memory_space<vmem>>, vector<1x32xf32>
    %cst_50 = arith.constant dense<0.000000e+00> : vector<16xf32>
    %140 = vector.multi_reduction <add>, %137, %cst_50 [1] : vector<16x32xf32> to vector<16xf32>
    %141 = vector.shape_cast %140 : vector<16xf32> to vector<16x1xf32>
    %cst_51 = arith.constant 3.200000e+01 : f32
    %142 = vector.broadcast %cst_51 : f32 to vector<16x1xf32>
    %143 = arith.divf %141, %142 : vector<16x1xf32>
    %144 = vector.broadcast %143 : vector<16x1xf32> to vector<16x32xf32>
    %145 = arith.subf %137, %144 : vector<16x32xf32>
    %146 = arith.mulf %145, %145 : vector<16x32xf32>
    %cst_52 = arith.constant dense<0.000000e+00> : vector<16xf32>
    %147 = vector.multi_reduction <add>, %146, %cst_52 [1] : vector<16x32xf32> to vector<16xf32>
    %148 = vector.shape_cast %147 : vector<16xf32> to vector<16x1xf32>
    %cst_53 = arith.constant 3.200000e+01 : f32
    %149 = vector.broadcast %cst_53 : f32 to vector<16x1xf32>
    %150 = arith.divf %148, %149 : vector<16x1xf32>
    %cst_54 = arith.constant 9.99999974E-6 : f32
    %151 = vector.broadcast %cst_54 : f32 to vector<16x1xf32>
    %152 = arith.addf %150, %151 : vector<16x1xf32>
    %153 = math.rsqrt %152 : vector<16x1xf32>
    %154 = vector.broadcast %153 : vector<16x1xf32> to vector<16x32xf32>
    %155 = arith.mulf %145, %154 : vector<16x32xf32>
    %156 = vector.broadcast %138 : vector<1x32xf32> to vector<16x32xf32>
    %157 = arith.mulf %155, %156 : vector<16x32xf32>
    %158 = vector.broadcast %139 : vector<1x32xf32> to vector<16x32xf32>
    %159 = arith.addf %157, %158 : vector<16x32xf32>
    %160 = arith.truncf %159 : vector<16x32xf32> to vector<16x32xbf16>
    %c0_55 = arith.constant 0 : index
    %c0_56 = arith.constant 0 : index
    %161 = vector.load %arg11[%c0_55, %c0_56] : memref<32x128xbf16, #tpu.memory_space<vmem>>, vector<32x128xbf16>
    %cst_57 = arith.constant dense<0.000000e+00> : vector<16x128xf32>
    %162 = tpu.matmul %160, %161, %cst_57 {dimension_numbers = #tpu.dot_dimension_numbers<[1], [0], [0], [1], [0, 0, 1, 1], [], []>} : vector<16x32xbf16>, vector<32x128xbf16>, vector<16x128xf32> -> vector<16x128xf32>
    %c0_58 = arith.constant 0 : index
    %c0_59 = arith.constant 0 : index
    %163 = vector.load %arg12[%c0_58, %c0_59] : memref<1x128xf32, #tpu.memory_space<vmem>>, vector<1x128xf32>
    %164 = vector.broadcast %163 : vector<1x128xf32> to vector<16x128xf32>
    %165 = arith.addf %162, %164 : vector<16x128xf32>
    %cst_60 = arith.constant 5.000000e-01 : f32
    %166 = vector.broadcast %cst_60 : f32 to vector<16x128xf32>
    %167 = arith.mulf %166, %165 : vector<16x128xf32>
    %cst_61 = arith.constant 4.471500e-02 : f32
    %168 = vector.broadcast %cst_61 : f32 to vector<16x128xf32>
    %169 = arith.mulf %168, %165 : vector<16x128xf32>
    %170 = arith.mulf %169, %165 : vector<16x128xf32>
    %171 = arith.mulf %170, %165 : vector<16x128xf32>
    %172 = arith.addf %165, %171 : vector<16x128xf32>
    %cst_62 = arith.constant 0.797884583 : f32
    %173 = vector.broadcast %cst_62 : f32 to vector<16x128xf32>
    %174 = arith.mulf %173, %172 : vector<16x128xf32>
    %175 = math.tanh %174 : vector<16x128xf32>
    %cst_63 = arith.constant 1.000000e+00 : f32
    %176 = vector.broadcast %cst_63 : f32 to vector<16x128xf32>
    %177 = arith.addf %176, %175 : vector<16x128xf32>
    %178 = arith.mulf %167, %177 : vector<16x128xf32>
    %179 = arith.truncf %178 : vector<16x128xf32> to vector<16x128xbf16>
    %c0_64 = arith.constant 0 : index
    %c0_65 = arith.constant 0 : index
    %180 = vector.load %arg13[%c0_64, %c0_65] : memref<128x32xbf16, #tpu.memory_space<vmem>>, vector<128x32xbf16>
    %cst_66 = arith.constant dense<0.000000e+00> : vector<16x32xf32>
    %181 = tpu.matmul %179, %180, %cst_66 {dimension_numbers = #tpu.dot_dimension_numbers<[1], [0], [0], [1], [0, 0, 1, 1], [], []>} : vector<16x128xbf16>, vector<128x32xbf16>, vector<16x32xf32> -> vector<16x32xf32>
    %182 = arith.addf %137, %181 : vector<16x32xf32>
    %c0_67 = arith.constant 0 : index
    %c0_68 = arith.constant 0 : index
    %183 = vector.load %arg14[%c0_67, %c0_68] : memref<1x32xf32, #tpu.memory_space<vmem>>, vector<1x32xf32>
    %184 = vector.broadcast %183 : vector<1x32xf32> to vector<16x32xf32>
    %185 = arith.addf %182, %184 : vector<16x32xf32>
    %186 = arith.truncf %185 : vector<16x32xf32> to vector<16x32xbf16>
    %c0_69 = arith.constant 0 : index
    %c0_70 = arith.constant 0 : index
    %c0_71 = arith.constant 0 : index
    %187 = vector.load %arg15[%c0_69, %c0_70, %c0_71] : memref<1x16x32xbf16, #tpu.memory_space<vmem>>, vector<1x16x32xbf16>
    %188 = vector.shape_cast %187 : vector<1x16x32xbf16> to vector<16x32xbf16>
    %189 = vector.shape_cast %186 : vector<16x32xbf16> to vector<1x16x32xbf16>
    tpu.vector_store %arg15[%c0_69, %c0_70, %c0_71], %189 {strides = array<i32>} : memref<1x16x32xbf16, #tpu.memory_space<vmem>>, vector<1x16x32xbf16>,
    return
  }
  func.func @transform_0(%arg0: i32) -> (i32, i32, i32) {
    %c0_i32 = arith.constant 0 : i32
    %c0_i32_0 = arith.constant 0 : i32
    %c0_i32_1 = arith.constant 0 : i32
    return %arg0, %c0_i32, %c0_i32_0 : i32, i32, i32
  }
  func.func @transform_1(%arg0: i32) -> (i32, i32, i32) {
    %c0_i32 = arith.constant 0 : i32
    %c0_i32_0 = arith.constant 0 : i32
    %c0_i32_1 = arith.constant 0 : i32
    return %arg0, %c0_i32, %c0_i32_0 : i32, i32, i32
  }
  func.func @transform_2(%arg0: i32) -> (i32, i32) {
    %c0_i32 = arith.constant 0 : i32
    %c0_i32_0 = arith.constant 0 : i32
    %c0_i32_1 = arith.constant 0 : i32
    return %c0_i32, %c0_i32_0 : i32, i32
  }
  func.func @transform_3(%arg0: i32) -> (i32, i32) {
    %c0_i32 = arith.constant 0 : i32
    %c0_i32_0 = arith.constant 0 : i32
    %c0_i32_1 = arith.constant 0 : i32
    return %c0_i32, %c0_i32_0 : i32, i32
  }
  func.func @transform_4(%arg0: i32) -> (i32, i32) {
    %c0_i32 = arith.constant 0 : i32
    %c0_i32_0 = arith.constant 0 : i32
    %c0_i32_1 = arith.constant 0 : i32
    return %c0_i32, %c0_i32_0 : i32, i32
  }
  func.func @transform_5(%arg0: i32) -> (i32, i32) {
    %c0_i32 = arith.constant 0 : i32
    %c0_i32_0 = arith.constant 0 : i32
    %c0_i32_1 = arith.constant 0 : i32
    return %c0_i32, %c0_i32_0 : i32, i32
  }
  func.func @transform_6(%arg0: i32) -> (i32, i32) {
    %c0_i32 = arith.constant 0 : i32
    %c0_i32_0 = arith.constant 0 : i32
    %c0_i32_1 = arith.constant 0 : i32
    return %c0_i32, %c0_i32_0 : i32, i32
  }
  func.func @transform_7(%arg0: i32) -> (i32, i32) {
    %c0_i32 = arith.constant 0 : i32
    %c0_i32_0 = arith.constant 0 : i32
    %c0_i32_1 = arith.constant 0 : i32
    return %c0_i32, %c0_i32_0 : i32, i32
  }
  func.func @transform_8(%arg0: i32) -> (i32, i32) {
    %c0_i32 = arith.constant 0 : i32
    %c0_i32_0 = arith.constant 0 : i32
    %c0_i32_1 = arith.constant 0 : i32
    return %c0_i32, %c0_i32_0 : i32, i32
  }
  func.func @transform_9(%arg0: i32) -> (i32, i32) {
    %c0_i32 = arith.constant 0 : i32
    %c0_i32_0 = arith.constant 0 : i32
    %c0_i32_1 = arith.constant 0 : i32
    return %c0_i32, %c0_i32_0 : i32, i32
  }
  func.func @transform_10(%arg0: i32) -> (i32, i32) {
    %c0_i32 = arith.constant 0 : i32
    %c0_i32_0 = arith.constant 0 : i32
    %c0_i32_1 = arith.constant 0 : i32
    return %c0_i32, %c0_i32_0 : i32, i32
  }
  func.func @transform_11(%arg0: i32) -> (i32, i32) {
    %c0_i32 = arith.constant 0 : i32
    %c0_i32_0 = arith.constant 0 : i32
    %c0_i32_1 = arith.constant 0 : i32
    return %c0_i32, %c0_i32_0 : i32, i32
  }
  func.func @transform_12(%arg0: i32) -> (i32, i32) {
    %c0_i32 = arith.constant 0 : i32
    %c0_i32_0 = arith.constant 0 : i32
    %c0_i32_1 = arith.constant 0 : i32
    return %c0_i32, %c0_i32_0 : i32, i32
  }
  func.func @transform_13(%arg0: i32) -> (i32, i32) {
    %c0_i32 = arith.constant 0 : i32
    %c0_i32_0 = arith.constant 0 : i32
    %c0_i32_1 = arith.constant 0 : i32
    return %c0_i32, %c0_i32_0 : i32, i32
  }
  func.func @transform_14(%arg0: i32) -> (i32, i32, i32) {
    %c0_i32 = arith.constant 0 : i32
    %c0_i32_0 = arith.constant 0 : i32
    %c0_i32_1 = arith.constant 0 : i32
    return %arg0, %c0_i32, %c0_i32_0 : i32, i32, i32
  }
}

</mosaic_0001>

<bundles_post_ra>
// kernel: evoformer_lite_msa_seq.12
= control target key start
LH: loop header
LB: loop body
LE: loop exit
PB: predicated region body
PF: predicated region fallthrough
CT: control target
= control target key end

     0   :  { %vm131_vm0 = vcmask 1043456   ;;  %vm82_vm1 = vcmask 195584   ;;  %vm424_vm2 = vcmask 257024   ;;  %s912_s1 = inlined_call_operand.vmem [shape: bf16[24,32], index: 1, kind: input, shape index: {}]   ;;  %s913_s0 = inlined_call_operand.vmem [shape: f32[256,24], index: 0, kind: input, shape index: {}]   ;;  %s914_s2 = inlined_call_operand.vmem [shape: f32[1,32], index: 2, kind: input, shape index: {}]   ;;  %s915_s3 = inlined_call_operand.vmem [shape: bf16[256,32], index: 3, kind: output, shape index: {}]  }
   0x1   :  { %v604_v0 = vld [vmem:[%s912_s1] sm:$0xff]   ;;  %v605_v1 = vld [vmem:[%s912_s1 + $0x8] ss:$0 sps:$4 sm:$0xff]   ;;  %v17_v8 = vld [vmem:[%s913_s0 + $0x10] sm:$0xff] }
   0x2   :  { %v15_v2 = vld [vmem:[%s913_s0] sm:$0xff]  ;;  %562 = vmatprep.subr.bf16.mxu0 %v604_v0  ;;  %598 = vmatprep.subr.bf16.mxu1 %v604_v0  ;;  %v16_v3 = vld [vmem:[%s913_s0 + $0x8] sm:$0xff]  ;;  %v18_v9 = vld [vmem:[%s913_s0 + $0x18] sm:$0xff]  ;;  %v133_v11 = vsel %vm131_vm0, %v605_v1, 0 }
   0x3   :  { %v31_v4 = vld [vmem:[%s913_s0 + $0x80] sm:$0xff]  ;;  %v32_v5 = vld [vmem:[%s913_s0 + $0x88] sm:$0xff]  ;;  %563 = vmatpush3.bf16.msra.mxu0 %v604_v0  ;;  %600 = vmatpush3.bf16.msra.mxu1 %v604_v0  ;;  %v47_v6 = vpack.c.bf16 %v16_v3, %v15_v2  ;;  %v33_v10 = vld [vmem:[%s913_s0 + $0x90] sm:$0xff]  ;;  %v48_v17 = vpack.c.bf16 %v18_v9, %v17_v8 }
   0x4   :  { %v55_v7 = vpack.c.bf16 %v32_v5, %v31_v4  ;;  %602 = vmatprep.subr.msk.bf16.mxu0 %vm131_vm0, %v605_v1  ;;  %603 = vmatprep.subr.msk.bf16.mxu1 %vm131_vm0, %v605_v1  ;;  %v34_v12 = vld [vmem:[%s913_s0 + $0x98] sm:$0xff]  ;;  %v19_v13 = vld [vmem:[%s913_s0 + $0x20] sm:$0xff]  ;;  %v20_v14 = vld [vmem:[%s913_s0 + $0x28] sm:$0xff] }
   0x5   :  { %566 = vmatprep.mubr.msk.bf16.mxu0 %vm82_vm1, %v47_v6  ;;  %v35_v15 = vld [vmem:[%s913_s0 + $0xa0] sm:$0xff]  ;;  %v36_v16 = vld [vmem:[%s913_s0 + $0xa8] sm:$0xff]  ;;  %v56_v18 = vpack.c.bf16 %v34_v12, %v33_v10  ;;  %v49_v19 = vpack.c.bf16 %v20_v14, %v19_v13  ;;  %v21_v21 = vld [vmem:[%s913_s0 + $0x30] sm:$0xff] }
   0x6   :  { %582 = vmatprep.mubr.msk.bf16.mxu1 %vm82_vm1, %v55_v7  ;;  %v57_v20 = vpack.c.bf16 %v36_v16, %v35_v15  ;;  %v22_v22 = vld [vmem:[%s913_s0 + $0x38] sm:$0xff]  ;;  %v37_v23 = vld [vmem:[%s913_s0 + $0xb0] sm:$0xff]  ;;  %v23_v25 = vld [vmem:[%s913_s0 + $0x40] sm:$0xff] }
   0x7   :  { %565 = vmatpush3.bf16.msra.mxu0 %v133_v11  ;;  %601 = vmatpush3.bf16.msra.mxu1 %v133_v11  ;;  %v38_v24 = vld [vmem:[%s913_s0 + $0xb8] sm:$0xff]  ;;  %v24_v26 = vld [vmem:[%s913_s0 + $0x48] sm:$0xff]  ;;  %v39_v27 = vld [vmem:[%s913_s0 + $0xc0] sm:$0xff]  ;;  %v50_v29 = vpack.c.bf16 %v22_v22, %v21_v21 }
   0x8   :  { %v40_v28 = vld [vmem:[%s913_s0 + $0xc8] sm:$0xff]  ;;  %v58_v30 = vpack.c.bf16 %v38_v24, %v37_v23  ;;  %v51_v31 = vpack.c.bf16 %v24_v26, %v23_v25  ;;  %v25_v33 = vld [vmem:[%s913_s0 + $0x50] sm:$0xff]  ;;  %v26_v34 = vld [vmem:[%s913_s0 + $0x58] sm:$0xff] }
   0x9   :  { %v59_v32 = vpack.c.bf16 %v40_v28, %v39_v27  ;;  %v41_v35 = vld [vmem:[%s913_s0 + $0xd0] sm:$0xff]  ;;  %v42_v36 = vld [vmem:[%s913_s0 + $0xd8] sm:$0xff]  ;;  %v27_v37 = vld [vmem:[%s913_s0 + $0x60] sm:$0xff]  ;;  %v52_v41 = vpack.c.bf16 %v26_v34, %v25_v33 }
   0xa   :  { %567 = vmatmul.mubr.msk.bf16.vlgmr.msra.gmra.mrb[0].mxu0 %vm82_vm1, %v48_v17  ;;  %583 = vmatmul.mubr.msk.bf16.vlgmr.msra.gmra.mrb[0].mxu1 %vm82_vm1, %v56_v18  ;;  %v28_v38 = vld [vmem:[%s913_s0 + $0x68] sm:$0xff]  ;;  %v43_v39 = vld [vmem:[%s913_s0 + $0xe0] sm:$0xff]  ;;  %v60_v42 = vpack.c.bf16 %v42_v36, %v41_v35  ;;  %v29_v45 = vld [vmem:[%s913_s0 + $0x70] sm:$0xff] }
   0xb   :  { %570 = vmatprep.mubr.msk.bf16.mxu0 %vm82_vm1, %v49_v19  ;;  %586 = vmatprep.mubr.msk.bf16.mxu1 %vm82_vm1, %v57_v20  ;;  %v44_v40 = vld [vmem:[%s913_s0 + $0xe8] sm:$0xff]  ;;  %v53_v43 = vpack.c.bf16 %v28_v38, %v27_v37  ;;  %v30_v46 = vld [vmem:[%s913_s0 + $0x78] sm:$0xff]  ;;  %v45_v47 = vld [vmem:[%s913_s0 + $0xf0] sm:$0xff] }
   0xc   :  { %v61_v44 = vpack.c.bf16 %v44_v40, %v43_v39  ;;  %v46_v48 = vld [vmem:[%s913_s0 + $0xf8] sm:$0xff]  ;;  %v54_v49 = vpack.c.bf16 %v30_v46, %v29_v45  ;;  %v750_v51 = vld [vmem:[%s914_s2] ss:$0 sm:$0xff] }
   0xd   :  { %v62_v50 = vpack.c.bf16 %v46_v48, %v45_v47 }
  0x12   :  { %571 = vmatmul.mubr.msk.bf16.gmra.mrb[4].mxu0 %vm82_vm1, %v50_v29  ;;  %587 = vmatmul.mubr.msk.bf16.gmra.mrb[4].mxu1 %vm82_vm1, %v58_v30 }
  0x13   :  { %574 = vmatprep.mubr.msk.bf16.mxu0 %vm82_vm1, %v51_v31  ;;  %590 = vmatprep.mubr.msk.bf16.mxu1 %vm82_vm1, %v59_v32 }
  0x1a   :  { %575 = vmatmul.mubr.msk.bf16.gmra.mrb[8].mxu0 %vm82_vm1, %v52_v41  ;;  %591 = vmatmul.mubr.msk.bf16.gmra.mrb[8].mxu1 %vm82_vm1, %v60_v42 }
  0x1b   :  { %578 = vmatprep.mubr.msk.bf16.mxu0 %vm82_vm1, %v53_v43  ;;  %594 = vmatprep.mubr.msk.bf16.mxu1 %vm82_vm1, %v61_v44 }
  0x22   :  { %579 = vmatmul.mubr.msk.bf16.gmra.mrb[12].mxu0 %vm82_vm1, %v54_v49  ;;  %595 = vmatmul.mubr.msk.bf16.gmra.mrb[12].mxu1 %vm82_vm1, %v62_v50 }
  0xdd   :  { %v568_v52 = vpop.f32.mrb[0].mxu0  ;;  %v584_v53 = vpop.f32.mrb[0].mxu1 }
  0xde   :  { %v178_v54 = vadd.f32 %v568_v52, %v750_v51  ;;  %v242_v55 = vadd.f32 %v584_v53, %v750_v51  ;;  %v169_v56 = vpop.f32.mrb[1].mxu0  ;;  %v233_v57 = vpop.f32.mrb[1].mxu1 }
  0xdf   :  { %v170_v58 = vadd.f32 %v750_v51, %v169_v56  ;;  %v234_v59 = vadd.f32 %v750_v51, %v233_v57  ;;  %v569_v60 = vpop.f32.mrb[2].mxu0  ;;  %v585_v61 = vpop.f32.mrb[2].mxu1 }
  0xe0   :  { %v514_v62 = vpack.c.bf16 %v178_v54, %v178_v54  ;;  %v530_v63 = vpack.c.bf16 %v242_v55, %v242_v55  ;;  %v181_v0 = vadd.f32 %v569_v60, %v750_v51  ;;  %v245_v1 = vadd.f32 %v585_v61, %v750_v51  ;;  %v172_v2 = vpop.f32.mrb[3].mxu0  ;;  %v236_v3 = vpop.f32.mrb[3].mxu1 }
  0xe1   :  { %v512_v4 = vpack.c.bf16 %v170_v58, %v170_v58  ;;  %v528_v5 = vpack.c.bf16 %v234_v59, %v234_v59  ;;  %v173_v6 = vadd.f32 %v750_v51, %v172_v2  ;;  %v237_v7 = vadd.f32 %v750_v51, %v236_v3 }
  0xe2   :  { %427 = vst.msk [vmem:[%s915_s3 + $0x8] sm:$0xf] %vm424_vm2, %v514_v62  ;;  %443 = vst.msk [vmem:[%s915_s3 + $0x48] sm:$0xf] %vm424_vm2, %v530_v63  ;;  %v515_v8 = vpack.c.bf16 %v181_v0, %v181_v0  ;;  %v531_v9 = vpack.c.bf16 %v245_v1, %v245_v1 }
  0xe3   :  { %425 = vst.msk [vmem:[%s915_s3] sm:$0xf] %vm424_vm2, %v512_v4  ;;  %441 = vst.msk [vmem:[%s915_s3 + $0x40] sm:$0xf] %vm424_vm2, %v528_v5  ;;  %v513_v10 = vpack.c.bf16 %v173_v6, %v173_v6  ;;  %v529_v11 = vpack.c.bf16 %v237_v7, %v237_v7 }
  0xe4   :  { %428 = vst.msk [vmem:[%s915_s3 + $0xc] sm:$0xf] %vm424_vm2, %v515_v8  ;;  %444 = vst.msk [vmem:[%s915_s3 + $0x4c] sm:$0xf] %vm424_vm2, %v531_v9 }
  0xe5   :  { %426 = vst.msk [vmem:[%s915_s3 + $0x4] sm:$0xf] %vm424_vm2, %v513_v10  ;;  %442 = vst.msk [vmem:[%s915_s3 + $0x44] sm:$0xf] %vm424_vm2, %v529_v11  ;;  %v572_v12 = vpop.f32.mrb[4].mxu0  ;;  %v588_v13 = vpop.f32.mrb[4].mxu1 }
  0xe6   :  { %v194_v14 = vadd.f32 %v572_v12, %v750_v51  ;;  %v258_v15 = vadd.f32 %v588_v13, %v750_v51  ;;  %v185_v16 = vpop.f32.mrb[5].mxu0  ;;  %v249_v17 = vpop.f32.mrb[5].mxu1 }
  0xe7   :  { %v186_v18 = vadd.f32 %v750_v51, %v185_v16  ;;  %v250_v19 = vadd.f32 %v750_v51, %v249_v17  ;;  %v573_v20 = vpop.f32.mrb[6].mxu0  ;;  %v589_v21 = vpop.f32.mrb[6].mxu1 }
  0xe8   :  { %v518_v22 = vpack.c.bf16 %v194_v14, %v194_v14  ;;  %v534_v23 = vpack.c.bf16 %v258_v15, %v258_v15  ;;  %v197_v24 = vadd.f32 %v573_v20, %v750_v51  ;;  %v261_v25 = vadd.f32 %v589_v21, %v750_v51  ;;  %v188_v26 = vpop.f32.mrb[7].mxu0  ;;  %v252_v27 = vpop.f32.mrb[7].mxu1 }
  0xe9   :  { %v516_v28 = vpack.c.bf16 %v186_v18, %v186_v18  ;;  %v532_v29 = vpack.c.bf16 %v250_v19, %v250_v19  ;;  %v189_v30 = vadd.f32 %v750_v51, %v188_v26  ;;  %v253_v31 = vadd.f32 %v750_v51, %v252_v27 }
  0xea   :  { %431 = vst.msk [vmem:[%s915_s3 + $0x18] sm:$0xf] %vm424_vm2, %v518_v22  ;;  %447 = vst.msk [vmem:[%s915_s3 + $0x58] sm:$0xf] %vm424_vm2, %v534_v23  ;;  %v519_v32 = vpack.c.bf16 %v197_v24, %v197_v24  ;;  %v535_v33 = vpack.c.bf16 %v261_v25, %v261_v25 }
  0xeb   :  { %429 = vst.msk [vmem:[%s915_s3 + $0x10] sm:$0xf] %vm424_vm2, %v516_v28  ;;  %445 = vst.msk [vmem:[%s915_s3 + $0x50] sm:$0xf] %vm424_vm2, %v532_v29  ;;  %v517_v34 = vpack.c.bf16 %v189_v30, %v189_v30  ;;  %v533_v35 = vpack.c.bf16 %v253_v31, %v253_v31 }
  0xec   :  { %432 = vst.msk [vmem:[%s915_s3 + $0x1c] sm:$0xf] %vm424_vm2, %v519_v32  ;;  %448 = vst.msk [vmem:[%s915_s3 + $0x5c] sm:$0xf] %vm424_vm2, %v535_v33 }
  0xed   :  { %430 = vst.msk [vmem:[%s915_s3 + $0x14] sm:$0xf] %vm424_vm2, %v517_v34  ;;  %446 = vst.msk [vmem:[%s915_s3 + $0x54] sm:$0xf] %vm424_vm2, %v533_v35  ;;  %v576_v36 = vpop.f32.mrb[8].mxu0  ;;  %v592_v37 = vpop.f32.mrb[8].mxu1 }
  0xee   :  { %v210_v38 = vadd.f32 %v576_v36, %v750_v51  ;;  %v274_v39 = vadd.f32 %v592_v37, %v750_v51  ;;  %v201_v40 = vpop.f32.mrb[9].mxu0  ;;  %v265_v41 = vpop.f32.mrb[9].mxu1 }
  0xef   :  { %v202_v42 = vadd.f32 %v750_v51, %v201_v40  ;;  %v266_v43 = vadd.f32 %v750_v51, %v265_v41  ;;  %v577_v44 = vpop.f32.mrb[10].mxu0  ;;  %v593_v45 = vpop.f32.mrb[10].mxu1 }
  0xf0   :  { %v522_v46 = vpack.c.bf16 %v210_v38, %v210_v38  ;;  %v538_v47 = vpack.c.bf16 %v274_v39, %v274_v39  ;;  %v213_v48 = vadd.f32 %v577_v44, %v750_v51  ;;  %v277_v49 = vadd.f32 %v593_v45, %v750_v51  ;;  %v204_v50 = vpop.f32.mrb[11].mxu0  ;;  %v268_v52 = vpop.f32.mrb[11].mxu1 }
  0xf1   :  { %v520_v53 = vpack.c.bf16 %v202_v42, %v202_v42  ;;  %v536_v54 = vpack.c.bf16 %v266_v43, %v266_v43  ;;  %v205_v55 = vadd.f32 %v750_v51, %v204_v50  ;;  %v269_v56 = vadd.f32 %v750_v51, %v268_v52 }
  0xf2   :  { %435 = vst.msk [vmem:[%s915_s3 + $0x28] sm:$0xf] %vm424_vm2, %v522_v46  ;;  %451 = vst.msk [vmem:[%s915_s3 + $0x68] sm:$0xf] %vm424_vm2, %v538_v47  ;;  %v523_v57 = vpack.c.bf16 %v213_v48, %v213_v48  ;;  %v539_v58 = vpack.c.bf16 %v277_v49, %v277_v49 }
  0xf3   :  { %433 = vst.msk [vmem:[%s915_s3 + $0x20] sm:$0xf] %vm424_vm2, %v520_v53  ;;  %449 = vst.msk [vmem:[%s915_s3 + $0x60] sm:$0xf] %vm424_vm2, %v536_v54  ;;  %v521_v59 = vpack.c.bf16 %v205_v55, %v205_v55  ;;  %v537_v60 = vpack.c.bf16 %v269_v56, %v269_v56 }
  0xf4   :  { %436 = vst.msk [vmem:[%s915_s3 + $0x2c] sm:$0xf] %vm424_vm2, %v523_v57  ;;  %452 = vst.msk [vmem:[%s915_s3 + $0x6c] sm:$0xf] %vm424_vm2, %v539_v58 }
  0xf5   :  { %434 = vst.msk [vmem:[%s915_s3 + $0x24] sm:$0xf] %vm424_vm2, %v521_v59  ;;  %450 = vst.msk [vmem:[%s915_s3 + $0x64] sm:$0xf] %vm424_vm2, %v537_v60  ;;  %v580_v61 = vpop.f32.mrb[12].mxu0  ;;  %v596_v62 = vpop.f32.mrb[12].mxu1 }
  0xf6   :  { %v226_v63 = vadd.f32 %v580_v61, %v750_v51  ;;  %v290_v0 = vadd.f32 %v596_v62, %v750_v51  ;;  %v217_v1 = vpop.f32.mrb[13].mxu0  ;;  %v281_v2 = vpop.f32.mrb[13].mxu1 }
  0xf7   :  { %v218_v3 = vadd.f32 %v750_v51, %v217_v1  ;;  %v282_v4 = vadd.f32 %v750_v51, %v281_v2  ;;  %v581_v5 = vpop.f32.mrb[14].mxu0  ;;  %v597_v6 = vpop.f32.mrb[14].mxu1 }
  0xf8   :  { %v526_v7 = vpack.c.bf16 %v226_v63, %v226_v63  ;;  %v542_v8 = vpack.c.bf16 %v290_v0, %v290_v0  ;;  %v229_v9 = vadd.f32 %v581_v5, %v750_v51  ;;  %v293_v10 = vadd.f32 %v597_v6, %v750_v51  ;;  %v220_v11 = vpop.f32.mrb[15].mxu0  ;;  %v284_v12 = vpop.f32.mrb[15].mxu1 }
  0xf9   :  { %v524_v13 = vpack.c.bf16 %v218_v3, %v218_v3  ;;  %v540_v14 = vpack.c.bf16 %v282_v4, %v282_v4  ;;  %v221_v15 = vadd.f32 %v750_v51, %v220_v11  ;;  %v285_v16 = vadd.f32 %v750_v51, %v284_v12 }
  0xfa   :  { %439 = vst.msk [vmem:[%s915_s3 + $0x38] sm:$0xf] %vm424_vm2, %v526_v7  ;;  %455 = vst.msk [vmem:[%s915_s3 + $0x78] sm:$0xf] %vm424_vm2, %v542_v8  ;;  %v527_v17 = vpack.c.bf16 %v229_v9, %v229_v9  ;;  %v543_v18 = vpack.c.bf16 %v293_v10, %v293_v10 }
  0xfb   :  { %437 = vst.msk [vmem:[%s915_s3 + $0x30] sm:$0xf] %vm424_vm2, %v524_v13  ;;  %453 = vst.msk [vmem:[%s915_s3 + $0x70] sm:$0xf] %vm424_vm2, %v540_v14  ;;  %v525_v51 = vpack.c.bf16 %v221_v15, %v221_v15  ;;  %v541_v19 = vpack.c.bf16 %v285_v16, %v285_v16 }
  0xfc   :  { %440 = vst.msk [vmem:[%s915_s3 + $0x3c] sm:$0xf] %vm424_vm2, %v527_v17  ;;  %456 = vst.msk [vmem:[%s915_s3 + $0x7c] sm:$0xf] %vm424_vm2, %v543_v18 }
  0xfd   :  { %438 = vst.msk [vmem:[%s915_s3 + $0x34] sm:$0xf] %vm424_vm2, %v525_v51  ;;  %454 = vst.msk [vmem:[%s915_s3 + $0x74] sm:$0xf] %vm424_vm2, %v541_v19 }

// kernel: evoformer_lite_msa_seq.13
= control target key start
LH: loop header
LB: loop body
LE: loop exit
PB: predicated region body
PF: predicated region fallthrough
CT: control target
= control target key end

     0   :  { %v1017_v0 = vmov 0   ;;  %vm339_vm0 = vcmask 261120   ;;  %s1741_s1 = inlined_call_operand.vmem [shape: f32[256,1], index: 1, kind: input, shape index: {}]   ;;  %s1742_s0 = inlined_call_operand.vmem [shape: bf16[256,32], index: 0, kind: input, shape index: {}]   ;;  %s1743_s2 = inlined_call_operand.vmem [shape: f32[1,32], index: 2, kind: input, shape index: {}]   ;;  %s1744_s3 = inlined_call_operand.vmem [shape: f32[1,32], index: 3, kind: input, shape index: {}]   ;;  %s1745_s4 = inlined_call_operand.vmem [shape: f32[256,32], index: 4, kind: output, shape index: {}]  }
   0x1   :  { %952 = vset.pattern.permute.xlu1 %v1017_v0  ;;  %951 = vset.pattern.permute.xlu0 %v1017_v0  ;;  %v83_v1 = vld [vmem:[%s1741_s1 + $0x10] sm:$0xff]  ;;  %v81_v2 = vld [vmem:[%s1741_s1] sm:$0xff]  ;;  %v84_v3 = vld [vmem:[%s1741_s1 + $0x18] sm:$0xff] }
   0x2   :  { %v115_v4 = vsub.f32 1.0, %v83_v1  ;;  %v113_v5 = vsub.f32 1.0, %v81_v2  ;;  %v82_v6 = vld [vmem:[%s1741_s1 + $0x8] sm:$0xff]  ;;  %v116_v7 = vsub.f32 1.0, %v84_v3  ;;  %v85_v10 = vld [vmem:[%s1741_s1 + $0x20] sm:$0xff]  ;;  %v88_v13 = vld [vmem:[%s1741_s1 + $0x38] sm:$0xff] }
   0x3   :  { %v114_v8 = vsub.f32 1.0, %v82_v6  ;;  %v86_v9 = vld [vmem:[%s1741_s1 + $0x28] sm:$0xff]  ;;  %v117_v12 = vsub.f32 1.0, %v85_v10  ;;  %v87_v14 = vld [vmem:[%s1741_s1 + $0x30] sm:$0xff]  ;;  %v120_v15 = vsub.f32 1.0, %v88_v13  ;;  %v89_v18 = vld [vmem:[%s1741_s1 + $0x40] sm:$0xff] }
   0x4   :  { %157 = vperm.xlu1 %952, %v115_v4   ;;  %147 = vperm.xlu0 %951, %v113_v5   ;;  %v118_v11 = vsub.f32 1.0, %v86_v9  ;;  %v119_v16 = vsub.f32 1.0, %v87_v14  ;;  %v90_v17 = vld [vmem:[%s1741_s1 + $0x48] sm:$0xff]  ;;  %v121_v20 = vsub.f32 1.0, %v89_v18  ;;  %v92_v21 = vld [vmem:[%s1741_s1 + $0x58] sm:$0xff]  ;;  %v91_v22 = vld [vmem:[%s1741_s1 + $0x50] sm:$0xff] }
   0x5   :  { %v122_v19 = vsub.f32 1.0, %v90_v17  ;;  %v124_v23 = vsub.f32 1.0, %v92_v21  ;;  %v123_v24 = vsub.f32 1.0, %v91_v22  ;;  %v94_v25 = vld [vmem:[%s1741_s1 + $0x68] sm:$0xff]  ;;  %v93_v26 = vld [vmem:[%s1741_s1 + $0x60] sm:$0xff]  ;;  %v96_v29 = vld [vmem:[%s1741_s1 + $0x78] sm:$0xff] }
   0x6   :  { %v126_v27 = vsub.f32 1.0, %v94_v25  ;;  %v125_v28 = vsub.f32 1.0, %v93_v26  ;;  %v95_v30 = vld [vmem:[%s1741_s1 + $0x70] sm:$0xff]  ;;  %v128_v31 = vsub.f32 1.0, %v96_v29  ;;  %v98_v33 = vld [vmem:[%s1741_s1 + $0x88] sm:$0xff]  ;;  %v97_v34 = vld [vmem:[%s1741_s1 + $0x80] sm:$0xff] }
   0x7   :  { %v127_v32 = vsub.f32 1.0, %v95_v30  ;;  %v130_v35 = vsub.f32 1.0, %v98_v33  ;;  %v129_v36 = vsub.f32 1.0, %v97_v34  ;;  %v100_v37 = vld [vmem:[%s1741_s1 + $0x98] sm:$0xff]  ;;  %v99_v38 = vld [vmem:[%s1741_s1 + $0x90] sm:$0xff]  ;;  %v102_v41 = vld [vmem:[%s1741_s1 + $0xa8] sm:$0xff] }
   0x8   :  { %162 = vperm.xlu1 %952, %v116_v7   ;;  %152 = vperm.xlu0 %951, %v114_v8   ;;  %v132_v39 = vsub.f32 1.0, %v100_v37  ;;  %v131_v40 = vsub.f32 1.0, %v99_v38  ;;  %v101_v42 = vld [vmem:[%s1741_s1 + $0xa0] sm:$0xff]  ;;  %v134_v43 = vsub.f32 1.0, %v102_v41  ;;  %v104_v45 = vld [vmem:[%s1741_s1 + $0xb8] sm:$0xff]  ;;  %v103_v46 = vld [vmem:[%s1741_s1 + $0xb0] sm:$0xff] }
   0x9   :  { %v133_v44 = vsub.f32 1.0, %v101_v42  ;;  %v136_v47 = vsub.f32 1.0, %v104_v45  ;;  %v135_v48 = vsub.f32 1.0, %v103_v46  ;;  %v106_v49 = vld [vmem:[%s1741_s1 + $0xc8] sm:$0xff]  ;;  %v105_v50 = vld [vmem:[%s1741_s1 + $0xc0] sm:$0xff]  ;;  %v108_v53 = vld [vmem:[%s1741_s1 + $0xd8] sm:$0xff] }
   0xa   :  { %v138_v51 = vsub.f32 1.0, %v106_v49  ;;  %v137_v52 = vsub.f32 1.0, %v105_v50  ;;  %v107_v54 = vld [vmem:[%s1741_s1 + $0xd0] sm:$0xff]  ;;  %v140_v55 = vsub.f32 1.0, %v108_v53  ;;  %v110_v57 = vld [vmem:[%s1741_s1 + $0xe8] sm:$0xff]  ;;  %v109_v58 = vld [vmem:[%s1741_s1 + $0xe0] sm:$0xff] }
   0xb   :  { %v139_v56 = vsub.f32 1.0, %v107_v54  ;;  %v142_v59 = vsub.f32 1.0, %v110_v57  ;;  %v141_v60 = vsub.f32 1.0, %v109_v58  ;;  %v112_v61 = vld [vmem:[%s1741_s1 + $0xf8] sm:$0xff]  ;;  %v111_v62 = vld [vmem:[%s1741_s1 + $0xf0] sm:$0xff]  ;;  %v935_v1 = vld [vmem:[%s1742_s0 + $0x8] sm:$0xff]  }
   0xc   :  { %172 = vperm.xlu1 %952, %v118_v11   ;;  %167 = vperm.xlu0 %951, %v117_v12   ;;  %v144_v63 = vsub.f32 1.0, %v112_v61  ;;  %v143_v0 = vsub.f32 1.0, %v111_v62  ;;  %v872_v2 = vld [vmem:[%s1742_s0] sm:$0xff]   ;;  %v877_v3 = vunpack.c.l.bf16 %v935_v1  ;;  %v936_v10 = vld [vmem:[%s1742_s0 + $0x10] sm:$0xff]   ;;  %v878_v11 = vunpack.c.h.bf16 %v935_v1  ;;  %v937_v18 = vld [vmem:[%s1742_s0 + $0x18] sm:$0xff]  }
   0xd   :  { %v873_v4 = vunpack.c.l.bf16 %v872_v2  ;;  %v874_v9 = vunpack.c.h.bf16 %v872_v2  ;;  %v885_v25 = vunpack.c.l.bf16 %v937_v18  ;;  %v938_v26 = vld [vmem:[%s1742_s0 + $0x20] sm:$0xff]   ;;  %v941_v53 = vld [vmem:[%s1742_s0 + $0x38] sm:$0xff]  }
   0xe   :  { %v889_v34 = vunpack.c.l.bf16 %v938_v26  ;;  %v890_v37 = vunpack.c.h.bf16 %v938_v26  ;;  %v901_v61 = vunpack.c.l.bf16 %v941_v53  ;;  %v942_v62 = vld [vmem:[%s1742_s0 + $0x40] sm:$0xff]  }
  0x10   :  { %182 = vperm.xlu1 %952, %v120_v15   ;;  %177 = vperm.xlu0 %951, %v119_v16   ;;  %v881_v16 = vunpack.c.l.bf16 %v936_v10 }
  0x14   :  { %192 = vperm.xlu1 %952, %v122_v19   ;;  %187 = vperm.xlu0 %951, %v121_v20   ;;  %v882_v20 = vunpack.c.h.bf16 %v936_v10 }
  0x18   :  { %202 = vperm.xlu1 %952, %v124_v23   ;;  %197 = vperm.xlu0 %951, %v123_v24  }
  0x1c   :  { %212 = vperm.xlu1 %952, %v126_v27   ;;  %207 = vperm.xlu0 %951, %v125_v28   ;;  %v886_v28 = vunpack.c.h.bf16 %v937_v18 }
  0x20   :  { %222 = vperm.xlu1 %952, %v128_v31   ;;  %217 = vperm.xlu0 %951, %v127_v32  }
  0x24   :  { %232 = vperm.xlu1 %952, %v130_v35   ;;  %227 = vperm.xlu0 %951, %v129_v36   ;;  %v939_v35 = vld [vmem:[%s1742_s0 + $0x28] sm:$0xff]  }
  0x25   :  { %v894_v46 = vunpack.c.h.bf16 %v939_v35 }
  0x28   :  { %242 = vperm.xlu1 %952, %v132_v39   ;;  %237 = vperm.xlu0 %951, %v131_v40  }
  0x2c   :  { %252 = vperm.xlu1 %952, %v134_v43   ;;  %247 = vperm.xlu0 %951, %v133_v44   ;;  %v893_v43 = vunpack.c.l.bf16 %v939_v35  ;;  %v940_v44 = vld [vmem:[%s1742_s0 + $0x30] sm:$0xff]  }
  0x30   :  { %262 = vperm.xlu1 %952, %v136_v47   ;;  %257 = vperm.xlu0 %951, %v135_v48  }
  0x34   :  { %272 = vperm.xlu1 %952, %v138_v51   ;;  %267 = vperm.xlu0 %951, %v137_v52   ;;  %v897_v52 = vunpack.c.l.bf16 %v940_v44 }
  0x38   :  { %282 = vperm.xlu1 %952, %v140_v55   ;;  %277 = vperm.xlu0 %951, %v139_v56   ;;  %v898_v55 = vunpack.c.h.bf16 %v940_v44 }
  0x3c   :  { %292 = vperm.xlu1 %952, %v142_v59   ;;  %287 = vperm.xlu0 %951, %v141_v60  }
  0x40   :  { %302 = vperm.xlu1 %952, %v144_v63   ;;  %297 = vperm.xlu0 %951, %v143_v0   ;;  %v902_v0 = vunpack.c.h.bf16 %v941_v53 }
  0x83   :  { %v158_v5 = vpop.permute.xlu1 %157  ;;  %v148_v6 = vpop.permute.xlu0 %147 }
  0x84   :  { %v1145_v7 = vmul.f32 %v877_v3, %v158_v5  ;;  %v1147_v8 = vmul.f32 %v873_v4, %v148_v6  ;;  %v905_v6 = vunpack.c.l.bf16 %v942_v62 }
  0x86   :  { %v340_v12 = vsel %vm339_vm0, %v1147_v8, 0.0  ;;  %v346_v17 = vsel %vm339_vm0, %v1145_v7, 0.0 }
  0x87   :  { %v163_v13 = vpop.permute.xlu1 %162  ;;  %v153_v14 = vpop.permute.xlu0 %152  ;;  %341 = vadd.xlane.f32.xlu0 %v340_v12 }
  0x88   :  { %v1154_v15 = vmul.f32 %v874_v9, %v153_v14  ;;  %v1161_v19 = vmul.f32 %v878_v11, %v163_v13  ;;  %v943_v9 = vld [vmem:[%s1742_s0 + $0x48] sm:$0xff]   ;;  %v906_v11 = vunpack.c.h.bf16 %v942_v62 }
  0x89   :  { %v909_v18 = vunpack.c.l.bf16 %v943_v9 }
  0x8a   :  { %v343_v21 = vsel %vm339_vm0, %v1154_v15, 0.0  ;;  %v349_v30 = vsel %vm339_vm0, %v1161_v19, 0.0 }
  0x8b   :  { %v173_v22 = vpop.permute.xlu1 %172  ;;  %v168_v23 = vpop.permute.xlu0 %167  ;;  %344 = vadd.xlane.f32.xlu1 %v343_v21  ;;  %347 = vadd.xlane.f32.xlu0 %v346_v17 }
  0x8c   :  { %v1165_v24 = vmul.f32 %v881_v16, %v168_v23  ;;  %v1170_v27 = vmul.f32 %v882_v20, %v173_v22  ;;  %v944_v20 = vld [vmem:[%s1742_s0 + $0x50] sm:$0xff]   ;;  %v910_v22 = vunpack.c.h.bf16 %v943_v9 }
  0x8e   :  { %v352_v29 = vsel %vm339_vm0, %v1165_v24, 0.0  ;;  %v355_v39 = vsel %vm339_vm0, %v1170_v27, 0.0 }
  0x8f   :  { %v183_v31 = vpop.permute.xlu1 %182  ;;  %v178_v32 = vpop.permute.xlu0 %177  ;;  %353 = vadd.xlane.f32.xlu1 %v352_v29  ;;  %350 = vadd.xlane.f32.xlu0 %v349_v30  ;;  %v913_v30 = vunpack.c.l.bf16 %v944_v20 }
  0x90   :  { %v1176_v33 = vmul.f32 %v885_v25, %v178_v32  ;;  %v1181_v36 = vmul.f32 %v886_v28, %v183_v31  ;;  %v945_v31 = vld [vmem:[%s1742_s0 + $0x58] sm:$0xff]  }
  0x92   :  { %v358_v38 = vsel %vm339_vm0, %v1176_v33, 0.0  ;;  %v361_v48 = vsel %vm339_vm0, %v1181_v36, 0.0 }
  0x93   :  { %v193_v40 = vpop.permute.xlu1 %192  ;;  %v188_v41 = vpop.permute.xlu0 %187  ;;  %359 = vadd.xlane.f32.xlu1 %v358_v38  ;;  %356 = vadd.xlane.f32.xlu0 %v355_v39 }
  0x94   :  { %v1187_v42 = vmul.f32 %v889_v34, %v188_v41  ;;  %v1192_v45 = vmul.f32 %v890_v37, %v193_v40  ;;  %v914_v34 = vunpack.c.h.bf16 %v944_v20  ;;  %v917_v41 = vunpack.c.l.bf16 %v945_v31 }
  0x96   :  { %v364_v47 = vsel %vm339_vm0, %v1187_v42, 0.0  ;;  %v367_v57 = vsel %vm339_vm0, %v1192_v45, 0.0 }
  0x97   :  { %v203_v49 = vpop.permute.xlu1 %202  ;;  %v198_v50 = vpop.permute.xlu0 %197  ;;  %365 = vadd.xlane.f32.xlu1 %v364_v47  ;;  %362 = vadd.xlane.f32.xlu0 %v361_v48 }
  0x98   :  { %v1198_v51 = vmul.f32 %v893_v43, %v198_v50  ;;  %v1203_v54 = vmul.f32 %v894_v46, %v203_v49  ;;  %v946_v43 = vld [vmem:[%s1742_s0 + $0x60] sm:$0xff]   ;;  %v918_v46 = vunpack.c.h.bf16 %v945_v31 }
  0x99   :  { %v921_v53 = vunpack.c.l.bf16 %v946_v43 }
  0x9a   :  { %v370_v56 = vsel %vm339_vm0, %v1198_v51, 0.0  ;;  %v373_v2 = vsel %vm339_vm0, %v1203_v54, 0.0 }
  0x9b   :  { %v213_v58 = vpop.permute.xlu1 %212  ;;  %v208_v59 = vpop.permute.xlu0 %207  ;;  %371 = vadd.xlane.f32.xlu1 %v370_v56  ;;  %368 = vadd.xlane.f32.xlu0 %v367_v57  ;;  %v922_v57 = vunpack.c.h.bf16 %v946_v43 }
  0x9c   :  { %v1209_v60 = vmul.f32 %v897_v52, %v208_v59  ;;  %v1214_v63 = vmul.f32 %v898_v55, %v213_v58  ;;  %v947_v55 = vld [vmem:[%s1742_s0 + $0x68] sm:$0xff]  }
  0x9e   :  { %v376_v1 = vsel %vm339_vm0, %v1209_v60, 0.0  ;;  %v379_v13 = vsel %vm339_vm0, %v1214_v63, 0.0 }
  0x9f   :  { %v223_v3 = vpop.permute.xlu1 %222  ;;  %v218_v4 = vpop.permute.xlu0 %217  ;;  %377 = vadd.xlane.f32.xlu1 %v376_v1  ;;  %374 = vadd.xlane.f32.xlu0 %v373_v2  ;;  %v925_v1 = vunpack.c.l.bf16 %v947_v55  ;;  %v948_v2 = vld [vmem:[%s1742_s0 + $0x70] sm:$0xff]  }
  0xa0   :  { %v1220_v5 = vmul.f32 %v901_v61, %v218_v4  ;;  %v1225_v10 = vmul.f32 %v902_v0, %v223_v3  ;;  %v926_v4 = vunpack.c.h.bf16 %v947_v55  ;;  %v930_v20 = vunpack.c.h.bf16 %v948_v2 }
  0xa2   :  { %v382_v12 = vsel %vm339_vm0, %v1220_v5, 0.0  ;;  %v385_v25 = vsel %vm339_vm0, %v1225_v10, 0.0 }
  0xa3   :  { %v233_v14 = vpop.permute.xlu1 %232  ;;  %v228_v16 = vpop.permute.xlu0 %227  ;;  %383 = vadd.xlane.f32.xlu1 %v382_v12  ;;  %380 = vadd.xlane.f32.xlu0 %v379_v13 }
  0xa4   :  { %v1231_v17 = vmul.f32 %v905_v6, %v228_v16  ;;  %v1236_v21 = vmul.f32 %v906_v11, %v233_v14  ;;  %v929_v14 = vunpack.c.l.bf16 %v948_v2  ;;  %v949_v16 = vld [vmem:[%s1742_s0 + $0x78] sm:$0xff]  }
  0xa6   :  { %v388_v23 = vsel %vm339_vm0, %v1231_v17, 0.0  ;;  %v391_v37 = vsel %vm339_vm0, %v1236_v21, 0.0 }
  0xa7   :  { %v243_v26 = vpop.permute.xlu1 %242  ;;  %v238_v28 = vpop.permute.xlu0 %237  ;;  %389 = vadd.xlane.f32.xlu1 %v388_v23  ;;  %386 = vadd.xlane.f32.xlu0 %v385_v25 }
  0xa8   :  { %v1242_v29 = vmul.f32 %v909_v18, %v238_v28  ;;  %v1247_v32 = vmul.f32 %v910_v22, %v243_v26 }
  0xaa   :  { %v394_v35 = vsel %vm339_vm0, %v1242_v29, 0.0  ;;  %v397_v48 = vsel %vm339_vm0, %v1247_v32, 0.0 }
  0xab   :  { %v253_v38 = vpop.permute.xlu1 %252  ;;  %v248_v39 = vpop.permute.xlu0 %247  ;;  %395 = vadd.xlane.f32.xlu1 %v394_v35  ;;  %392 = vadd.xlane.f32.xlu0 %v391_v37 }
  0xac   :  { %v1253_v40 = vmul.f32 %v913_v30, %v248_v39  ;;  %v1258_v44 = vmul.f32 %v914_v34, %v253_v38  ;;  %v933_v30 = vunpack.c.l.bf16 %v949_v16  ;;  %v934_v34 = vunpack.c.h.bf16 %v949_v16 }
  0xae   :  { %v400_v47 = vsel %vm339_vm0, %v1253_v40, 0.0  ;;  %v403_v59 = vsel %vm339_vm0, %v1258_v44, 0.0 }
  0xaf   :  { %v263_v49 = vpop.permute.xlu1 %262  ;;  %v258_v50 = vpop.permute.xlu0 %257  ;;  %401 = vadd.xlane.f32.xlu1 %v400_v47  ;;  %398 = vadd.xlane.f32.xlu0 %v397_v48 }
  0xb0   :  { %v1264_v52 = vmul.f32 %v917_v41, %v258_v50  ;;  %v1269_v56 = vmul.f32 %v918_v46, %v263_v49 }
  0xb2   :  { %v406_v58 = vsel %vm339_vm0, %v1264_v52, 0.0  ;;  %v409_v9 = vsel %vm339_vm0, %v1269_v56, 0.0 }
  0xb3   :  { %v273_v61 = vpop.permute.xlu1 %272  ;;  %v268_v62 = vpop.permute.xlu0 %267  ;;  %407 = vadd.xlane.f32.xlu1 %v406_v58  ;;  %404 = vadd.xlane.f32.xlu0 %v403_v59 }
  0xb4   :  { %v1275_v0 = vmul.f32 %v921_v53, %v268_v62  ;;  %v1280_v3 = vmul.f32 %v922_v57, %v273_v61 }
  0xb6   :  { %v412_v6 = vsel %vm339_vm0, %v1275_v0, 0.0  ;;  %v415_v23 = vsel %vm339_vm0, %v1280_v3, 0.0 }
  0xb7   :  { %v283_v11 = vpop.permute.xlu1 %282  ;;  %v278_v12 = vpop.permute.xlu0 %277  ;;  %413 = vadd.xlane.f32.xlu1 %v412_v6  ;;  %410 = vadd.xlane.f32.xlu0 %v409_v9 }
  0xb8   :  { %v1286_v13 = vmul.f32 %v925_v1, %v278_v12  ;;  %v1291_v18 = vmul.f32 %v926_v4, %v283_v11 }
  0xba   :  { %v418_v22 = vsel %vm339_vm0, %v1286_v13, 0.0  ;;  %v421_v37 = vsel %vm339_vm0, %v1291_v18, 0.0 }
  0xbb   :  { %v293_v25 = vpop.permute.xlu1 %292  ;;  %v288_v26 = vpop.permute.xlu0 %287  ;;  %419 = vadd.xlane.f32.xlu1 %v418_v22  ;;  %416 = vadd.xlane.f32.xlu0 %v415_v23 }
  0xbc   :  { %v1297_v28 = vmul.f32 %v929_v14, %v288_v26  ;;  %v1299_v31 = vmul.f32 %v930_v20, %v293_v25 }
  0xbe   :  { %v424_v35 = vsel %vm339_vm0, %v1297_v28, 0.0  ;;  %v427_v47 = vsel %vm339_vm0, %v1299_v31, 0.0 }
  0xbf   :  { %v303_v38 = vpop.permute.xlu1 %302  ;;  %v298_v39 = vpop.permute.xlu0 %297  ;;  %425 = vadd.xlane.f32.xlu1 %v424_v35  ;;  %422 = vadd.xlane.f32.xlu0 %v421_v37 }
  0xc0   :  { %v1305_v41 = vmul.f32 %v933_v30, %v298_v39  ;;  %v1307_v43 = vmul.f32 %v934_v34, %v303_v38 }
  0xc2   :  { %v430_v46 = vsel %vm339_vm0, %v1305_v41, 0.0  ;;  %v433_v48 = vsel %vm339_vm0, %v1307_v43, 0.0 }
  0xc3   :  { %431 = vadd.xlane.f32.xlu1 %v430_v46  ;;  %428 = vadd.xlane.f32.xlu0 %v427_v47 }
  0xc7   :  { %434 = vadd.xlane.f32.xlu0 %v433_v48 }
 0x114   :  { %v342_v49 = vpop.xlane.xlu0 %341 }
 0x115   :  { %v437_v50 = vmul.f32 0.03125, %v342_v49 }
 0x117   :  { %v1316_v53 = vsub.f32 %v1147_v8, %v437_v50 }
 0x118   :  { %v345_v55 = vpop.xlane.xlu1 %344  ;;  %v348_v57 = vpop.xlane.xlu0 %347 }
 0x119   :  { %v438_v58 = vmul.f32 0.03125, %v345_v55  ;;  %v439_v59 = vmul.f32 0.03125, %v348_v57  ;;  %v501_v61 = vmul.f32 %v1316_v53, %v1316_v53 }
 0x11b   :  { %v1321_v62 = vsub.f32 %v1154_v15, %v438_v58  ;;  %v1324_v1 = vsub.f32 %v1145_v7, %v439_v59  ;;  %v533_v2 = vsel %vm339_vm0, %v501_v61, 0.0 }
 0x11c   :  { %v354_v4 = vpop.xlane.xlu1 %353  ;;  %534 = vadd.xlane.f32.xlu1 %v533_v2  ;;  %v351_v6 = vpop.xlane.xlu0 %350 }
 0x11d   :  { %v441_v8 = vmul.f32 0.03125, %v354_v4  ;;  %v440_v9 = vmul.f32 0.03125, %v351_v6  ;;  %v502_v11 = vmul.f32 %v1321_v62, %v1321_v62  ;;  %v503_v12 = vmul.f32 %v1324_v1, %v1324_v1 }
 0x11f   :  { %v1332_v14 = vsub.f32 %v1165_v24, %v441_v8  ;;  %v1335_v15 = vsub.f32 %v1161_v19, %v440_v9  ;;  %v536_v7 = vsel %vm339_vm0, %v502_v11, 0.0  ;;  %v539_v16 = vsel %vm339_vm0, %v503_v12, 0.0 }
 0x120   :  { %v360_v20 = vpop.xlane.xlu1 %359  ;;  %537 = vadd.xlane.f32.xlu0 %v536_v7  ;;  %540 = vadd.xlane.f32.xlu1 %v539_v16  ;;  %v357_v22 = vpop.xlane.xlu0 %356 }
 0x121   :  { %v443_v23 = vmul.f32 0.03125, %v360_v20  ;;  %v442_v25 = vmul.f32 0.03125, %v357_v22  ;;  %v505_v26 = vmul.f32 %v1332_v14, %v1332_v14  ;;  %v504_v24 = vmul.f32 %v1335_v15, %v1335_v15 }
 0x123   :  { %v1344_v30 = vsub.f32 %v1176_v33, %v443_v23  ;;  %v1347_v19 = vsub.f32 %v1170_v27, %v442_v25  ;;  %v545_v34 = vsel %vm339_vm0, %v505_v26, 0.0  ;;  %v542_v35 = vsel %vm339_vm0, %v504_v24, 0.0 }
 0x124   :  { %v366_v37 = vpop.xlane.xlu1 %365  ;;  %546 = vadd.xlane.f32.xlu1 %v545_v34  ;;  %543 = vadd.xlane.f32.xlu0 %v542_v35  ;;  %v363_v38 = vpop.xlane.xlu0 %362 }
 0x125   :  { %v445_v39 = vmul.f32 0.03125, %v366_v37  ;;  %v444_v46 = vmul.f32 0.03125, %v363_v38  ;;  %v507_v47 = vmul.f32 %v1344_v30, %v1344_v30  ;;  %v506_v33 = vmul.f32 %v1347_v19, %v1347_v19 }
 0x127   :  { %v1356_v48 = vsub.f32 %v1187_v42, %v445_v39  ;;  %v1359_v27 = vsub.f32 %v1181_v36, %v444_v46  ;;  %v551_v49 = vsel %vm339_vm0, %v507_v47, 0.0  ;;  %v548_v50 = vsel %vm339_vm0, %v506_v33, 0.0 }
 0x128   :  { %v372_v55 = vpop.xlane.xlu1 %371  ;;  %552 = vadd.xlane.f32.xlu1 %v551_v49  ;;  %549 = vadd.xlane.f32.xlu0 %v548_v50  ;;  %v369_v57 = vpop.xlane.xlu0 %368 }
 0x129   :  { %v447_v58 = vmul.f32 0.03125, %v372_v55  ;;  %v446_v59 = vmul.f32 0.03125, %v369_v57  ;;  %v509_v61 = vmul.f32 %v1356_v48, %v1356_v48  ;;  %v508_v42 = vmul.f32 %v1359_v27, %v1359_v27 }
 0x12b   :  { %v1368_v2 = vsub.f32 %v1198_v51, %v447_v58  ;;  %v1371_v36 = vsub.f32 %v1192_v45, %v446_v59  ;;  %v557_v4 = vsel %vm339_vm0, %v509_v61, 0.0  ;;  %v554_v6 = vsel %vm339_vm0, %v508_v42, 0.0 }
 0x12c   :  { %v378_v8 = vpop.xlane.xlu1 %377  ;;  %558 = vadd.xlane.f32.xlu1 %v557_v4  ;;  %555 = vadd.xlane.f32.xlu0 %v554_v6  ;;  %v375_v9 = vpop.xlane.xlu0 %374 }
 0x12d   :  { %v449_v11 = vmul.f32 0.03125, %v378_v8  ;;  %v448_v12 = vmul.f32 0.03125, %v375_v9  ;;  %v511_v7 = vmul.f32 %v1368_v2, %v1368_v2  ;;  %v510_v51 = vmul.f32 %v1371_v36, %v1371_v36 }
 0x12f   :  { %v1380_v16 = vsub.f32 %v1209_v60, %v449_v11  ;;  %v1383_v45 = vsub.f32 %v1203_v54, %v448_v12  ;;  %v563_v20 = vsel %vm339_vm0, %v511_v7, 0.0  ;;  %v560_v22 = vsel %vm339_vm0, %v510_v51, 0.0 }
 0x130   :  { %v384_v23 = vpop.xlane.xlu1 %383  ;;  %564 = vadd.xlane.f32.xlu1 %v563_v20  ;;  %561 = vadd.xlane.f32.xlu0 %v560_v22  ;;  %v381_v25 = vpop.xlane.xlu0 %380 }
 0x131   :  { %v451_v26 = vmul.f32 0.03125, %v384_v23  ;;  %v450_v24 = vmul.f32 0.03125, %v381_v25  ;;  %v513_v34 = vmul.f32 %v1380_v16, %v1380_v16  ;;  %v512_v60 = vmul.f32 %v1383_v45, %v1383_v45 }
 0x133   :  { %v1392_v35 = vsub.f32 %v1220_v5, %v451_v26  ;;  %v1395_v54 = vsub.f32 %v1214_v63, %v450_v24  ;;  %v569_v37 = vsel %vm339_vm0, %v513_v34, 0.0  ;;  %v566_v38 = vsel %vm339_vm0, %v512_v60, 0.0 }
 0x134   :  { %v390_v39 = vpop.xlane.xlu1 %389  ;;  %570 = vadd.xlane.f32.xlu1 %v569_v37  ;;  %567 = vadd.xlane.f32.xlu0 %v566_v38  ;;  %v387_v46 = vpop.xlane.xlu0 %386 }
 0x135   :  { %v453_v47 = vmul.f32 0.03125, %v390_v39  ;;  %v452_v33 = vmul.f32 0.03125, %v387_v46  ;;  %v515_v49 = vmul.f32 %v1392_v35, %v1392_v35  ;;  %v514_v5 = vmul.f32 %v1395_v54, %v1395_v54 }
 0x137   :  { %v1404_v50 = vsub.f32 %v1231_v17, %v453_v47  ;;  %v1407_v63 = vsub.f32 %v1225_v10, %v452_v33  ;;  %v575_v55 = vsel %vm339_vm0, %v515_v49, 0.0  ;;  %v572_v57 = vsel %vm339_vm0, %v514_v5, 0.0 }
 0x138   :  { %v396_v58 = vpop.xlane.xlu1 %395  ;;  %576 = vadd.xlane.f32.xlu1 %v575_v55  ;;  %573 = vadd.xlane.f32.xlu0 %v572_v57  ;;  %v393_v59 = vpop.xlane.xlu0 %392 }
 0x139   :  { %v455_v61 = vmul.f32 0.03125, %v396_v58  ;;  %v454_v42 = vmul.f32 0.03125, %v393_v59  ;;  %v517_v4 = vmul.f32 %v1404_v50, %v1404_v50  ;;  %v516_v17 = vmul.f32 %v1407_v63, %v1407_v63 }
 0x13b   :  { %v1416_v6 = vsub.f32 %v1242_v29, %v455_v61  ;;  %v1419_v10 = vsub.f32 %v1236_v21, %v454_v42  ;;  %v581_v8 = vsel %vm339_vm0, %v517_v4, 0.0  ;;  %v578_v9 = vsel %vm339_vm0, %v516_v17, 0.0 }
 0x13c   :  { %v402_v11 = vpop.xlane.xlu1 %401  ;;  %582 = vadd.xlane.f32.xlu1 %v581_v8  ;;  %579 = vadd.xlane.f32.xlu0 %v578_v9  ;;  %v399_v12 = vpop.xlane.xlu0 %398 }
 0x13d   :  { %v457_v7 = vmul.f32 0.03125, %v402_v11  ;;  %v456_v51 = vmul.f32 0.03125, %v399_v12  ;;  %v519_v20 = vmul.f32 %v1416_v6, %v1416_v6  ;;  %v518_v29 = vmul.f32 %v1419_v10, %v1419_v10 }
 0x13f   :  { %v1428_v22 = vsub.f32 %v1253_v40, %v457_v7  ;;  %v1431_v21 = vsub.f32 %v1247_v32, %v456_v51  ;;  %v587_v23 = vsel %vm339_vm0, %v519_v20, 0.0  ;;  %v584_v25 = vsel %vm339_vm0, %v518_v29, 0.0 }
 0x140   :  { %v408_v26 = vpop.xlane.xlu1 %407  ;;  %588 = vadd.xlane.f32.xlu1 %v587_v23  ;;  %585 = vadd.xlane.f32.xlu0 %v584_v25  ;;  %v405_v24 = vpop.xlane.xlu0 %404 }
 0x141   :  { %v459_v34 = vmul.f32 0.03125, %v408_v26  ;;  %v458_v60 = vmul.f32 0.03125, %v405_v24  ;;  %v521_v37 = vmul.f32 %v1428_v22, %v1428_v22  ;;  %v520_v40 = vmul.f32 %v1431_v21, %v1431_v21 }
 0x143   :  { %v1440_v38 = vsub.f32 %v1264_v52, %v459_v34  ;;  %v1443_v32 = vsub.f32 %v1258_v44, %v458_v60  ;;  %v593_v39 = vsel %vm339_vm0, %v521_v37, 0.0  ;;  %v590_v46 = vsel %vm339_vm0, %v520_v40, 0.0 }
 0x144   :  { %v414_v47 = vpop.xlane.xlu1 %413  ;;  %594 = vadd.xlane.f32.xlu1 %v593_v39  ;;  %591 = vadd.xlane.f32.xlu0 %v590_v46  ;;  %v411_v33 = vpop.xlane.xlu0 %410 }
 0x145   :  { %v461_v49 = vmul.f32 0.03125, %v414_v47  ;;  %v460_v5 = vmul.f32 0.03125, %v411_v33  ;;  %v523_v55 = vmul.f32 %v1440_v38, %v1440_v38  ;;  %v522_v52 = vmul.f32 %v1443_v32, %v1443_v32 }
 0x147   :  { %v1452_v57 = vsub.f32 %v1275_v0, %v461_v49  ;;  %v1455_v44 = vsub.f32 %v1269_v56, %v460_v5  ;;  %v599_v58 = vsel %vm339_vm0, %v523_v55, 0.0  ;;  %v596_v59 = vsel %vm339_vm0, %v522_v52, 0.0 }
 0x148   :  { %v420_v61 = vpop.xlane.xlu1 %419  ;;  %600 = vadd.xlane.f32.xlu1 %v599_v58  ;;  %597 = vadd.xlane.f32.xlu0 %v596_v59  ;;  %v417_v42 = vpop.xlane.xlu0 %416 }
 0x149   :  { %v463_v4 = vmul.f32 0.03125, %v420_v61  ;;  %v462_v17 = vmul.f32 0.03125, %v417_v42  ;;  %v525_v8 = vmul.f32 %v1452_v57, %v1452_v57  ;;  %v524_v0 = vmul.f32 %v1455_v44, %v1455_v44 }
 0x14b   :  { %v1464_v9 = vsub.f32 %v1286_v13, %v463_v4  ;;  %v1467_v56 = vsub.f32 %v1280_v3, %v462_v17  ;;  %v605_v11 = vsel %vm339_vm0, %v525_v8, 0.0  ;;  %v602_v12 = vsel %vm339_vm0, %v524_v0, 0.0 }
 0x14c   :  { %v426_v7 = vpop.xlane.xlu1 %425  ;;  %606 = vadd.xlane.f32.xlu1 %v605_v11  ;;  %603 = vadd.xlane.f32.xlu0 %v602_v12  ;;  %v423_v51 = vpop.xlane.xlu0 %422 }
 0x14d   :  { %v465_v20 = vmul.f32 0.03125, %v426_v7  ;;  %v464_v29 = vmul.f32 0.03125, %v423_v51  ;;  %v527_v23 = vmul.f32 %v1464_v9, %v1464_v9  ;;  %v526_v13 = vmul.f32 %v1467_v56, %v1467_v56 }
 0x14f   :  { %v1476_v25 = vsub.f32 %v1297_v28, %v465_v20  ;;  %v1479_v3 = vsub.f32 %v1291_v18, %v464_v29  ;;  %v611_v26 = vsel %vm339_vm0, %v527_v23, 0.0  ;;  %v608_v24 = vsel %vm339_vm0, %v526_v13, 0.0 }
 0x150   :  { %v432_v34 = vpop.xlane.xlu1 %431  ;;  %612 = vadd.xlane.f32.xlu1 %v611_v26  ;;  %609 = vadd.xlane.f32.xlu0 %v608_v24  ;;  %v429_v60 = vpop.xlane.xlu0 %428 }
 0x151   :  { %v467_v37 = vmul.f32 0.03125, %v432_v34  ;;  %v466_v40 = vmul.f32 0.03125, %v429_v60  ;;  %v529_v39 = vmul.f32 %v1476_v25, %v1476_v25  ;;  %v528_v28 = vmul.f32 %v1479_v3, %v1479_v3 }
 0x153   :  { %v1488_v46 = vsub.f32 %v1305_v41, %v467_v37  ;;  %v1491_v18 = vsub.f32 %v1299_v31, %v466_v40  ;;  %v617_v47 = vsel %vm339_vm0, %v529_v39, 0.0  ;;  %v614_v33 = vsel %vm339_vm0, %v528_v28, 0.0  ;;  %v1510_v39 = vld [vmem:[%s1743_s2] ss:$0 sm:$0xff] }
 0x154   :  { %618 = vadd.xlane.f32.xlu1 %v617_v47  ;;  %615 = vadd.xlane.f32.xlu0 %v614_v33  ;;  %v435_v49 = vpop.xlane.xlu0 %434 }
 0x155   :  { %v468_v5 = vmul.f32 0.03125, %v435_v49  ;;  %v531_v55 = vmul.f32 %v1488_v46, %v1488_v46  ;;  %v530_v52 = vmul.f32 %v1491_v18, %v1491_v18 }
 0x157   :  { %v1500_v41 = vsub.f32 %v1307_v43, %v468_v5  ;;  %v623_v31 = vsel %vm339_vm0, %v531_v55, 0.0  ;;  %v620_v58 = vsel %vm339_vm0, %v530_v52, 0.0  ;;  %v1516_v55 = vld [vmem:[%s1744_s3] ss:$0 sm:$0xff] }
 0x158   :  { %624 = vadd.xlane.f32.xlu1 %v623_v31  ;;  %621 = vadd.xlane.f32.xlu0 %v620_v58 }
 0x159   :  { %v532_v59 = vmul.f32 %v1500_v41, %v1500_v41 }
 0x15b   :  { %v626_v61 = vsel %vm339_vm0, %v532_v59, 0.0 }
 0x15c   :  { %627 = vadd.xlane.f32.xlu0 %v626_v61 }
 0x1a9   :  { %v535_v42 = vpop.xlane.xlu1 %534 }
 0x1aa   :  { %v629_v4 = vmul.f32 0.03125, %v535_v42 }
 0x1ac   :  { %v661_v17 = vadd.f32 1e-05, %v629_v4 }
 0x1ad   :  { %v541_v8 = vpop.xlane.xlu1 %540  ;;  %v538_v0 = vpop.xlane.xlu0 %537 }
 0x1ae   :  { %953 = vrsqrt.f32 %v661_v17  ;;  %v631_v43 = vmul.f32 0.03125, %v541_v8  ;;  %v630_v11 = vmul.f32 0.03125, %v538_v0 }
 0x1b0   :  { %v663_v12 = vadd.f32 1e-05, %v631_v43  ;;  %v662_v7 = vadd.f32 1e-05, %v630_v11 }
 0x1b1   :  { %v547_v51 = vpop.xlane.xlu1 %546  ;;  %v544_v20 = vpop.xlane.xlu0 %543 }
 0x1b2   :  { %955 = vrsqrt.f32 %v663_v12  ;;  %v633_v29 = vmul.f32 0.03125, %v547_v51  ;;  %v632_v23 = vmul.f32 0.03125, %v544_v20 }
 0x1b3   :  { %957 = vrsqrt.f32 %v662_v7 }
 0x1b4   :  { %v665_v13 = vadd.f32 1e-05, %v633_v29  ;;  %v664_v26 = vadd.f32 1e-05, %v632_v23 }
 0x1b5   :  { %v553_v24 = vpop.xlane.xlu1 %552  ;;  %v550_v34 = vpop.xlane.xlu0 %549 }
 0x1b6   :  { %959 = vrsqrt.f32 %v665_v13  ;;  %v635_v60 = vmul.f32 0.03125, %v553_v24  ;;  %v634_v37 = vmul.f32 0.03125, %v550_v34 }
 0x1b7   :  { %961 = vrsqrt.f32 %v664_v26 }
 0x1b8   :  { %v954_v40 = vpop.eup %953  ;;  %v667_v28 = vadd.f32 1e-05, %v635_v60  ;;  %v666_v47 = vadd.f32 1e-05, %v634_v37 }
 0x1b9   :  { %v725_v33 = vmul.f32 %v954_v40, %v1316_v53  ;;  %v559_v49 = vpop.xlane.xlu1 %558  ;;  %v556_v5 = vpop.xlane.xlu0 %555 }
 0x1ba   :  { %963 = vrsqrt.f32 %v667_v28  ;;  %v637_v52 = vmul.f32 0.03125, %v559_v49  ;;  %v636_v31 = vmul.f32 0.03125, %v556_v5 }
 0x1bb   :  { %v763_v58 = vmul.f32 %v1510_v39, %v725_v33  ;;  %965 = vrsqrt.f32 %v666_v47 }
 0x1bc   :  { %v956_v59 = vpop.eup %955  ;;  %v669_v61 = vadd.f32 1e-05, %v637_v52  ;;  %v668_v42 = vadd.f32 1e-05, %v636_v31 }
 0x1bd   :  { %v958_v4 = vpop.eup %957  ;;  %v801_v17 = vadd.f32 %v1516_v55, %v763_v58  ;;  %v727_v53 = vmul.f32 %v956_v59, %v1324_v1  ;;  %v565_v8 = vpop.xlane.xlu1 %564 }
 0x1be   :  { %v562_v0 = vpop.xlane.xlu0 %561  ;;  %v726_v43 = vmul.f32 %v958_v4, %v1321_v62  ;;  %967 = vrsqrt.f32 %v669_v61  ;;  %v639_v11 = vmul.f32 0.03125, %v565_v8 }
 0x1bf   :  { %v638_v12 = vmul.f32 0.03125, %v562_v0  ;;  %833 = vst.msk [vmem:[%s1745_s4] sm:$0xff] %vm339_vm0, %v801_v17  ;;  %v765_v7 = vmul.f32 %v1510_v39, %v727_v53  ;;  %969 = vrsqrt.f32 %v668_v42 }
 0x1c0   :  { %v960_v51 = vpop.eup %959  ;;  %v764_v20 = vmul.f32 %v1510_v39, %v726_v43  ;;  %v671_v29 = vadd.f32 1e-05, %v639_v11 }
 0x1c1   :  { %v670_v1 = vadd.f32 1e-05, %v638_v12  ;;  %v962_v23 = vpop.eup %961  ;;  %v803_v13 = vadd.f32 %v1516_v55, %v765_v7  ;;  %v729_v62 = vmul.f32 %v960_v51, %v1332_v14  ;;  %v571_v26 = vpop.xlane.xlu1 %570 }
 0x1c2   :  { %v568_v24 = vpop.xlane.xlu0 %567  ;;  %v802_v34 = vadd.f32 %v1516_v55, %v764_v20  ;;  %v728_v60 = vmul.f32 %v962_v23, %v1335_v15  ;;  %971 = vrsqrt.f32 %v671_v29  ;;  %v641_v37 = vmul.f32 0.03125, %v571_v26 }
 0x1c3   :  { %835 = vst.msk [vmem:[%s1745_s4 + $0x10] sm:$0xff] %vm339_vm0, %v803_v13  ;;  %v767_v40 = vmul.f32 %v1510_v39, %v729_v62  ;;  %973 = vrsqrt.f32 %v670_v1  ;;  %v640_v28 = vmul.f32 0.03125, %v568_v24 }
 0x1c4   :  { %v964_v47 = vpop.eup %963  ;;  %834 = vst.msk [vmem:[%s1745_s4 + $0x8] sm:$0xff] %vm339_vm0, %v802_v34  ;;  %v766_v14 = vmul.f32 %v1510_v39, %v728_v60  ;;  %v673_v15 = vadd.f32 1e-05, %v641_v37 }
 0x1c5   :  { %v966_v33 = vpop.eup %965  ;;  %v805_v49 = vadd.f32 %v1516_v55, %v767_v40  ;;  %v731_v5 = vmul.f32 %v964_v47, %v1344_v30  ;;  %v672_v52 = vadd.f32 1e-05, %v640_v28  ;;  %v577_v31 = vpop.xlane.xlu1 %576 }
 0x1c6   :  { %v574_v58 = vpop.xlane.xlu0 %573  ;;  %v804_v59 = vadd.f32 %v1516_v55, %v766_v14  ;;  %v730_v61 = vmul.f32 %v966_v33, %v1347_v19  ;;  %975 = vrsqrt.f32 %v673_v15  ;;  %v643_v42 = vmul.f32 0.03125, %v577_v31 }
 0x1c7   :  { %837 = vst.msk [vmem:[%s1745_s4 + $0x20] sm:$0xff] %vm339_vm0, %v805_v49  ;;  %v769_v4 = vmul.f32 %v1510_v39, %v731_v5  ;;  %977 = vrsqrt.f32 %v672_v52  ;;  %v642_v17 = vmul.f32 0.03125, %v574_v58 }
 0x1c8   :  { %v968_v53 = vpop.eup %967  ;;  %836 = vst.msk [vmem:[%s1745_s4 + $0x18] sm:$0xff] %vm339_vm0, %v804_v59  ;;  %v768_v30 = vmul.f32 %v1510_v39, %v730_v61  ;;  %v675_v19 = vadd.f32 1e-05, %v643_v42 }
 0x1c9   :  { %v970_v8 = vpop.eup %969  ;;  %v807_v0 = vadd.f32 %v1516_v55, %v769_v4  ;;  %v733_v43 = vmul.f32 %v968_v53, %v1356_v48  ;;  %v674_v11 = vadd.f32 1e-05, %v642_v17  ;;  %v583_v12 = vpop.xlane.xlu1 %582 }
 0x1ca   :  { %v580_v7 = vpop.xlane.xlu0 %579  ;;  %v806_v51 = vadd.f32 %v1516_v55, %v768_v30  ;;  %v732_v20 = vmul.f32 %v970_v8, %v1359_v27  ;;  %979 = vrsqrt.f32 %v675_v19  ;;  %v645_v29 = vmul.f32 0.03125, %v583_v12 }
 0x1cb   :  { %839 = vst.msk [vmem:[%s1745_s4 + $0x30] sm:$0xff] %vm339_vm0, %v807_v0  ;;  %v771_v1 = vmul.f32 %v1510_v39, %v733_v43  ;;  %981 = vrsqrt.f32 %v674_v11  ;;  %v644_v23 = vmul.f32 0.03125, %v580_v7 }
 0x1cc   :  { %v972_v13 = vpop.eup %971  ;;  %838 = vst.msk [vmem:[%s1745_s4 + $0x28] sm:$0xff] %vm339_vm0, %v806_v51  ;;  %v770_v48 = vmul.f32 %v1510_v39, %v732_v20  ;;  %v677_v27 = vadd.f32 1e-05, %v645_v29 }
 0x1cd   :  { %v974_v62 = vpop.eup %973  ;;  %v809_v26 = vadd.f32 %v1516_v55, %v771_v1  ;;  %v735_v24 = vmul.f32 %v972_v13, %v1368_v2  ;;  %v676_v34 = vadd.f32 1e-05, %v644_v23  ;;  %v589_v60 = vpop.xlane.xlu1 %588 }
 0x1ce   :  { %v586_v37 = vpop.xlane.xlu0 %585  ;;  %v808_v40 = vadd.f32 %v1516_v55, %v770_v48  ;;  %v734_v28 = vmul.f32 %v974_v62, %v1371_v36  ;;  %983 = vrsqrt.f32 %v677_v27  ;;  %v647_v47 = vmul.f32 0.03125, %v589_v60 }
 0x1cf   :  { %841 = vst.msk [vmem:[%s1745_s4 + $0x40] sm:$0xff] %vm339_vm0, %v809_v26  ;;  %v773_v14 = vmul.f32 %v1510_v39, %v735_v24  ;;  %985 = vrsqrt.f32 %v676_v34  ;;  %v646_v15 = vmul.f32 0.03125, %v586_v37 }
 0x1d0   :  { %v976_v33 = vpop.eup %975  ;;  %840 = vst.msk [vmem:[%s1745_s4 + $0x38] sm:$0xff] %vm339_vm0, %v808_v40  ;;  %v772_v2 = vmul.f32 %v1510_v39, %v734_v28  ;;  %v679_v36 = vadd.f32 1e-05, %v647_v47 }
 0x1d1   :  { %v978_v49 = vpop.eup %977  ;;  %v811_v5 = vadd.f32 %v1516_v55, %v773_v14  ;;  %v737_v52 = vmul.f32 %v976_v33, %v1380_v16  ;;  %v678_v31 = vadd.f32 1e-05, %v646_v15  ;;  %v595_v58 = vpop.xlane.xlu1 %594 }
 0x1d2   :  { %v592_v59 = vpop.xlane.xlu0 %591  ;;  %v810_v61 = vadd.f32 %v1516_v55, %v772_v2  ;;  %v736_v42 = vmul.f32 %v978_v49, %v1383_v45  ;;  %987 = vrsqrt.f32 %v679_v36  ;;  %v649_v4 = vmul.f32 0.03125, %v595_v58 }
 0x1d3   :  { %843 = vst.msk [vmem:[%s1745_s4 + $0x50] sm:$0xff] %vm339_vm0, %v811_v5  ;;  %v775_v17 = vmul.f32 %v1510_v39, %v737_v52  ;;  %989 = vrsqrt.f32 %v678_v31  ;;  %v648_v53 = vmul.f32 0.03125, %v592_v59 }
 0x1d4   :  { %v980_v30 = vpop.eup %979  ;;  %842 = vst.msk [vmem:[%s1745_s4 + $0x48] sm:$0xff] %vm339_vm0, %v810_v61  ;;  %v774_v16 = vmul.f32 %v1510_v39, %v736_v42  ;;  %v681_v45 = vadd.f32 1e-05, %v649_v4 }
 0x1d5   :  { %v982_v19 = vpop.eup %981  ;;  %v813_v8 = vadd.f32 %v1516_v55, %v775_v17  ;;  %v739_v0 = vmul.f32 %v980_v30, %v1392_v35  ;;  %v680_v43 = vadd.f32 1e-05, %v648_v53  ;;  %v601_v11 = vpop.xlane.xlu1 %600 }
 0x1d6   :  { %v598_v12 = vpop.xlane.xlu0 %597  ;;  %v812_v7 = vadd.f32 %v1516_v55, %v774_v16  ;;  %v738_v51 = vmul.f32 %v982_v19, %v1395_v54  ;;  %991 = vrsqrt.f32 %v681_v45  ;;  %v651_v20 = vmul.f32 0.03125, %v601_v11 }
 0x1d7   :  { %845 = vst.msk [vmem:[%s1745_s4 + $0x60] sm:$0xff] %vm339_vm0, %v813_v8  ;;  %v777_v29 = vmul.f32 %v1510_v39, %v739_v0  ;;  %993 = vrsqrt.f32 %v680_v43  ;;  %v650_v1 = vmul.f32 0.03125, %v598_v12 }
 0x1d8   :  { %v984_v23 = vpop.eup %983  ;;  %844 = vst.msk [vmem:[%s1745_s4 + $0x58] sm:$0xff] %vm339_vm0, %v812_v7  ;;  %v776_v35 = vmul.f32 %v1510_v39, %v738_v51  ;;  %v683_v54 = vadd.f32 1e-05, %v651_v20 }
 0x1d9   :  { %v986_v13 = vpop.eup %985  ;;  %v815_v48 = vadd.f32 %v1516_v55, %v777_v29  ;;  %v741_v27 = vmul.f32 %v984_v23, %v1404_v50  ;;  %v682_v62 = vadd.f32 1e-05, %v650_v1  ;;  %v607_v26 = vpop.xlane.xlu1 %606 }
 0x1da   :  { %v604_v24 = vpop.xlane.xlu0 %603  ;;  %v814_v34 = vadd.f32 %v1516_v55, %v776_v35  ;;  %v740_v60 = vmul.f32 %v986_v13, %v1407_v63  ;;  %995 = vrsqrt.f32 %v683_v54  ;;  %v653_v37 = vmul.f32 0.03125, %v607_v26 }
 0x1db   :  { %847 = vst.msk [vmem:[%s1745_s4 + $0x70] sm:$0xff] %vm339_vm0, %v815_v48  ;;  %v779_v40 = vmul.f32 %v1510_v39, %v741_v27  ;;  %997 = vrsqrt.f32 %v682_v62  ;;  %v652_v28 = vmul.f32 0.03125, %v604_v24 }
 0x1dc   :  { %v988_v47 = vpop.eup %987  ;;  %846 = vst.msk [vmem:[%s1745_s4 + $0x68] sm:$0xff] %vm339_vm0, %v814_v34  ;;  %v778_v50 = vmul.f32 %v1510_v39, %v740_v60  ;;  %v685_v63 = vadd.f32 1e-05, %v653_v37 }
 0x1dd   :  { %v990_v14 = vpop.eup %989  ;;  %v817_v15 = vadd.f32 %v1516_v55, %v779_v40  ;;  %v743_v33 = vmul.f32 %v988_v47, %v1416_v6  ;;  %v684_v2 = vadd.f32 1e-05, %v652_v28  ;;  %v613_v36 = vpop.xlane.xlu1 %612 }
 0x1de   :  { %v610_v49 = vpop.xlane.xlu0 %609  ;;  %v816_v5 = vadd.f32 %v1516_v55, %v778_v50  ;;  %v742_v52 = vmul.f32 %v990_v14, %v1419_v10  ;;  %999 = vrsqrt.f32 %v685_v63  ;;  %v655_v31 = vmul.f32 0.03125, %v613_v36 }
 0x1df   :  { %849 = vst.msk [vmem:[%s1745_s4 + $0x80] sm:$0xff] %vm339_vm0, %v817_v15  ;;  %v781_v58 = vmul.f32 %v1510_v39, %v743_v33  ;;  %1001 = vrsqrt.f32 %v684_v2  ;;  %v654_v59 = vmul.f32 0.03125, %v610_v49 }
 0x1e0   :  { %v992_v61 = vpop.eup %991  ;;  %848 = vst.msk [vmem:[%s1745_s4 + $0x78] sm:$0xff] %vm339_vm0, %v816_v5  ;;  %v780_v6 = vmul.f32 %v1510_v39, %v742_v52  ;;  %v687_v10 = vadd.f32 1e-05, %v655_v31 }
 0x1e1   :  { %v994_v42 = vpop.eup %993  ;;  %v819_v4 = vadd.f32 %v1516_v55, %v781_v58  ;;  %v745_v17 = vmul.f32 %v992_v61, %v1428_v22  ;;  %v686_v53 = vadd.f32 1e-05, %v654_v59  ;;  %v619_v30 = vpop.xlane.xlu1 %618 }
 0x1e2   :  { %v616_v16 = vpop.xlane.xlu0 %615  ;;  %v818_v45 = vadd.f32 %v1516_v55, %v780_v6  ;;  %v744_v19 = vmul.f32 %v994_v42, %v1431_v21  ;;  %1003 = vrsqrt.f32 %v687_v10  ;;  %v657_v8 = vmul.f32 0.03125, %v619_v30 }
 0x1e3   :  { %851 = vst.msk [vmem:[%s1745_s4 + $0x90] sm:$0xff] %vm339_vm0, %v819_v4  ;;  %v783_v0 = vmul.f32 %v1510_v39, %v745_v17  ;;  %1005 = vrsqrt.f32 %v686_v53  ;;  %v656_v43 = vmul.f32 0.03125, %v616_v16 }
 0x1e4   :  { %v996_v11 = vpop.eup %995  ;;  %850 = vst.msk [vmem:[%s1745_s4 + $0x88] sm:$0xff] %vm339_vm0, %v818_v45  ;;  %v782_v22 = vmul.f32 %v1510_v39, %v744_v19  ;;  %v689_v21 = vadd.f32 1e-05, %v657_v8 }
 0x1e5   :  { %v998_v12 = vpop.eup %997  ;;  %v821_v7 = vadd.f32 %v1516_v55, %v783_v0  ;;  %v747_v51 = vmul.f32 %v996_v11, %v1440_v38  ;;  %v688_v20 = vadd.f32 1e-05, %v656_v43  ;;  %v625_v29 = vpop.xlane.xlu1 %624 }
 0x1e6   :  { %v622_v1 = vpop.xlane.xlu0 %621  ;;  %v820_v23 = vadd.f32 %v1516_v55, %v782_v22  ;;  %v746_v35 = vmul.f32 %v998_v12, %v1443_v32  ;;  %1007 = vrsqrt.f32 %v689_v21  ;;  %v659_v54 = vmul.f32 0.03125, %v625_v29 }
 0x1e7   :  { %853 = vst.msk [vmem:[%s1745_s4 + $0xa0] sm:$0xff] %vm339_vm0, %v821_v7  ;;  %v785_v13 = vmul.f32 %v1510_v39, %v747_v51  ;;  %1009 = vrsqrt.f32 %v688_v20  ;;  %v658_v48 = vmul.f32 0.03125, %v622_v1 }
 0x1e8   :  { %v1000_v27 = vpop.eup %999  ;;  %852 = vst.msk [vmem:[%s1745_s4 + $0x98] sm:$0xff] %vm339_vm0, %v820_v23  ;;  %v784_v38 = vmul.f32 %v1510_v39, %v746_v35  ;;  %v691_v32 = vadd.f32 1e-05, %v659_v54 }
 0x1e9   :  { %v1002_v62 = vpop.eup %1001  ;;  %v823_v26 = vadd.f32 %v1516_v55, %v785_v13  ;;  %v749_v24 = vmul.f32 %v1000_v27, %v1452_v57  ;;  %v690_v34 = vadd.f32 1e-05, %v658_v48 }
 0x1ea   :  { %v628_v60 = vpop.xlane.xlu0 %627  ;;  %v822_v37 = vadd.f32 %v1516_v55, %v784_v38  ;;  %v748_v40 = vmul.f32 %v1002_v62, %v1455_v44  ;;  %1011 = vrsqrt.f32 %v691_v32 }
 0x1eb   :  { %v660_v28 = vmul.f32 0.03125, %v628_v60  ;;  %855 = vst.msk [vmem:[%s1745_s4 + $0xb0] sm:$0xff] %vm339_vm0, %v823_v26  ;;  %v787_v47 = vmul.f32 %v1510_v39, %v749_v24  ;;  %1013 = vrsqrt.f32 %v690_v34 }
 0x1ec   :  { %v1004_v50 = vpop.eup %1003  ;;  %854 = vst.msk [vmem:[%s1745_s4 + $0xa8] sm:$0xff] %vm339_vm0, %v822_v37  ;;  %v786_v57 = vmul.f32 %v1510_v39, %v748_v40 }
 0x1ed   :  { %v692_v63 = vadd.f32 1e-05, %v660_v28  ;;  %v1006_v44 = vpop.eup %1005  ;;  %v825_v14 = vadd.f32 %v1516_v55, %v787_v47  ;;  %v751_v15 = vmul.f32 %v1004_v50, %v1464_v9 }
 0x1ee   :  { %v824_v33 = vadd.f32 %v1516_v55, %v786_v57  ;;  %v750_v2 = vmul.f32 %v1006_v44, %v1467_v56 }
 0x1ef   :  { %1015 = vrsqrt.f32 %v692_v63  ;;  %857 = vst.msk [vmem:[%s1745_s4 + $0xc0] sm:$0xff] %vm339_vm0, %v825_v14  ;;  %v789_v36 = vmul.f32 %v1510_v39, %v751_v15 }
 0x1f0   :  { %v1008_v49 = vpop.eup %1007  ;;  %856 = vst.msk [vmem:[%s1745_s4 + $0xb8] sm:$0xff] %vm339_vm0, %v824_v33  ;;  %v788_v9 = vmul.f32 %v1510_v39, %v750_v2 }
 0x1f1   :  { %v1010_v5 = vpop.eup %1009  ;;  %v827_v52 = vadd.f32 %v1516_v55, %v789_v36  ;;  %v753_v56 = vmul.f32 %v1008_v49, %v1476_v25 }
 0x1f2   :  { %v826_v31 = vadd.f32 %v1516_v55, %v788_v9  ;;  %v752_v58 = vmul.f32 %v1010_v5, %v1479_v3 }
 0x1f3   :  { %859 = vst.msk [vmem:[%s1745_s4 + $0xd0] sm:$0xff] %vm339_vm0, %v827_v52  ;;  %v791_v59 = vmul.f32 %v1510_v39, %v753_v56 }
 0x1f4   :  { %v1012_v61 = vpop.eup %1011  ;;  %858 = vst.msk [vmem:[%s1745_s4 + $0xc8] sm:$0xff] %vm339_vm0, %v826_v31  ;;  %v790_v6 = vmul.f32 %v1510_v39, %v752_v58 }
 0x1f5   :  { %v1014_v25 = vpop.eup %1013  ;;  %v829_v10 = vadd.f32 %v1516_v55, %v791_v59  ;;  %v755_v3 = vmul.f32 %v1012_v61, %v1488_v46 }
 0x1f6   :  { %v828_v42 = vadd.f32 %v1516_v55, %v790_v6  ;;  %v754_v4 = vmul.f32 %v1014_v25, %v1491_v18 }
 0x1f7   :  { %861 = vst.msk [vmem:[%s1745_s4 + $0xe0] sm:$0xff] %vm339_vm0, %v829_v10  ;;  %v793_v17 = vmul.f32 %v1510_v39, %v755_v3 }
 0x1f8   :  { %860 = vst.msk [vmem:[%s1745_s4 + $0xd8] sm:$0xff] %vm339_vm0, %v828_v42  ;;  %v792_v30 = vmul.f32 %v1510_v39, %v754_v4 }
 0x1f9   :  { %v1016_v53 = vpop.eup %1015  ;;  %v831_v46 = vadd.f32 %v1516_v55, %v793_v17 }
 0x1fa   :  { %v756_v16 = vmul.f32 %v1016_v53, %v1500_v41  ;;  %v830_v18 = vadd.f32 %v1516_v55, %v792_v30 }
 0x1fb   :  { %863 = vst.msk [vmem:[%s1745_s4 + $0xf0] sm:$0xff] %vm339_vm0, %v831_v46 }
 0x1fc   :  { %v794_v45 = vmul.f32 %v1510_v39, %v756_v16  ;;  %862 = vst.msk [vmem:[%s1745_s4 + $0xe8] sm:$0xff] %vm339_vm0, %v830_v18 }
 0x1fe   :  { %v832_v19 = vadd.f32 %v1516_v55, %v794_v45 }
 0x200   :  { %864 = vst.msk [vmem:[%s1745_s4 + $0xf8] sm:$0xff] %vm339_vm0, %v832_v19 }

// kernel: reverse.4
= control target key start
LH: loop header
LB: loop body
LE: loop exit
PB: predicated region body
PF: predicated region fallthrough
CT: control target
= control target key end

     0   :  { %s176_s0 = inlined_call_operand.vmem [shape: f32[2,32,8,7], index: 0, kind: input, shape index: {}]   ;;  %s177_s1 = inlined_call_operand.vmem [shape: f32[2,32,8,7], index: 1, kind: output, shape index: {}]  }
   0x1   :  { %v56_v0 = vld [vmem:[%s176_s0 + $0x30] sm:$0xff]  ;;  %v57_v1 = vld [vmem:[%s176_s0 + $0x68] sm:$0xff]  ;;  %v61_v3 = vld [vmem:[%s176_s0 + $0x60] sm:$0xff] }
   0x2   :  { %v59_v2 = vld [vmem:[%s176_s0 + $0x28] sm:$0xff]  ;;  %4 = vst [vmem:[%s177_s1] sm:$0xff] %v56_v0  ;;  %58 = vst [vmem:[%s177_s1 + $0x38] sm:$0xff] %v57_v1  ;;  %v63_v4 = vld [vmem:[%s176_s0 + $0x20] sm:$0xff] }
   0x3   :  { %60 = vst [vmem:[%s177_s1 + $0x8] sm:$0xff] %v59_v2  ;;  %v65_v5 = vld [vmem:[%s176_s0 + $0x58] sm:$0xff]  ;;  %62 = vst [vmem:[%s177_s1 + $0x40] sm:$0xff] %v61_v3  ;;  %v69_v7 = vld [vmem:[%s176_s0 + $0x50] sm:$0xff] }
   0x4   :  { %64 = vst [vmem:[%s177_s1 + $0x10] sm:$0xff] %v63_v4  ;;  %66 = vst [vmem:[%s177_s1 + $0x48] sm:$0xff] %v65_v5  ;;  %v67_v6 = vld [vmem:[%s176_s0 + $0x18] sm:$0xff]  ;;  %v71_v8 = vld [vmem:[%s176_s0 + $0x10] sm:$0xff] }
   0x5   :  { %68 = vst [vmem:[%s177_s1 + $0x18] sm:$0xff] %v67_v6  ;;  %70 = vst [vmem:[%s177_s1 + $0x50] sm:$0xff] %v69_v7  ;;  %v73_v9 = vld [vmem:[%s176_s0 + $0x48] sm:$0xff]  ;;  %v77_v11 = vld [vmem:[%s176_s0 + $0x40] sm:$0xff] }
   0x6   :  { %72 = vst [vmem:[%s177_s1 + $0x20] sm:$0xff] %v71_v8  ;;  %v75_v10 = vld [vmem:[%s176_s0 + $0x8] sm:$0xff]  ;;  %74 = vst [vmem:[%s177_s1 + $0x58] sm:$0xff] %v73_v9  ;;  %v49_v12 = vld [vmem:[%s176_s0] sm:$0xff] }
   0x7   :  { %76 = vst [vmem:[%s177_s1 + $0x28] sm:$0xff] %v75_v10  ;;  %78 = vst [vmem:[%s177_s1 + $0x60] sm:$0xff] %v77_v11  ;;  %v80_v13 = vld [vmem:[%s176_s0 + $0x38] sm:$0xff] }
   0x8   :  { %79 = vst [vmem:[%s177_s1 + $0x30] sm:$0xff] %v49_v12  ;;  %81 = vst [vmem:[%s177_s1 + $0x68] sm:$0xff] %v80_v13 }

// kernel: evoformer_lite_msa_seq.14
= control target key start
LH: loop header
LB: loop body
LE: loop exit
PB: predicated region body
PF: predicated region fallthrough
CT: control target
= control target key end

     0   :  { %v1549_v3 = vmov 0.0   ;;  %vm1550_vm0 = vmmov 0   ;;  %s1551_s17 = smov 32   ;;  %vm134_vm1 = vcmask 261120   ;;  %vm201_vm2 = vcmask 523264   ;;  %s1552_s21 = smov 96   ;;  %s2460_s1 = inlined_call_operand.vmem [shape: f32[144,32], index: 1, kind: input, shape index: {}]   ;;  %s2461_s2 = inlined_call_operand.vmem [shape: bf16[64,64], index: 2, kind: input, shape index: {}]   ;;  %s2462_s0 = inlined_call_operand.vmem [shape: f32[144,32], index: 0, kind: input, shape index: {}]   ;;  %s2463_s4 = inlined_call_operand.vmem [shape: bf16[64,64], index: 4, kind: input, shape index: {}]   ;;  %s2464_s3 = inlined_call_operand.vmem [shape: f32[1,64], index: 3, kind: input, shape index: {}]   ;;  %s2465_s5 = inlined_call_operand.vmem [shape: f32[1,64], index: 5, kind: input, shape index: {}]   ;;  %s2466_s6 = inlined_call_operand.vmem [shape: f32[144,32], index: 6, kind: output, shape index: {0}]   ;;  %s2467_s7 = inlined_call_operand.vmem [shape: f32[144,32], index: 7, kind: output, shape index: {1}]  }
   0x1   :  { %v44_v0 = vld [vmem:[%s2460_s1] sm:$0xff]  ;;  %v45_v1 = vld [vmem:[%s2460_s1 + $0x8] sm:$0xff]  ;;  %v46_v2 = vld [vmem:[%s2460_s1 + $0x10] sm:$0xff]  ;;  %1296 = vmatprep.subr.bf16.mxu0 %v1549_v3  ;;  %1304 = vmatprep.mubr.msk.bf16.mxu0 %vm1550_vm0, %v1549_v3 }
   0x2   :  { %v1388_v4 = vpack.i.bf16 %v45_v1, %v44_v0  ;;  %v47_v5 = vld [vmem:[%s2460_s1 + $0x18] sm:$0xff]  ;;  %v48_v6 = vld [vmem:[%s2460_s1 + $0x20] sm:$0xff]  ;;  %v49_v7 = vld [vmem:[%s2460_s1 + $0x28] sm:$0xff]  ;;  %1340 = vmatprep.subr.bf16.mxu1 %v1549_v3  ;;  %1348 = vmatprep.mubr.msk.bf16.mxu1 %vm1550_vm0, %v1549_v3 }
   0x3   :  { %v1398_v8 = vpack.i.bf16 %v49_v7, %v48_v6  ;;  %v50_v9 = vld [vmem:[%s2460_s1 + $0x30] sm:$0xff]  ;;  %v51_v10 = vld [vmem:[%s2460_s1 + $0x38] sm:$0xff]  ;;  %v1393_v11 = vpack.i.bf16 %v47_v5, %v46_v2  ;;  %v52_v13 = vld [vmem:[%s2460_s1 + $0x40] sm:$0xff] }
   0x4   :  { %1389 = vrot.lane.b32.xlu0 %v1388_v4, %s1551_s17  ;;  %v1403_v12 = vpack.i.bf16 %v51_v10, %v50_v9  ;;  %v53_v14 = vld [vmem:[%s2460_s1 + $0x48] sm:$0xff]  ;;  %v54_v15 = vld [vmem:[%s2460_s1 + $0x50] sm:$0xff]  ;;  %v55_v16 = vld [vmem:[%s2460_s1 + $0x58] sm:$0xff] }
   0x5   :  { %1399 = vrot.lane.b32.xlu1 %v1398_v8, %s1551_s17  ;;  %v56_v17 = vld [vmem:[%s2460_s1 + $0x60] sm:$0xff]  ;;  %v1408_v19 = vpack.i.bf16 %v53_v14, %v52_v13  ;;  %v57_v20 = vld [vmem:[%s2460_s1 + $0x68] sm:$0xff]  ;;  %v1413_v21 = vpack.i.bf16 %v55_v16, %v54_v15  ;;  %v58_v23 = vld [vmem:[%s2460_s1 + $0x70] sm:$0xff] }
   0x6   :  { %v1433_v18 = vld [vmem:[%s2461_s2] sm:$0xff]   ;;  %v1434_v22 = vld [vmem:[%s2461_s2 + $0x8] sm:$0xff]   ;;  %v59_v24 = vld [vmem:[%s2460_s1 + $0x78] sm:$0xff]  ;;  %v1418_v25 = vpack.i.bf16 %v57_v20, %v56_v17 }
   0x7   :  { %1297 = vmatpush3.bf16.msra.mxu0 %v1433_v18  ;;  %v1423_v26 = vpack.i.bf16 %v59_v24, %v58_v23  ;;  %v60_v27 = vld [vmem:[%s2460_s1 + $0x80] sm:$0xff]  ;;  %v61_v28 = vld [vmem:[%s2460_s1 + $0x88] sm:$0xff]  ;;  %v1435_v29 = vld [vmem:[%s2461_s2 + $0x10] sm:$0xff]  }
   0x8   :  { %1394 = vrot.lane.b32.xlu0 %v1393_v11, %s1551_s17  ;;  %1298 = vmatprep.subr.bf16.mxu0 %v1549_v3  ;;  %v1428_v30 = vpack.i.bf16 %v61_v28, %v60_v27  ;;  %v1436_v31 = vld [vmem:[%s2461_s2 + $0x18] sm:$0xff]   ;;  %v26_v33 = vld [vmem:[%s2462_s0] sm:$0xff]  ;;  %v27_v34 = vld [vmem:[%s2462_s0 + $0x8] sm:$0xff] }
   0x9   :  { %1404 = vrot.lane.b32.xlu1 %v1403_v12, %s1551_s17  ;;  %v28_v41 = vld [vmem:[%s2462_s0 + $0x10] sm:$0xff]  ;;  %v29_v42 = vld [vmem:[%s2462_s0 + $0x18] sm:$0xff]  ;;  %v30_v51 = vld [vmem:[%s2462_s0 + $0x20] sm:$0xff] }
   0xa   :  { %v31_v52 = vld [vmem:[%s2462_s0 + $0x28] sm:$0xff]  ;;  %v32_v59 = vld [vmem:[%s2462_s0 + $0x30] sm:$0xff]  ;;  %v33_v60 = vld [vmem:[%s2462_s0 + $0x38] sm:$0xff] }
   0xb   :  { %1299 = vmatpush3.bf16.msra.mxu0 %v1434_v22  ;;  %v34_v4 = vld [vmem:[%s2462_s0 + $0x40] sm:$0xff]  ;;  %v35_v5 = vld [vmem:[%s2462_s0 + $0x48] sm:$0xff]  ;;  %v36_v12 = vld [vmem:[%s2462_s0 + $0x50] sm:$0xff] }
   0xc   :  { %1409 = vrot.lane.b32.xlu0 %v1408_v19, %s1551_s17  ;;  %1300 = vmatprep.subr.bf16.mxu0 %v1549_v3  ;;  %v37_v13 = vld [vmem:[%s2462_s0 + $0x58] sm:$0xff]  ;;  %v38_v20 = vld [vmem:[%s2462_s0 + $0x60] sm:$0xff]  ;;  %v40_v28 = vld [vmem:[%s2462_s0 + $0x70] sm:$0xff] }
   0xd   :  { %1414 = vrot.lane.b32.xlu1 %v1413_v21, %s1551_s17  ;;  %v39_v21 = vld [vmem:[%s2462_s0 + $0x68] sm:$0xff] }
   0xf   :  { %1301 = vmatpush3.bf16.msra.mxu0 %v1435_v29  ;;  %v41_v29 = vld [vmem:[%s2462_s0 + $0x78] sm:$0xff] }
  0x10   :  { %1419 = vrot.lane.b32.xlu0 %v1418_v25, %s1551_s17  ;;  %1302 = vmatprep.subr.bf16.mxu0 %v1549_v3 }
  0x11   :  { %1424 = vrot.lane.b32.xlu1 %v1423_v26, %s1551_s17 }
  0x13   :  { %1303 = vmatpush3.bf16.msra.mxu0 %v1436_v31 }
  0x14   :  { %1429 = vrot.lane.b32.xlu0 %v1428_v30, %s1551_s17 }
  0x76   :  { %v1390_v32 = vpop.permute.xlu0 %1389 }
  0x77   :  { %v1392_v35 = vunpack.i.h.bf16 %v1390_v32  ;;  %v1391_v36 = vunpack.i.l.bf16 %v1390_v32  ;;  %v1400_v47 = vpop.permute.xlu1 %1399 }
  0x78   :  { %v1402_v49 = vunpack.i.h.bf16 %v1400_v47  ;;  %v1401_v50 = vunpack.i.l.bf16 %v1400_v47 }
  0x79   :  { %v135_v37 = vsel %vm134_vm1, %v26_v33, %v1391_v36  ;;  %v136_v38 = vsel %vm134_vm1, %v27_v34, %v1392_v35  ;;  %v42_v36 = vld [vmem:[%s2462_s0 + $0x80] sm:$0xff] }
  0x7a   :  { %v153_v39 = vpack.c.bf16 %v136_v38, %v135_v37  ;;  %v1395_v40 = vpop.permute.xlu0 %1394  ;;  %v139_v53 = vsel %vm134_vm1, %v30_v51, %v1401_v50  ;;  %v140_v54 = vsel %vm134_vm1, %v31_v52, %v1402_v49  ;;  %v43_v37 = vld [vmem:[%s2462_s0 + $0x88] sm:$0xff] }
  0x7b   :  { %v1397_v43 = vunpack.i.h.bf16 %v1395_v40  ;;  %v1396_v44 = vunpack.i.l.bf16 %v1395_v40  ;;  %v1405_v55 = vpop.permute.xlu1 %1404  ;;  %v155_v56 = vpack.c.bf16 %v140_v54, %v139_v53 }
  0x7c   :  { %1305 = vmatmul.mubr.msk.bf16.vlgmr.msra.gmra.mrb[0].mxu0 %vm201_vm2, %v153_v39  ;;  %v1407_v57 = vunpack.i.h.bf16 %v1405_v55  ;;  %v1406_v58 = vunpack.i.l.bf16 %v1405_v55 }
  0x7d   :  { %v137_v45 = vsel %vm134_vm1, %v28_v41, %v1396_v44  ;;  %v138_v46 = vsel %vm134_vm1, %v29_v42, %v1397_v43  ;;  %1308 = vmatprep.mubr.msk.bf16.mxu0 %vm1550_vm0, %v1549_v3  ;;  %v1437_v41 = vld [vmem:[%s2463_s4] sm:$0xff]   ;;  %v1438_v42 = vld [vmem:[%s2463_s4 + $0x8] sm:$0xff]   ;;  %v1439_v43 = vld [vmem:[%s2463_s4 + $0x10] sm:$0xff]  }
  0x7e   :  { %v154_v48 = vpack.c.bf16 %v138_v46, %v137_v45  ;;  %v141_v61 = vsel %vm134_vm1, %v32_v59, %v1406_v58  ;;  %v142_v62 = vsel %vm134_vm1, %v33_v60, %v1407_v57  ;;  %v1410_v63 = vpop.permute.xlu0 %1409  ;;  %1341 = vmatpush3.bf16.msra.mxu1 %v1437_v41  ;;  %v1440_v44 = vld [vmem:[%s2463_s4 + $0x18] sm:$0xff]   ;;  %v1792_v45 = vld [vmem:[%s2464_s3] ss:$0 sm:$0xff] }
  0x7f   :  { %v156_v0 = vpack.c.bf16 %v142_v62, %v141_v61  ;;  %v1412_v1 = vunpack.i.h.bf16 %v1410_v63  ;;  %v1411_v2 = vunpack.i.l.bf16 %v1410_v63  ;;  %v1415_v8 = vpop.permute.xlu1 %1414  ;;  %1342 = vmatprep.subr.bf16.mxu1 %v1549_v3 }
  0x80   :  { %v1417_v10 = vunpack.i.h.bf16 %v1415_v8  ;;  %v1416_v11 = vunpack.i.l.bf16 %v1415_v8 }
  0x81   :  { %v143_v6 = vsel %vm134_vm1, %v34_v4, %v1411_v2  ;;  %v144_v7 = vsel %vm134_vm1, %v35_v5, %v1412_v1 }
  0x82   :  { %v157_v9 = vpack.c.bf16 %v144_v7, %v143_v6  ;;  %v145_v14 = vsel %vm134_vm1, %v36_v12, %v1416_v11  ;;  %v146_v15 = vsel %vm134_vm1, %v37_v13, %v1417_v10  ;;  %v1420_v16 = vpop.permute.xlu0 %1419  ;;  %1343 = vmatpush3.bf16.msra.mxu1 %v1438_v42 }
  0x83   :  { %v158_v17 = vpack.c.bf16 %v146_v15, %v145_v14  ;;  %v1422_v18 = vunpack.i.h.bf16 %v1420_v16  ;;  %v1421_v19 = vunpack.i.l.bf16 %v1420_v16  ;;  %v1425_v24 = vpop.permute.xlu1 %1424  ;;  %1344 = vmatprep.subr.bf16.mxu1 %v1549_v3 }
  0x84   :  { %1309 = vmatmul.mubr.msk.bf16.gmra.mrb[4].mxu0 %vm201_vm2, %v154_v48  ;;  %v1427_v26 = vunpack.i.h.bf16 %v1425_v24  ;;  %v1426_v27 = vunpack.i.l.bf16 %v1425_v24 }
  0x85   :  { %1312 = vmatprep.mubr.msk.bf16.mxu0 %vm1550_vm0, %v1549_v3  ;;  %v147_v22 = vsel %vm134_vm1, %v38_v20, %v1421_v19  ;;  %v148_v23 = vsel %vm134_vm1, %v39_v21, %v1422_v18 }
  0x86   :  { %v159_v25 = vpack.c.bf16 %v148_v23, %v147_v22  ;;  %v149_v30 = vsel %vm134_vm1, %v40_v28, %v1426_v27  ;;  %v150_v31 = vsel %vm134_vm1, %v41_v29, %v1427_v26  ;;  %v1430_v32 = vpop.permute.xlu0 %1429  ;;  %1345 = vmatpush3.bf16.msra.mxu1 %v1439_v43 }
  0x87   :  { %v160_v33 = vpack.c.bf16 %v150_v31, %v149_v30  ;;  %v1432_v34 = vunpack.i.h.bf16 %v1430_v32  ;;  %v1431_v35 = vunpack.i.l.bf16 %v1430_v32  ;;  %1346 = vmatprep.subr.bf16.mxu1 %v1549_v3 }
  0x89   :  { %v151_v38 = vsel %vm134_vm1, %v42_v36, %v1431_v35  ;;  %v152_v39 = vsel %vm134_vm1, %v43_v37, %v1432_v34 }
  0x8a   :  { %v161_v40 = vpack.c.bf16 %v152_v39, %v151_v38  ;;  %1347 = vmatpush3.bf16.msra.mxu1 %v1440_v44 }
  0x8c   :  { %1313 = vmatmul.mubr.msk.bf16.gmra.mrb[8].mxu0 %vm201_vm2, %v155_v56 }
  0x8d   :  { %1316 = vmatprep.mubr.msk.bf16.mxu0 %vm1550_vm0, %v1549_v3 }
  0x94   :  { %1317 = vmatmul.mubr.msk.bf16.gmra.mrb[12].mxu0 %vm201_vm2, %v156_v0 }
  0x95   :  { %1320 = vmatprep.mubr.msk.bf16.mxu0 %vm1550_vm0, %v1549_v3 }
  0x9c   :  { %1321 = vmatmul.mubr.msk.bf16.gmra.mrb[16].mxu0 %vm201_vm2, %v157_v9 }
  0x9d   :  { %1324 = vmatprep.mubr.msk.bf16.mxu0 %vm1550_vm0, %v1549_v3 }
  0xa4   :  { %1325 = vmatmul.mubr.msk.bf16.gmra.mrb[20].mxu0 %vm201_vm2, %v158_v17 }
  0xa5   :  { %1328 = vmatprep.mubr.msk.bf16.mxu0 %vm1550_vm0, %v1549_v3 }
  0xac   :  { %1329 = vmatmul.mubr.msk.bf16.gmra.mrb[24].mxu0 %vm201_vm2, %v159_v25 }
  0xad   :  { %1332 = vmatprep.mubr.msk.bf16.mxu0 %vm1550_vm0, %v1549_v3 }
  0xb4   :  { %1333 = vmatmul.mubr.msk.bf16.gmra.mrb[28].mxu0 %vm201_vm2, %v160_v33 }
  0xb5   :  { %1336 = vmatprep.mubr.msk.bf16.mxu0 %vm1550_vm0, %v1549_v3 }
  0xbc   :  { %1337 = vmatmul.mubr.msk.bf16.gmra.mrb[32].mxu0 %vm201_vm2, %v161_v40 }
 0x14f   :  { %v263_v46 = vpop.f32.mrb[0].mxu0 }
 0x150   :  { %v264_v47 = vadd.f32 %v1792_v45, %v263_v46  ;;  %v1306_v48 = vpop.f32.mrb[1].mxu0 }
 0x151   :  { %v266_v49 = vpop.f32.mrb[2].mxu0 }
 0x152   :  { %v352_v50 = vmul.f32 0.044715, %v264_v47  ;;  %v267_v51 = vadd.f32 %v1792_v45, %v266_v49  ;;  %v1307_v52 = vpop.f32.mrb[3].mxu0  ;;  %v334_v35 = vmul.f32 0.5, %v264_v47 }
 0x154   :  { %v370_v53 = vmul.f32 %v352_v50, %v264_v47  ;;  %v353_v54 = vmul.f32 0.044715, %v267_v51  ;;  %v335_v36 = vmul.f32 0.5, %v267_v51 }
 0x156   :  { %v388_v55 = vmul.f32 %v370_v53, %v264_v47  ;;  %v371_v56 = vmul.f32 %v353_v54, %v267_v51 }
 0x157   :  { %v271_v57 = vpop.f32.mrb[4].mxu0 }
 0x158   :  { %v406_v58 = vadd.f32 %v388_v55, %v264_v47  ;;  %v389_v59 = vmul.f32 %v371_v56, %v267_v51  ;;  %v1797_v60 = vadd.f32 %v1792_v45, %v271_v57  ;;  %v1310_v61 = vpop.f32.mrb[5].mxu0 }
 0x159   :  { %v274_v62 = vpop.f32.mrb[6].mxu0 }
 0x15a   :  { %v424_v63 = vmul.f32 0.7978846, %v406_v58  ;;  %v407_v0 = vadd.f32 %v389_v59, %v267_v51  ;;  %v354_v1 = vmul.f32 0.044715, %v1797_v60  ;;  %v1801_v2 = vadd.f32 %v1792_v45, %v274_v62  ;;  %v1311_v4 = vpop.f32.mrb[7].mxu0 }
 0x15b   :  { %v336_v62 = vmul.f32 0.5, %v1797_v60 }
 0x15c   :  { %1441 = vtanh.f32 %v424_v63  ;;  %v425_v5 = vmul.f32 0.7978846, %v407_v0  ;;  %v372_v6 = vmul.f32 %v354_v1, %v1797_v60  ;;  %v355_v7 = vmul.f32 0.044715, %v1801_v2 }
 0x15d   :  { %v337_v63 = vmul.f32 0.5, %v1801_v2 }
 0x15e   :  { %1443 = vtanh.f32 %v425_v5  ;;  %v390_v8 = vmul.f32 %v372_v6, %v1797_v60  ;;  %v373_v9 = vmul.f32 %v355_v7, %v1801_v2 }
 0x15f   :  { %v279_v10 = vpop.f32.mrb[8].mxu0 }
 0x160   :  { %v408_v11 = vadd.f32 %v390_v8, %v1797_v60  ;;  %v391_v12 = vmul.f32 %v373_v9, %v1801_v2  ;;  %v1810_v13 = vadd.f32 %v1792_v45, %v279_v10  ;;  %v1314_v14 = vpop.f32.mrb[9].mxu0 }
 0x161   :  { %v282_v15 = vpop.f32.mrb[10].mxu0 }
 0x162   :  { %v426_v16 = vmul.f32 0.7978846, %v408_v11  ;;  %v409_v17 = vadd.f32 %v391_v12, %v1801_v2  ;;  %v356_v18 = vmul.f32 0.044715, %v1810_v13  ;;  %v1815_v19 = vadd.f32 %v1792_v45, %v282_v15  ;;  %v1315_v20 = vpop.f32.mrb[11].mxu0 }
 0x164   :  { %1445 = vtanh.f32 %v426_v16  ;;  %v427_v21 = vmul.f32 0.7978846, %v409_v17  ;;  %v374_v22 = vmul.f32 %v356_v18, %v1810_v13  ;;  %v357_v23 = vmul.f32 0.044715, %v1815_v19 }
 0x166   :  { %v1442_v24 = vpop.eup %1441  ;;  %1447 = vtanh.f32 %v427_v21  ;;  %v392_v25 = vmul.f32 %v374_v22, %v1810_v13  ;;  %v375_v26 = vmul.f32 %v357_v23, %v1815_v19 }
 0x167   :  { %v287_v27 = vpop.f32.mrb[12].mxu0  ;;  %v460_v28 = vadd.f32 1.0, %v1442_v24 }
 0x168   :  { %v1444_v29 = vpop.eup %1443  ;;  %v410_v30 = vadd.f32 %v392_v25, %v1810_v13  ;;  %v393_v31 = vmul.f32 %v375_v26, %v1815_v19  ;;  %v1824_v32 = vadd.f32 %v1792_v45, %v287_v27  ;;  %v1318_v33 = vpop.f32.mrb[13].mxu0  ;;  %v338_v25 = vmul.f32 0.5, %v1810_v13 }
 0x169   :  { %v290_v34 = vpop.f32.mrb[14].mxu0  ;;  %v461_v37 = vadd.f32 1.0, %v1444_v29  ;;  %v478_v43 = vmul.f32 %v460_v28, %v334_v35  ;;  %v339_v26 = vmul.f32 0.5, %v1815_v19 }
 0x16a   :  { %v428_v38 = vmul.f32 0.7978846, %v410_v30  ;;  %v411_v39 = vadd.f32 %v393_v31, %v1815_v19  ;;  %v358_v40 = vmul.f32 0.044715, %v1824_v32  ;;  %v1829_v41 = vadd.f32 %v1792_v45, %v290_v34  ;;  %v1319_v42 = vpop.f32.mrb[15].mxu0 }
 0x16b   :  { %v479_v44 = vmul.f32 %v461_v37, %v335_v36 }
 0x16c   :  { %1449 = vtanh.f32 %v428_v38  ;;  %v429_v46 = vmul.f32 0.7978846, %v411_v39  ;;  %v376_v48 = vmul.f32 %v358_v40, %v1824_v32  ;;  %v359_v49 = vmul.f32 0.044715, %v1829_v41 }
 0x16d   :  { %v496_v47 = vpack.c.bf16 %v479_v44, %v478_v43 }
 0x16e   :  { %v1446_v50 = vpop.eup %1445  ;;  %1451 = vtanh.f32 %v429_v46  ;;  %v394_v51 = vmul.f32 %v376_v48, %v1824_v32  ;;  %v377_v52 = vmul.f32 %v359_v49, %v1829_v41 }
 0x16f   :  { %v295_v53 = vpop.f32.mrb[16].mxu0  ;;  %1349 = vmatmul.mubr.msk.bf16.vlgmr.msra.gmra.mrb[0].mxu1 %vm201_vm2, %v496_v47  ;;  %v462_v54 = vadd.f32 1.0, %v1446_v50 }
 0x170   :  { %v1448_v55 = vpop.eup %1447  ;;  %v412_v56 = vadd.f32 %v394_v51, %v1824_v32  ;;  %v395_v57 = vmul.f32 %v377_v52, %v1829_v41  ;;  %v1839_v58 = vadd.f32 %v1792_v45, %v295_v53  ;;  %v1322_v59 = vpop.f32.mrb[17].mxu0  ;;  %1352 = vmatprep.mubr.msk.bf16.mxu1 %vm1550_vm0, %v1549_v3  ;;  %v340_v51 = vmul.f32 0.5, %v1824_v32 }
 0x171   :  { %v298_v61 = vpop.f32.mrb[18].mxu0  ;;  %v463_v0 = vadd.f32 1.0, %v1448_v55  ;;  %v480_v8 = vmul.f32 %v462_v54, %v336_v62  ;;  %v341_v52 = vmul.f32 0.5, %v1829_v41 }
 0x172   :  { %v430_v1 = vmul.f32 0.7978846, %v412_v56  ;;  %v413_v4 = vadd.f32 %v395_v57, %v1829_v41  ;;  %v360_v5 = vmul.f32 0.044715, %v1839_v58  ;;  %v1848_v6 = vadd.f32 %v1792_v45, %v298_v61  ;;  %v1323_v7 = vpop.f32.mrb[19].mxu0 }
 0x173   :  { %v481_v9 = vmul.f32 %v463_v0, %v337_v63 }
 0x174   :  { %1453 = vtanh.f32 %v430_v1  ;;  %v431_v10 = vmul.f32 0.7978846, %v413_v4  ;;  %v378_v11 = vmul.f32 %v360_v5, %v1839_v58  ;;  %v361_v60 = vmul.f32 0.044715, %v1848_v6 }
 0x175   :  { %v497_v12 = vpack.c.bf16 %v481_v9, %v480_v8 }
 0x176   :  { %v1450_v2 = vpop.eup %1449  ;;  %1455 = vtanh.f32 %v431_v10  ;;  %v396_v14 = vmul.f32 %v378_v11, %v1839_v58  ;;  %v379_v15 = vmul.f32 %v361_v60, %v1848_v6 }
 0x177   :  { %v303_v16 = vpop.f32.mrb[20].mxu0  ;;  %1353 = vmatmul.mubr.msk.bf16.gmra.mrb[4].mxu1 %vm201_vm2, %v497_v12  ;;  %v464_v17 = vadd.f32 1.0, %v1450_v2 }
 0x178   :  { %v1452_v18 = vpop.eup %1451  ;;  %v414_v20 = vadd.f32 %v396_v14, %v1839_v58  ;;  %v397_v21 = vmul.f32 %v379_v15, %v1848_v6  ;;  %v1858_v22 = vadd.f32 %v1792_v45, %v303_v16  ;;  %v1326_v23 = vpop.f32.mrb[21].mxu0  ;;  %1356 = vmatprep.mubr.msk.bf16.mxu1 %vm1550_vm0, %v1549_v3  ;;  %v342_v14 = vmul.f32 0.5, %v1839_v58 }
 0x179   :  { %v306_v24 = vpop.f32.mrb[22].mxu0  ;;  %v465_v27 = vadd.f32 1.0, %v1452_v18  ;;  %v482_v34 = vmul.f32 %v464_v17, %v338_v25  ;;  %v343_v15 = vmul.f32 0.5, %v1848_v6 }
 0x17a   :  { %v432_v28 = vmul.f32 0.7978846, %v414_v20  ;;  %v415_v29 = vadd.f32 %v397_v21, %v1848_v6  ;;  %v362_v30 = vmul.f32 0.044715, %v1858_v22  ;;  %v1867_v31 = vadd.f32 %v1792_v45, %v306_v24  ;;  %v1327_v33 = vpop.f32.mrb[23].mxu0 }
 0x17b   :  { %v483_v35 = vmul.f32 %v465_v27, %v339_v26 }
 0x17c   :  { %1457 = vtanh.f32 %v432_v28  ;;  %v433_v36 = vmul.f32 0.7978846, %v415_v29  ;;  %v380_v37 = vmul.f32 %v362_v30, %v1858_v22  ;;  %v363_v13 = vmul.f32 0.044715, %v1867_v31 }
 0x17d   :  { %v498_v38 = vpack.c.bf16 %v483_v35, %v482_v34 }
 0x17e   :  { %v1454_v19 = vpop.eup %1453  ;;  %1459 = vtanh.f32 %v433_v36  ;;  %v398_v39 = vmul.f32 %v380_v37, %v1858_v22  ;;  %v381_v40 = vmul.f32 %v363_v13, %v1867_v31 }
 0x17f   :  { %v311_v42 = vpop.f32.mrb[24].mxu0  ;;  %1357 = vmatmul.mubr.msk.bf16.gmra.mrb[8].mxu1 %vm201_vm2, %v498_v38  ;;  %v466_v43 = vadd.f32 1.0, %v1454_v19 }
 0x180   :  { %v1456_v44 = vpop.eup %1455  ;;  %v416_v46 = vadd.f32 %v398_v39, %v1858_v22  ;;  %v399_v48 = vmul.f32 %v381_v40, %v1867_v31  ;;  %v1877_v49 = vadd.f32 %v1792_v45, %v311_v42  ;;  %v1330_v47 = vpop.f32.mrb[25].mxu0  ;;  %1360 = vmatprep.mubr.msk.bf16.mxu1 %vm1550_vm0, %v1549_v3  ;;  %v344_v39 = vmul.f32 0.5, %v1858_v22 }
 0x181   :  { %v314_v50 = vpop.f32.mrb[26].mxu0  ;;  %v467_v53 = vadd.f32 1.0, %v1456_v44  ;;  %v484_v61 = vmul.f32 %v466_v43, %v340_v51  ;;  %v345_v40 = vmul.f32 0.5, %v1867_v31 }
 0x182   :  { %v434_v54 = vmul.f32 0.7978846, %v416_v46  ;;  %v417_v55 = vadd.f32 %v399_v48, %v1867_v31  ;;  %v364_v56 = vmul.f32 0.044715, %v1877_v49  ;;  %v1886_v57 = vadd.f32 %v1792_v45, %v314_v50  ;;  %v1331_v59 = vpop.f32.mrb[27].mxu0 }
 0x183   :  { %v485_v62 = vmul.f32 %v467_v53, %v341_v52 }
 0x184   :  { %1461 = vtanh.f32 %v434_v54  ;;  %v435_v63 = vmul.f32 0.7978846, %v417_v55  ;;  %v382_v0 = vmul.f32 %v364_v56, %v1877_v49  ;;  %v365_v32 = vmul.f32 0.044715, %v1886_v57 }
 0x185   :  { %v499_v1 = vpack.c.bf16 %v485_v62, %v484_v61 }
 0x186   :  { %v1458_v41 = vpop.eup %1457  ;;  %1463 = vtanh.f32 %v435_v63  ;;  %v400_v4 = vmul.f32 %v382_v0, %v1877_v49  ;;  %v383_v5 = vmul.f32 %v365_v32, %v1886_v57  ;;  %v347_v0 = vmul.f32 0.5, %v1886_v57 }
 0x187   :  { %v319_v7 = vpop.f32.mrb[28].mxu0  ;;  %1361 = vmatmul.mubr.msk.bf16.gmra.mrb[12].mxu1 %vm201_vm2, %v499_v1  ;;  %v468_v8 = vadd.f32 1.0, %v1458_v41 }
 0x188   :  { %v1460_v9 = vpop.eup %1459  ;;  %v418_v10 = vadd.f32 %v400_v4, %v1877_v49  ;;  %v401_v11 = vmul.f32 %v383_v5, %v1886_v57  ;;  %v1896_v60 = vadd.f32 %v1792_v45, %v319_v7  ;;  %v1334_v12 = vpop.f32.mrb[29].mxu0  ;;  %1364 = vmatprep.mubr.msk.bf16.mxu1 %vm1550_vm0, %v1549_v3 }
 0x189   :  { %v322_v2 = vpop.f32.mrb[30].mxu0  ;;  %v469_v16 = vadd.f32 1.0, %v1460_v9  ;;  %v486_v24 = vmul.f32 %v468_v8, %v342_v14 }
 0x18a   :  { %v436_v17 = vmul.f32 0.7978846, %v418_v10  ;;  %v419_v18 = vadd.f32 %v401_v11, %v1886_v57  ;;  %v366_v20 = vmul.f32 0.044715, %v1896_v60  ;;  %v1905_v21 = vadd.f32 %v1792_v45, %v322_v2  ;;  %v1335_v23 = vpop.f32.mrb[31].mxu0 }
 0x18b   :  { %v487_v25 = vmul.f32 %v469_v16, %v343_v15 }
 0x18c   :  { %1465 = vtanh.f32 %v436_v17  ;;  %v437_v26 = vmul.f32 0.7978846, %v419_v18  ;;  %v384_v27 = vmul.f32 %v366_v20, %v1896_v60  ;;  %v367_v58 = vmul.f32 0.044715, %v1905_v21 }
 0x18d   :  { %v500_v28 = vpack.c.bf16 %v487_v25, %v486_v24  ;;  %v349_v57 = vmul.f32 0.5, %v1905_v21 }
 0x18e   :  { %v1462_v6 = vpop.eup %1461  ;;  %1467 = vtanh.f32 %v437_v26  ;;  %v402_v29 = vmul.f32 %v384_v27, %v1896_v60  ;;  %v385_v30 = vmul.f32 %v367_v58, %v1905_v21 }
 0x18f   :  { %v327_v33 = vpop.f32.mrb[32].mxu0  ;;  %1365 = vmatmul.mubr.msk.bf16.gmra.mrb[16].mxu1 %vm201_vm2, %v500_v28  ;;  %v470_v34 = vadd.f32 1.0, %v1462_v6 }
 0x190   :  { %v1464_v35 = vpop.eup %1463  ;;  %v420_v36 = vadd.f32 %v402_v29, %v1896_v60  ;;  %v403_v37 = vmul.f32 %v385_v30, %v1905_v21  ;;  %v328_v13 = vadd.f32 %v1792_v45, %v327_v33  ;;  %v1338_v38 = vpop.f32.mrb[33].mxu0  ;;  %1368 = vmatprep.mubr.msk.bf16.mxu1 %vm1550_vm0, %v1549_v3 }
 0x191   :  { %v330_v19 = vpop.f32.mrb[34].mxu0  ;;  %v471_v42 = vadd.f32 1.0, %v1464_v35  ;;  %v488_v50 = vmul.f32 %v470_v34, %v344_v39 }
 0x192   :  { %v438_v43 = vmul.f32 0.7978846, %v420_v36  ;;  %v421_v44 = vadd.f32 %v403_v37, %v1905_v21  ;;  %v368_v46 = vmul.f32 0.044715, %v328_v13  ;;  %v331_v48 = vadd.f32 %v1792_v45, %v330_v19  ;;  %v1339_v47 = vpop.f32.mrb[35].mxu0 }
 0x193   :  { %v489_v51 = vmul.f32 %v471_v42, %v345_v40  ;;  %v346_v45 = vmul.f32 0.5, %v1877_v49  ;;  %v348_v49 = vmul.f32 0.5, %v1896_v60  ;;  %v350_v20 = vmul.f32 0.5, %v328_v13  ;;  %v1938_v21 = vld [vmem:[%s2465_s5] ss:$0 sm:$0xff] }
 0x194   :  { %1469 = vtanh.f32 %v438_v43  ;;  %v439_v52 = vmul.f32 0.7978846, %v421_v44  ;;  %v386_v53 = vmul.f32 %v368_v46, %v328_v13  ;;  %v369_v54 = vmul.f32 0.044715, %v331_v48 }
 0x195   :  { %v501_v55 = vpack.c.bf16 %v489_v51, %v488_v50  ;;  %v351_v23 = vmul.f32 0.5, %v331_v48 }
 0x196   :  { %v1466_v56 = vpop.eup %1465  ;;  %1471 = vtanh.f32 %v439_v52  ;;  %v404_v22 = vmul.f32 %v386_v53, %v328_v13  ;;  %v387_v59 = vmul.f32 %v369_v54, %v331_v48 }
 0x197   :  { %1369 = vmatmul.mubr.msk.bf16.gmra.mrb[20].mxu1 %vm201_vm2, %v501_v55  ;;  %v472_v31 = vadd.f32 1.0, %v1466_v56 }
 0x198   :  { %v1468_v61 = vpop.eup %1467  ;;  %v422_v62 = vadd.f32 %v404_v22, %v328_v13  ;;  %v405_v63 = vmul.f32 %v387_v59, %v331_v48  ;;  %1372 = vmatprep.mubr.msk.bf16.mxu1 %vm1550_vm0, %v1549_v3 }
 0x199   :  { %v473_v32 = vadd.f32 1.0, %v1468_v61  ;;  %v490_v4 = vmul.f32 %v472_v31, %v346_v45 }
 0x19a   :  { %v440_v1 = vmul.f32 0.7978846, %v422_v62  ;;  %v423_v41 = vadd.f32 %v405_v63, %v331_v48 }
 0x19b   :  { %v491_v5 = vmul.f32 %v473_v32, %v347_v0 }
 0x19c   :  { %1473 = vtanh.f32 %v440_v1  ;;  %v441_v7 = vmul.f32 0.7978846, %v423_v41 }
 0x19d   :  { %v502_v8 = vpack.c.bf16 %v491_v5, %v490_v4 }
 0x19e   :  { %v1470_v9 = vpop.eup %1469  ;;  %1475 = vtanh.f32 %v441_v7 }
 0x19f   :  { %1373 = vmatmul.mubr.msk.bf16.gmra.mrb[24].mxu1 %vm201_vm2, %v502_v8  ;;  %v474_v10 = vadd.f32 1.0, %v1470_v9 }
 0x1a0   :  { %v1472_v11 = vpop.eup %1471  ;;  %1376 = vmatprep.mubr.msk.bf16.mxu1 %vm1550_vm0, %v1549_v3 }
 0x1a1   :  { %v475_v12 = vadd.f32 1.0, %v1472_v11  ;;  %v492_v2 = vmul.f32 %v474_v10, %v348_v49 }
 0x1a3   :  { %v493_v14 = vmul.f32 %v475_v12, %v349_v57 }
 0x1a5   :  { %v503_v15 = vpack.c.bf16 %v493_v14, %v492_v2 }
 0x1a6   :  { %v1474_v16 = vpop.eup %1473 }
 0x1a7   :  { %1377 = vmatmul.mubr.msk.bf16.gmra.mrb[28].mxu1 %vm201_vm2, %v503_v15  ;;  %v476_v17 = vadd.f32 1.0, %v1474_v16 }
 0x1a8   :  { %v1476_v18 = vpop.eup %1475  ;;  %1380 = vmatprep.mubr.msk.bf16.mxu1 %vm1550_vm0, %v1549_v3 }
 0x1a9   :  { %v477_v24 = vadd.f32 1.0, %v1476_v18  ;;  %v494_v25 = vmul.f32 %v476_v17, %v350_v20 }
 0x1ab   :  { %v495_v26 = vmul.f32 %v477_v24, %v351_v23 }
 0x1ad   :  { %v504_v60 = vpack.c.bf16 %v495_v26, %v494_v25 }
 0x1af   :  { %1381 = vmatmul.mubr.msk.bf16.gmra.mrb[32].mxu1 %vm201_vm2, %v504_v60 }
 0x242   :  { %v605_v27 = vpop.f32.mrb[0].mxu1 }
 0x243   :  { %v1941_v58 = vadd.f32 %v1938_v21, %v605_v27  ;;  %v1350_v28 = vpop.f32.mrb[1].mxu1 }
 0x244   :  { %v608_v6 = vpop.f32.mrb[2].mxu1 }
 0x245   :  { %v1944_v3 = vadd.f32 %v1938_v21, %v608_v6  ;;  %v1351_v29 = vpop.f32.mrb[3].mxu1  ;;  %v1948_v30 = vmul.f32 %v1941_v58, %v1941_v58 }
 0x247   :  { %712 = vrot.lane.b32.xlu1 %v1948_v30, %s1552_s21  ;;  %v1954_v33 = vmul.f32 %v1944_v3, %v1944_v3 }
 0x249   :  { %714 = vrot.lane.b32.xlu0 %v1954_v33, %s1552_s21 }
 0x24a   :  { %v613_v34 = vpop.f32.mrb[4].mxu1 }
 0x24b   :  { %v1959_v35 = vadd.f32 %v1938_v21, %v613_v34  ;;  %v1354_v36 = vpop.f32.mrb[5].mxu1 }
 0x24c   :  { %v616_v37 = vpop.f32.mrb[6].mxu1 }
 0x24d   :  { %v1962_v13 = vadd.f32 %v1938_v21, %v616_v37  ;;  %v1355_v38 = vpop.f32.mrb[7].mxu1  ;;  %v1966_v19 = vmul.f32 %v1959_v35, %v1959_v35 }
 0x24f   :  { %716 = vrot.lane.b32.xlu1 %v1966_v19, %s1552_s21  ;;  %v1972_v39 = vmul.f32 %v1962_v13, %v1962_v13 }
 0x251   :  { %718 = vrot.lane.b32.xlu0 %v1972_v39, %s1552_s21 }
 0x252   :  { %v621_v40 = vpop.f32.mrb[8].mxu1 }
 0x253   :  { %v1977_v42 = vadd.f32 %v1938_v21, %v621_v40  ;;  %v1358_v43 = vpop.f32.mrb[9].mxu1 }
 0x254   :  { %v624_v44 = vpop.f32.mrb[10].mxu1 }
 0x255   :  { %v1980_v46 = vadd.f32 %v1938_v21, %v624_v44  ;;  %v1359_v48 = vpop.f32.mrb[11].mxu1  ;;  %v1984_v47 = vmul.f32 %v1977_v42, %v1977_v42 }
 0x257   :  { %720 = vrot.lane.b32.xlu1 %v1984_v47, %s1552_s21  ;;  %v1990_v50 = vmul.f32 %v1980_v46, %v1980_v46 }
 0x259   :  { %722 = vrot.lane.b32.xlu0 %v1990_v50, %s1552_s21 }
 0x25a   :  { %v629_v51 = vpop.f32.mrb[12].mxu1 }
 0x25b   :  { %v1995_v52 = vadd.f32 %v1938_v21, %v629_v51  ;;  %v1362_v53 = vpop.f32.mrb[13].mxu1 }
 0x25c   :  { %v632_v54 = vpop.f32.mrb[14].mxu1 }
 0x25d   :  { %v1998_v55 = vadd.f32 %v1938_v21, %v632_v54  ;;  %v1363_v56 = vpop.f32.mrb[15].mxu1  ;;  %v2002_v22 = vmul.f32 %v1995_v52, %v1995_v52 }
 0x25f   :  { %724 = vrot.lane.b32.xlu1 %v2002_v22, %s1552_s21  ;;  %v2008_v59 = vmul.f32 %v1998_v55, %v1998_v55 }
 0x261   :  { %726 = vrot.lane.b32.xlu0 %v2008_v59, %s1552_s21 }
 0x262   :  { %v637_v31 = vpop.f32.mrb[16].mxu1 }
 0x263   :  { %v2013_v61 = vadd.f32 %v1938_v21, %v637_v31  ;;  %v1366_v62 = vpop.f32.mrb[17].mxu1 }
 0x264   :  { %v640_v63 = vpop.f32.mrb[18].mxu1 }
 0x265   :  { %v2016_v45 = vadd.f32 %v1938_v21, %v640_v63  ;;  %v1367_v0 = vpop.f32.mrb[19].mxu1  ;;  %v2020_v32 = vmul.f32 %v2013_v61, %v2013_v61 }
 0x267   :  { %728 = vrot.lane.b32.xlu1 %v2020_v32, %s1552_s21  ;;  %v2026_v1 = vmul.f32 %v2016_v45, %v2016_v45 }
 0x269   :  { %730 = vrot.lane.b32.xlu0 %v2026_v1, %s1552_s21 }
 0x26a   :  { %v645_v41 = vpop.f32.mrb[20].mxu1 }
 0x26b   :  { %v2031_v4 = vadd.f32 %v1938_v21, %v645_v41  ;;  %v1370_v5 = vpop.f32.mrb[21].mxu1 }
 0x26c   :  { %v648_v7 = vpop.f32.mrb[22].mxu1 }
 0x26d   :  { %v2034_v8 = vadd.f32 %v1938_v21, %v648_v7  ;;  %v1371_v9 = vpop.f32.mrb[23].mxu1  ;;  %v2038_v10 = vmul.f32 %v2031_v4, %v2031_v4 }
 0x26f   :  { %732 = vrot.lane.b32.xlu1 %v2038_v10, %s1552_s21  ;;  %v2044_v11 = vmul.f32 %v2034_v8, %v2034_v8 }
 0x271   :  { %734 = vrot.lane.b32.xlu0 %v2044_v11, %s1552_s21 }
 0x272   :  { %v653_v49 = vpop.f32.mrb[24].mxu1 }
 0x273   :  { %v2049_v57 = vadd.f32 %v1938_v21, %v653_v49  ;;  %v1374_v12 = vpop.f32.mrb[25].mxu1 }
 0x274   :  { %v656_v2 = vpop.f32.mrb[26].mxu1 }
 0x275   :  { %v2052_v14 = vadd.f32 %v1938_v21, %v656_v2  ;;  %v1375_v15 = vpop.f32.mrb[27].mxu1  ;;  %v2056_v16 = vmul.f32 %v2049_v57, %v2049_v57 }
 0x277   :  { %736 = vrot.lane.b32.xlu1 %v2056_v16, %s1552_s21  ;;  %v2062_v17 = vmul.f32 %v2052_v14, %v2052_v14 }
 0x279   :  { %738 = vrot.lane.b32.xlu0 %v2062_v17, %s1552_s21 }
 0x27a   :  { %v661_v18 = vpop.f32.mrb[28].mxu1 }
 0x27b   :  { %v2067_v20 = vadd.f32 %v1938_v21, %v661_v18  ;;  %v1378_v23 = vpop.f32.mrb[29].mxu1 }
 0x27c   :  { %v664_v24 = vpop.f32.mrb[30].mxu1 }
 0x27d   :  { %v2070_v25 = vadd.f32 %v1938_v21, %v664_v24  ;;  %v1379_v26 = vpop.f32.mrb[31].mxu1  ;;  %v2074_v60 = vmul.f32 %v2067_v20, %v2067_v20 }
 0x27f   :  { %740 = vrot.lane.b32.xlu1 %v2074_v60, %s1552_s21  ;;  %v2080_v27 = vmul.f32 %v2070_v25, %v2070_v25 }
 0x281   :  { %742 = vrot.lane.b32.xlu0 %v2080_v27, %s1552_s21 }
 0x282   :  { %v669_v28 = vpop.f32.mrb[32].mxu1 }
 0x283   :  { %v2085_v6 = vadd.f32 %v1938_v21, %v669_v28  ;;  %v1382_v29 = vpop.f32.mrb[33].mxu1 }
 0x284   :  { %v672_v34 = vpop.f32.mrb[34].mxu1 }
 0x285   :  { %v2088_v36 = vadd.f32 %v1938_v21, %v672_v34  ;;  %v1383_v37 = vpop.f32.mrb[35].mxu1  ;;  %v2092_v38 = vmul.f32 %v2085_v6, %v2085_v6 }
 0x287   :  { %744 = vrot.lane.b32.xlu1 %v2092_v38, %s1552_s21  ;;  %v2098_v40 = vmul.f32 %v2088_v36, %v2088_v36 }
 0x289   :  { %746 = vrot.lane.b32.xlu0 %v2098_v40, %s1552_s21 }
 0x2b9   :  { %v713_v43 = vpop.permute.xlu1 %712 }
 0x2ba   :  { %v766_v44 = vadd.f32 %v713_v43, %v1948_v30 }
 0x2bb   :  { %v715_v21 = vpop.permute.xlu0 %714 }
 0x2bc   :  { %1477 = vrsqrt.f32 %v766_v44  ;;  %v767_v48 = vadd.f32 %v715_v21, %v1954_v33  ;;  %vm786_vm3 = vcmp.eq.f32.partialorder %v766_v44, inf  ;;  %v789_v0 = vand.u32 2147483648, %v766_v44 }
 0x2bd   :  { %vm788_vm4 = vcmp.eq.f32.partialorder %v766_v44, 0.0 }
 0x2be   :  { %1479 = vrsqrt.f32 %v767_v48  ;;  %vm793_vm5 = vcmp.eq.f32.partialorder %v767_v48, inf  ;;  %vm795_vm6 = vcmp.eq.f32.partialorder %v767_v48, 0.0 }
 0x2c1   :  { %v717_v51 = vpop.permute.xlu1 %716 }
 0x2c2   :  { %v768_v53 = vadd.f32 %v717_v51, %v1966_v19  ;;  %v796_v19 = vand.u32 2147483648, %v767_v48 }
 0x2c3   :  { %v719_v54 = vpop.permute.xlu0 %718 }
 0x2c4   :  { %1481 = vrsqrt.f32 %v768_v53  ;;  %v769_v56 = vadd.f32 %v719_v54, %v1972_v39  ;;  %vm800_vm7 = vcmp.eq.f32.partialorder %v768_v53, inf  ;;  %v803_v24 = vand.u32 2147483648, %v768_v53 }
 0x2c5   :  { %vm802_vm8 = vcmp.eq.f32.partialorder %v768_v53, 0.0 }
 0x2c6   :  { %v1478_v31 = vpop.eup %1477  ;;  %1483 = vrsqrt.f32 %v769_v56  ;;  %vm807_vm9 = vcmp.eq.f32.partialorder %v769_v56, inf  ;;  %v810_v43 = vand.u32 2147483648, %v769_v56  ;;  %vm809_vm10 = vcmp.eq.f32.partialorder %v769_v56, 0.0 }
 0x2c7   :  { %v785_v62 = vmul.f32 %v1478_v31, %v766_v44 }
 0x2c8   :  { %v1480_v63 = vpop.eup %1479 }
 0x2c9   :  { %v721_v41 = vpop.permute.xlu1 %720  ;;  %v787_v30 = vsel %vm786_vm3, %v766_v44, %v785_v62  ;;  %v792_v5 = vmul.f32 %v1480_v63, %v767_v48 }
 0x2ca   :  { %v2107_v33 = vadd.f32 %v721_v41, %v1984_v47  ;;  %v790_v7 = vsel %vm788_vm4, %v789_v0, %v787_v30 }
 0x2cb   :  { %v723_v9 = vpop.permute.xlu0 %722  ;;  %v946_v49 = vadd.f32 1e-09, %v790_v7  ;;  %v794_v12 = vsel %vm793_vm5, %v767_v48, %v792_v5 }
 0x2cc   :  { %1485 = vrsqrt.f32 %v2107_v33  ;;  %v2111_v39 = vadd.f32 %v723_v9, %v1990_v50  ;;  %v797_v2 = vsel %vm795_vm6, %v796_v19, %v794_v12  ;;  %v1252_v50 = vadd.f32 -0.01, %v790_v7 }
 0x2cd   :  { %1487 = vrcp.f32 %v946_v49  ;;  %v947_v15 = vadd.f32 1e-09, %v797_v2  ;;  %v1253_v54 = vadd.f32 -0.01, %v797_v2  ;;  %vm814_vm11 = vcmp.eq.f32.partialorder %v2107_v33, inf }
 0x2ce   :  { %v1482_v18 = vpop.eup %1481  ;;  %1489 = vrsqrt.f32 %v2111_v39  ;;  %vm816_vm12 = vcmp.eq.f32.partialorder %v2107_v33, 0.0  ;;  %v817_v30 = vand.u32 2147483648, %v2107_v33  ;;  %vm821_vm13 = vcmp.eq.f32.partialorder %v2111_v39, inf }
 0x2cf   :  { %1491 = vrcp.f32 %v947_v15  ;;  %v799_v47 = vmul.f32 %v1482_v18, %v768_v53  ;;  %v824_v12 = vand.u32 2147483648, %v2111_v39  ;;  %vm823_vm14 = vcmp.eq.f32.partialorder %v2111_v39, 0.0 }
 0x2d0   :  { %v1484_v23 = vpop.eup %1483 }
 0x2d1   :  { %v725_v26 = vpop.permute.xlu1 %724  ;;  %v801_v28 = vsel %vm800_vm7, %v768_v53, %v799_v47  ;;  %v806_v29 = vmul.f32 %v1484_v23, %v769_v56 }
 0x2d2   :  { %v2115_v34 = vadd.f32 %v725_v26, %v2002_v22  ;;  %v804_v37 = vsel %vm802_vm8, %v803_v24, %v801_v28  ;;  %v928_v22 = vmax.f32 %v1252_v50, 0.0 }
 0x2d3   :  { %v727_v44 = vpop.permute.xlu0 %726  ;;  %v948_v21 = vadd.f32 1e-09, %v804_v37  ;;  %v808_v48 = vsel %vm807_vm9, %v769_v56, %v806_v29  ;;  %v1254_v19 = vadd.f32 -0.01, %v804_v37 }
 0x2d4   :  { %1493 = vrsqrt.f32 %v2115_v34  ;;  %v2119_v51 = vadd.f32 %v727_v44, %v2008_v59  ;;  %v811_v31 = vsel %vm809_vm10, %v810_v43, %v808_v48  ;;  %v929_v59 = vmax.f32 %v1253_v54, 0.0 }
 0x2d5   :  { %1495 = vrcp.f32 %v948_v21  ;;  %v949_v53 = vadd.f32 1e-09, %v811_v31  ;;  %v1255_v24 = vadd.f32 -0.01, %v811_v31  ;;  %vm828_vm15 = vcmp.eq.f32.partialorder %v2115_v34, inf }
 0x2d6   :  { %v1486_v62 = vpop.eup %1485  ;;  %1497 = vrsqrt.f32 %v2119_v51  ;;  %vm830_vm0 = vcmp.eq.f32.partialorder %v2115_v34, 0.0  ;;  %v831_v54 = vand.u32 2147483648, %v2115_v34  ;;  %vm835_vm2 = vcmp.eq.f32.partialorder %v2119_v51, inf }
 0x2d7   :  { %v1488_v63 = vpop.eup %1487  ;;  %1499 = vrcp.f32 %v949_v53  ;;  %v813_v0 = vmul.f32 %v1486_v62, %v2107_v33  ;;  %v931_v48 = vmax.f32 %v1255_v24, 0.0  ;;  %vm837_vm3 = vcmp.eq.f32.partialorder %v2119_v51, 0.0 }
 0x2d8   :  { %v1490_v56 = vpop.eup %1489  ;;  %v982_v41 = vmul.f32 %v1488_v63, %v928_v22 }
 0x2d9   :  { %v1492_v5 = vpop.eup %1491  ;;  %v729_v7 = vpop.permute.xlu1 %728  ;;  %v815_v9 = vsel %vm814_vm11, %v2107_v33, %v813_v0  ;;  %v820_v49 = vmul.f32 %v1490_v56, %v2111_v39  ;;  %v838_v0 = vand.u32 2147483648, %v2119_v51 }
 0x2da   :  { %v2131_v2 = vadd.f32 %v729_v7, %v2020_v32  ;;  %v1000_v15 = vmul.f32 %v982_v41, %v1941_v58  ;;  %1054 = vrot.lane.b32.xlu1 %v982_v41, %s1551_s17  ;;  %v983_v18 = vmul.f32 %v1492_v5, %v929_v59  ;;  %v818_v47 = vsel %vm816_vm12, %v817_v30, %v815_v9 }
 0x2db   :  { %v731_v23 = vpop.permute.xlu0 %730  ;;  %v950_v26 = vadd.f32 1e-09, %v818_v47  ;;  %v822_v28 = vsel %vm821_vm13, %v2111_v39, %v820_v49  ;;  %v930_v39 = vmax.f32 %v1254_v19, 0.0  ;;  %v1256_v62 = vadd.f32 -0.01, %v818_v47 }
 0x2dc   :  { %1501 = vrsqrt.f32 %v2131_v2  ;;  %1018 = vst.msk [vmem:[%s2466_s6] sm:$0xff] %vm134_vm1, %v1000_v15  ;;  %v2147_v32 = vadd.f32 %v731_v23, %v2026_v1  ;;  %v1001_v33 = vmul.f32 %v983_v18, %v1944_v3  ;;  %1056 = vrot.lane.b32.xlu0 %v983_v18, %s1551_s17  ;;  %v825_v29 = vsel %vm823_vm14, %v824_v12, %v822_v28 }
 0x2dd   :  { %1503 = vrcp.f32 %v950_v26  ;;  %v951_v50 = vadd.f32 1e-09, %v825_v29  ;;  %v1257_v7 = vadd.f32 -0.01, %v825_v29  ;;  %vm842_vm4 = vcmp.eq.f32.partialorder %v2131_v2, inf }
 0x2de   :  { %v1494_v37 = vpop.eup %1493  ;;  %1505 = vrsqrt.f32 %v2147_v32  ;;  %1019 = vst.msk [vmem:[%s2466_s6 + $0x8] sm:$0xff] %vm134_vm1, %v1001_v33  ;;  %vm844_vm5 = vcmp.eq.f32.partialorder %v2131_v2, 0.0  ;;  %v845_v26 = vand.u32 2147483648, %v2131_v2  ;;  %vm849_vm6 = vcmp.eq.f32.partialorder %v2147_v32, inf }
 0x2df   :  { %v1496_v43 = vpop.eup %1495  ;;  %1507 = vrcp.f32 %v951_v50  ;;  %v827_v1 = vmul.f32 %v1494_v37, %v2115_v34  ;;  %v933_v24 = vmax.f32 %v1257_v7, 0.0  ;;  %vm851_vm7 = vcmp.eq.f32.partialorder %v2147_v32, 0.0 }
 0x2e0   :  { %v1498_v44 = vpop.eup %1497  ;;  %v984_v21 = vmul.f32 %v1496_v43, %v930_v39  ;;  %v852_v39 = vand.u32 2147483648, %v2147_v32 }
 0x2e1   :  { %v1500_v31 = vpop.eup %1499  ;;  %v733_v53 = vpop.permute.xlu1 %732  ;;  %v829_v22 = vsel %vm828_vm15, %v2115_v34, %v827_v1  ;;  %v834_v63 = vmul.f32 %v1498_v44, %v2119_v51 }
 0x2e2   :  { %v2165_v56 = vadd.f32 %v733_v53, %v2038_v10  ;;  %v1002_v41 = vmul.f32 %v984_v21, %v1959_v35  ;;  %1058 = vrot.lane.b32.xlu1 %v984_v21, %s1551_s17  ;;  %v985_v59 = vmul.f32 %v1500_v31, %v931_v48  ;;  %v832_v30 = vsel %vm830_vm0, %v831_v54, %v829_v22 }
 0x2e3   :  { %v735_v5 = vpop.permute.xlu0 %734  ;;  %v952_v19 = vadd.f32 1e-09, %v832_v30  ;;  %v836_v9 = vsel %vm835_vm2, %v2119_v51, %v834_v63  ;;  %v932_v51 = vmax.f32 %v1256_v62, 0.0  ;;  %v1258_v29 = vadd.f32 -0.01, %v832_v30 }
 0x2e4   :  { %1509 = vrsqrt.f32 %v2165_v56  ;;  %1020 = vst.msk [vmem:[%s2466_s6 + $0x10] sm:$0xff] %vm134_vm1, %v1002_v41  ;;  %v2179_v10 = vadd.f32 %v735_v5, %v2044_v11  ;;  %v1003_v34 = vmul.f32 %v985_v59, %v1962_v13  ;;  %1060 = vrot.lane.b32.xlu0 %v985_v59, %s1551_s17  ;;  %v839_v49 = vsel %vm837_vm3, %v838_v0, %v836_v9 }
 0x2e5   :  { %1511 = vrcp.f32 %v952_v19  ;;  %v953_v12 = vadd.f32 1e-09, %v839_v49  ;;  %v1259_v54 = vadd.f32 -0.01, %v839_v49  ;;  %vm856_vm8 = vcmp.eq.f32.partialorder %v2165_v56, inf }
 0x2e6   :  { %v1502_v15 = vpop.eup %1501  ;;  %1513 = vrsqrt.f32 %v2179_v10  ;;  %1021 = vst.msk [vmem:[%s2466_s6 + $0x18] sm:$0xff] %vm134_vm1, %v1003_v34  ;;  %vm858_vm9 = vcmp.eq.f32.partialorder %v2165_v56, 0.0  ;;  %v859_v5 = vand.u32 2147483648, %v2165_v56  ;;  %vm863_vm10 = vcmp.eq.f32.partialorder %v2179_v10, inf }
 0x2e7   :  { %v1504_v18 = vpop.eup %1503  ;;  %1515 = vrcp.f32 %v953_v12  ;;  %v841_v11 = vmul.f32 %v1502_v15, %v2131_v2  ;;  %v935_v30 = vmax.f32 %v1259_v54, 0.0  ;;  %v866_v12 = vand.u32 2147483648, %v2179_v10 }
 0x2e8   :  { %v1506_v47 = vpop.eup %1505  ;;  %v986_v23 = vmul.f32 %v1504_v18, %v932_v51  ;;  %vm865_vm11 = vcmp.eq.f32.partialorder %v2179_v10, 0.0 }
 0x2e9   :  { %v1508_v28 = vpop.eup %1507  ;;  %v737_v33 = vpop.permute.xlu1 %736  ;;  %v843_v50 = vsel %vm842_vm4, %v2131_v2, %v841_v11  ;;  %v848_v37 = vmul.f32 %v1506_v47, %v2147_v32 }
 0x2ea   :  { %v2197_v43 = vadd.f32 %v737_v33, %v2056_v16  ;;  %v1004_v1 = vmul.f32 %v986_v23, %v1977_v42  ;;  %1062 = vrot.lane.b32.xlu1 %v986_v23, %s1551_s17  ;;  %v987_v44 = vmul.f32 %v1508_v28, %v933_v24  ;;  %v846_v21 = vsel %vm844_vm5, %v845_v26, %v843_v50 }
 0x2eb   :  { %v739_v48 = vpop.permute.xlu0 %738  ;;  %v954_v31 = vadd.f32 1e-09, %v846_v21  ;;  %v850_v53 = vsel %vm849_vm6, %v2147_v32, %v848_v37  ;;  %v934_v32 = vmax.f32 %v1258_v29, 0.0  ;;  %v1260_v9 = vadd.f32 -0.01, %v846_v21 }
 0x2ec   :  { %1517 = vrsqrt.f32 %v2197_v43  ;;  %1022 = vst.msk [vmem:[%s2466_s6 + $0x20] sm:$0xff] %vm134_vm1, %v1004_v1  ;;  %v2211_v16 = vadd.f32 %v739_v48, %v2062_v17  ;;  %v1005_v2 = vmul.f32 %v987_v44, %v1980_v46  ;;  %1064 = vrot.lane.b32.xlu0 %v987_v44, %s1551_s17  ;;  %v853_v62 = vsel %vm851_vm7, %v852_v39, %v850_v53 }
 0x2ed   :  { %1519 = vrcp.f32 %v954_v31  ;;  %v955_v22 = vadd.f32 1e-09, %v853_v62  ;;  %v1261_v23 = vadd.f32 -0.01, %v853_v62  ;;  %vm870_vm12 = vcmp.eq.f32.partialorder %v2197_v43, inf }
 0x2ee   :  { %v1510_v63 = vpop.eup %1509  ;;  %1521 = vrsqrt.f32 %v2211_v16  ;;  %1023 = vst.msk [vmem:[%s2466_s6 + $0x28] sm:$0xff] %vm134_vm1, %v1005_v2  ;;  %vm872_vm13 = vcmp.eq.f32.partialorder %v2197_v43, 0.0  ;;  %v873_v44 = vand.u32 2147483648, %v2197_v43  ;;  %vm877_vm14 = vcmp.eq.f32.partialorder %v2211_v16, inf }
 0x2ef   :  { %v1512_v0 = vpop.eup %1511  ;;  %1523 = vrcp.f32 %v955_v22  ;;  %v855_v17 = vmul.f32 %v1510_v63, %v2165_v56  ;;  %v937_v1 = vmax.f32 %v1261_v23, 0.0  ;;  %v880_v2 = vand.u32 2147483648, %v2211_v16 }
 0x2f0   :  { %v1514_v41 = vpop.eup %1513  ;;  %v988_v59 = vmul.f32 %v1512_v0, %v934_v32  ;;  %vm879_vm15 = vcmp.eq.f32.partialorder %v2211_v16, 0.0 }
 0x2f1   :  { %v1516_v7 = vpop.eup %1515  ;;  %v741_v19 = vpop.permute.xlu1 %740  ;;  %v857_v34 = vsel %vm856_vm8, %v2165_v56, %v855_v17  ;;  %v862_v49 = vmul.f32 %v1514_v41, %v2179_v10 }
 0x2f2   :  { %v2229_v15 = vadd.f32 %v741_v19, %v2074_v60  ;;  %v1006_v51 = vmul.f32 %v988_v59, %v1995_v52  ;;  %1066 = vrot.lane.b32.xlu1 %v988_v59, %s1551_s17  ;;  %v989_v18 = vmul.f32 %v1516_v7, %v935_v30  ;;  %v860_v11 = vsel %vm858_vm9, %v859_v5, %v857_v34 }
 0x2f3   :  { %v743_v47 = vpop.permute.xlu0 %742  ;;  %v956_v24 = vadd.f32 1e-09, %v860_v11  ;;  %v864_v26 = vsel %vm863_vm10, %v2179_v10, %v862_v49  ;;  %v936_v10 = vmax.f32 %v1260_v9, 0.0  ;;  %v1262_v54 = vadd.f32 -0.01, %v860_v11 }
 0x2f4   :  { %1525 = vrsqrt.f32 %v2229_v15  ;;  %1024 = vst.msk [vmem:[%s2466_s6 + $0x30] sm:$0xff] %vm134_vm1, %v1006_v51  ;;  %v2243_v60 = vadd.f32 %v743_v47, %v2080_v27  ;;  %v1007_v56 = vmul.f32 %v989_v18, %v1998_v55  ;;  %1068 = vrot.lane.b32.xlu0 %v989_v18, %s1551_s17  ;;  %v867_v28 = vsel %vm865_vm11, %v866_v12, %v864_v26 }
 0x2f5   :  { %1527 = vrcp.f32 %v956_v24  ;;  %v957_v33 = vadd.f32 1e-09, %v867_v28  ;;  %v1263_v17 = vadd.f32 -0.01, %v867_v28  ;;  %vm884_vm0 = vcmp.eq.f32.partialorder %v2229_v15, inf }
 0x2f6   :  { %v1518_v29 = vpop.eup %1517  ;;  %1529 = vrsqrt.f32 %v2243_v60  ;;  %1025 = vst.msk [vmem:[%s2466_s6 + $0x38] sm:$0xff] %vm134_vm1, %v1007_v56  ;;  %vm886_vm2 = vcmp.eq.f32.partialorder %v2229_v15, 0.0  ;;  %v887_v12 = vand.u32 2147483648, %v2229_v15  ;;  %vm891_vm3 = vcmp.eq.f32.partialorder %v2243_v60, inf }
 0x2f7   :  { %v1520_v50 = vpop.eup %1519  ;;  %1531 = vrcp.f32 %v957_v33  ;;  %v869_v27 = vmul.f32 %v1518_v29, %v2197_v43  ;;  %v939_v49 = vmax.f32 %v1263_v17, 0.0  ;;  %v894_v47 = vand.u32 2147483648, %v2243_v60 }
 0x2f8   :  { %v1522_v37 = vpop.eup %1521  ;;  %v990_v39 = vmul.f32 %v1520_v50, %v936_v10  ;;  %vm893_vm4 = vcmp.eq.f32.partialorder %v2243_v60, 0.0 }
 0x2f9   :  { %v1524_v21 = vpop.eup %1523  ;;  %v745_v48 = vpop.permute.xlu1 %744  ;;  %v871_v31 = vsel %vm870_vm12, %v2197_v43, %v869_v27  ;;  %v876_v53 = vmul.f32 %v1522_v37, %v2211_v16 }
 0x2fa   :  { %v2261_v62 = vadd.f32 %v745_v48, %v2092_v38  ;;  %v1008_v22 = vmul.f32 %v990_v39, %v2013_v61  ;;  %1070 = vrot.lane.b32.xlu1 %v990_v39, %s1551_s17  ;;  %v991_v63 = vmul.f32 %v1524_v21, %v937_v1  ;;  %v874_v32 = vsel %vm872_vm13, %v873_v44, %v871_v31 }
 0x2fb   :  { %v747_v0 = vpop.permute.xlu0 %746  ;;  %v958_v41 = vadd.f32 1e-09, %v874_v32  ;;  %v878_v59 = vsel %vm877_vm14, %v2211_v16, %v876_v53  ;;  %v938_v16 = vmax.f32 %v1262_v54, 0.0  ;;  %v1264_v26 = vadd.f32 -0.01, %v874_v32 }
 0x2fc   :  { %1533 = vrsqrt.f32 %v2261_v62  ;;  %1026 = vst.msk [vmem:[%s2466_s6 + $0x40] sm:$0xff] %vm134_vm1, %v1008_v22  ;;  %v2275_v38 = vadd.f32 %v747_v0, %v2098_v40  ;;  %v1009_v43 = vmul.f32 %v991_v63, %v2016_v45  ;;  %1072 = vrot.lane.b32.xlu0 %v991_v63, %s1551_s17  ;;  %v881_v30 = vsel %vm879_vm15, %v880_v2, %v878_v59 }
 0x2fd   :  { %1535 = vrcp.f32 %v958_v41  ;;  %v959_v5 = vadd.f32 1e-09, %v881_v30  ;;  %v1265_v29 = vadd.f32 -0.01, %v881_v30  ;;  %vm898_vm5 = vcmp.eq.f32.partialorder %v2261_v62, inf }
 0x2fe   :  { %v1526_v7 = vpop.eup %1525  ;;  %1537 = vrsqrt.f32 %v2275_v38  ;;  %1027 = vst.msk [vmem:[%s2466_s6 + $0x48] sm:$0xff] %vm134_vm1, %v1009_v43  ;;  %vm900_vm6 = vcmp.eq.f32.partialorder %v2261_v62, 0.0  ;;  %v901_v48 = vand.u32 2147483648, %v2261_v62  ;;  %vm905_vm7 = vcmp.eq.f32.partialorder %v2275_v38, inf }
 0x2ff   :  { %v1528_v19 = vpop.eup %1527  ;;  %1539 = vrcp.f32 %v959_v5  ;;  %v883_v40 = vmul.f32 %v1526_v7, %v2229_v15  ;;  %v941_v21 = vmax.f32 %v1265_v29, 0.0  ;;  %v908_v2 = vand.u32 2147483648, %v2275_v38 }
 0x300   :  { %v1530_v9 = vpop.eup %1529  ;;  %v992_v34 = vmul.f32 %v1528_v19, %v938_v16  ;;  %vm907_vm8 = vcmp.eq.f32.partialorder %v2275_v38, 0.0 }
 0x301   :  { %v1532_v51 = vpop.eup %1531  ;;  %v885_v18 = vsel %vm884_vm0, %v2229_v15, %v883_v40  ;;  %v890_v11 = vmul.f32 %v1530_v9, %v2243_v60 }
 0x302   :  { %v1010_v23 = vmul.f32 %v992_v34, %v2031_v4  ;;  %1074 = vrot.lane.b32.xlu1 %v992_v34, %s1551_s17  ;;  %v993_v24 = vmul.f32 %v1532_v51, %v939_v49  ;;  %v888_v56 = vsel %vm886_vm2, %v887_v12, %v885_v18 }
 0x303   :  { %v960_v28 = vadd.f32 1e-09, %v888_v56  ;;  %v892_v33 = vsel %vm891_vm3, %v2243_v60, %v890_v11  ;;  %v940_v60 = vmax.f32 %v1264_v26, 0.0  ;;  %v1266_v32 = vadd.f32 -0.01, %v888_v56 }
 0x304   :  { %1028 = vst.msk [vmem:[%s2466_s6 + $0x50] sm:$0xff] %vm134_vm1, %v1010_v23  ;;  %v1011_v15 = vmul.f32 %v993_v24, %v2034_v8  ;;  %1076 = vrot.lane.b32.xlu0 %v993_v24, %s1551_s17  ;;  %v895_v10 = vsel %vm893_vm4, %v894_v47, %v892_v33 }
 0x305   :  { %1541 = vrcp.f32 %v960_v28  ;;  %v961_v50 = vadd.f32 1e-09, %v895_v10  ;;  %v1267_v59 = vadd.f32 -0.01, %v895_v10  ;;  %v942_v5 = vmax.f32 %v1266_v32, 0.0 }
 0x306   :  { %v1534_v27 = vpop.eup %1533  ;;  %1029 = vst.msk [vmem:[%s2466_s6 + $0x58] sm:$0xff] %vm134_vm1, %v1011_v15 }
 0x307   :  { %v1536_v37 = vpop.eup %1535  ;;  %1543 = vrcp.f32 %v961_v50  ;;  %v897_v39 = vmul.f32 %v1534_v27, %v2261_v62  ;;  %v943_v16 = vmax.f32 %v1267_v59, 0.0 }
 0x308   :  { %v1538_v1 = vpop.eup %1537  ;;  %v994_v44 = vmul.f32 %v1536_v37, %v940_v60 }
 0x309   :  { %v1540_v54 = vpop.eup %1539  ;;  %v899_v31 = vsel %vm898_vm5, %v2261_v62, %v897_v39  ;;  %v904_v53 = vmul.f32 %v1538_v1, %v2275_v38 }
 0x30a   :  { %v1012_v22 = vmul.f32 %v994_v44, %v2049_v57  ;;  %1078 = vrot.lane.b32.xlu1 %v994_v44, %s1551_s17  ;;  %v995_v63 = vmul.f32 %v1540_v54, %v941_v21  ;;  %v902_v0 = vsel %vm900_vm6, %v901_v48, %v899_v31 }
 0x30b   :  { %v962_v17 = vadd.f32 1e-09, %v902_v0  ;;  %v906_v41 = vsel %vm905_vm7, %v2275_v38, %v904_v53  ;;  %v1268_v34 = vadd.f32 -0.01, %v902_v0 }
 0x30c   :  { %1030 = vst.msk [vmem:[%s2466_s6 + $0x60] sm:$0xff] %vm134_vm1, %v1012_v22  ;;  %v1013_v62 = vmul.f32 %v995_v63, %v2052_v14  ;;  %1080 = vrot.lane.b32.xlu0 %v995_v63, %s1551_s17  ;;  %v909_v43 = vsel %vm907_vm8, %v908_v2, %v906_v41 }
 0x30d   :  { %1545 = vrcp.f32 %v962_v17  ;;  %v963_v30 = vadd.f32 1e-09, %v909_v43  ;;  %v1269_v12 = vadd.f32 -0.01, %v909_v43  ;;  %v944_v51 = vmax.f32 %v1268_v34, 0.0 }
 0x30e   :  { %1031 = vst.msk [vmem:[%s2466_s6 + $0x68] sm:$0xff] %vm134_vm1, %v1013_v62 }
 0x30f   :  { %v1542_v38 = vpop.eup %1541  ;;  %1547 = vrcp.f32 %v963_v30  ;;  %v945_v47 = vmax.f32 %v1269_v12, 0.0 }
 0x310   :  { %v996_v7 = vmul.f32 %v1542_v38, %v942_v5 }
 0x311   :  { %v1544_v19 = vpop.eup %1543 }
 0x312   :  { %v1014_v40 = vmul.f32 %v996_v7, %v2067_v20  ;;  %1082 = vrot.lane.b32.xlu1 %v996_v7, %s1551_s17  ;;  %v997_v9 = vmul.f32 %v1544_v19, %v943_v16 }
 0x314   :  { %1032 = vst.msk [vmem:[%s2466_s6 + $0x70] sm:$0xff] %vm134_vm1, %v1014_v40  ;;  %v1015_v49 = vmul.f32 %v997_v9, %v2070_v25  ;;  %1084 = vrot.lane.b32.xlu0 %v997_v9, %s1551_s17 }
 0x316   :  { %1033 = vst.msk [vmem:[%s2466_s6 + $0x78] sm:$0xff] %vm134_vm1, %v1015_v49 }
 0x317   :  { %v1546_v18 = vpop.eup %1545 }
 0x318   :  { %v998_v11 = vmul.f32 %v1546_v18, %v944_v51 }
 0x319   :  { %v1548_v23 = vpop.eup %1547 }
 0x31a   :  { %1086 = vrot.lane.b32.xlu1 %v998_v11, %s1551_s17  ;;  %v1016_v24 = vmul.f32 %v998_v11, %v2085_v6  ;;  %v999_v26 = vmul.f32 %v1548_v23, %v945_v47 }
 0x31c   :  { %1034 = vst.msk [vmem:[%s2466_s6 + $0x80] sm:$0xff] %vm134_vm1, %v1016_v24  ;;  %1088 = vrot.lane.b32.xlu0 %v999_v26, %s1551_s17  ;;  %v1017_v56 = vmul.f32 %v999_v26, %v2088_v36 }
 0x31e   :  { %1035 = vst.msk [vmem:[%s2466_s6 + $0x88] sm:$0xff] %vm134_vm1, %v1017_v56 }
 0x34c   :  { %v1055_v28 = vpop.permute.xlu1 %1054 }
 0x34d   :  { %v1108_v33 = vmul.f32 %v1055_v28, %v1941_v58 }
 0x34e   :  { %v1057_v15 = vpop.permute.xlu0 %1056 }
 0x34f   :  { %v1109_v29 = vmul.f32 %v1057_v15, %v1944_v3  ;;  %1144 = vrot.lane.b32.xlu1 %v1108_v33, %s1552_s21 }
 0x351   :  { %1146 = vrot.lane.b32.xlu0 %v1109_v29, %s1552_s21 }
 0x354   :  { %v1059_v10 = vpop.permute.xlu1 %1058 }
 0x355   :  { %v1110_v50 = vmul.f32 %v1059_v10, %v1959_v35 }
 0x356   :  { %v1061_v27 = vpop.permute.xlu0 %1060 }
 0x357   :  { %v1111_v60 = vmul.f32 %v1061_v27, %v1962_v13  ;;  %1148 = vrot.lane.b32.xlu1 %v1110_v50, %s1552_s21 }
 0x359   :  { %1150 = vrot.lane.b32.xlu0 %v1111_v60, %s1552_s21 }
 0x35c   :  { %v1063_v37 = vpop.permute.xlu1 %1062 }
 0x35d   :  { %v1112_v58 = vmul.f32 %v1063_v37, %v1977_v42 }
 0x35e   :  { %v1065_v39 = vpop.permute.xlu0 %1064 }
 0x35f   :  { %v1113_v3 = vmul.f32 %v1065_v39, %v1980_v46  ;;  %1152 = vrot.lane.b32.xlu1 %v1112_v58, %s1552_s21 }
 0x361   :  { %1154 = vrot.lane.b32.xlu0 %v1113_v3, %s1552_s21 }
 0x364   :  { %v1067_v1 = vpop.permute.xlu1 %1066 }
 0x365   :  { %v1114_v35 = vmul.f32 %v1067_v1, %v1995_v52 }
 0x366   :  { %v1069_v44 = vpop.permute.xlu0 %1068 }
 0x367   :  { %v1115_v13 = vmul.f32 %v1069_v44, %v1998_v55  ;;  %1156 = vrot.lane.b32.xlu1 %v1114_v35, %s1552_s21 }
 0x369   :  { %1158 = vrot.lane.b32.xlu0 %v1115_v13, %s1552_s21 }
 0x36c   :  { %v1071_v21 = vpop.permute.xlu1 %1070 }
 0x36d   :  { %v1116_v42 = vmul.f32 %v1071_v21, %v2013_v61 }
 0x36e   :  { %v1073_v48 = vpop.permute.xlu0 %1072 }
 0x36f   :  { %v1117_v46 = vmul.f32 %v1073_v48, %v2016_v45  ;;  %1160 = vrot.lane.b32.xlu1 %v1116_v42, %s1552_s21 }
 0x371   :  { %1162 = vrot.lane.b32.xlu0 %v1117_v46, %s1552_s21 }
 0x374   :  { %v1075_v54 = vpop.permute.xlu1 %1074 }
 0x375   :  { %v1118_v52 = vmul.f32 %v1075_v54, %v2031_v4 }
 0x376   :  { %v1077_v31 = vpop.permute.xlu0 %1076 }
 0x377   :  { %v1119_v55 = vmul.f32 %v1077_v31, %v2034_v8  ;;  %1164 = vrot.lane.b32.xlu1 %v1118_v52, %s1552_s21 }
 0x379   :  { %1166 = vrot.lane.b32.xlu0 %v1119_v55, %s1552_s21 }
 0x37c   :  { %v1079_v53 = vpop.permute.xlu1 %1078 }
 0x37d   :  { %v1120_v61 = vmul.f32 %v1079_v53, %v2049_v57 }
 0x37e   :  { %v1081_v2 = vpop.permute.xlu0 %1080 }
 0x37f   :  { %v1121_v45 = vmul.f32 %v1081_v2, %v2052_v14  ;;  %1168 = vrot.lane.b32.xlu1 %v1120_v61, %s1552_s21 }
 0x381   :  { %1170 = vrot.lane.b32.xlu0 %v1121_v45, %s1552_s21 }
 0x384   :  { %v1083_v22 = vpop.permute.xlu1 %1082 }
 0x385   :  { %v1122_v4 = vmul.f32 %v1083_v22, %v2067_v20 }
 0x386   :  { %v1085_v63 = vpop.permute.xlu0 %1084 }
 0x387   :  { %v1123_v8 = vmul.f32 %v1085_v63, %v2070_v25  ;;  %1172 = vrot.lane.b32.xlu1 %v1122_v4, %s1552_s21 }
 0x389   :  { %1174 = vrot.lane.b32.xlu0 %v1123_v8, %s1552_s21 }
 0x38c   :  { %v1087_v32 = vpop.permute.xlu1 %1086 }
 0x38d   :  { %v1124_v57 = vmul.f32 %v1087_v32, %v2085_v6 }
 0x38e   :  { %v1089_v0 = vpop.permute.xlu0 %1088 }
 0x38f   :  { %v1125_v14 = vmul.f32 %v1089_v0, %v2088_v36  ;;  %1176 = vrot.lane.b32.xlu1 %v1124_v57, %s1552_s21 }
 0x391   :  { %1178 = vrot.lane.b32.xlu0 %v1125_v14, %s1552_s21 }
 0x3c1   :  { %v1145_v17 = vpop.permute.xlu1 %1144 }
 0x3c2   :  { %1198 = vst.msk [vmem:[%s2467_s7] sm:$0xff] %vm134_vm1, %v1145_v17 }
 0x3c3   :  { %v1147_v20 = vpop.permute.xlu0 %1146 }
 0x3c4   :  { %1199 = vst.msk [vmem:[%s2467_s7 + $0x8] sm:$0xff] %vm134_vm1, %v1147_v20 }
 0x3c9   :  { %v1149_v25 = vpop.permute.xlu1 %1148 }
 0x3ca   :  { %1200 = vst.msk [vmem:[%s2467_s7 + $0x10] sm:$0xff] %vm134_vm1, %v1149_v25 }
 0x3cb   :  { %v1151_v6 = vpop.permute.xlu0 %1150 }
 0x3cc   :  { %1201 = vst.msk [vmem:[%s2467_s7 + $0x18] sm:$0xff] %vm134_vm1, %v1151_v6 }
 0x3d1   :  { %v1153_v36 = vpop.permute.xlu1 %1152 }
 0x3d2   :  { %1202 = vst.msk [vmem:[%s2467_s7 + $0x20] sm:$0xff] %vm134_vm1, %v1153_v36 }
 0x3d3   :  { %v1155_v41 = vpop.permute.xlu0 %1154 }
 0x3d4   :  { %1203 = vst.msk [vmem:[%s2467_s7 + $0x28] sm:$0xff] %vm134_vm1, %v1155_v41 }
 0x3d9   :  { %v1157_v62 = vpop.permute.xlu1 %1156 }
 0x3da   :  { %1204 = vst.msk [vmem:[%s2467_s7 + $0x30] sm:$0xff] %vm134_vm1, %v1157_v62 }
 0x3db   :  { %v1159_v59 = vpop.permute.xlu0 %1158 }
 0x3dc   :  { %1205 = vst.msk [vmem:[%s2467_s7 + $0x38] sm:$0xff] %vm134_vm1, %v1159_v59 }
 0x3e1   :  { %v1161_v43 = vpop.permute.xlu1 %1160 }
 0x3e2   :  { %1206 = vst.msk [vmem:[%s2467_s7 + $0x40] sm:$0xff] %vm134_vm1, %v1161_v43 }
 0x3e3   :  { %v1163_v30 = vpop.permute.xlu0 %1162 }
 0x3e4   :  { %1207 = vst.msk [vmem:[%s2467_s7 + $0x48] sm:$0xff] %vm134_vm1, %v1163_v30 }
 0x3e9   :  { %v1165_v5 = vpop.permute.xlu1 %1164 }
 0x3ea   :  { %1208 = vst.msk [vmem:[%s2467_s7 + $0x50] sm:$0xff] %vm134_vm1, %v1165_v5 }
 0x3eb   :  { %v1167_v38 = vpop.permute.xlu0 %1166 }
 0x3ec   :  { %1209 = vst.msk [vmem:[%s2467_s7 + $0x58] sm:$0xff] %vm134_vm1, %v1167_v38 }
 0x3f1   :  { %v1169_v7 = vpop.permute.xlu1 %1168 }
 0x3f2   :  { %1210 = vst.msk [vmem:[%s2467_s7 + $0x60] sm:$0xff] %vm134_vm1, %v1169_v7 }
 0x3f3   :  { %v1171_v16 = vpop.permute.xlu0 %1170 }
 0x3f4   :  { %1211 = vst.msk [vmem:[%s2467_s7 + $0x68] sm:$0xff] %vm134_vm1, %v1171_v16 }
 0x3f9   :  { %v1173_v19 = vpop.permute.xlu1 %1172 }
 0x3fa   :  { %1212 = vst.msk [vmem:[%s2467_s7 + $0x70] sm:$0xff] %vm134_vm1, %v1173_v19 }
 0x3fb   :  { %v1175_v40 = vpop.permute.xlu0 %1174 }
 0x3fc   :  { %1213 = vst.msk [vmem:[%s2467_s7 + $0x78] sm:$0xff] %vm134_vm1, %v1175_v40 }
 0x401   :  { %v1177_v9 = vpop.permute.xlu1 %1176 }
 0x402   :  { %1214 = vst.msk [vmem:[%s2467_s7 + $0x80] sm:$0xff] %vm134_vm1, %v1177_v9 }
 0x403   :  { %v1179_v34 = vpop.permute.xlu0 %1178 }
 0x404   :  { %1215 = vst.msk [vmem:[%s2467_s7 + $0x88] sm:$0xff] %vm134_vm1, %v1179_v34 }

// kernel: evoformer_lite_msa_seq.15
= control target key start
LH: loop header
LB: loop body
LE: loop exit
PB: predicated region body
PF: predicated region fallthrough
CT: control target
= control target key end

     0   :  { %v2314_v0 = vmov 0   ;;  %vm429_vm0 = vcmask 261120   ;;  %vm1899_vm1 = vcmask 257024   ;;  %s3640_s2 = inlined_call_operand.vmem [shape: f32[256,1], index: 2, kind: input, shape index: {}]   ;;  %s3641_s1 = inlined_call_operand.vmem [shape: f32[256,32], index: 1, kind: input, shape index: {}]   ;;  %s3642_s3 = inlined_call_operand.vmem [shape: f32[1,32], index: 3, kind: input, shape index: {}]   ;;  %s3643_s0 = inlined_call_operand.vmem [shape: f32[256,32], index: 0, kind: input, shape index: {}]   ;;  %s3644_s6 = inlined_call_operand.vmem [shape: bf16[32,128], index: 6, kind: input, shape index: {}]   ;;  %s3645_s4 = inlined_call_operand.vmem [shape: f32[1,32], index: 4, kind: input, shape index: {}]   ;;  %s3646_s5 = inlined_call_operand.vmem [shape: f32[1,32], index: 5, kind: input, shape index: {}]   ;;  %s3647_s8 = inlined_call_operand.vmem [shape: bf16[128,32], index: 8, kind: input, shape index: {}]   ;;  %s3648_s7 = inlined_call_operand.vmem [shape: f32[1,128], index: 7, kind: input, shape index: {}]   ;;  %s3649_s9 = inlined_call_operand.vmem [shape: f32[1,32], index: 9, kind: input, shape index: {}]   ;;  %s3650_s10 = inlined_call_operand.vmem [shape: bf16[256,32], index: 10, kind: output, shape index: {}]  }
   0x1   :  { %2175 = vset.pattern.permute.xlu1 %v2314_v0  ;;  %2174 = vset.pattern.permute.xlu0 %v2314_v0  ;;  %v103_v1 = vld [vmem:[%s3640_s2 + $0x10] sm:$0xff]  ;;  %v101_v2 = vld [vmem:[%s3640_s2] sm:$0xff]  ;;  %v104_v3 = vld [vmem:[%s3640_s2 + $0x18] sm:$0xff] }
   0x2   :  { %v135_v4 = vsub.f32 1.0, %v103_v1  ;;  %v133_v5 = vsub.f32 1.0, %v101_v2  ;;  %v102_v6 = vld [vmem:[%s3640_s2 + $0x8] sm:$0xff]  ;;  %v136_v7 = vsub.f32 1.0, %v104_v3  ;;  %v105_v10 = vld [vmem:[%s3640_s2 + $0x20] sm:$0xff]  ;;  %v108_v13 = vld [vmem:[%s3640_s2 + $0x38] sm:$0xff] }
   0x3   :  { %v134_v8 = vsub.f32 1.0, %v102_v6  ;;  %v106_v9 = vld [vmem:[%s3640_s2 + $0x28] sm:$0xff]  ;;  %v137_v12 = vsub.f32 1.0, %v105_v10  ;;  %v107_v14 = vld [vmem:[%s3640_s2 + $0x30] sm:$0xff]  ;;  %v140_v15 = vsub.f32 1.0, %v108_v13  ;;  %v109_v18 = vld [vmem:[%s3640_s2 + $0x40] sm:$0xff] }
   0x4   :  { %177 = vperm.xlu1 %2175, %v135_v4   ;;  %167 = vperm.xlu0 %2174, %v133_v5   ;;  %v138_v11 = vsub.f32 1.0, %v106_v9  ;;  %v139_v16 = vsub.f32 1.0, %v107_v14  ;;  %v110_v17 = vld [vmem:[%s3640_s2 + $0x48] sm:$0xff]  ;;  %v141_v20 = vsub.f32 1.0, %v109_v18  ;;  %v112_v21 = vld [vmem:[%s3640_s2 + $0x58] sm:$0xff]  ;;  %v111_v22 = vld [vmem:[%s3640_s2 + $0x50] sm:$0xff] }
   0x5   :  { %v142_v19 = vsub.f32 1.0, %v110_v17  ;;  %v144_v23 = vsub.f32 1.0, %v112_v21  ;;  %v143_v24 = vsub.f32 1.0, %v111_v22  ;;  %v114_v25 = vld [vmem:[%s3640_s2 + $0x68] sm:$0xff]  ;;  %v113_v26 = vld [vmem:[%s3640_s2 + $0x60] sm:$0xff]  ;;  %v116_v29 = vld [vmem:[%s3640_s2 + $0x78] sm:$0xff] }
   0x6   :  { %v146_v27 = vsub.f32 1.0, %v114_v25  ;;  %v145_v28 = vsub.f32 1.0, %v113_v26  ;;  %v115_v30 = vld [vmem:[%s3640_s2 + $0x70] sm:$0xff]  ;;  %v148_v31 = vsub.f32 1.0, %v116_v29  ;;  %v118_v33 = vld [vmem:[%s3640_s2 + $0x88] sm:$0xff]  ;;  %v117_v34 = vld [vmem:[%s3640_s2 + $0x80] sm:$0xff] }
   0x7   :  { %v147_v32 = vsub.f32 1.0, %v115_v30  ;;  %v150_v35 = vsub.f32 1.0, %v118_v33  ;;  %v149_v36 = vsub.f32 1.0, %v117_v34  ;;  %v120_v37 = vld [vmem:[%s3640_s2 + $0x98] sm:$0xff]  ;;  %v119_v38 = vld [vmem:[%s3640_s2 + $0x90] sm:$0xff]  ;;  %v122_v41 = vld [vmem:[%s3640_s2 + $0xa8] sm:$0xff] }
   0x8   :  { %182 = vperm.xlu1 %2175, %v136_v7   ;;  %172 = vperm.xlu0 %2174, %v134_v8   ;;  %v152_v39 = vsub.f32 1.0, %v120_v37  ;;  %v151_v40 = vsub.f32 1.0, %v119_v38  ;;  %v121_v42 = vld [vmem:[%s3640_s2 + $0xa0] sm:$0xff]  ;;  %v154_v43 = vsub.f32 1.0, %v122_v41  ;;  %v124_v45 = vld [vmem:[%s3640_s2 + $0xb8] sm:$0xff]  ;;  %v123_v46 = vld [vmem:[%s3640_s2 + $0xb0] sm:$0xff] }
   0x9   :  { %v153_v44 = vsub.f32 1.0, %v121_v42  ;;  %v156_v47 = vsub.f32 1.0, %v124_v45  ;;  %v155_v48 = vsub.f32 1.0, %v123_v46  ;;  %v126_v49 = vld [vmem:[%s3640_s2 + $0xc8] sm:$0xff]  ;;  %v125_v50 = vld [vmem:[%s3640_s2 + $0xc0] sm:$0xff]  ;;  %v128_v53 = vld [vmem:[%s3640_s2 + $0xd8] sm:$0xff] }
   0xa   :  { %v158_v51 = vsub.f32 1.0, %v126_v49  ;;  %v157_v52 = vsub.f32 1.0, %v125_v50  ;;  %v127_v54 = vld [vmem:[%s3640_s2 + $0xd0] sm:$0xff]  ;;  %v160_v55 = vsub.f32 1.0, %v128_v53  ;;  %v130_v57 = vld [vmem:[%s3640_s2 + $0xe8] sm:$0xff]  ;;  %v129_v58 = vld [vmem:[%s3640_s2 + $0xe0] sm:$0xff] }
   0xb   :  { %v159_v56 = vsub.f32 1.0, %v127_v54  ;;  %v162_v59 = vsub.f32 1.0, %v130_v57  ;;  %v161_v60 = vsub.f32 1.0, %v129_v58  ;;  %v132_v61 = vld [vmem:[%s3640_s2 + $0xf8] sm:$0xff]  ;;  %v131_v62 = vld [vmem:[%s3640_s2 + $0xf0] sm:$0xff]  ;;  %v69_v2 = vld [vmem:[%s3641_s1] sm:$0xff] }
   0xc   :  { %192 = vperm.xlu1 %2175, %v138_v11   ;;  %187 = vperm.xlu0 %2174, %v137_v12   ;;  %v164_v63 = vsub.f32 1.0, %v132_v61  ;;  %v163_v0 = vsub.f32 1.0, %v131_v62  ;;  %v71_v1 = vld [vmem:[%s3641_s1 + $0x10] sm:$0xff]  ;;  %v2475_v3 = vld [vmem:[%s3642_s3] ss:$0 sm:$0xff]  ;;  %v72_v10 = vld [vmem:[%s3641_s1 + $0x18] sm:$0xff] }
   0xd   :  { %v38_v6 = vld [vmem:[%s3643_s0 + $0x10] sm:$0xff]  ;;  %v36_v9 = vld [vmem:[%s3643_s0] sm:$0xff]  ;;  %v70_v11 = vld [vmem:[%s3641_s1 + $0x8] sm:$0xff] }
   0xe   :  { %v74_v21 = vld [vmem:[%s3641_s1 + $0x28] sm:$0xff]  ;;  %v73_v22 = vld [vmem:[%s3641_s1 + $0x20] sm:$0xff]  ;;  %v42_v46 = vld [vmem:[%s3643_s0 + $0x30] sm:$0xff] }
   0xf   :  { %v40_v34 = vld [vmem:[%s3643_s0 + $0x20] sm:$0xff]  ;;  %v80_v62 = vld [vmem:[%s3641_s1 + $0x58] sm:$0xff] }
  0x10   :  { %202 = vperm.xlu1 %2175, %v140_v15   ;;  %197 = vperm.xlu0 %2174, %v139_v16   ;;  %v44_v61 = vld [vmem:[%s3643_s0 + $0x40] sm:$0xff] }
  0x14   :  { %212 = vperm.xlu1 %2175, %v142_v19   ;;  %207 = vperm.xlu0 %2174, %v141_v20   ;;  %v37_v20 = vld [vmem:[%s3643_s0 + $0x8] sm:$0xff] }
  0x18   :  { %222 = vperm.xlu1 %2175, %v144_v23   ;;  %217 = vperm.xlu0 %2174, %v143_v24   ;;  %v39_v23 = vld [vmem:[%s3643_s0 + $0x18] sm:$0xff] }
  0x1c   :  { %232 = vperm.xlu1 %2175, %v146_v27   ;;  %227 = vperm.xlu0 %2174, %v145_v28  }
  0x20   :  { %242 = vperm.xlu1 %2175, %v148_v31   ;;  %237 = vperm.xlu0 %2174, %v147_v32  }
  0x24   :  { %252 = vperm.xlu1 %2175, %v150_v35   ;;  %247 = vperm.xlu0 %2174, %v149_v36   ;;  %v76_v35 = vld [vmem:[%s3641_s1 + $0x38] sm:$0xff]  ;;  %v75_v36 = vld [vmem:[%s3641_s1 + $0x30] sm:$0xff] }
  0x28   :  { %262 = vperm.xlu1 %2175, %v152_v39   ;;  %257 = vperm.xlu0 %2174, %v151_v40   ;;  %v41_v40 = vld [vmem:[%s3643_s0 + $0x28] sm:$0xff] }
  0x2c   :  { %272 = vperm.xlu1 %2175, %v154_v43   ;;  %267 = vperm.xlu0 %2174, %v153_v44  }
  0x30   :  { %282 = vperm.xlu1 %2175, %v156_v47   ;;  %277 = vperm.xlu0 %2174, %v155_v48   ;;  %v78_v47 = vld [vmem:[%s3641_s1 + $0x48] sm:$0xff]  ;;  %v77_v48 = vld [vmem:[%s3641_s1 + $0x40] sm:$0xff] }
  0x34   :  { %292 = vperm.xlu1 %2175, %v158_v51   ;;  %287 = vperm.xlu0 %2174, %v157_v52   ;;  %v43_v51 = vld [vmem:[%s3643_s0 + $0x38] sm:$0xff] }
  0x38   :  { %302 = vperm.xlu1 %2175, %v160_v55   ;;  %297 = vperm.xlu0 %2174, %v159_v56  }
  0x3c   :  { %312 = vperm.xlu1 %2175, %v162_v59   ;;  %307 = vperm.xlu0 %2174, %v161_v60  }
  0x40   :  { %322 = vperm.xlu1 %2175, %v164_v63   ;;  %317 = vperm.xlu0 %2174, %v163_v0   ;;  %v79_v63 = vld [vmem:[%s3641_s1 + $0x50] sm:$0xff] }
  0x83   :  { %v178_v4 = vpop.permute.xlu1 %177  ;;  %v168_v5 = vpop.permute.xlu0 %167 }
  0x84   :  { %v327_v7 = vmul.f32 %v178_v4, %v71_v1  ;;  %v325_v8 = vmul.f32 %v168_v5, %v69_v2  ;;  %v45_v5 = vld [vmem:[%s3643_s0 + $0x48] sm:$0xff] }
  0x86   :  { %v365_v12 = vmul.f32 %v2475_v3, %v327_v7  ;;  %v363_v13 = vmul.f32 %v2475_v3, %v325_v8 }
  0x87   :  { %v183_v14 = vpop.permute.xlu1 %182  ;;  %v173_v15 = vpop.permute.xlu0 %172 }
  0x88   :  { %v2491_v16 = vadd.f32 %v365_v12, %v38_v6  ;;  %v2493_v17 = vadd.f32 %v363_v13, %v36_v9  ;;  %v328_v18 = vmul.f32 %v183_v14, %v72_v10  ;;  %v326_v19 = vmul.f32 %v173_v15, %v70_v11  ;;  %v46_v11 = vld [vmem:[%s3643_s0 + $0x50] sm:$0xff]  ;;  %v82_v12 = vld [vmem:[%s3641_s1 + $0x68] sm:$0xff]  ;;  %v81_v13 = vld [vmem:[%s3641_s1 + $0x60] sm:$0xff] }
  0x8a   :  { %v366_v24 = vmul.f32 %v2475_v3, %v328_v18  ;;  %v364_v25 = vmul.f32 %v2475_v3, %v326_v19  ;;  %v430_v26 = vsel %vm429_vm0, %v2493_v17, 0.0  ;;  %v436_v32 = vsel %vm429_vm0, %v2491_v16, 0.0  ;;  %v47_v18 = vld [vmem:[%s3643_s0 + $0x58] sm:$0xff] }
  0x8b   :  { %v193_v27 = vpop.permute.xlu1 %192  ;;  %v188_v28 = vpop.permute.xlu0 %187  ;;  %431 = vadd.xlane.f32.xlu0 %v430_v26 }
  0x8c   :  { %v2511_v29 = vadd.f32 %v364_v25, %v37_v20  ;;  %v330_v30 = vmul.f32 %v193_v27, %v74_v21  ;;  %v329_v31 = vmul.f32 %v188_v28, %v73_v22  ;;  %v2515_v33 = vadd.f32 %v366_v24, %v39_v23  ;;  %v48_v28 = vld [vmem:[%s3643_s0 + $0x60] sm:$0xff] }
  0x8e   :  { %v368_v37 = vmul.f32 %v2475_v3, %v330_v30  ;;  %v367_v38 = vmul.f32 %v2475_v3, %v329_v31  ;;  %v433_v39 = vsel %vm429_vm0, %v2511_v29, 0.0  ;;  %v439_v49 = vsel %vm429_vm0, %v2515_v33, 0.0  ;;  %v84_v30 = vld [vmem:[%s3641_s1 + $0x78] sm:$0xff]  ;;  %v83_v31 = vld [vmem:[%s3641_s1 + $0x70] sm:$0xff] }
  0x8f   :  { %v203_v41 = vpop.permute.xlu1 %202  ;;  %v198_v42 = vpop.permute.xlu0 %197  ;;  %434 = vadd.xlane.f32.xlu1 %v433_v39  ;;  %437 = vadd.xlane.f32.xlu0 %v436_v32 }
  0x90   :  { %v2533_v43 = vadd.f32 %v367_v38, %v40_v34  ;;  %v332_v44 = vmul.f32 %v203_v41, %v76_v35  ;;  %v331_v45 = vmul.f32 %v198_v42, %v75_v36  ;;  %v2546_v50 = vadd.f32 %v368_v37, %v41_v40  ;;  %v49_v37 = vld [vmem:[%s3643_s0 + $0x68] sm:$0xff] }
  0x92   :  { %v370_v52 = vmul.f32 %v2475_v3, %v332_v44  ;;  %v369_v53 = vmul.f32 %v2475_v3, %v331_v45  ;;  %v442_v54 = vsel %vm429_vm0, %v2533_v43, 0.0  ;;  %v445_v4 = vsel %vm429_vm0, %v2546_v50, 0.0  ;;  %v50_v44 = vld [vmem:[%s3643_s0 + $0x70] sm:$0xff]  ;;  %v86_v45 = vld [vmem:[%s3641_s1 + $0x88] sm:$0xff] }
  0x93   :  { %v213_v55 = vpop.permute.xlu1 %212  ;;  %v208_v56 = vpop.permute.xlu0 %207  ;;  %443 = vadd.xlane.f32.xlu1 %v442_v54  ;;  %440 = vadd.xlane.f32.xlu0 %v439_v49  ;;  %v51_v49 = vld [vmem:[%s3643_s0 + $0x78] sm:$0xff] }
  0x94   :  { %v2555_v57 = vadd.f32 %v369_v53, %v42_v46  ;;  %v334_v58 = vmul.f32 %v213_v55, %v78_v47  ;;  %v333_v59 = vmul.f32 %v208_v56, %v77_v48  ;;  %v2557_v60 = vadd.f32 %v370_v52, %v43_v51  ;;  %v85_v46 = vld [vmem:[%s3641_s1 + $0x80] sm:$0xff] }
  0x96   :  { %v372_v0 = vmul.f32 %v2475_v3, %v334_v58  ;;  %v371_v1 = vmul.f32 %v2475_v3, %v333_v59  ;;  %v448_v2 = vsel %vm429_vm0, %v2555_v57, 0.0  ;;  %v451_v14 = vsel %vm429_vm0, %v2557_v60, 0.0 }
  0x97   :  { %v223_v6 = vpop.permute.xlu1 %222  ;;  %v218_v7 = vpop.permute.xlu0 %217  ;;  %449 = vadd.xlane.f32.xlu1 %v448_v2  ;;  %446 = vadd.xlane.f32.xlu0 %v445_v4 }
  0x98   :  { %v2577_v8 = vadd.f32 %v371_v1, %v44_v61  ;;  %v336_v9 = vmul.f32 %v223_v6, %v80_v62  ;;  %v335_v10 = vmul.f32 %v218_v7, %v79_v63  ;;  %v2590_v15 = vadd.f32 %v372_v0, %v45_v5  ;;  %v52_v62 = vld [vmem:[%s3643_s0 + $0x80] sm:$0xff]  ;;  %v88_v63 = vld [vmem:[%s3641_s1 + $0x98] sm:$0xff]  ;;  %v87_v0 = vld [vmem:[%s3641_s1 + $0x90] sm:$0xff] }
  0x99   :  { %v53_v6 = vld [vmem:[%s3643_s0 + $0x88] sm:$0xff] }
  0x9a   :  { %3673 = vst [vmem:[#allocation2_spill] sm:$0xff] %v2590_v15  ;;  %v374_v19 = vmul.f32 %v2475_v3, %v336_v9  ;;  %v373_v20 = vmul.f32 %v2475_v3, %v335_v10  ;;  %v454_v21 = vsel %vm429_vm0, %v2577_v8, 0.0  ;;  %v457_v36 = vsel %vm429_vm0, %v2590_v15, 0.0 }
  0x9b   :  { %v233_v22 = vpop.permute.xlu1 %232  ;;  %v228_v23 = vpop.permute.xlu0 %227  ;;  %455 = vadd.xlane.f32.xlu1 %v454_v21  ;;  %452 = vadd.xlane.f32.xlu0 %v451_v14  ;;  %v90_v14 = vld [vmem:[%s3641_s1 + $0xa8] sm:$0xff]  ;;  %v55_v21 = vld [vmem:[%s3643_s0 + $0x98] sm:$0xff] }
  0x9c   :  { %v2599_v24 = vadd.f32 %v373_v20, %v46_v11  ;;  %v338_v25 = vmul.f32 %v233_v22, %v82_v12  ;;  %v337_v26 = vmul.f32 %v228_v23, %v81_v13  ;;  %v2601_v27 = vadd.f32 %v374_v19, %v47_v18  ;;  %v54_v13 = vld [vmem:[%s3643_s0 + $0x90] sm:$0xff]  ;;  %v89_v18 = vld [vmem:[%s3641_s1 + $0xa0] sm:$0xff] }
  0x9e   :  { %3674 = vst [vmem:[#allocation3_spill] sm:$0xff] %v2601_v27  ;;  %v376_v32 = vmul.f32 %v2475_v3, %v338_v25  ;;  %v375_v34 = vmul.f32 %v2475_v3, %v337_v26  ;;  %v460_v35 = vsel %vm429_vm0, %v2599_v24, 0.0  ;;  %v463_v47 = vsel %vm429_vm0, %v2601_v27, 0.0 }
  0x9f   :  { %v243_v38 = vpop.permute.xlu1 %242  ;;  %v238_v39 = vpop.permute.xlu0 %237  ;;  %461 = vadd.xlane.f32.xlu1 %v460_v35  ;;  %458 = vadd.xlane.f32.xlu0 %v457_v36  ;;  %v56_v35 = vld [vmem:[%s3643_s0 + $0xa0] sm:$0xff]  ;;  %v92_v36 = vld [vmem:[%s3641_s1 + $0xb8] sm:$0xff] }
  0xa0   :  { %v2621_v40 = vadd.f32 %v375_v34, %v48_v28  ;;  %v340_v41 = vmul.f32 %v243_v38, %v84_v30  ;;  %v339_v42 = vmul.f32 %v238_v39, %v83_v31  ;;  %v2634_v48 = vadd.f32 %v376_v32, %v49_v37  ;;  %v91_v37 = vld [vmem:[%s3641_s1 + $0xb0] sm:$0xff] }
  0xa2   :  { %3675 = vst [vmem:[#allocation4_spill] sm:$0xff] %v2621_v40  ;;  %3676 = vst [vmem:[#allocation5_spill] sm:$0xff] %v2634_v48  ;;  %v378_v51 = vmul.f32 %v2475_v3, %v340_v41  ;;  %v377_v52 = vmul.f32 %v2475_v3, %v339_v42  ;;  %v466_v53 = vsel %vm429_vm0, %v2621_v40, 0.0  ;;  %v469_v5 = vsel %vm429_vm0, %v2634_v48, 0.0 }
  0xa3   :  { %v253_v54 = vpop.permute.xlu1 %252  ;;  %v248_v55 = vpop.permute.xlu0 %247  ;;  %467 = vadd.xlane.f32.xlu1 %v466_v53  ;;  %464 = vadd.xlane.f32.xlu0 %v463_v47  ;;  %v94_v53 = vld [vmem:[%s3641_s1 + $0xc8] sm:$0xff] }
  0xa4   :  { %v2643_v56 = vadd.f32 %v377_v52, %v50_v44  ;;  %v342_v58 = vmul.f32 %v253_v54, %v86_v45  ;;  %v341_v59 = vmul.f32 %v248_v55, %v85_v46  ;;  %v2645_v61 = vadd.f32 %v378_v51, %v51_v49  ;;  %v57_v44 = vld [vmem:[%s3643_s0 + $0xa8] sm:$0xff]  ;;  %v58_v52 = vld [vmem:[%s3643_s0 + $0xb0] sm:$0xff]  ;;  %v93_v54 = vld [vmem:[%s3641_s1 + $0xc0] sm:$0xff] }
  0xa6   :  { %3677 = vst [vmem:[#allocation6_spill] sm:$0xff] %v2643_v56  ;;  %3678 = vst [vmem:[#allocation7_spill] sm:$0xff] %v2645_v61  ;;  %v380_v1 = vmul.f32 %v2475_v3, %v342_v58  ;;  %v379_v2 = vmul.f32 %v2475_v3, %v341_v59  ;;  %v472_v4 = vsel %vm429_vm0, %v2643_v56, 0.0  ;;  %v475_v19 = vsel %vm429_vm0, %v2645_v61, 0.0  ;;  %v59_v59 = vld [vmem:[%s3643_s0 + $0xb8] sm:$0xff] }
  0xa7   :  { %v263_v7 = vpop.permute.xlu1 %262  ;;  %v258_v9 = vpop.permute.xlu0 %257  ;;  %473 = vadd.xlane.f32.xlu1 %v472_v4  ;;  %470 = vadd.xlane.f32.xlu0 %v469_v5 }
  0xa8   :  { %v2665_v10 = vadd.f32 %v379_v2, %v52_v62  ;;  %v344_v11 = vmul.f32 %v263_v7, %v88_v63  ;;  %v343_v12 = vmul.f32 %v258_v9, %v87_v0  ;;  %v2678_v20 = vadd.f32 %v380_v1, %v53_v6  ;;  %v60_v9 = vld [vmem:[%s3643_s0 + $0xc0] sm:$0xff] }
  0xaa   :  { %3679 = vst [vmem:[#allocation8_spill] sm:$0xff] %v2665_v10  ;;  %3680 = vst [vmem:[#allocation9_spill] sm:$0xff] %v2678_v20  ;;  %v382_v22 = vmul.f32 %v2475_v3, %v344_v11  ;;  %v381_v23 = vmul.f32 %v2475_v3, %v343_v12  ;;  %v478_v25 = vsel %vm429_vm0, %v2665_v10, 0.0  ;;  %v481_v42 = vsel %vm429_vm0, %v2678_v20, 0.0  ;;  %v96_v11 = vld [vmem:[%s3641_s1 + $0xd8] sm:$0xff]  ;;  %v95_v12 = vld [vmem:[%s3641_s1 + $0xd0] sm:$0xff] }
  0xab   :  { %v273_v26 = vpop.permute.xlu1 %272  ;;  %v268_v28 = vpop.permute.xlu0 %267  ;;  %479 = vadd.xlane.f32.xlu1 %v478_v25  ;;  %476 = vadd.xlane.f32.xlu0 %v475_v19 }
  0xac   :  { %v2687_v30 = vadd.f32 %v381_v23, %v54_v13  ;;  %v346_v31 = vmul.f32 %v273_v26, %v90_v14  ;;  %v345_v32 = vmul.f32 %v268_v28, %v89_v18  ;;  %v2689_v34 = vadd.f32 %v382_v22, %v55_v21  ;;  %v61_v21 = vld [vmem:[%s3643_s0 + $0xc8] sm:$0xff] }
  0xae   :  { %3681 = vst [vmem:[#allocation10_spill] sm:$0xff] %v2687_v30  ;;  %3682 = vst [vmem:[#allocation11_spill] sm:$0xff] %v2689_v34  ;;  %v384_v38 = vmul.f32 %v2475_v3, %v346_v31  ;;  %v383_v39 = vmul.f32 %v2475_v3, %v345_v32  ;;  %v484_v41 = vsel %vm429_vm0, %v2687_v30, 0.0  ;;  %v487_v55 = vsel %vm429_vm0, %v2689_v34, 0.0  ;;  %v62_v31 = vld [vmem:[%s3643_s0 + $0xd0] sm:$0xff]  ;;  %v98_v32 = vld [vmem:[%s3641_s1 + $0xe8] sm:$0xff] }
  0xaf   :  { %v283_v45 = vpop.permute.xlu1 %282  ;;  %v278_v46 = vpop.permute.xlu0 %277  ;;  %485 = vadd.xlane.f32.xlu1 %v484_v41  ;;  %482 = vadd.xlane.f32.xlu0 %v481_v42 }
  0xb0   :  { %v2709_v47 = vadd.f32 %v383_v39, %v56_v35  ;;  %v348_v49 = vmul.f32 %v283_v45, %v92_v36  ;;  %v347_v51 = vmul.f32 %v278_v46, %v91_v37  ;;  %v2722_v58 = vadd.f32 %v384_v38, %v57_v44  ;;  %v97_v35 = vld [vmem:[%s3641_s1 + $0xe0] sm:$0xff]  ;;  %v63_v38 = vld [vmem:[%s3643_s0 + $0xd8] sm:$0xff] }
  0xb2   :  { %3683 = vst [vmem:[#allocation12_spill] sm:$0xff] %v2709_v47  ;;  %3684 = vst [vmem:[#allocation13_spill] sm:$0xff] %v2722_v58  ;;  %v386_v62 = vmul.f32 %v2475_v3, %v348_v49  ;;  %v385_v63 = vmul.f32 %v2475_v3, %v347_v51  ;;  %v490_v0 = vsel %vm429_vm0, %v2709_v47, 0.0  ;;  %v493_v19 = vsel %vm429_vm0, %v2722_v58, 0.0 }
  0xb3   :  { %v293_v1 = vpop.permute.xlu1 %292  ;;  %v288_v2 = vpop.permute.xlu0 %287  ;;  %491 = vadd.xlane.f32.xlu1 %v490_v0  ;;  %488 = vadd.xlane.f32.xlu0 %v487_v55  ;;  %v99_v55 = vld [vmem:[%s3641_s1 + $0xf0] sm:$0xff] }
  0xb4   :  { %v2731_v4 = vadd.f32 %v385_v63, %v58_v52  ;;  %v350_v5 = vmul.f32 %v293_v1, %v94_v53  ;;  %v349_v6 = vmul.f32 %v288_v2, %v93_v54  ;;  %v2733_v7 = vadd.f32 %v386_v62, %v59_v59  ;;  %v64_v53 = vld [vmem:[%s3643_s0 + $0xe0] sm:$0xff]  ;;  %v100_v54 = vld [vmem:[%s3641_s1 + $0xf8] sm:$0xff]  ;;  %v65_v1 = vld [vmem:[%s3643_s0 + $0xe8] sm:$0xff] }
  0xb6   :  { %3685 = vst [vmem:[#allocation14_spill] sm:$0xff] %v2731_v4  ;;  %3686 = vst [vmem:[#allocation15_spill] sm:$0xff] %v2733_v7  ;;  %v388_v13 = vmul.f32 %v2475_v3, %v350_v5  ;;  %v387_v14 = vmul.f32 %v2475_v3, %v349_v6  ;;  %v496_v18 = vsel %vm429_vm0, %v2731_v4, 0.0  ;;  %v499_v36 = vsel %vm429_vm0, %v2733_v7, 0.0 }
  0xb7   :  { %v303_v22 = vpop.permute.xlu1 %302  ;;  %v298_v23 = vpop.permute.xlu0 %297  ;;  %497 = vadd.xlane.f32.xlu1 %v496_v18  ;;  %494 = vadd.xlane.f32.xlu0 %v493_v19 }
  0xb8   :  { %v2753_v25 = vadd.f32 %v387_v14, %v60_v9  ;;  %v352_v26 = vmul.f32 %v303_v22, %v96_v11  ;;  %v351_v28 = vmul.f32 %v298_v23, %v95_v12  ;;  %v2766_v37 = vadd.f32 %v388_v13, %v61_v21  ;;  %v67_v12 = vld [vmem:[%s3643_s0 + $0xf8] sm:$0xff]  ;;  %v66_v13 = vld [vmem:[%s3643_s0 + $0xf0] sm:$0xff] }
  0xba   :  { %3687 = vst [vmem:[#allocation16_spill] sm:$0xff] %v2753_v25  ;;  %3688 = vst [vmem:[#allocation17_spill] sm:$0xff] %v2766_v37  ;;  %v390_v39 = vmul.f32 %v2475_v3, %v352_v26  ;;  %v389_v41 = vmul.f32 %v2475_v3, %v351_v28  ;;  %v502_v42 = vsel %vm429_vm0, %v2753_v25, 0.0  ;;  %v505_v0 = vsel %vm429_vm0, %v2766_v37, 0.0 }
  0xbb   :  { %v313_v44 = vpop.permute.xlu1 %312  ;;  %v308_v45 = vpop.permute.xlu0 %307  ;;  %503 = vadd.xlane.f32.xlu1 %v502_v42  ;;  %500 = vadd.xlane.f32.xlu0 %v499_v36 }
  0xbc   :  { %v2775_v46 = vadd.f32 %v389_v41, %v62_v31  ;;  %v354_v49 = vmul.f32 %v313_v44, %v98_v32  ;;  %v353_v51 = vmul.f32 %v308_v45, %v97_v35  ;;  %v2777_v52 = vadd.f32 %v390_v39, %v63_v38 }
  0xbe   :  { %3689 = vst [vmem:[#allocation18_spill] sm:$0xff] %v2775_v46  ;;  %3690 = vst [vmem:[#allocation19_spill] sm:$0xff] %v2777_v52  ;;  %v392_v59 = vmul.f32 %v2475_v3, %v354_v49  ;;  %v391_v62 = vmul.f32 %v2475_v3, %v353_v51  ;;  %v508_v63 = vsel %vm429_vm0, %v2775_v46, 0.0  ;;  %v511_v14 = vsel %vm429_vm0, %v2777_v52, 0.0 }
  0xbf   :  { %v323_v2 = vpop.permute.xlu1 %322  ;;  %v318_v5 = vpop.permute.xlu0 %317  ;;  %509 = vadd.xlane.f32.xlu1 %v508_v63  ;;  %506 = vadd.xlane.f32.xlu0 %v505_v0 }
  0xc0   :  { %v2797_v6 = vadd.f32 %v391_v62, %v64_v53  ;;  %v356_v9 = vmul.f32 %v323_v2, %v100_v54  ;;  %v355_v11 = vmul.f32 %v318_v5, %v99_v55  ;;  %v2807_v18 = vadd.f32 %v392_v59, %v65_v1 }
  0xc2   :  { %3691 = vst [vmem:[#allocation20_spill] sm:$0xff] %v2797_v6  ;;  %3692 = vst [vmem:[#allocation21_spill] sm:$0xff] %v2807_v18  ;;  %v394_v19 = vmul.f32 %v2475_v3, %v356_v9  ;;  %v393_v21 = vmul.f32 %v2475_v3, %v355_v11  ;;  %v514_v22 = vsel %vm429_vm0, %v2797_v6, 0.0  ;;  %v517_v31 = vsel %vm429_vm0, %v2807_v18, 0.0 }
  0xc3   :  { %515 = vadd.xlane.f32.xlu1 %v514_v22  ;;  %512 = vadd.xlane.f32.xlu0 %v511_v14 }
  0xc4   :  { %v2813_v23 = vadd.f32 %v394_v19, %v67_v12  ;;  %v2815_v26 = vadd.f32 %v393_v21, %v66_v13 }
  0xc6   :  { %3693 = vst [vmem:[#allocation22_spill] sm:$0xff] %v2813_v23  ;;  %3694 = vst [vmem:[#allocation23_spill] sm:$0xff] %v2815_v26  ;;  %v520_v28 = vsel %vm429_vm0, %v2815_v26, 0.0  ;;  %v523_v3 = vsel %vm429_vm0, %v2813_v23, 0.0 }
  0xc7   :  { %521 = vadd.xlane.f32.xlu1 %v520_v28  ;;  %518 = vadd.xlane.f32.xlu0 %v517_v31 }
  0xcb   :  { %524 = vadd.xlane.f32.xlu0 %v523_v3 }
 0x118   :  { %v432_v32 = vpop.xlane.xlu0 %431 }
 0x119   :  { %v527_v35 = vmul.f32 0.03125, %v432_v32 }
 0x11b   :  { %v2824_v36 = vsub.f32 %v2493_v17, %v527_v35 }
 0x11c   :  { %v435_v38 = vpop.xlane.xlu1 %434  ;;  %v438_v39 = vpop.xlane.xlu0 %437 }
 0x11d   :  { %v528_v41 = vmul.f32 0.03125, %v435_v38  ;;  %v529_v42 = vmul.f32 0.03125, %v438_v39  ;;  %v591_v44 = vmul.f32 %v2824_v36, %v2824_v36 }
 0x11f   :  { %v2829_v45 = vsub.f32 %v2511_v29, %v528_v41  ;;  %v2832_v49 = vsub.f32 %v2491_v16, %v529_v42  ;;  %v623_v51 = vsel %vm429_vm0, %v591_v44, 0.0 }
 0x120   :  { %v444_v53 = vpop.xlane.xlu1 %443  ;;  %624 = vadd.xlane.f32.xlu1 %v623_v51  ;;  %v441_v54 = vpop.xlane.xlu0 %440 }
 0x121   :  { %v531_v55 = vmul.f32 0.03125, %v444_v53  ;;  %v530_v59 = vmul.f32 0.03125, %v441_v54  ;;  %v592_v62 = vmul.f32 %v2829_v45, %v2829_v45  ;;  %v593_v63 = vmul.f32 %v2832_v49, %v2832_v49 }
 0x123   :  { %v2840_v0 = vsub.f32 %v2533_v43, %v531_v55  ;;  %v2843_v1 = vsub.f32 %v2515_v33, %v530_v59  ;;  %v626_v2 = vsel %vm429_vm0, %v592_v62, 0.0  ;;  %v629_v5 = vsel %vm429_vm0, %v593_v63, 0.0 }
 0x124   :  { %v450_v9 = vpop.xlane.xlu1 %449  ;;  %627 = vadd.xlane.f32.xlu0 %v626_v2  ;;  %630 = vadd.xlane.f32.xlu1 %v629_v5  ;;  %v447_v11 = vpop.xlane.xlu0 %446 }
 0x125   :  { %v533_v12 = vmul.f32 0.03125, %v450_v9  ;;  %v532_v13 = vmul.f32 0.03125, %v447_v11  ;;  %v595_v14 = vmul.f32 %v2840_v0, %v2840_v0  ;;  %v594_v19 = vmul.f32 %v2843_v1, %v2843_v1 }
 0x127   :  { %v2852_v21 = vsub.f32 %v2555_v57, %v533_v12  ;;  %v2855_v22 = vsub.f32 %v2546_v50, %v532_v13  ;;  %v635_v28 = vsel %vm429_vm0, %v595_v14, 0.0  ;;  %v632_v31 = vsel %vm429_vm0, %v594_v19, 0.0 }
 0x128   :  { %v456_v3 = vpop.xlane.xlu1 %455  ;;  %636 = vadd.xlane.f32.xlu1 %v635_v28  ;;  %633 = vadd.xlane.f32.xlu0 %v632_v31  ;;  %v453_v32 = vpop.xlane.xlu0 %452 }
 0x129   :  { %v535_v35 = vmul.f32 0.03125, %v456_v3  ;;  %v534_v38 = vmul.f32 0.03125, %v453_v32  ;;  %v597_v39 = vmul.f32 %v2852_v21, %v2852_v21  ;;  %v596_v41 = vmul.f32 %v2855_v22, %v2855_v22 }
 0x12b   :  { %v2864_v42 = vsub.f32 %v2577_v8, %v535_v35  ;;  %v2867_v44 = vsub.f32 %v2557_v60, %v534_v38  ;;  %v641_v51 = vsel %vm429_vm0, %v597_v39, 0.0  ;;  %v638_v53 = vsel %vm429_vm0, %v596_v41, 0.0 }
 0x12c   :  { %v462_v54 = vpop.xlane.xlu1 %461  ;;  %642 = vadd.xlane.f32.xlu1 %v641_v51  ;;  %639 = vadd.xlane.f32.xlu0 %v638_v53  ;;  %v459_v55 = vpop.xlane.xlu0 %458 }
 0x12d   :  { %v537_v59 = vmul.f32 0.03125, %v462_v54  ;;  %v536_v62 = vmul.f32 0.03125, %v459_v55  ;;  %v599_v63 = vmul.f32 %v2864_v42, %v2864_v42  ;;  %v598_v2 = vmul.f32 %v2867_v44, %v2867_v44 }
 0x12f   :  { %v2876_v5 = vsub.f32 %v2599_v24, %v537_v59  ;;  %v2879_v9 = vsub.f32 %v2590_v15, %v536_v62  ;;  %v647_v11 = vsel %vm429_vm0, %v599_v63, 0.0  ;;  %v644_v12 = vsel %vm429_vm0, %v598_v2, 0.0 }
 0x130   :  { %v468_v13 = vpop.xlane.xlu1 %467  ;;  %648 = vadd.xlane.f32.xlu1 %v647_v11  ;;  %645 = vadd.xlane.f32.xlu0 %v644_v12  ;;  %v465_v14 = vpop.xlane.xlu0 %464 }
 0x131   :  { %v539_v19 = vmul.f32 0.03125, %v468_v13  ;;  %v538_v28 = vmul.f32 0.03125, %v465_v14  ;;  %v601_v31 = vmul.f32 %v2876_v5, %v2876_v5  ;;  %v600_v3 = vmul.f32 %v2879_v9, %v2879_v9 }
 0x133   :  { %v2888_v32 = vsub.f32 %v2621_v40, %v539_v19  ;;  %v2891_v35 = vsub.f32 %v2601_v27, %v538_v28  ;;  %v653_v38 = vsel %vm429_vm0, %v601_v31, 0.0  ;;  %v650_v39 = vsel %vm429_vm0, %v600_v3, 0.0 }
 0x134   :  { %v474_v41 = vpop.xlane.xlu1 %473  ;;  %654 = vadd.xlane.f32.xlu1 %v653_v38  ;;  %651 = vadd.xlane.f32.xlu0 %v650_v39  ;;  %v471_v51 = vpop.xlane.xlu0 %470 }
 0x135   :  { %v541_v53 = vmul.f32 0.03125, %v474_v41  ;;  %v540_v54 = vmul.f32 0.03125, %v471_v51  ;;  %v603_v55 = vmul.f32 %v2888_v32, %v2888_v32  ;;  %v602_v59 = vmul.f32 %v2891_v35, %v2891_v35 }
 0x137   :  { %v2900_v62 = vsub.f32 %v2643_v56, %v541_v53  ;;  %v2903_v63 = vsub.f32 %v2634_v48, %v540_v54  ;;  %v659_v2 = vsel %vm429_vm0, %v603_v55, 0.0  ;;  %v656_v11 = vsel %vm429_vm0, %v602_v59, 0.0 }
 0x138   :  { %v480_v12 = vpop.xlane.xlu1 %479  ;;  %660 = vadd.xlane.f32.xlu1 %v659_v2  ;;  %657 = vadd.xlane.f32.xlu0 %v656_v11  ;;  %v477_v13 = vpop.xlane.xlu0 %476 }
 0x139   :  { %v543_v14 = vmul.f32 0.03125, %v480_v12  ;;  %v542_v19 = vmul.f32 0.03125, %v477_v13  ;;  %v605_v28 = vmul.f32 %v2900_v62, %v2900_v62  ;;  %v604_v31 = vmul.f32 %v2903_v63, %v2903_v63 }
 0x13b   :  { %v2912_v3 = vsub.f32 %v2665_v10, %v543_v14  ;;  %v2915_v38 = vsub.f32 %v2645_v61, %v542_v19  ;;  %v665_v39 = vsel %vm429_vm0, %v605_v28, 0.0  ;;  %v662_v41 = vsel %vm429_vm0, %v604_v31, 0.0 }
 0x13c   :  { %v486_v51 = vpop.xlane.xlu1 %485  ;;  %666 = vadd.xlane.f32.xlu1 %v665_v39  ;;  %663 = vadd.xlane.f32.xlu0 %v662_v41  ;;  %v483_v53 = vpop.xlane.xlu0 %482 }
 0x13d   :  { %v545_v54 = vmul.f32 0.03125, %v486_v51  ;;  %v544_v55 = vmul.f32 0.03125, %v483_v53  ;;  %v607_v59 = vmul.f32 %v2912_v3, %v2912_v3  ;;  %v606_v2 = vmul.f32 %v2915_v38, %v2915_v38 }
 0x13f   :  { %v2924_v11 = vsub.f32 %v2687_v30, %v545_v54  ;;  %v2927_v12 = vsub.f32 %v2678_v20, %v544_v55  ;;  %v671_v13 = vsel %vm429_vm0, %v607_v59, 0.0  ;;  %v668_v14 = vsel %vm429_vm0, %v606_v2, 0.0 }
 0x140   :  { %v492_v19 = vpop.xlane.xlu1 %491  ;;  %672 = vadd.xlane.f32.xlu1 %v671_v13  ;;  %669 = vadd.xlane.f32.xlu0 %v668_v14  ;;  %v489_v28 = vpop.xlane.xlu0 %488  ;;  %v2176_v14 = vld [vmem:[%s3644_s6] sm:$0xff]  }
 0x141   :  { %v547_v31 = vmul.f32 0.03125, %v492_v19  ;;  %v546_v39 = vmul.f32 0.03125, %v489_v28  ;;  %v609_v41 = vmul.f32 %v2924_v11, %v2924_v11  ;;  %v608_v51 = vmul.f32 %v2927_v12, %v2927_v12  ;;  %2073 = vmatprep.subr.bf16.mxu0 %v2176_v14 }
 0x142   :  { %2074 = vmatpush3.bf16.msra.mxu0 %v2176_v14 }
 0x143   :  { %v2936_v53 = vsub.f32 %v2709_v47, %v547_v31  ;;  %v2939_v54 = vsub.f32 %v2689_v34, %v546_v39  ;;  %v677_v55 = vsel %vm429_vm0, %v609_v41, 0.0  ;;  %v674_v59 = vsel %vm429_vm0, %v608_v51, 0.0  ;;  %v2177_v47 = vld [vmem:[%s3644_s6 + $0x8] sm:$0xff]  }
 0x144   :  { %v498_v2 = vpop.xlane.xlu1 %497  ;;  %678 = vadd.xlane.f32.xlu1 %v677_v55  ;;  %675 = vadd.xlane.f32.xlu0 %v674_v59  ;;  %v495_v13 = vpop.xlane.xlu0 %494 }
 0x145   :  { %v549_v19 = vmul.f32 0.03125, %v498_v2  ;;  %v548_v28 = vmul.f32 0.03125, %v495_v13  ;;  %v611_v31 = vmul.f32 %v2936_v53, %v2936_v53  ;;  %v610_v39 = vmul.f32 %v2939_v54, %v2939_v54  ;;  %2075 = vmatprep.subr.bf16.mxu0 %v2177_v47 }
 0x146   :  { %2076 = vmatpush3.bf16.msra.mxu0 %v2177_v47 }
 0x147   :  { %v2951_v41 = vsub.f32 %v2731_v4, %v549_v19  ;;  %v2954_v51 = vsub.f32 %v2722_v58, %v548_v28  ;;  %v683_v55 = vsel %vm429_vm0, %v611_v31, 0.0  ;;  %v680_v59 = vsel %vm429_vm0, %v610_v39, 0.0 }
 0x148   :  { %v504_v2 = vpop.xlane.xlu1 %503  ;;  %684 = vadd.xlane.f32.xlu1 %v683_v55  ;;  %681 = vadd.xlane.f32.xlu0 %v680_v59  ;;  %v501_v13 = vpop.xlane.xlu0 %500 }
 0x149   :  { %v551_v20 = vmul.f32 0.03125, %v504_v2  ;;  %v550_v34 = vmul.f32 0.03125, %v501_v13  ;;  %v613_v19 = vmul.f32 %v2951_v41, %v2951_v41  ;;  %v612_v28 = vmul.f32 %v2954_v51, %v2954_v51 }
 0x14b   :  { %v2966_v31 = vsub.f32 %v2753_v25, %v551_v20  ;;  %v2969_v14 = vsub.f32 %v2733_v7, %v550_v34  ;;  %v689_v39 = vsel %vm429_vm0, %v613_v19, 0.0  ;;  %v686_v55 = vsel %vm429_vm0, %v612_v28, 0.0 }
 0x14c   :  { %v510_v59 = vpop.xlane.xlu1 %509  ;;  %690 = vadd.xlane.f32.xlu1 %v689_v39  ;;  %687 = vadd.xlane.f32.xlu0 %v686_v55  ;;  %v507_v2 = vpop.xlane.xlu0 %506 }
 0x14d   :  { %v553_v13 = vmul.f32 0.03125, %v510_v59  ;;  %v552_v58 = vmul.f32 0.03125, %v507_v2  ;;  %v615_v4 = vmul.f32 %v2966_v31, %v2966_v31  ;;  %v614_v20 = vmul.f32 %v2969_v14, %v2969_v14 }
 0x14f   :  { %v2978_v34 = vsub.f32 %v2775_v46, %v553_v13  ;;  %v2981_v19 = vsub.f32 %v2766_v37, %v552_v58  ;;  %v695_v47 = vsel %vm429_vm0, %v615_v4, 0.0  ;;  %v692_v28 = vsel %vm429_vm0, %v614_v20, 0.0 }
 0x150   :  { %v516_v39 = vpop.xlane.xlu1 %515  ;;  %696 = vadd.xlane.f32.xlu1 %v695_v47  ;;  %693 = vadd.xlane.f32.xlu0 %v692_v28  ;;  %v513_v55 = vpop.xlane.xlu0 %512 }
 0x151   :  { %v555_v59 = vmul.f32 0.03125, %v516_v39  ;;  %v554_v2 = vmul.f32 0.03125, %v513_v55  ;;  %v617_v25 = vmul.f32 %v2978_v34, %v2978_v34  ;;  %v616_v13 = vmul.f32 %v2981_v19, %v2981_v19 }
 0x153   :  { %v2990_v46 = vsub.f32 %v2797_v6, %v555_v59  ;;  %v2993_v58 = vsub.f32 %v2777_v52, %v554_v2  ;;  %v701_v4 = vsel %vm429_vm0, %v617_v25, 0.0  ;;  %v698_v20 = vsel %vm429_vm0, %v616_v13, 0.0 }
 0x154   :  { %v522_v47 = vpop.xlane.xlu1 %521  ;;  %702 = vadd.xlane.f32.xlu1 %v701_v4  ;;  %699 = vadd.xlane.f32.xlu0 %v698_v20  ;;  %v519_v28 = vpop.xlane.xlu0 %518 }
 0x155   :  { %v557_v39 = vmul.f32 0.03125, %v522_v47  ;;  %v556_v55 = vmul.f32 0.03125, %v519_v28  ;;  %v619_v37 = vmul.f32 %v2990_v46, %v2990_v46  ;;  %v618_v59 = vmul.f32 %v2993_v58, %v2993_v58 }
 0x157   :  { %v3002_v6 = vsub.f32 %v2815_v26, %v557_v39  ;;  %v3005_v2 = vsub.f32 %v2807_v18, %v556_v55  ;;  %v707_v25 = vsel %vm429_vm0, %v619_v37, 0.0  ;;  %v704_v13 = vsel %vm429_vm0, %v618_v59, 0.0 }
 0x158   :  { %708 = vadd.xlane.f32.xlu1 %v707_v25  ;;  %705 = vadd.xlane.f32.xlu0 %v704_v13  ;;  %v525_v4 = vpop.xlane.xlu0 %524 }
 0x159   :  { %v558_v20 = vmul.f32 0.03125, %v525_v4  ;;  %v621_v47 = vmul.f32 %v3002_v6, %v3002_v6  ;;  %v620_v28 = vmul.f32 %v3005_v2, %v3005_v2 }
 0x15b   :  { %v3014_v39 = vsub.f32 %v2813_v23, %v558_v20  ;;  %v713_v55 = vsel %vm429_vm0, %v621_v47, 0.0  ;;  %v710_v18 = vsel %vm429_vm0, %v620_v28, 0.0 }
 0x15c   :  { %714 = vadd.xlane.f32.xlu1 %v713_v55  ;;  %711 = vadd.xlane.f32.xlu0 %v710_v18 }
 0x15d   :  { %v622_v37 = vmul.f32 %v3014_v39, %v3014_v39 }
 0x15f   :  { %v716_v59 = vsel %vm429_vm0, %v622_v37, 0.0 }
 0x160   :  { %717 = vadd.xlane.f32.xlu0 %v716_v59 }
 0x1ad   :  { %v625_v25 = vpop.xlane.xlu1 %624 }
 0x1ae   :  { %v719_v13 = vmul.f32 0.03125, %v625_v25 }
 0x1b0   :  { %v751_v4 = vadd.f32 1e-05, %v719_v13 }
 0x1b1   :  { %v631_v26 = vpop.xlane.xlu1 %630  ;;  %v628_v52 = vpop.xlane.xlu0 %627 }
 0x1b2   :  { %2186 = vrsqrt.f32 %v751_v4  ;;  %v721_v20 = vmul.f32 0.03125, %v631_v26  ;;  %v720_v23 = vmul.f32 0.03125, %v628_v52 }
 0x1b4   :  { %v753_v7 = vadd.f32 1e-05, %v721_v20  ;;  %v752_v47 = vadd.f32 1e-05, %v720_v23 }
 0x1b5   :  { %v637_v10 = vpop.xlane.xlu1 %636  ;;  %v634_v28 = vpop.xlane.xlu0 %633 }
 0x1b6   :  { %2188 = vrsqrt.f32 %v753_v7  ;;  %v723_v18 = vmul.f32 0.03125, %v637_v10  ;;  %v722_v55 = vmul.f32 0.03125, %v634_v28 }
 0x1b7   :  { %2190 = vrsqrt.f32 %v752_v47 }
 0x1b8   :  { %v755_v30 = vadd.f32 1e-05, %v723_v18  ;;  %v754_v48 = vadd.f32 1e-05, %v722_v55 }
 0x1b9   :  { %v643_v37 = vpop.xlane.xlu1 %642  ;;  %v640_v59 = vpop.xlane.xlu0 %639 }
 0x1ba   :  { %2192 = vrsqrt.f32 %v755_v30  ;;  %v725_v25 = vmul.f32 0.03125, %v643_v37  ;;  %v724_v13 = vmul.f32 0.03125, %v640_v59  ;;  %v3025_v30 = vld [vmem:[%s3645_s4] ss:$0 sm:$0xff] }
 0x1bb   :  { %2194 = vrsqrt.f32 %v754_v48 }
 0x1bc   :  { %v2187_v61 = vpop.eup %2186  ;;  %v757_v4 = vadd.f32 1e-05, %v725_v25  ;;  %v756_v26 = vadd.f32 1e-05, %v724_v13 }
 0x1bd   :  { %v649_v52 = vpop.xlane.xlu1 %648  ;;  %v646_v20 = vpop.xlane.xlu0 %645  ;;  %v815_v10 = vmul.f32 %v2187_v61, %v2824_v36 }
 0x1be   :  { %2196 = vrsqrt.f32 %v757_v4  ;;  %v727_v23 = vmul.f32 0.03125, %v649_v52  ;;  %v726_v40 = vmul.f32 0.03125, %v646_v20 }
 0x1bf   :  { %2198 = vrsqrt.f32 %v756_v26  ;;  %v853_v61 = vmul.f32 %v3025_v30, %v815_v10  ;;  %v3033_v26 = vld [vmem:[%s3646_s5] ss:$0 sm:$0xff] }
 0x1c0   :  { %v2189_v7 = vpop.eup %2188  ;;  %v759_v47 = vadd.f32 1e-05, %v727_v23  ;;  %v758_v28 = vadd.f32 1e-05, %v726_v40 }
 0x1c1   :  { %v2191_v48 = vpop.eup %2190  ;;  %v817_v18 = vmul.f32 %v2189_v7, %v2832_v49  ;;  %v655_v55 = vpop.xlane.xlu1 %654 }
 0x1c2   :  { %v652_v37 = vpop.xlane.xlu0 %651  ;;  %2200 = vrsqrt.f32 %v759_v47  ;;  %v729_v59 = vmul.f32 0.03125, %v655_v55  ;;  %v816_v13 = vmul.f32 %v2191_v48, %v2829_v45  ;;  %v891_v48 = vadd.f32 %v3033_v26, %v853_v61 }
 0x1c3   :  { %v728_v25 = vmul.f32 0.03125, %v652_v37  ;;  %2202 = vrsqrt.f32 %v758_v28  ;;  %v855_v7 = vmul.f32 %v3025_v30, %v817_v18 }
 0x1c4   :  { %v2193_v36 = vpop.eup %2192  ;;  %v761_v40 = vadd.f32 1e-05, %v729_v59  ;;  %v854_v49 = vmul.f32 %v3025_v30, %v816_v13 }
 0x1c5   :  { %v760_v4 = vadd.f32 1e-05, %v728_v25  ;;  %v2195_v52 = vpop.eup %2194  ;;  %v661_v20 = vpop.xlane.xlu1 %660  ;;  %v819_v28 = vmul.f32 %v2193_v36, %v2840_v0 }
 0x1c6   :  { %v658_v23 = vpop.xlane.xlu0 %657  ;;  %v818_v45 = vmul.f32 %v2195_v52, %v2843_v1  ;;  %2204 = vrsqrt.f32 %v761_v40  ;;  %v731_v47 = vmul.f32 0.03125, %v661_v20  ;;  %v892_v55 = vadd.f32 %v3033_v26, %v854_v49 }
 0x1c7   :  { %v730_v10 = vmul.f32 0.03125, %v658_v23  ;;  %2206 = vrsqrt.f32 %v760_v4  ;;  %v893_v1 = vadd.f32 %v3033_v26, %v855_v7  ;;  %v857_v49 = vmul.f32 %v3025_v30, %v819_v28 }
 0x1c8   :  { %v2197_v37 = vpop.eup %2196  ;;  %v763_v59 = vadd.f32 1e-05, %v731_v47  ;;  %v856_v13 = vmul.f32 %v3025_v30, %v818_v45  ;;  %v923_v18 = vpack.c.bf16 %v892_v55, %v891_v48 }
 0x1c9   :  { %v762_v25 = vadd.f32 1e-05, %v730_v10  ;;  %v2199_v56 = vpop.eup %2198  ;;  %v667_v15 = vpop.xlane.xlu1 %666  ;;  %v821_v61 = vmul.f32 %v2197_v37, %v2852_v21  ;;  %v895_v28 = vadd.f32 %v3033_v26, %v857_v49 }
 0x1ca   :  { %v664_v27 = vpop.xlane.xlu0 %663  ;;  %v820_v40 = vmul.f32 %v2199_v56, %v2855_v22  ;;  %2208 = vrsqrt.f32 %v763_v59  ;;  %v733_v0 = vmul.f32 0.03125, %v667_v15  ;;  %2077 = vmatprep.mubr.msk.bf16.mxu0 %vm429_vm0, %v923_v18  ;;  %v894_v4 = vadd.f32 %v3033_v26, %v856_v13 }
 0x1cb   :  { %v732_v36 = vmul.f32 0.03125, %v664_v27  ;;  %2210 = vrsqrt.f32 %v762_v25  ;;  %v859_v55 = vmul.f32 %v3025_v30, %v821_v61 }
 0x1cc   :  { %v2201_v52 = vpop.eup %2200  ;;  %v765_v20 = vadd.f32 1e-05, %v733_v0  ;;  %v858_v45 = vmul.f32 %v3025_v30, %v820_v40  ;;  %v924_v15 = vpack.c.bf16 %v894_v4, %v893_v1 }
 0x1cd   :  { %v764_v23 = vadd.f32 1e-05, %v732_v36  ;;  %v2203_v7 = vpop.eup %2202  ;;  %v823_v56 = vmul.f32 %v2201_v52, %v2864_v42  ;;  %v673_v22 = vpop.xlane.xlu1 %672  ;;  %v897_v61 = vadd.f32 %v3033_v26, %v859_v55 }
 0x1ce   :  { %v670_v27 = vpop.xlane.xlu0 %669  ;;  %v822_v21 = vmul.f32 %v2203_v7, %v2867_v44  ;;  %2212 = vrsqrt.f32 %v765_v20  ;;  %v735_v47 = vmul.f32 0.03125, %v673_v22  ;;  %2078 = vmatmul.mubr.msk.bf16.vlgmr.msra.gmra.mrb[0].mxu0 %vm429_vm0, %v924_v15  ;;  %v896_v48 = vadd.f32 %v3033_v26, %v858_v45 }
 0x1cf   :  { %v734_v10 = vmul.f32 0.03125, %v670_v27  ;;  %2214 = vrsqrt.f32 %v764_v23  ;;  %v861_v40 = vmul.f32 %v3025_v30, %v823_v56 }
 0x1d0   :  { %v2205_v37 = vpop.eup %2204  ;;  %v767_v59 = vadd.f32 1e-05, %v735_v47  ;;  %v860_v25 = vmul.f32 %v3025_v30, %v822_v21  ;;  %v925_v44 = vpack.c.bf16 %v896_v48, %v895_v28 }
 0x1d1   :  { %v766_v42 = vadd.f32 1e-05, %v734_v10  ;;  %v2207_v13 = vpop.eup %2206  ;;  %v679_v18 = vpop.xlane.xlu1 %678  ;;  %v825_v49 = vmul.f32 %v2205_v37, %v2876_v5  ;;  %v899_v27 = vadd.f32 %v3033_v26, %v861_v40 }
 0x1d2   :  { %v676_v1 = vpop.xlane.xlu0 %675  ;;  %v824_v0 = vmul.f32 %v2207_v13, %v2879_v9  ;;  %2216 = vrsqrt.f32 %v767_v59  ;;  %v737_v36 = vmul.f32 0.03125, %v679_v18  ;;  %2081 = vmatprep.mubr.msk.bf16.mxu0 %vm429_vm0, %v925_v44  ;;  %v898_v52 = vadd.f32 %v3033_v26, %v860_v25 }
 0x1d3   :  { %v736_v4 = vmul.f32 0.03125, %v676_v1  ;;  %2218 = vrsqrt.f32 %v766_v42  ;;  %v863_v48 = vmul.f32 %v3025_v30, %v825_v49 }
 0x1d4   :  { %v2209_v20 = vpop.eup %2208  ;;  %v769_v23 = vadd.f32 1e-05, %v737_v36  ;;  %v862_v7 = vmul.f32 %v3025_v30, %v824_v0  ;;  %v926_v9 = vpack.c.bf16 %v898_v52, %v897_v61 }
 0x1d5   :  { %v768_v45 = vadd.f32 1e-05, %v736_v4  ;;  %v2211_v56 = vpop.eup %2210  ;;  %v685_v22 = vpop.xlane.xlu1 %684  ;;  %v827_v10 = vmul.f32 %v2209_v20, %v2888_v32  ;;  %v901_v0 = vadd.f32 %v3033_v26, %v863_v48 }
 0x1d6   :  { %v682_v15 = vpop.xlane.xlu0 %681  ;;  %v826_v5 = vmul.f32 %v2211_v56, %v2891_v35  ;;  %2220 = vrsqrt.f32 %v769_v23  ;;  %v739_v21 = vmul.f32 0.03125, %v685_v22  ;;  %2082 = vmatmul.mubr.msk.bf16.gmra.mrb[4].mxu0 %vm429_vm0, %v926_v9  ;;  %v900_v28 = vadd.f32 %v3033_v26, %v862_v7 }
 0x1d7   :  { %v738_v47 = vmul.f32 0.03125, %v682_v15  ;;  %2222 = vrsqrt.f32 %v768_v45  ;;  %v865_v4 = vmul.f32 %v3025_v30, %v827_v10 }
 0x1d8   :  { %v2213_v55 = vpop.eup %2212  ;;  %v771_v37 = vadd.f32 1e-05, %v739_v21  ;;  %v864_v42 = vmul.f32 %v3025_v30, %v826_v5  ;;  %v927_v18 = vpack.c.bf16 %v900_v28, %v899_v27 }
 0x1d9   :  { %v770_v59 = vadd.f32 1e-05, %v738_v47  ;;  %v2215_v25 = vpop.eup %2214  ;;  %v829_v35 = vmul.f32 %v2213_v55, %v2900_v62  ;;  %v691_v13 = vpop.xlane.xlu1 %690  ;;  %v903_v27 = vadd.f32 %v3033_v26, %v865_v4 }
 0x1da   :  { %v688_v44 = vpop.xlane.xlu0 %687  ;;  %v828_v32 = vmul.f32 %v2215_v25, %v2903_v63  ;;  %2224 = vrsqrt.f32 %v771_v37  ;;  %v741_v1 = vmul.f32 0.03125, %v691_v13  ;;  %2085 = vmatprep.mubr.msk.bf16.mxu0 %vm429_vm0, %v927_v18  ;;  %v902_v36 = vadd.f32 %v3033_v26, %v864_v42 }
 0x1db   :  { %v740_v40 = vmul.f32 0.03125, %v688_v44  ;;  %2226 = vrsqrt.f32 %v770_v59  ;;  %v867_v7 = vmul.f32 %v3025_v30, %v829_v35 }
 0x1dc   :  { %v2217_v49 = vpop.eup %2216  ;;  %v773_v61 = vadd.f32 1e-05, %v741_v1  ;;  %v866_v52 = vmul.f32 %v3025_v30, %v828_v32  ;;  %v928_v63 = vpack.c.bf16 %v902_v36, %v901_v0 }
 0x1dd   :  { %v772_v62 = vadd.f32 1e-05, %v740_v40  ;;  %v2219_v20 = vpop.eup %2218  ;;  %v697_v23 = vpop.xlane.xlu1 %696  ;;  %v831_v15 = vmul.f32 %v2217_v49, %v2912_v3  ;;  %v905_v59 = vadd.f32 %v3033_v26, %v867_v7 }
 0x1de   :  { %v694_v45 = vpop.xlane.xlu0 %693  ;;  %v830_v56 = vmul.f32 %v2219_v20, %v2915_v38  ;;  %2228 = vrsqrt.f32 %v773_v61  ;;  %v743_v22 = vmul.f32 0.03125, %v697_v23  ;;  %2086 = vmatmul.mubr.msk.bf16.gmra.mrb[8].mxu0 %vm429_vm0, %v928_v63  ;;  %v904_v5 = vadd.f32 %v3033_v26, %v866_v52 }
 0x1df   :  { %v742_v9 = vmul.f32 0.03125, %v694_v45  ;;  %2230 = vrsqrt.f32 %v772_v62  ;;  %v869_v18 = vmul.f32 %v3025_v30, %v831_v15 }
 0x1e0   :  { %v2221_v21 = vpop.eup %2220  ;;  %v775_v47 = vadd.f32 1e-05, %v743_v22  ;;  %v868_v28 = vmul.f32 %v3025_v30, %v830_v56  ;;  %v929_v38 = vpack.c.bf16 %v904_v5, %v903_v27 }
 0x1e1   :  { %v774_v10 = vadd.f32 1e-05, %v742_v9  ;;  %v2223_v48 = vpop.eup %2222  ;;  %v703_v55 = vpop.xlane.xlu1 %702  ;;  %v833_v35 = vmul.f32 %v2221_v21, %v2924_v11  ;;  %v907_v52 = vadd.f32 %v3033_v26, %v869_v18 }
 0x1e2   :  { %v700_v37 = vpop.xlane.xlu0 %699  ;;  %v832_v3 = vmul.f32 %v2223_v48, %v2927_v12  ;;  %2232 = vrsqrt.f32 %v775_v47  ;;  %v745_v42 = vmul.f32 0.03125, %v703_v55  ;;  %2089 = vmatprep.mubr.msk.bf16.mxu0 %vm429_vm0, %v929_v38  ;;  %v906_v13 = vadd.f32 %v3033_v26, %v868_v28 }
 0x1e3   :  { %v744_v25 = vmul.f32 0.03125, %v700_v37  ;;  %2234 = vrsqrt.f32 %v774_v10  ;;  %v871_v23 = vmul.f32 %v3025_v30, %v833_v35 }
 0x1e4   :  { %v2225_v44 = vpop.eup %2224  ;;  %v777_v32 = vadd.f32 1e-05, %v745_v42  ;;  %v870_v40 = vmul.f32 %v3025_v30, %v832_v3  ;;  %v930_v4 = vpack.c.bf16 %v906_v13, %v905_v59 }
 0x1e5   :  { %v776_v1 = vadd.f32 1e-05, %v744_v25  ;;  %v2227_v0 = vpop.eup %2226  ;;  %v835_v12 = vmul.f32 %v2225_v44, %v2936_v53  ;;  %v709_v36 = vpop.xlane.xlu1 %708  ;;  %v909_v10 = vadd.f32 %v3033_v26, %v871_v23 }
 0x1e6   :  { %v706_v49 = vpop.xlane.xlu0 %705  ;;  %v834_v11 = vmul.f32 %v2227_v0, %v2939_v54  ;;  %2236 = vrsqrt.f32 %v777_v32  ;;  %v747_v61 = vmul.f32 0.03125, %v709_v36  ;;  %2090 = vmatmul.mubr.msk.bf16.gmra.mrb[12].mxu0 %vm429_vm0, %v930_v4  ;;  %v908_v20 = vadd.f32 %v3033_v26, %v870_v40 }
 0x1e7   :  { %v746_v62 = vmul.f32 0.03125, %v706_v49  ;;  %2238 = vrsqrt.f32 %v776_v1  ;;  %v873_v27 = vmul.f32 %v3025_v30, %v835_v12 }
 0x1e8   :  { %v2229_v63 = vpop.eup %2228  ;;  %v779_v45 = vadd.f32 1e-05, %v747_v61  ;;  %v872_v7 = vmul.f32 %v3025_v30, %v834_v11  ;;  %v931_v9 = vpack.c.bf16 %v908_v20, %v907_v52 }
 0x1e9   :  { %v778_v53 = vadd.f32 1e-05, %v746_v62  ;;  %v2231_v56 = vpop.eup %2230  ;;  %v837_v54 = vmul.f32 %v2229_v63, %v2951_v41  ;;  %v715_v22 = vpop.xlane.xlu1 %714  ;;  %v911_v42 = vadd.f32 %v3033_v26, %v873_v27 }
 0x1ea   :  { %v712_v15 = vpop.xlane.xlu0 %711  ;;  %v836_v5 = vmul.f32 %v2231_v56, %v2954_v51  ;;  %2240 = vrsqrt.f32 %v779_v45  ;;  %v749_v21 = vmul.f32 0.03125, %v715_v22  ;;  %2093 = vmatprep.mubr.msk.bf16.mxu0 %vm429_vm0, %v931_v9  ;;  %v910_v28 = vadd.f32 %v3033_v26, %v872_v7 }
 0x1eb   :  { %v748_v47 = vmul.f32 0.03125, %v712_v15  ;;  %2242 = vrsqrt.f32 %v778_v53  ;;  %v875_v25 = vmul.f32 %v3025_v30, %v837_v54 }
 0x1ec   :  { %v2233_v48 = vpop.eup %2232  ;;  %v781_v55 = vadd.f32 1e-05, %v749_v21  ;;  %v874_v38 = vmul.f32 %v3025_v30, %v836_v5  ;;  %v932_v3 = vpack.c.bf16 %v910_v28, %v909_v10 }
 0x1ed   :  { %v780_v41 = vadd.f32 1e-05, %v748_v47  ;;  %v2235_v37 = vpop.eup %2234  ;;  %v839_v59 = vmul.f32 %v2233_v48, %v2966_v31  ;;  %v913_v0 = vadd.f32 %v3033_v26, %v875_v25 }
 0x1ee   :  { %v718_v51 = vpop.xlane.xlu0 %717  ;;  %v838_v35 = vmul.f32 %v2235_v37, %v2969_v14  ;;  %2244 = vrsqrt.f32 %v781_v55  ;;  %v912_v18 = vadd.f32 %v3033_v26, %v874_v38  ;;  %2094 = vmatmul.mubr.msk.bf16.gmra.mrb[16].mxu0 %vm429_vm0, %v932_v3  ;;  %v2182_v38 = vld [vmem:[%s3647_s8 + $0x20] sm:$0xff]   ;;  %v2183_v37 = vld [vmem:[%s3647_s8 + $0x28] sm:$0xff]   ;;  %v2185_v3 = vld [vmem:[%s3647_s8 + $0x38] sm:$0xff]  }
 0x1ef   :  { %v750_v13 = vmul.f32 0.03125, %v718_v51  ;;  %2246 = vrsqrt.f32 %v780_v41  ;;  %v877_v12 = vmul.f32 %v3025_v30, %v839_v59  ;;  %v2181_v41 = vld [vmem:[%s3647_s8 + $0x18] sm:$0xff]   ;;  %v2184_v59 = vld [vmem:[%s3647_s8 + $0x30] sm:$0xff]   ;;  %v3170_v51 = vld [vmem:[%s3648_s7] ss:$0 sm:$0xff] }
 0x1f0   :  { %v2237_v44 = vpop.eup %2236  ;;  %v933_v1 = vpack.c.bf16 %v912_v18, %v911_v42  ;;  %v876_v31 = vmul.f32 %v3025_v30, %v838_v35 }
 0x1f1   :  { %v782_v32 = vadd.f32 1e-05, %v750_v13  ;;  %v2239_v40 = vpop.eup %2238  ;;  %v841_v36 = vmul.f32 %v2237_v44, %v2978_v34  ;;  %v915_v52 = vadd.f32 %v3033_v26, %v877_v12 }
 0x1f2   :  { %v840_v14 = vmul.f32 %v2239_v40, %v2981_v19  ;;  %2097 = vmatprep.mubr.msk.bf16.mxu0 %vm429_vm0, %v933_v1  ;;  %v914_v4 = vadd.f32 %v3033_v26, %v876_v31 }
 0x1f3   :  { %2248 = vrsqrt.f32 %v782_v32  ;;  %v879_v19 = vmul.f32 %v3025_v30, %v841_v36 }
 0x1f4   :  { %v2241_v49 = vpop.eup %2240  ;;  %v934_v11 = vpack.c.bf16 %v914_v4, %v913_v0  ;;  %v878_v61 = vmul.f32 %v3025_v30, %v840_v14 }
 0x1f5   :  { %v2243_v62 = vpop.eup %2242  ;;  %v843_v20 = vmul.f32 %v2241_v49, %v2990_v46  ;;  %v917_v46 = vadd.f32 %v3033_v26, %v879_v19 }
 0x1f6   :  { %v842_v23 = vmul.f32 %v2243_v62, %v2993_v58  ;;  %v916_v34 = vadd.f32 %v3033_v26, %v878_v61  ;;  %2098 = vmatmul.mubr.msk.bf16.gmra.mrb[20].mxu0 %vm429_vm0, %v934_v11 }
 0x1f7   :  { %v881_v22 = vmul.f32 %v3025_v30, %v843_v20 }
 0x1f8   :  { %v2245_v63 = vpop.eup %2244  ;;  %v935_v45 = vpack.c.bf16 %v916_v34, %v915_v52  ;;  %v880_v53 = vmul.f32 %v3025_v30, %v842_v23 }
 0x1f9   :  { %v2247_v7 = vpop.eup %2246  ;;  %v845_v56 = vmul.f32 %v2245_v63, %v3002_v6  ;;  %v919_v6 = vadd.f32 %v3033_v26, %v881_v22 }
 0x1fa   :  { %v844_v54 = vmul.f32 %v2247_v7, %v3005_v2  ;;  %2101 = vmatprep.mubr.msk.bf16.mxu0 %vm429_vm0, %v935_v45  ;;  %v918_v58 = vadd.f32 %v3033_v26, %v880_v53 }
 0x1fb   :  { %v883_v21 = vmul.f32 %v3025_v30, %v845_v56 }
 0x1fc   :  { %v936_v15 = vpack.c.bf16 %v918_v58, %v917_v46  ;;  %v882_v27 = vmul.f32 %v3025_v30, %v844_v54 }
 0x1fd   :  { %v2249_v9 = vpop.eup %2248  ;;  %v921_v28 = vadd.f32 %v3033_v26, %v883_v21 }
 0x1fe   :  { %v846_v5 = vmul.f32 %v2249_v9, %v3014_v39  ;;  %v920_v2 = vadd.f32 %v3033_v26, %v882_v27  ;;  %2102 = vmatmul.mubr.msk.bf16.gmra.mrb[24].mxu0 %vm429_vm0, %v936_v15  ;;  %v2178_v39 = vld [vmem:[%s3647_s8] sm:$0xff]  }
 0x1ff   :  { %2109 = vmatprep.subr.bf16.mxu0 %v2178_v39  ;;  %2157 = vmatprep.subr.bf16.mxu1 %v2178_v39 }
 0x200   :  { %v884_v47 = vmul.f32 %v3025_v30, %v846_v5  ;;  %v937_v10 = vpack.c.bf16 %v920_v2, %v919_v6  ;;  %2110 = vmatpush3.bf16.msra.mxu0 %v2178_v39  ;;  %v2179_v30 = vld [vmem:[%s3647_s8 + $0x8] sm:$0xff]   ;;  %2165 = vmatpush3.bf16.msra.mxu1 %v2178_v39 }
 0x201   :  { %2111 = vmatprep.subr.bf16.mxu0 %v2179_v30  ;;  %2158 = vmatprep.subr.bf16.mxu1 %v2179_v30 }
 0x202   :  { %v922_v48 = vadd.f32 %v3033_v26, %v884_v47  ;;  %2105 = vmatprep.mubr.msk.bf16.mxu0 %vm429_vm0, %v937_v10  ;;  %v2180_v26 = vld [vmem:[%s3647_s8 + $0x10] sm:$0xff]  }
 0x204   :  { %v938_v55 = vpack.c.bf16 %v922_v48, %v921_v28  ;;  %2112 = vmatpush3.bf16.msra.mxu0 %v2179_v30  ;;  %2166 = vmatpush3.bf16.msra.mxu1 %v2179_v30 }
 0x205   :  { %2113 = vmatprep.subr.bf16.mxu0 %v2180_v26  ;;  %2159 = vmatprep.subr.bf16.mxu1 %v2180_v26 }
 0x206   :  { %2106 = vmatmul.mubr.msk.bf16.gmra.mrb[28].mxu0 %vm429_vm0, %v938_v55 }
 0x208   :  { %2114 = vmatpush3.bf16.msra.mxu0 %v2180_v26  ;;  %2167 = vmatpush3.bf16.msra.mxu1 %v2180_v26 }
 0x209   :  { %2115 = vmatprep.subr.bf16.mxu0 %v2181_v41  ;;  %2160 = vmatprep.subr.bf16.mxu1 %v2181_v41 }
 0x20c   :  { %2116 = vmatpush3.bf16.msra.mxu0 %v2181_v41  ;;  %2168 = vmatpush3.bf16.msra.mxu1 %v2181_v41 }
 0x20d   :  { %2117 = vmatprep.subr.bf16.mxu0 %v2182_v38  ;;  %2161 = vmatprep.subr.bf16.mxu1 %v2182_v38 }
 0x210   :  { %2118 = vmatpush3.bf16.msra.mxu0 %v2182_v38  ;;  %2169 = vmatpush3.bf16.msra.mxu1 %v2182_v38 }
 0x211   :  { %2119 = vmatprep.subr.bf16.mxu0 %v2183_v37  ;;  %2162 = vmatprep.subr.bf16.mxu1 %v2183_v37 }
 0x214   :  { %2120 = vmatpush3.bf16.msra.mxu0 %v2183_v37  ;;  %2170 = vmatpush3.bf16.msra.mxu1 %v2183_v37 }
 0x215   :  { %2121 = vmatprep.subr.bf16.mxu0 %v2184_v59  ;;  %2163 = vmatprep.subr.bf16.mxu1 %v2184_v59 }
 0x218   :  { %2122 = vmatpush3.bf16.msra.mxu0 %v2184_v59  ;;  %2171 = vmatpush3.bf16.msra.mxu1 %v2184_v59 }
 0x219   :  { %2123 = vmatprep.subr.bf16.mxu0 %v2185_v3  ;;  %2164 = vmatprep.subr.bf16.mxu1 %v2185_v3 }
 0x21c   :  { %2124 = vmatpush3.bf16.msra.mxu0 %v2185_v3  ;;  %2172 = vmatpush3.bf16.msra.mxu1 %v2185_v3 }
 0x2a1   :  { %v2079_v42 = vpop.f32.mrb[0].mxu0 }
 0x2a2   :  { %v3173_v25 = vadd.f32 %v2079_v42, %v3170_v51  ;;  %v1044_v35 = vpop.f32.mrb[1].mxu0 }
 0x2a3   :  { %v3176_v13 = vadd.f32 %v3170_v51, %v1044_v35  ;;  %v2080_v18 = vpop.f32.mrb[2].mxu0 }
 0x2a4   :  { %v1205_v44 = vmul.f32 0.044715, %v3173_v25  ;;  %v3180_v32 = vadd.f32 %v2080_v18, %v3170_v51  ;;  %v1047_v1 = vpop.f32.mrb[3].mxu0 }
 0x2a5   :  { %v1203_v31 = vmul.f32 0.044715, %v3176_v13  ;;  %v3184_v40 = vadd.f32 %v3170_v51, %v1047_v1 }
 0x2a6   :  { %v1237_v0 = vmul.f32 %v1205_v44, %v3173_v25  ;;  %v1206_v12 = vmul.f32 0.044715, %v3180_v32 }
 0x2a7   :  { %v1235_v36 = vmul.f32 %v1203_v31, %v3176_v13  ;;  %v1204_v14 = vmul.f32 0.044715, %v3184_v40 }
 0x2a8   :  { %v1269_v4 = vmul.f32 %v1237_v0, %v3173_v25  ;;  %v1238_v49 = vmul.f32 %v1206_v12, %v3180_v32 }
 0x2a9   :  { %v1267_v11 = vmul.f32 %v1235_v36, %v3176_v13  ;;  %v1236_v61 = vmul.f32 %v1204_v14, %v3184_v40  ;;  %v2083_v62 = vpop.f32.mrb[4].mxu0 }
 0x2aa   :  { %v1301_v52 = vadd.f32 %v1269_v4, %v3173_v25  ;;  %v1270_v20 = vmul.f32 %v1238_v49, %v3180_v32  ;;  %v3197_v23 = vadd.f32 %v2083_v62, %v3170_v51  ;;  %v1060_v34 = vpop.f32.mrb[5].mxu0 }
 0x2ab   :  { %v1268_v19 = vmul.f32 %v1236_v61, %v3184_v40  ;;  %v3201_v63 = vadd.f32 %v3170_v51, %v1060_v34  ;;  %v2084_v45 = vpop.f32.mrb[6].mxu0  ;;  %v1299_v53 = vadd.f32 %v1267_v11, %v3176_v13 }
 0x2ac   :  { %v1333_v7 = vmul.f32 0.7978846, %v1301_v52  ;;  %v1302_v56 = vadd.f32 %v1270_v20, %v3180_v32  ;;  %v1209_v54 = vmul.f32 0.044715, %v3197_v23  ;;  %v3207_v46 = vadd.f32 %v2084_v45, %v3170_v51  ;;  %v1063_v58 = vpop.f32.mrb[7].mxu0 }
 0x2ad   :  { %v1207_v22 = vmul.f32 0.044715, %v3201_v63  ;;  %v3211_v9 = vadd.f32 %v3170_v51, %v1063_v58  ;;  %v1300_v15 = vadd.f32 %v1268_v19, %v3184_v40  ;;  %v1331_v27 = vmul.f32 0.7978846, %v1299_v53 }
 0x2ae   :  { %2250 = vtanh.f32 %v1333_v7  ;;  %v1334_v5 = vmul.f32 0.7978846, %v1302_v56  ;;  %v1241_v21 = vmul.f32 %v1209_v54, %v3197_v23  ;;  %v1210_v6 = vmul.f32 0.044715, %v3207_v46 }
 0x2af   :  { %v1208_v2 = vmul.f32 0.044715, %v3211_v9  ;;  %v1332_v47 = vmul.f32 0.7978846, %v1300_v15  ;;  %2252 = vtanh.f32 %v1331_v27  ;;  %v1239_v55 = vmul.f32 %v1207_v22, %v3201_v63 }
 0x2b0   :  { %2254 = vtanh.f32 %v1334_v5  ;;  %v1273_v10 = vmul.f32 %v1241_v21, %v3197_v23  ;;  %v1242_v28 = vmul.f32 %v1210_v6, %v3207_v46  ;;  %v1173_v52 = vmul.f32 0.5, %v3173_v25 }
 0x2b1   :  { %v2087_v48 = vpop.f32.mrb[8].mxu0  ;;  %2256 = vtanh.f32 %v1332_v47  ;;  %v1240_v39 = vmul.f32 %v1208_v2, %v3211_v9  ;;  %v1271_v59 = vmul.f32 %v1239_v55, %v3201_v63  ;;  %v1171_v20 = vmul.f32 0.5, %v3176_v13 }
 0x2b2   :  { %v1274_v30 = vmul.f32 %v1242_v28, %v3207_v46  ;;  %v1076_v26 = vpop.f32.mrb[9].mxu0  ;;  %v1305_v41 = vadd.f32 %v1273_v10, %v3197_v23  ;;  %v3229_v42 = vadd.f32 %v2087_v48, %v3170_v51  ;;  %v1174_v54 = vmul.f32 0.5, %v3180_v32 }
 0x2b3   :  { %v3224_v38 = vadd.f32 %v3170_v51, %v1076_v26  ;;  %v2088_v37 = vpop.f32.mrb[10].mxu0  ;;  %v1272_v3 = vmul.f32 %v1240_v39, %v3211_v9  ;;  %v1303_v0 = vadd.f32 %v1271_v59, %v3201_v63  ;;  %v1172_v32 = vmul.f32 0.5, %v3184_v40 }
 0x2b4   :  { %v1079_v35 = vpop.f32.mrb[11].mxu0  ;;  %v1306_v18 = vadd.f32 %v1274_v30, %v3207_v46  ;;  %v1337_v44 = vmul.f32 0.7978846, %v1305_v41  ;;  %v3239_v36 = vadd.f32 %v2088_v37, %v3170_v51  ;;  %v1213_v19 = vmul.f32 0.044715, %v3229_v42 }
 0x2b5   :  { %v1211_v1 = vmul.f32 0.044715, %v3224_v38  ;;  %v3234_v31 = vadd.f32 %v3170_v51, %v1079_v35  ;;  %v1304_v12 = vadd.f32 %v1272_v3, %v3211_v9  ;;  %v1335_v11 = vmul.f32 0.7978846, %v1303_v0 }
 0x2b6   :  { %v1338_v14 = vmul.f32 0.7978846, %v1306_v18  ;;  %2258 = vtanh.f32 %v1337_v44  ;;  %v1214_v13 = vmul.f32 0.044715, %v3239_v36  ;;  %v1175_v28 = vmul.f32 0.5, %v3201_v63 }
 0x2b7   :  { %v1243_v4 = vmul.f32 %v1211_v1, %v3224_v38  ;;  %v1212_v49 = vmul.f32 0.044715, %v3234_v31  ;;  %v1336_v61 = vmul.f32 0.7978846, %v1304_v12  ;;  %v1245_v48 = vmul.f32 %v1213_v19, %v3229_v42 }
 0x2b8   :  { %v2251_v62 = vpop.eup %2250  ;;  %2260 = vtanh.f32 %v1338_v14  ;;  %v1246_v3 = vmul.f32 %v1214_v13, %v3239_v36  ;;  %v1176_v0 = vmul.f32 0.5, %v3211_v9 }
 0x2b9   :  { %v2253_v34 = vpop.eup %2252  ;;  %v1244_v45 = vmul.f32 %v1212_v49, %v3234_v31  ;;  %v2091_v53 = vpop.f32.mrb[12].mxu0  ;;  %v1397_v7 = vadd.f32 1.0, %v2251_v62  ;;  %2262 = vtanh.f32 %v1335_v11  ;;  %v1275_v58 = vmul.f32 %v1243_v4, %v3224_v38 }
 0x2ba   :  { %v2255_v56 = vpop.eup %2254  ;;  %v1092_v22 = vpop.f32.mrb[13].mxu0  ;;  %v1395_v15 = vadd.f32 1.0, %v2253_v34  ;;  %2264 = vtanh.f32 %v1336_v61  ;;  %v3255_v2 = vadd.f32 %v2091_v53, %v3170_v51  ;;  %v1177_v49 = vmul.f32 0.5, %v3197_v23 }
 0x2bb   :  { %v2257_v25 = vpop.eup %2256  ;;  %v1276_v27 = vmul.f32 %v1244_v45, %v3234_v31  ;;  %v3252_v5 = vadd.f32 %v3170_v51, %v1092_v22  ;;  %v2092_v21 = vpop.f32.mrb[14].mxu0  ;;  %v1398_v6 = vadd.f32 1.0, %v2255_v56  ;;  %v1429_v39 = vmul.f32 %v1397_v7, %v1173_v52 }
 0x2bc   :  { %v1095_v47 = vpop.f32.mrb[15].mxu0  ;;  %v1396_v10 = vadd.f32 1.0, %v2257_v25  ;;  %v1427_v41 = vmul.f32 %v1395_v15, %v1171_v20  ;;  %v1307_v59 = vadd.f32 %v1275_v58, %v3224_v38  ;;  %v1217_v44 = vmul.f32 0.044715, %v3255_v2 }
 0x2bd   :  { %v3261_v55 = vadd.f32 %v3170_v51, %v1095_v47  ;;  %v1430_v30 = vmul.f32 %v1398_v6, %v1174_v54  ;;  %v1215_v26 = vmul.f32 0.044715, %v3252_v5  ;;  %v1308_v63 = vadd.f32 %v1276_v27, %v3234_v31 }
 0x2be   :  { %v1428_v37 = vmul.f32 %v1396_v10, %v1172_v32  ;;  %v1339_v12 = vmul.f32 0.7978846, %v1307_v59  ;;  %v3271_v14 = vadd.f32 %v2092_v21, %v3170_v51  ;;  %v1277_v45 = vmul.f32 %v1245_v48, %v3229_v42 }
 0x2bf   :  { %v1216_v40 = vmul.f32 0.044715, %v3261_v55  ;;  %v1460_v35 = vpack.c.bf16 %v1430_v30, %v1429_v39  ;;  %v1340_v61 = vmul.f32 0.7978846, %v1308_v63  ;;  %v1247_v52 = vmul.f32 %v1215_v26, %v3252_v5 }
 0x2c0   :  { %v2259_v18 = vpop.eup %2258  ;;  %v1459_v1 = vpack.c.bf16 %v1428_v37, %v1427_v41  ;;  %2266 = vtanh.f32 %v1339_v12  ;;  %v1278_v53 = vmul.f32 %v1246_v3, %v3239_v36  ;;  %v1178_v23 = vmul.f32 0.5, %v3207_v46 }
 0x2c1   :  { %v2095_v4 = vpop.f32.mrb[16].mxu0  ;;  %v1401_v11 = vadd.f32 1.0, %v2259_v18  ;;  %v1248_v20 = vmul.f32 %v1216_v40, %v3261_v55  ;;  %v1249_v58 = vmul.f32 %v1217_v44, %v3255_v2  ;;  %2268 = vtanh.f32 %v1340_v61 }
 0x2c2   :  { %v2261_v62 = vpop.eup %2260  ;;  %v3277_v34 = vadd.f32 %v2095_v4, %v3170_v51  ;;  %v1108_v19 = vpop.f32.mrb[17].mxu0  ;;  %2125 = vmatprep.mubr.bf16.mxu0 %v1459_v1  ;;  %v1218_v13 = vmul.f32 0.044715, %v3271_v14  ;;  %v1279_v47 = vmul.f32 %v1247_v52, %v3252_v5  ;;  %v1179_v10 = vmul.f32 0.5, %v3224_v38 }
 0x2c3   :  { %v2263_v9 = vpop.eup %2262  ;;  %v2096_v7 = vpop.f32.mrb[18].mxu0  ;;  %2126 = vmatmul.mubr.bf16.vlgmr.msra.gmra.mrb[32].mxu0 %v1460_v35  ;;  %v1402_v56 = vadd.f32 1.0, %v2261_v62  ;;  %v3284_v22 = vadd.f32 %v3170_v51, %v1108_v19  ;;  %v1433_v21 = vmul.f32 %v1401_v11, %v1177_v49  ;;  %v1280_v32 = vmul.f32 %v1248_v20, %v3261_v55 }
 0x2c4   :  { %v2265_v54 = vpop.eup %2264  ;;  %v1111_v15 = vpop.f32.mrb[19].mxu0  ;;  %v1399_v25 = vadd.f32 1.0, %v2263_v9  ;;  %v1221_v46 = vmul.f32 0.044715, %v3277_v34  ;;  %v3296_v37 = vadd.f32 %v2096_v7, %v3170_v51  ;;  %v1309_v59 = vadd.f32 %v1277_v45, %v3229_v42 }
 0x2c5   :  { %v1400_v27 = vadd.f32 1.0, %v2265_v54  ;;  %v1434_v6 = vmul.f32 %v1402_v56, %v1178_v23  ;;  %v3292_v48 = vadd.f32 %v3170_v51, %v1111_v15  ;;  %v1219_v41 = vmul.f32 0.044715, %v3284_v22 }
 0x2c6   :  { %v1431_v39 = vmul.f32 %v1399_v25, %v1175_v28  ;;  %v1310_v3 = vadd.f32 %v1278_v53, %v3239_v36  ;;  %v1281_v40 = vmul.f32 %v1249_v58, %v3255_v2  ;;  %v1250_v35 = vmul.f32 %v1218_v13, %v3271_v14 }
 0x2c7   :  { %v1432_v30 = vmul.f32 %v1400_v27, %v1176_v0  ;;  %v1462_v26 = vpack.c.bf16 %v1434_v6, %v1433_v21  ;;  %v1180_v18 = vmul.f32 0.5, %v3234_v31  ;;  %v3307_v1 = vmul.f32 0.5, %v3229_v42 }
 0x2c8   :  { %v1341_v0 = vmul.f32 0.7978846, %v1309_v59  ;;  %v1342_v12 = vmul.f32 0.7978846, %v1310_v3  ;;  %v1253_v4 = vmul.f32 %v1221_v46, %v3277_v34  ;;  %v1220_v49 = vmul.f32 0.044715, %v3292_v48 }
 0x2c9   :  { %v2099_v38 = vpop.f32.mrb[20].mxu0  ;;  %v1461_v63 = vpack.c.bf16 %v1432_v30, %v1431_v39  ;;  %v1311_v31 = vadd.f32 %v1279_v47, %v3252_v5  ;;  %v1251_v52 = vmul.f32 %v1219_v41, %v3284_v22  ;;  %v1222_v20 = vmul.f32 0.044715, %v3296_v37 }
 0x2ca   :  { %v3304_v28 = vadd.f32 %v2099_v38, %v3170_v51  ;;  %v1124_v44 = vpop.f32.mrb[21].mxu0  ;;  %v2267_v62 = vpop.eup %2266  ;;  %2270 = vtanh.f32 %v1341_v0  ;;  %v1312_v19 = vadd.f32 %v1280_v32, %v3261_v55  ;;  %v1182_v53 = vmul.f32 0.5, %v3239_v36 }
 0x2cb   :  { %v3312_v11 = vadd.f32 %v3170_v51, %v1124_v44  ;;  %2129 = vmatprep.mubr.bf16.mxu1 %v1461_v63  ;;  %v2100_v61 = vpop.f32.mrb[22].mxu0  ;;  %v1403_v45 = vadd.f32 1.0, %v2267_v62  ;;  %2272 = vtanh.f32 %v1342_v12  ;;  %v2269_v7 = vpop.eup %2268  ;;  %v1282_v23 = vmul.f32 %v1250_v35, %v3271_v14 }
 0x2cc   :  { %2130 = vmatmul.mubr.bf16.vlgmr.msra.gmra.mrb[0].mxu1 %v1462_v26  ;;  %v1127_v42 = vpop.f32.mrb[23].mxu0  ;;  %v3319_v9 = vadd.f32 %v2100_v61, %v3170_v51  ;;  %v1225_v56 = vmul.f32 0.044715, %v3304_v28  ;;  %v1343_v54 = vmul.f32 0.7978846, %v1311_v31  ;;  %v3325_v15 = vmul.f32 %v1253_v4, %v3277_v34 }
 0x2cd   :  { %v1344_v58 = vmul.f32 0.7978846, %v1312_v19  ;;  %v1252_v25 = vmul.f32 %v1220_v49, %v3292_v48  ;;  %v1223_v13 = vmul.f32 0.044715, %v3312_v11  ;;  %v1404_v27 = vadd.f32 1.0, %v2269_v7 }
 0x2ce   :  { %v1283_v21 = vmul.f32 %v1251_v52, %v3284_v22  ;;  %v1254_v36 = vmul.f32 %v1222_v20, %v3296_v37  ;;  %v3332_v6 = vadd.f32 %v3170_v51, %v1127_v42  ;;  %2274 = vtanh.f32 %v1343_v54 }
 0x2cf   :  { %v1226_v47 = vmul.f32 0.044715, %v3319_v9  ;;  %v1435_v46 = vmul.f32 %v1403_v45, %v1179_v10  ;;  %v1436_v39 = vmul.f32 %v1404_v27, %v1180_v18  ;;  %2276 = vtanh.f32 %v1344_v58 }
 0x2d0   :  { %v1257_v30 = vmul.f32 %v1225_v56, %v3304_v28  ;;  %v1183_v59 = vmul.f32 0.5, %v3252_v5  ;;  %v1313_v3 = vadd.f32 %v1281_v40, %v3255_v2  ;;  %v1284_v35 = vmul.f32 %v1252_v25, %v3292_v48 }
 0x2d1   :  { %v2103_v32 = vpop.f32.mrb[24].mxu0  ;;  %v1255_v38 = vmul.f32 %v1223_v13, %v3312_v11  ;;  %v1463_v63 = vpack.c.bf16 %v1436_v39, %v1435_v46  ;;  %v1314_v10 = vadd.f32 %v1282_v23, %v3271_v14  ;;  %v1224_v18 = vmul.f32 0.044715, %v3332_v6 }
 0x2d2   :  { %v3337_v26 = vadd.f32 %v2103_v32, %v3170_v51  ;;  %v1140_v41 = vpop.f32.mrb[25].mxu0  ;;  %v1345_v5 = vmul.f32 0.7978846, %v1313_v3  ;;  %v1286_v40 = vmul.f32 %v1254_v36, %v3296_v37  ;;  %v1258_v49 = vmul.f32 %v1226_v47, %v3319_v9 }
 0x2d3   :  { %v2104_v44 = vpop.f32.mrb[26].mxu0  ;;  %v3346_v0 = vadd.f32 %v3170_v51, %v1140_v41  ;;  %2133 = vmatprep.mubr.bf16.mxu1 %v1463_v63  ;;  %v1184_v61 = vmul.f32 0.5, %v3261_v55  ;;  %v1346_v31 = vmul.f32 0.7978846, %v1314_v10  ;;  %v3355_v52 = vmul.f32 %v1257_v30, %v3304_v28 }
 0x2d4   :  { %v3349_v12 = vadd.f32 %v2104_v44, %v3170_v51  ;;  %v1143_v4 = vpop.f32.mrb[27].mxu0  ;;  %v2271_v62 = vpop.eup %2270  ;;  %v3358_v20 = vmul.f32 0.5, %v3255_v2  ;;  %2278 = vtanh.f32 %v1345_v5  ;;  %v1315_v42 = vadd.f32 %v1283_v21, %v3284_v22 }
 0x2d5   :  { %v2273_v19 = vpop.eup %2272  ;;  %v3362_v45 = vmul.f32 %v1255_v38, %v3312_v11  ;;  %v1229_v7 = vmul.f32 0.044715, %v3337_v26  ;;  %v1405_v23 = vadd.f32 1.0, %v2271_v62  ;;  %2280 = vtanh.f32 %v1346_v31 }
 0x2d6   :  { %v1256_v55 = vmul.f32 %v1224_v18, %v3332_v6  ;;  %v1227_v56 = vmul.f32 0.044715, %v3346_v0  ;;  %v1406_v54 = vadd.f32 1.0, %v2273_v19  ;;  %v1316_v58 = vadd.f32 %v1284_v35, %v3292_v48 }
 0x2d7   :  { %v1290_v2 = vmul.f32 %v1258_v49, %v3319_v9  ;;  %v1230_v25 = vmul.f32 0.044715, %v3349_v12  ;;  %v3371_v13 = vadd.f32 %v3170_v51, %v1143_v4  ;;  %v1347_v21 = vmul.f32 0.7978846, %v1315_v42 }
 0x2d8   :  { %v2275_v36 = vpop.eup %2274  ;;  %v1437_v47 = vmul.f32 %v1405_v23, %v3307_v1  ;;  %v1438_v32 = vmul.f32 %v1406_v54, %v1182_v53  ;;  %v1348_v30 = vmul.f32 0.7978846, %v1316_v58  ;;  %v1261_v3 = vmul.f32 %v1229_v7, %v3337_v26 }
 0x2d9   :  { %v2107_v27 = vpop.f32.mrb[28].mxu0  ;;  %v2277_v41 = vpop.eup %2276  ;;  %v1407_v38 = vadd.f32 1.0, %v2275_v36  ;;  %2282 = vtanh.f32 %v1347_v21  ;;  %v1259_v44 = vmul.f32 %v1227_v56, %v3346_v0  ;;  %v1228_v4 = vmul.f32 0.044715, %v3371_v13 }
 0x2da   :  { %v3375_v46 = vadd.f32 %v2107_v27, %v3170_v51  ;;  %v1156_v39 = vpop.f32.mrb[29].mxu0  ;;  %v1464_v10 = vpack.c.bf16 %v1438_v32, %v1437_v47  ;;  %v1408_v18 = vadd.f32 1.0, %v2277_v41  ;;  %v1186_v5 = vmul.f32 0.5, %v3271_v14 }
 0x2db   :  { %v3379_v35 = vadd.f32 %v3170_v51, %v1156_v39  ;;  %v2108_v63 = vpop.f32.mrb[30].mxu0  ;;  %2284 = vtanh.f32 %v1348_v30  ;;  %v1288_v31 = vmul.f32 %v1256_v55, %v3332_v6  ;;  %v1262_v62 = vmul.f32 %v1230_v25, %v3349_v12 }
 0x2dc   :  { %v3383_v1 = vadd.f32 %v2108_v63, %v3170_v51  ;;  %v1159_v53 = vpop.f32.mrb[31].mxu0  ;;  %2134 = vmatmul.mubr.bf16.gmra.mrb[4].mxu1 %v1464_v10  ;;  %v1439_v42 = vmul.f32 %v1407_v38, %v1183_v59  ;;  %v1440_v19 = vmul.f32 %v1408_v18, %v1184_v61  ;;  %v1187_v23 = vmul.f32 0.5, %v3284_v22 }
 0x2dd   :  { %v3388_v49 = vadd.f32 %v3170_v51, %v1159_v53  ;;  %v1231_v7 = vmul.f32 0.044715, %v3379_v35  ;;  %v1188_v56 = vmul.f32 0.5, %v3292_v48  ;;  %v1317_v14 = vadd.f32 %v3325_v15, %v3277_v34 }
 0x2de   :  { %v2279_v54 = vpop.eup %2278  ;;  %v1293_v51 = vmul.f32 %v1261_v3, %v3337_v26  ;;  %v1291_v58 = vmul.f32 %v1259_v44, %v3346_v0  ;;  %v1465_v55 = vpack.c.bf16 %v1440_v19, %v1439_v42  ;;  %v1318_v25 = vadd.f32 %v1286_v40, %v3296_v37 }
 0x2df   :  { %v2281_v27 = vpop.eup %2280  ;;  %v1260_v59 = vmul.f32 %v1228_v4, %v3371_v13  ;;  %v1409_v61 = vadd.f32 1.0, %v2279_v54  ;;  %v1232_v21 = vmul.f32 0.044715, %v3388_v49  ;;  %v1349_v22 = vmul.f32 0.7978846, %v1317_v14 }
 0x2e0   :  { %v1294_v48 = vmul.f32 %v1262_v62, %v3349_v12  ;;  %v1233_v36 = vmul.f32 0.044715, %v3375_v46  ;;  %2137 = vmatprep.mubr.bf16.mxu1 %v1465_v55  ;;  %v1410_v15 = vadd.f32 1.0, %v2281_v27  ;;  %v1350_v47 = vmul.f32 0.7978846, %v1318_v25 }
 0x2e1   :  { %v1263_v32 = vmul.f32 %v1231_v7, %v3379_v35  ;;  %v1234_v39 = vmul.f32 0.044715, %v3383_v1  ;;  %v1441_v40 = vmul.f32 %v1409_v61, %v3358_v20  ;;  %2286 = vtanh.f32 %v1349_v22 }
 0x2e2   :  { %v1442_v30 = vmul.f32 %v1410_v15, %v1186_v5  ;;  %2288 = vtanh.f32 %v1350_v47  ;;  %v1319_v41 = vadd.f32 %v3362_v45, %v3312_v11  ;;  %v1320_v3 = vadd.f32 %v1288_v31, %v3332_v6 }
 0x2e3   :  { %v2283_v38 = vpop.eup %2282  ;;  %v1292_v63 = vmul.f32 %v1260_v59, %v3371_v13  ;;  %v1264_v44 = vmul.f32 %v1232_v21, %v3388_v49  ;;  %v1321_v10 = vadd.f32 %v3355_v52, %v3304_v28  ;;  %v1322_v18 = vadd.f32 %v1290_v2, %v3319_v9 }
 0x2e4   :  { %v1466_v53 = vpack.c.bf16 %v1442_v30, %v1441_v40  ;;  %v1411_v20 = vadd.f32 1.0, %v2283_v38  ;;  %v1351_v4 = vmul.f32 0.7978846, %v1319_v41  ;;  %v1352_v5 = vmul.f32 0.7978846, %v1320_v3 }
 0x2e5   :  { %v2285_v62 = vpop.eup %2284  ;;  %v1265_v42 = vmul.f32 %v1233_v36, %v3375_v46  ;;  %v1266_v45 = vmul.f32 %v1234_v39, %v3383_v1  ;;  %v1353_v31 = vmul.f32 0.7978846, %v1321_v10  ;;  %v1354_v19 = vmul.f32 0.7978846, %v1322_v18 }
 0x2e6   :  { %v1295_v7 = vmul.f32 %v1263_v32, %v3379_v35  ;;  %2138 = vmatmul.mubr.bf16.gmra.mrb[8].mxu1 %v1466_v53  ;;  %v1412_v14 = vadd.f32 1.0, %v2285_v62  ;;  %2290 = vtanh.f32 %v1351_v4  ;;  %v1323_v52 = vadd.f32 %v1291_v58, %v3346_v0 }
 0x2e7   :  { %v1296_v2 = vmul.f32 %v1264_v44, %v3388_v49  ;;  %v1443_v54 = vmul.f32 %v1411_v20, %v1187_v23  ;;  %2292 = vtanh.f32 %v1352_v5  ;;  %v1324_v55 = vadd.f32 %v1292_v63, %v3371_v13 }
 0x2e8   :  { %v1444_v25 = vmul.f32 %v1412_v14, %v1188_v56  ;;  %2294 = vtanh.f32 %v1353_v31  ;;  %v1355_v27 = vmul.f32 0.7978846, %v1323_v52  ;;  %v1325_v59 = vadd.f32 %v1293_v51, %v3337_v26 }
 0x2e9   :  { %v1297_v61 = vmul.f32 %v1265_v42, %v3375_v46  ;;  %2296 = vtanh.f32 %v1354_v19  ;;  %v1356_v21 = vmul.f32 0.7978846, %v1324_v55  ;;  %v1326_v22 = vadd.f32 %v1294_v48, %v3349_v12 }
 0x2ea   :  { %v1298_v36 = vmul.f32 %v1266_v45, %v3383_v1  ;;  %v1467_v58 = vpack.c.bf16 %v1444_v25, %v1443_v54  ;;  %2298 = vtanh.f32 %v1355_v27  ;;  %v1357_v15 = vmul.f32 0.7978846, %v1325_v59 }
 0x2eb   :  { %v2287_v23 = vpop.eup %2286  ;;  %2300 = vtanh.f32 %v1356_v21  ;;  %v1358_v47 = vmul.f32 0.7978846, %v1326_v22  ;;  %v1327_v56 = vadd.f32 %v1295_v7, %v3379_v35  ;;  %v1328_v32 = vadd.f32 %v1296_v2, %v3388_v49 }
 0x2ec   :  { %v2289_v39 = vpop.eup %2288  ;;  %2141 = vmatprep.mubr.bf16.mxu1 %v1467_v58  ;;  %v1189_v51 = vmul.f32 0.5, %v3277_v34  ;;  %v1190_v40 = vmul.f32 0.5, %v3296_v37  ;;  %v1413_v30 = vadd.f32 1.0, %v2287_v23  ;;  %2302 = vtanh.f32 %v1357_v15 }
 0x2ed   :  { %v1414_v48 = vadd.f32 1.0, %v2289_v39  ;;  %2304 = vtanh.f32 %v1358_v47  ;;  %v1359_v41 = vmul.f32 0.7978846, %v1327_v56  ;;  %v1360_v3 = vmul.f32 0.7978846, %v1328_v32 }
 0x2ee   :  { %v1329_v38 = vadd.f32 %v1297_v61, %v3375_v46  ;;  %v1330_v63 = vadd.f32 %v1298_v36, %v3383_v1  ;;  %v1445_v44 = vmul.f32 %v1413_v30, %v1189_v51  ;;  %v1191_v62 = vmul.f32 0.5, %v3312_v11 }
 0x2ef   :  { %v1446_v10 = vmul.f32 %v1414_v48, %v1190_v40  ;;  %2306 = vtanh.f32 %v1359_v41  ;;  %v1192_v42 = vmul.f32 0.5, %v3332_v6  ;;  %v1193_v19 = vmul.f32 0.5, %v3304_v28 }
 0x2f0   :  { %v2291_v18 = vpop.eup %2290  ;;  %2308 = vtanh.f32 %v1360_v3  ;;  %v1361_v53 = vmul.f32 0.7978846, %v1329_v38  ;;  %v1362_v20 = vmul.f32 0.7978846, %v1330_v63  ;;  %v1194_v54 = vmul.f32 0.5, %v3319_v9 }
 0x2f1   :  { %v2293_v34 = vpop.eup %2292  ;;  %v1468_v4 = vpack.c.bf16 %v1446_v10, %v1445_v44  ;;  %v1415_v37 = vadd.f32 1.0, %v2291_v18  ;;  %v1195_v27 = vmul.f32 0.5, %v3346_v0  ;;  %v1196_v11 = vmul.f32 0.5, %v3371_v13 }
 0x2f2   :  { %v2295_v5 = vpop.eup %2294  ;;  %v1416_v45 = vadd.f32 1.0, %v2293_v34  ;;  %2310 = vtanh.f32 %v1361_v53  ;;  %v1197_v58 = vmul.f32 0.5, %v3337_v26  ;;  %v1198_v15 = vmul.f32 0.5, %v3349_v12 }
 0x2f3   :  { %v2297_v31 = vpop.eup %2296  ;;  %2142 = vmatmul.mubr.bf16.gmra.mrb[12].mxu1 %v1468_v4  ;;  %v1417_v7 = vadd.f32 1.0, %v2295_v5  ;;  %2312 = vtanh.f32 %v1362_v20  ;;  %v1447_v52 = vmul.f32 %v1415_v37, %v1191_v62  ;;  %v1199_v48 = vmul.f32 0.5, %v3379_v35 }
 0x2f4   :  { %v2299_v14 = vpop.eup %2298  ;;  %v1448_v2 = vmul.f32 %v1416_v45, %v1192_v42  ;;  %v1418_v55 = vadd.f32 1.0, %v2297_v31  ;;  %v1200_v41 = vmul.f32 0.5, %v3388_v49  ;;  %v1201_v18 = vmul.f32 0.5, %v3375_v46  ;;  %v3446_v49 = vld [vmem:[%s3649_s9] ss:$0 sm:$0xff] }
 0x2f5   :  { %v2301_v25 = vpop.eup %2300  ;;  %v1419_v6 = vadd.f32 1.0, %v2299_v14  ;;  %v1449_v21 = vmul.f32 %v1417_v7, %v1193_v19  ;;  %v1202_v53 = vmul.f32 0.5, %v3383_v1 }
 0x2f6   :  { %v2303_v59 = vpop.eup %2302  ;;  %v1469_v61 = vpack.c.bf16 %v1448_v2, %v1447_v52  ;;  %v1450_v22 = vmul.f32 %v1418_v55, %v1194_v54  ;;  %v1420_v36 = vadd.f32 1.0, %v2301_v25 }
 0x2f7   :  { %v2305_v28 = vpop.eup %2304  ;;  %v1421_v23 = vadd.f32 1.0, %v2303_v59  ;;  %v1451_v47 = vmul.f32 %v1419_v6, %v1195_v27 }
 0x2f8   :  { %2145 = vmatprep.mubr.bf16.mxu1 %v1469_v61  ;;  %v1470_v9 = vpack.c.bf16 %v1450_v22, %v1449_v21  ;;  %v1452_v56 = vmul.f32 %v1420_v36, %v1196_v11  ;;  %v1422_v32 = vadd.f32 1.0, %v2305_v28 }
 0x2f9   :  { %v2307_v0 = vpop.eup %2306  ;;  %v1453_v51 = vmul.f32 %v1421_v23, %v1197_v58 }
 0x2fa   :  { %v2309_v39 = vpop.eup %2308  ;;  %v1471_v13 = vpack.c.bf16 %v1452_v56, %v1451_v47  ;;  %v1454_v40 = vmul.f32 %v1422_v32, %v1198_v15  ;;  %v1423_v30 = vadd.f32 1.0, %v2307_v0  ;;  %v3695_v32 = vld [vmem:[#allocation3_spill] sm:$0xff] }
 0x2fb   :  { %2146 = vmatmul.mubr.bf16.gmra.mrb[16].mxu1 %v1470_v9  ;;  %v1424_v26 = vadd.f32 1.0, %v2309_v39 }
 0x2fc   :  { %v2311_v3 = vpop.eup %2310  ;;  %2149 = vmatprep.mubr.bf16.mxu1 %v1471_v13  ;;  %v1472_v12 = vpack.c.bf16 %v1454_v40, %v1453_v51  ;;  %v1455_v63 = vmul.f32 %v1423_v30, %v1199_v48  ;;  %v3696_v51 = vld [vmem:[#allocation2_spill] sm:$0xff] }
 0x2fd   :  { %v2313_v38 = vpop.eup %2312  ;;  %v1456_v44 = vmul.f32 %v1424_v26, %v1200_v41  ;;  %v1425_v10 = vadd.f32 1.0, %v2311_v3 }
 0x2fe   :  { %v1426_v20 = vadd.f32 1.0, %v2313_v38 }
 0x2ff   :  { %v1473_v34 = vpack.c.bf16 %v1456_v44, %v1455_v63  ;;  %v1457_v4 = vmul.f32 %v1425_v10, %v1201_v18  ;;  %v3698_v44 = vld [vmem:[#allocation4_spill] sm:$0xff] }
 0x300   :  { %v1458_v37 = vmul.f32 %v1426_v20, %v1202_v53  ;;  %v3699_v20 = vld [vmem:[#allocation7_spill] sm:$0xff] }
 0x302   :  { %v1474_v5 = vpack.c.bf16 %v1458_v37, %v1457_v4 }
 0x303   :  { %2150 = vmatmul.mubr.bf16.gmra.mrb[20].mxu1 %v1472_v12  ;;  %v3697_v12 = vld [vmem:[#allocation6_spill] sm:$0xff] }
 0x304   :  { %2153 = vmatprep.mubr.bf16.mxu1 %v1473_v34 }
 0x30b   :  { %2154 = vmatmul.mubr.bf16.gmra.mrb[24].mxu1 %v1474_v5  ;;  %v3700_v5 = vld [vmem:[#allocation5_spill] sm:$0xff] }
 0x396   :  { %v2127_v35 = vpop.f32.mrb[32].mxu0 }
 0x397   :  { %v1702_v62 = vadd.f32 %v2127_v35, %v2491_v16  ;;  %v1573_v42 = vpop.f32.mrb[33].mxu0 }
 0x398   :  { %v1700_v46 = vadd.f32 %v1573_v42, %v2493_v17  ;;  %v2128_v1 = vpop.f32.mrb[34].mxu0 }
 0x399   :  { %v1741_v45 = vadd.f32 %v3446_v49, %v1702_v62  ;;  %v1703_v31 = vadd.f32 %v2128_v1, %v2515_v33  ;;  %v1576_v19 = vpop.f32.mrb[35].mxu0 }
 0x39a   :  { %v1739_v7 = vadd.f32 %v3446_v49, %v1700_v46  ;;  %v1701_v14 = vadd.f32 %v1576_v19, %v2511_v29 }
 0x39b   :  { %v2001_v52 = vpack.c.bf16 %v1741_v45, %v1741_v45  ;;  %v1742_v2 = vadd.f32 %v3446_v49, %v1703_v31 }
 0x39c   :  { %v1999_v54 = vpack.c.bf16 %v1739_v7, %v1739_v7  ;;  %v1740_v16 = vadd.f32 %v3446_v49, %v1701_v14  ;;  %v3701_v7 = vld [vmem:[#allocation10_spill] sm:$0xff] }
 0x39d   :  { %1902 = vst.msk [vmem:[%s3650_s10 + $0x8] sm:$0xf] %vm1899_vm1, %v2001_v52  ;;  %v2002_v17 = vpack.c.bf16 %v1742_v2, %v1742_v2  ;;  %v3702_v2 = vld [vmem:[#allocation8_spill] sm:$0xff] }
 0x39e   :  { %1900 = vst.msk [vmem:[%s3650_s10] sm:$0xf] %vm1899_vm1, %v1999_v54  ;;  %v2000_v33 = vpack.c.bf16 %v1740_v16, %v1740_v16 }
 0x39f   :  { %1903 = vst.msk [vmem:[%s3650_s10 + $0xc] sm:$0xf] %vm1899_vm1, %v2002_v17  ;;  %v2131_v29 = vpop.f32.mrb[0].mxu1 }
 0x3a0   :  { %1901 = vst.msk [vmem:[%s3650_s10 + $0x4] sm:$0xf] %vm1899_vm1, %v2000_v33  ;;  %v1706_v55 = vadd.f32 %v2131_v29, %v2555_v57  ;;  %v1589_v25 = vpop.f32.mrb[1].mxu1  ;;  %v3703_v33 = vld [vmem:[#allocation11_spill] sm:$0xff] }
 0x3a1   :  { %v1704_v27 = vadd.f32 %v1589_v25, %v2533_v43  ;;  %v2132_v11 = vpop.f32.mrb[2].mxu1 }
 0x3a2   :  { %v1745_v6 = vadd.f32 %v3446_v49, %v1706_v55  ;;  %v1707_v59 = vadd.f32 %v2132_v11, %v2557_v60  ;;  %v1592_v61 = vpop.f32.mrb[3].mxu1 }
 0x3a3   :  { %v1743_v21 = vadd.f32 %v3446_v49, %v1704_v27  ;;  %v1705_v22 = vadd.f32 %v1592_v61, %v2546_v50  ;;  %v3704_v27 = vld [vmem:[#allocation9_spill] sm:$0xff] }
 0x3a4   :  { %v2005_v36 = vpack.c.bf16 %v1745_v6, %v1745_v6  ;;  %v1746_v28 = vadd.f32 %v3446_v49, %v1707_v59 }
 0x3a5   :  { %v2003_v58 = vpack.c.bf16 %v1743_v21, %v1743_v21  ;;  %v1744_v15 = vadd.f32 %v3446_v49, %v1705_v22 }
 0x3a6   :  { %1906 = vst.msk [vmem:[%s3650_s10 + $0x18] sm:$0xf] %vm1899_vm1, %v2005_v36  ;;  %v2006_v43 = vpack.c.bf16 %v1746_v28, %v1746_v28 }
 0x3a7   :  { %1904 = vst.msk [vmem:[%s3650_s10 + $0x10] sm:$0xf] %vm1899_vm1, %v2003_v58  ;;  %v2004_v57 = vpack.c.bf16 %v1744_v15, %v1744_v15  ;;  %v3705_v58 = vld [vmem:[#allocation14_spill] sm:$0xff] }
 0x3a8   :  { %1907 = vst.msk [vmem:[%s3650_s10 + $0x1c] sm:$0xf] %vm1899_vm1, %v2006_v43 }
 0x3a9   :  { %1905 = vst.msk [vmem:[%s3650_s10 + $0x14] sm:$0xf] %vm1899_vm1, %v2004_v57  ;;  %v3706_v57 = vld [vmem:[#allocation12_spill] sm:$0xff] }
 0x3af   :  { %v2135_v50 = vpop.f32.mrb[4].mxu1 }
 0x3b0   :  { %v1710_v60 = vadd.f32 %v2135_v50, %v2599_v24  ;;  %v1605_v23 = vpop.f32.mrb[5].mxu1 }
 0x3b1   :  { %v1708_v9 = vadd.f32 %v1605_v23, %v2577_v8  ;;  %v2136_v47 = vpop.f32.mrb[6].mxu1 }
 0x3b2   :  { %v1749_v56 = vadd.f32 %v3446_v49, %v1710_v60  ;;  %v1711_v0 = vadd.f32 %v2136_v47, %v3695_v32  ;;  %v1608_v39 = vpop.f32.mrb[7].mxu1 }
 0x3b3   :  { %v1747_v13 = vadd.f32 %v3446_v49, %v1708_v9  ;;  %v1709_v40 = vadd.f32 %v1608_v39, %v3696_v51  ;;  %v3707_v9 = vld [vmem:[#allocation15_spill] sm:$0xff] }
 0x3b4   :  { %v2009_v30 = vpack.c.bf16 %v1749_v56, %v1749_v56  ;;  %v1750_v48 = vadd.f32 %v3446_v49, %v1711_v0  ;;  %v3708_v0 = vld [vmem:[#allocation13_spill] sm:$0xff] }
 0x3b5   :  { %v2007_v41 = vpack.c.bf16 %v1747_v13, %v1747_v13  ;;  %v1748_v26 = vadd.f32 %v3446_v49, %v1709_v40 }
 0x3b6   :  { %1910 = vst.msk [vmem:[%s3650_s10 + $0x28] sm:$0xf] %vm1899_vm1, %v2009_v30  ;;  %v2010_v8 = vpack.c.bf16 %v1750_v48, %v1750_v48 }
 0x3b7   :  { %1908 = vst.msk [vmem:[%s3650_s10 + $0x20] sm:$0xf] %vm1899_vm1, %v2007_v41  ;;  %v2008_v24 = vpack.c.bf16 %v1748_v26, %v1748_v26 }
 0x3b8   :  { %1911 = vst.msk [vmem:[%s3650_s10 + $0x2c] sm:$0xf] %vm1899_vm1, %v2010_v8  ;;  %v3709_v8 = vld [vmem:[#allocation18_spill] sm:$0xff] }
 0x3b9   :  { %1909 = vst.msk [vmem:[%s3650_s10 + $0x24] sm:$0xf] %vm1899_vm1, %v2008_v24  ;;  %v2139_v3 = vpop.f32.mrb[8].mxu1 }
 0x3ba   :  { %v1714_v38 = vadd.f32 %v2139_v3, %v3697_v12  ;;  %v1621_v63 = vpop.f32.mrb[9].mxu1  ;;  %v3710_v12 = vld [vmem:[#allocation16_spill] sm:$0xff] }
 0x3bb   :  { %v1712_v10 = vadd.f32 %v1621_v63, %v3698_v44  ;;  %v2140_v18 = vpop.f32.mrb[10].mxu1 }
 0x3bc   :  { %v1753_v53 = vadd.f32 %v3446_v49, %v1714_v38  ;;  %v1715_v34 = vadd.f32 %v2140_v18, %v3699_v20  ;;  %v1624_v4 = vpop.f32.mrb[11].mxu1 }
 0x3bd   :  { %v1751_v37 = vadd.f32 %v3446_v49, %v1712_v10  ;;  %v1713_v35 = vadd.f32 %v1624_v4, %v3700_v5  ;;  %v3711_v10 = vld [vmem:[#allocation19_spill] sm:$0xff] }
 0x3be   :  { %v2013_v62 = vpack.c.bf16 %v1753_v53, %v1753_v53  ;;  %v1754_v42 = vadd.f32 %v3446_v49, %v1715_v34  ;;  %v3712_v34 = vld [vmem:[#allocation17_spill] sm:$0xff] }
 0x3bf   :  { %v2011_v46 = vpack.c.bf16 %v1751_v37, %v1751_v37  ;;  %v1752_v1 = vadd.f32 %v3446_v49, %v1713_v35 }
 0x3c0   :  { %1914 = vst.msk [vmem:[%s3650_s10 + $0x38] sm:$0xf] %vm1899_vm1, %v2013_v62  ;;  %v2014_v45 = vpack.c.bf16 %v1754_v42, %v1754_v42 }
 0x3c1   :  { %1912 = vst.msk [vmem:[%s3650_s10 + $0x30] sm:$0xf] %vm1899_vm1, %v2011_v46  ;;  %v2012_v31 = vpack.c.bf16 %v1752_v1, %v1752_v1 }
 0x3c2   :  { %1915 = vst.msk [vmem:[%s3650_s10 + $0x3c] sm:$0xf] %vm1899_vm1, %v2014_v45  ;;  %v3713_v45 = vld [vmem:[#allocation23_spill] sm:$0xff] }
 0x3c3   :  { %1913 = vst.msk [vmem:[%s3650_s10 + $0x34] sm:$0xf] %vm1899_vm1, %v2012_v31 }
 0x3c6   :  { %v2143_v19 = vpop.f32.mrb[12].mxu1 }
 0x3c7   :  { %v1718_v14 = vadd.f32 %v2143_v19, %v3701_v7  ;;  %v1637_v52 = vpop.f32.mrb[13].mxu1  ;;  %v3714_v7 = vld [vmem:[#allocation20_spill] sm:$0xff] }
 0x3c8   :  { %v1716_v54 = vadd.f32 %v1637_v52, %v3702_v2  ;;  %v2144_v16 = vpop.f32.mrb[14].mxu1 }
 0x3c9   :  { %v1757_v17 = vadd.f32 %v3446_v49, %v1718_v14  ;;  %v1719_v29 = vadd.f32 %v2144_v16, %v3703_v33  ;;  %v1640_v55 = vpop.f32.mrb[15].mxu1 }
 0x3ca   :  { %v1755_v25 = vadd.f32 %v3446_v49, %v1716_v54  ;;  %v1717_v11 = vadd.f32 %v1640_v55, %v3704_v27  ;;  %v3715_v54 = vld [vmem:[#allocation22_spill] sm:$0xff] }
 0x3cb   :  { %v2017_v6 = vpack.c.bf16 %v1757_v17, %v1757_v17  ;;  %v1758_v59 = vadd.f32 %v3446_v49, %v1719_v29  ;;  %v3716_v29 = vld [vmem:[#allocation21_spill] sm:$0xff] }
 0x3cc   :  { %v2015_v61 = vpack.c.bf16 %v1755_v25, %v1755_v25  ;;  %v1756_v21 = vadd.f32 %v3446_v49, %v1717_v11 }
 0x3cd   :  { %1918 = vst.msk [vmem:[%s3650_s10 + $0x48] sm:$0xf] %vm1899_vm1, %v2017_v6  ;;  %v2018_v22 = vpack.c.bf16 %v1758_v59, %v1758_v59 }
 0x3ce   :  { %1916 = vst.msk [vmem:[%s3650_s10 + $0x40] sm:$0xf] %vm1899_vm1, %v2015_v61  ;;  %v2016_v36 = vpack.c.bf16 %v1756_v21, %v1756_v21  ;;  %v2147_v28 = vpop.f32.mrb[16].mxu1 }
 0x3cf   :  { %1919 = vst.msk [vmem:[%s3650_s10 + $0x4c] sm:$0xf] %vm1899_vm1, %v2018_v22  ;;  %v1722_v15 = vadd.f32 %v2147_v28, %v3705_v58  ;;  %v1653_v43 = vpop.f32.mrb[17].mxu1 }
 0x3d0   :  { %1917 = vst.msk [vmem:[%s3650_s10 + $0x44] sm:$0xf] %vm1899_vm1, %v2016_v36  ;;  %v1720_v50 = vadd.f32 %v1653_v43, %v3706_v57  ;;  %v2148_v60 = vpop.f32.mrb[18].mxu1 }
 0x3d1   :  { %v1761_v23 = vadd.f32 %v3446_v49, %v1722_v15  ;;  %v1723_v47 = vadd.f32 %v2148_v60, %v3707_v9  ;;  %v1656_v56 = vpop.f32.mrb[19].mxu1 }
 0x3d2   :  { %v1759_v32 = vadd.f32 %v3446_v49, %v1720_v50  ;;  %v1721_v39 = vadd.f32 %v1656_v56, %v3708_v0 }
 0x3d3   :  { %v2021_v13 = vpack.c.bf16 %v1761_v23, %v1761_v23  ;;  %v1762_v51 = vadd.f32 %v3446_v49, %v1723_v47 }
 0x3d4   :  { %v2019_v40 = vpack.c.bf16 %v1759_v32, %v1759_v32  ;;  %v1760_v30 = vadd.f32 %v3446_v49, %v1721_v39 }
 0x3d5   :  { %1922 = vst.msk [vmem:[%s3650_s10 + $0x58] sm:$0xf] %vm1899_vm1, %v2021_v13  ;;  %v2022_v48 = vpack.c.bf16 %v1762_v51, %v1762_v51 }
 0x3d6   :  { %1920 = vst.msk [vmem:[%s3650_s10 + $0x50] sm:$0xf] %vm1899_vm1, %v2019_v40  ;;  %v2020_v41 = vpack.c.bf16 %v1760_v30, %v1760_v30  ;;  %v2151_v26 = vpop.f32.mrb[20].mxu1 }
 0x3d7   :  { %1923 = vst.msk [vmem:[%s3650_s10 + $0x5c] sm:$0xf] %vm1899_vm1, %v2022_v48  ;;  %v1726_v24 = vadd.f32 %v2151_v26, %v3709_v8  ;;  %v1669_v3 = vpop.f32.mrb[21].mxu1 }
 0x3d8   :  { %1921 = vst.msk [vmem:[%s3650_s10 + $0x54] sm:$0xf] %vm1899_vm1, %v2020_v41  ;;  %v1724_v38 = vadd.f32 %v1669_v3, %v3710_v12  ;;  %v2152_v63 = vpop.f32.mrb[22].mxu1 }
 0x3d9   :  { %v1765_v44 = vadd.f32 %v3446_v49, %v1726_v24  ;;  %v1727_v18 = vadd.f32 %v2152_v63, %v3711_v10  ;;  %v1672_v53 = vpop.f32.mrb[23].mxu1 }
 0x3da   :  { %v1763_v20 = vadd.f32 %v3446_v49, %v1724_v38  ;;  %v1725_v4 = vadd.f32 %v1672_v53, %v3712_v34 }
 0x3db   :  { %v2025_v37 = vpack.c.bf16 %v1765_v44, %v1765_v44  ;;  %v1766_v5 = vadd.f32 %v3446_v49, %v1727_v18 }
 0x3dc   :  { %v2023_v35 = vpack.c.bf16 %v1763_v20, %v1763_v20  ;;  %v1764_v62 = vadd.f32 %v3446_v49, %v1725_v4 }
 0x3dd   :  { %1926 = vst.msk [vmem:[%s3650_s10 + $0x68] sm:$0xf] %vm1899_vm1, %v2025_v37  ;;  %v2026_v42 = vpack.c.bf16 %v1766_v5, %v1766_v5 }
 0x3de   :  { %1924 = vst.msk [vmem:[%s3650_s10 + $0x60] sm:$0xf] %vm1899_vm1, %v2023_v35  ;;  %v2024_v46 = vpack.c.bf16 %v1764_v62, %v1764_v62  ;;  %v2155_v1 = vpop.f32.mrb[24].mxu1 }
 0x3df   :  { %1927 = vst.msk [vmem:[%s3650_s10 + $0x6c] sm:$0xf] %vm1899_vm1, %v2026_v42  ;;  %v1730_v31 = vadd.f32 %v2155_v1, %v3713_v45  ;;  %v1685_v19 = vpop.f32.mrb[25].mxu1 }
 0x3e0   :  { %1925 = vst.msk [vmem:[%s3650_s10 + $0x64] sm:$0xf] %vm1899_vm1, %v2024_v46  ;;  %v1728_v14 = vadd.f32 %v1685_v19, %v3714_v7  ;;  %v2156_v52 = vpop.f32.mrb[26].mxu1 }
 0x3e1   :  { %v1769_v2 = vadd.f32 %v3446_v49, %v1730_v31  ;;  %v1731_v16 = vadd.f32 %v2156_v52, %v3715_v54  ;;  %v1688_v17 = vpop.f32.mrb[27].mxu1 }
 0x3e2   :  { %v1767_v33 = vadd.f32 %v3446_v49, %v1728_v14  ;;  %v1729_v55 = vadd.f32 %v1688_v17, %v3716_v29 }
 0x3e3   :  { %v2029_v25 = vpack.c.bf16 %v1769_v2, %v1769_v2  ;;  %v1770_v27 = vadd.f32 %v3446_v49, %v1731_v16 }
 0x3e4   :  { %v2027_v11 = vpack.c.bf16 %v1767_v33, %v1767_v33  ;;  %v1768_v6 = vadd.f32 %v3446_v49, %v1729_v55 }
 0x3e5   :  { %1930 = vst.msk [vmem:[%s3650_s10 + $0x78] sm:$0xf] %vm1899_vm1, %v2029_v25  ;;  %v2030_v59 = vpack.c.bf16 %v1770_v27, %v1770_v27 }
 0x3e6   :  { %1928 = vst.msk [vmem:[%s3650_s10 + $0x70] sm:$0xf] %vm1899_vm1, %v2027_v11  ;;  %v2028_v61 = vpack.c.bf16 %v1768_v6, %v1768_v6 }
 0x3e7   :  { %1931 = vst.msk [vmem:[%s3650_s10 + $0x7c] sm:$0xf] %vm1899_vm1, %v2030_v59 }
 0x3e8   :  { %1929 = vst.msk [vmem:[%s3650_s10 + $0x74] sm:$0xf] %vm1899_vm1, %v2028_v61 }

// kernel: evoformer_lite_msa_seq.19
= control target key start
LH: loop header
LB: loop body
LE: loop exit
PB: predicated region body
PF: predicated region fallthrough
CT: control target
= control target key end

     0   :  { %vm913_vm0 = vcmask 257024   ;;  %s1576_s1 = inlined_call_operand.vmem [shape: bf16[1152,32], index: 1, kind: input, shape index: {}]   ;;  %s1577_s0 = inlined_call_operand.vmem [shape: f32[32,1152], index: 0, kind: input, shape index: {}]   ;;  %s1578_s2 = inlined_call_operand.vmem [shape: f32[1,32], index: 2, kind: input, shape index: {}]   ;;  %s1579_s3 = inlined_call_operand.vmem [shape: bf16[32,32], index: 3, kind: output, shape index: {}]  }
   0x1   :  { %v1145_v0 = vld [vmem:[%s1576_s1 + $0x40] sm:$0xff]   ;;  %v1149_v4 = vld [vmem:[%s1576_s1 + $0x48] sm:$0xff]   ;;  %v1153_v8 = vld [vmem:[%s1576_s1 + $0x50] sm:$0xff]  }
   0x2   :  { %v1146_v1 = vld [vmem:[%s1576_s1] sm:$0xff]   ;;  %1003 = vmatprep.subr.bf16.mxu0 %v1145_v0  ;;  %v1150_v5 = vld [vmem:[%s1576_s1 + $0x8] sm:$0xff]   ;;  %v1154_v9 = vld [vmem:[%s1576_s1 + $0x10] sm:$0xff]  }
   0x3   :  { %v1147_v2 = vld [vmem:[%s1576_s1 + $0xc0] sm:$0xff]   ;;  %1004 = vmatpush3.bf16.msra.mxu0 %v1146_v1  ;;  %v1151_v6 = vld [vmem:[%s1576_s1 + $0xc8] sm:$0xff]   ;;  %v1155_v10 = vld [vmem:[%s1576_s1 + $0xd0] sm:$0xff]  }
   0x4   :  { %v1148_v3 = vld [vmem:[%s1576_s1 + $0x80] sm:$0xff]   ;;  %1031 = vmatprep.subr.bf16.mxu1 %v1147_v2  ;;  %1005 = vmatprep.subr.bf16.mxu0 %v1149_v4  ;;  %v1152_v7 = vld [vmem:[%s1576_s1 + $0x88] sm:$0xff]   ;;  %v1156_v11 = vld [vmem:[%s1576_s1 + $0x90] sm:$0xff]  }
   0x5   :  { %1032 = vmatpush3.bf16.msra.mxu1 %v1148_v3  ;;  %v1157_v12 = vld [vmem:[%s1576_s1 + $0x58] sm:$0xff]   ;;  %v1161_v16 = vld [vmem:[%s1576_s1 + $0x60] sm:$0xff]   ;;  %v1165_v20 = vld [vmem:[%s1576_s1 + $0x68] sm:$0xff]  }
   0x6   :  { %1033 = vmatprep.subr.bf16.mxu1 %v1151_v6  ;;  %v1158_v13 = vld [vmem:[%s1576_s1 + $0x18] sm:$0xff]   ;;  %v1162_v17 = vld [vmem:[%s1576_s1 + $0x20] sm:$0xff]   ;;  %v1166_v21 = vld [vmem:[%s1576_s1 + $0x28] sm:$0xff]  }
   0x7   :  { %1006 = vmatpush3.bf16.msra.mxu0 %v1150_v5  ;;  %v1159_v14 = vld [vmem:[%s1576_s1 + $0xd8] sm:$0xff]   ;;  %v1163_v18 = vld [vmem:[%s1576_s1 + $0xe0] sm:$0xff]   ;;  %v1167_v22 = vld [vmem:[%s1576_s1 + $0xe8] sm:$0xff]  }
   0x8   :  { %1007 = vmatprep.subr.bf16.mxu0 %v1153_v8  ;;  %v1160_v15 = vld [vmem:[%s1576_s1 + $0x98] sm:$0xff]   ;;  %v1164_v19 = vld [vmem:[%s1576_s1 + $0xa0] sm:$0xff]   ;;  %v1168_v23 = vld [vmem:[%s1576_s1 + $0xa8] sm:$0xff]  }
   0x9   :  { %1034 = vmatpush3.bf16.msra.mxu1 %v1152_v7  ;;  %v1169_v24 = vld [vmem:[%s1576_s1 + $0x70] sm:$0xff]   ;;  %v1173_v28 = vld [vmem:[%s1576_s1 + $0x78] sm:$0xff]   ;;  %v16_v31 = vld [vmem:[%s1577_s0 + $0x8] sm:$0xff] }
   0xa   :  { %1035 = vmatprep.subr.bf16.mxu1 %v1155_v10  ;;  %v1170_v25 = vld [vmem:[%s1576_s1 + $0x30] sm:$0xff]   ;;  %v1174_v29 = vld [vmem:[%s1576_s1 + $0x38] sm:$0xff]   ;;  %v15_v35 = vld [vmem:[%s1577_s0] sm:$0xff] }
   0xb   :  { %1008 = vmatpush3.bf16.msra.mxu0 %v1154_v9  ;;  %v1171_v26 = vld [vmem:[%s1576_s1 + $0xf0] sm:$0xff]   ;;  %v1175_v30 = vld [vmem:[%s1576_s1 + $0xf8] sm:$0xff]   ;;  %v24_v36 = vld [vmem:[%s1577_s0 + $0x48] sm:$0xff] }
   0xc   :  { %1009 = vmatprep.subr.bf16.mxu0 %v1157_v12  ;;  %v1172_v27 = vld [vmem:[%s1576_s1 + $0xb0] sm:$0xff]   ;;  %v1176_v34 = vld [vmem:[%s1576_s1 + $0xb8] sm:$0xff]   ;;  %v51_v37 = vpack.c.bf16 %v24_v36, %v15_v35  ;;  %v1177_v38 = vld [vmem:[%s1576_s1 + $0x140] sm:$0xff]  }
   0xd   :  { %1036 = vmatpush3.bf16.msra.mxu1 %v1156_v11  ;;  %v25_v32 = vld [vmem:[%s1577_s0 + $0x50] sm:$0xff]  ;;  %v18_v39 = vld [vmem:[%s1577_s0 + $0x18] sm:$0xff]  ;;  %v27_v40 = vld [vmem:[%s1577_s0 + $0x60] sm:$0xff] }
   0xe   :  { %1037 = vmatprep.subr.bf16.mxu1 %v1159_v14  ;;  %v52_v33 = vpack.c.bf16 %v25_v32, %v16_v31  ;;  %v54_v41 = vpack.c.bf16 %v27_v40, %v18_v39  ;;  %v1178_v42 = vld [vmem:[%s1576_s1 + $0x100] sm:$0xff]   ;;  %v17_v43 = vld [vmem:[%s1577_s0 + $0x10] sm:$0xff]  ;;  %v26_v44 = vld [vmem:[%s1577_s0 + $0x58] sm:$0xff] }
   0xf   :  { %1010 = vmatpush3.bf16.msra.mxu0 %v1158_v13  ;;  %v53_v45 = vpack.c.bf16 %v26_v44, %v17_v43  ;;  %v1179_v46 = vld [vmem:[%s1576_s1 + $0x1c0] sm:$0xff]   ;;  %v1181_v48 = vld [vmem:[%s1576_s1 + $0x148] sm:$0xff]   ;;  %v1185_v52 = vld [vmem:[%s1576_s1 + $0x150] sm:$0xff]  }
  0x10   :  { %1011 = vmatprep.subr.bf16.mxu0 %v1161_v16  ;;  %684 = vmatprep.mubr.bf16.mxu0 %v52_v33  ;;  %v1180_v47 = vld [vmem:[%s1576_s1 + $0x180] sm:$0xff]   ;;  %v1182_v49 = vld [vmem:[%s1576_s1 + $0x108] sm:$0xff]   ;;  %v1186_v53 = vld [vmem:[%s1576_s1 + $0x110] sm:$0xff]  }
  0x11   :  { %1038 = vmatpush3.bf16.msra.mxu1 %v1160_v15  ;;  %733 = vmatprep.mubr.bf16.mxu1 %v54_v41  ;;  %v1183_v50 = vld [vmem:[%s1576_s1 + $0x1c8] sm:$0xff]   ;;  %v1187_v54 = vld [vmem:[%s1576_s1 + $0x1d0] sm:$0xff]   ;;  %v1189_v56 = vld [vmem:[%s1576_s1 + $0x158] sm:$0xff]  }
  0x12   :  { %1039 = vmatprep.subr.bf16.mxu1 %v1163_v18  ;;  %v1184_v51 = vld [vmem:[%s1576_s1 + $0x188] sm:$0xff]   ;;  %v1188_v55 = vld [vmem:[%s1576_s1 + $0x190] sm:$0xff]   ;;  %v1190_v57 = vld [vmem:[%s1576_s1 + $0x118] sm:$0xff]  }
  0x13   :  { %1012 = vmatpush3.bf16.msra.mxu0 %v1162_v17  ;;  %v1191_v58 = vld [vmem:[%s1576_s1 + $0x1d8] sm:$0xff]   ;;  %v1193_v60 = vld [vmem:[%s1576_s1 + $0x160] sm:$0xff]   ;;  %v1197_v0 = vld [vmem:[%s1576_s1 + $0x168] sm:$0xff]  }
  0x14   :  { %1013 = vmatprep.subr.bf16.mxu0 %v1165_v20  ;;  %v1192_v59 = vld [vmem:[%s1576_s1 + $0x198] sm:$0xff]   ;;  %v1194_v61 = vld [vmem:[%s1576_s1 + $0x120] sm:$0xff]   ;;  %v1198_v4 = vld [vmem:[%s1576_s1 + $0x128] sm:$0xff]  }
  0x15   :  { %1040 = vmatpush3.bf16.msra.mxu1 %v1164_v19  ;;  %v1195_v62 = vld [vmem:[%s1576_s1 + $0x1e0] sm:$0xff]   ;;  %v34_v1 = vld [vmem:[%s1577_s0 + $0x98] sm:$0xff]  ;;  %v33_v5 = vld [vmem:[%s1577_s0 + $0x90] sm:$0xff] }
  0x16   :  { %1041 = vmatprep.subr.bf16.mxu1 %v1167_v22  ;;  %v1196_v63 = vld [vmem:[%s1576_s1 + $0x1a0] sm:$0xff]   ;;  %v42_v6 = vld [vmem:[%s1577_s0 + $0xd8] sm:$0xff]  ;;  %v1199_v8 = vld [vmem:[%s1576_s1 + $0x1e8] sm:$0xff]  }
  0x17   :  { %1014 = vmatpush3.bf16.msra.mxu0 %v1166_v21  ;;  %v43_v2 = vld [vmem:[%s1577_s0 + $0xe0] sm:$0xff]  ;;  %v60_v7 = vpack.c.bf16 %v42_v6, %v33_v5  ;;  %v36_v9 = vld [vmem:[%s1577_s0 + $0xa8] sm:$0xff]  ;;  %v45_v10 = vld [vmem:[%s1577_s0 + $0xf0] sm:$0xff] }
  0x18   :  { %1015 = vmatprep.subr.bf16.mxu0 %v1169_v24  ;;  %v61_v3 = vpack.c.bf16 %v43_v2, %v34_v1  ;;  %v63_v11 = vpack.c.bf16 %v45_v10, %v36_v9  ;;  %v1200_v12 = vld [vmem:[%s1576_s1 + $0x1a8] sm:$0xff]   ;;  %v35_v13 = vld [vmem:[%s1577_s0 + $0xa0] sm:$0xff]  ;;  %v1201_v16 = vld [vmem:[%s1576_s1 + $0x170] sm:$0xff]  }
  0x19   :  { %1042 = vmatpush3.bf16.msra.mxu1 %v1168_v23  ;;  %v44_v14 = vld [vmem:[%s1577_s0 + $0xe8] sm:$0xff]  ;;  %v1202_v17 = vld [vmem:[%s1576_s1 + $0x130] sm:$0xff]   ;;  %v1205_v20 = vld [vmem:[%s1576_s1 + $0x178] sm:$0xff]  }
  0x1a   :  { %1043 = vmatprep.subr.bf16.mxu1 %v1171_v26  ;;  %v62_v15 = vpack.c.bf16 %v44_v14, %v35_v13  ;;  %v1203_v18 = vld [vmem:[%s1576_s1 + $0x1f0] sm:$0xff]   ;;  %v1206_v21 = vld [vmem:[%s1576_s1 + $0x138] sm:$0xff]   ;;  %v20_v23 = vld [vmem:[%s1577_s0 + $0x28] sm:$0xff] }
  0x1b   :  { %1016 = vmatpush3.bf16.msra.mxu0 %v1170_v25  ;;  %v1204_v19 = vld [vmem:[%s1576_s1 + $0x1b0] sm:$0xff]   ;;  %v1207_v22 = vld [vmem:[%s1576_s1 + $0x1f8] sm:$0xff]   ;;  %v31_v32 = vld [vmem:[%s1577_s0 + $0x80] sm:$0xff] }
  0x1c   :  { %1017 = vmatprep.subr.bf16.mxu0 %v1173_v28  ;;  %v29_v24 = vld [vmem:[%s1577_s0 + $0x70] sm:$0xff]  ;;  %v1208_v26 = vld [vmem:[%s1576_s1 + $0x1b8] sm:$0xff]   ;;  %v28_v28 = vld [vmem:[%s1577_s0 + $0x68] sm:$0xff] }
  0x1d   :  { %1044 = vmatpush3.bf16.msra.mxu1 %v1172_v27  ;;  %v56_v25 = vpack.c.bf16 %v29_v24, %v20_v23  ;;  %v19_v27 = vld [vmem:[%s1577_s0 + $0x20] sm:$0xff]  ;;  %v22_v31 = vld [vmem:[%s1577_s0 + $0x38] sm:$0xff]  ;;  %v21_v33 = vld [vmem:[%s1577_s0 + $0x30] sm:$0xff] }
  0x1e   :  { %1045 = vmatprep.subr.bf16.mxu1 %v1175_v30  ;;  %v1209_v30 = vld [vmem:[%s1576_s1 + $0x200] sm:$0xff]   ;;  %v58_v35 = vpack.c.bf16 %v31_v32, %v22_v31  ;;  %v37_v40 = vld [vmem:[%s1577_s0 + $0xb0] sm:$0xff]  ;;  %v40_v44 = vld [vmem:[%s1577_s0 + $0xc8] sm:$0xff] }
  0x1f   :  { %1018 = vmatpush3.bf16.msra.mxu0 %v1174_v29  ;;  %v55_v29 = vpack.c.bf16 %v28_v28, %v19_v27  ;;  %v47_v39 = vld [vmem:[%s1577_s0 + $0x100] sm:$0xff]  ;;  %v1211_v43 = vld [vmem:[%s1576_s1 + $0x210] sm:$0xff]  }
  0x20   :  { %1059 = vmatprep.subr.bf16.mxu0 %v1177_v38  ;;  %v38_v38 = vld [vmem:[%s1577_s0 + $0xb8] sm:$0xff] }
  0x21   :  { %1046 = vmatpush3.bf16.msra.mxu1 %v1176_v34  ;;  %v30_v34 = vld [vmem:[%s1577_s0 + $0x78] sm:$0xff]  ;;  %v65_v41 = vpack.c.bf16 %v47_v39, %v38_v38 }
  0x22   :  { %685 = vmatmul.mubr.bf16.vlgmr.msra.gmra.mrb[0].mxu0 %v51_v37  ;;  %1087 = vmatprep.subr.bf16.mxu1 %v1179_v46  ;;  %v57_v36 = vpack.c.bf16 %v30_v34, %v21_v33  ;;  %v1210_v37 = vld [vmem:[%s1576_s1 + $0x208] sm:$0xff]  }
  0x23   :  { %1060 = vmatpush3.bf16.msra.mxu0 %v1178_v42  ;;  %692 = vmatprep.mubr.bf16.mxu0 %v61_v3  ;;  %v46_v42 = vld [vmem:[%s1577_s0 + $0xf8] sm:$0xff] }
  0x24   :  { %734 = vmatmul.mubr.bf16.vlgmr.msra.gmra.mrb[0].mxu1 %v53_v45  ;;  %1061 = vmatprep.subr.bf16.mxu0 %v1181_v48  ;;  %v49_v45 = vld [vmem:[%s1577_s0 + $0x110] sm:$0xff]  ;;  %v64_v46 = vpack.c.bf16 %v46_v42, %v37_v40  ;;  %v39_v48 = vld [vmem:[%s1577_s0 + $0xc0] sm:$0xff] }
  0x25   :  { %1088 = vmatpush3.bf16.msra.mxu1 %v1180_v47  ;;  %741 = vmatprep.mubr.bf16.mxu1 %v63_v11  ;;  %v67_v47 = vpack.c.bf16 %v49_v45, %v40_v44 }
  0x26   :  { %1089 = vmatprep.subr.bf16.mxu1 %v1183_v50  ;;  %v1212_v50 = vld [vmem:[%s1576_s1 + $0x218] sm:$0xff]  }
  0x27   :  { %1062 = vmatpush3.bf16.msra.mxu0 %v1182_v49  ;;  %v48_v49 = vld [vmem:[%s1577_s0 + $0x108] sm:$0xff] }
  0x28   :  { %1063 = vmatprep.subr.bf16.mxu0 %v1185_v52  ;;  %v23_v52 = vld [vmem:[%s1577_s0 + $0x40] sm:$0xff] }
  0x29   :  { %1090 = vmatpush3.bf16.msra.mxu1 %v1184_v51  ;;  %v66_v51 = vpack.c.bf16 %v48_v49, %v39_v48 }
  0x2a   :  { %1091 = vmatprep.subr.bf16.mxu1 %v1187_v54  ;;  %693 = vmatmul.mubr.bf16.gmra.mrb[4].mxu0 %v60_v7  ;;  %v32_v54 = vld [vmem:[%s1577_s0 + $0x88] sm:$0xff] }
  0x2b   :  { %1064 = vmatpush3.bf16.msra.mxu0 %v1186_v53  ;;  %782 = vmatprep.mubr.bf16.mxu0 %v56_v25  ;;  %v1213_v53 = vld [vmem:[%s1576_s1 + $0x220] sm:$0xff]  }
  0x2c   :  { %1065 = vmatprep.subr.bf16.mxu0 %v1189_v56  ;;  %742 = vmatmul.mubr.bf16.gmra.mrb[4].mxu1 %v62_v15  ;;  %v1214_v56 = vld [vmem:[%s1576_s1 + $0x228] sm:$0xff]  }
  0x2d   :  { %1092 = vmatpush3.bf16.msra.mxu1 %v1188_v55  ;;  %831 = vmatprep.mubr.bf16.mxu1 %v58_v35  ;;  %v59_v55 = vpack.c.bf16 %v32_v54, %v23_v52 }
  0x2e   :  { %1093 = vmatprep.subr.bf16.mxu1 %v1191_v58  ;;  %v1216_v58 = vld [vmem:[%s1576_s1 + $0x238] sm:$0xff]  }
  0x2f   :  { %1066 = vmatpush3.bf16.msra.mxu0 %v1190_v57  ;;  %v1215_v57 = vld [vmem:[%s1576_s1 + $0x230] sm:$0xff]  }
  0x30   :  { %1067 = vmatprep.subr.bf16.mxu0 %v1193_v60  ;;  %v50_v60 = vld [vmem:[%s1577_s0 + $0x118] sm:$0xff] }
  0x31   :  { %1094 = vmatpush3.bf16.msra.mxu1 %v1192_v59  ;;  %v41_v59 = vld [vmem:[%s1577_s0 + $0xd0] sm:$0xff] }
  0x32   :  { %1095 = vmatprep.subr.bf16.mxu1 %v1195_v62 }
  0x33   :  { %1068 = vmatpush3.bf16.msra.mxu0 %v1194_v61  ;;  %v68_v61 = vpack.c.bf16 %v50_v60, %v41_v59 }
  0x34   :  { %1069 = vmatprep.subr.bf16.mxu0 %v1197_v0 }
  0x35   :  { %1096 = vmatpush3.bf16.msra.mxu1 %v1196_v63  ;;  %v922_v63 = vld [vmem:[%s1578_s2] ss:$0 sm:$0xff] }
  0x36   :  { %1097 = vmatprep.subr.bf16.mxu1 %v1199_v8 }
  0x37   :  { %1070 = vmatpush3.bf16.msra.mxu0 %v1198_v4 }
  0x38   :  { %1071 = vmatprep.subr.bf16.mxu0 %v1201_v16 }
  0x39   :  { %1098 = vmatpush3.bf16.msra.mxu1 %v1200_v12 }
  0x3a   :  { %1099 = vmatprep.subr.bf16.mxu1 %v1203_v18 }
  0x3b   :  { %1072 = vmatpush3.bf16.msra.mxu0 %v1202_v17 }
  0x3c   :  { %1073 = vmatprep.subr.bf16.mxu0 %v1205_v20 }
  0x3d   :  { %1100 = vmatpush3.bf16.msra.mxu1 %v1204_v19 }
  0x3e   :  { %1101 = vmatprep.subr.bf16.mxu1 %v1207_v22 }
  0x3f   :  { %1074 = vmatpush3.bf16.msra.mxu0 %v1206_v21 }
  0x40   :  { %1125 = vmatprep.subr.bf16.mxu0 %v1209_v30 }
  0x41   :  { %1102 = vmatpush3.bf16.msra.mxu1 %v1208_v26 }
  0x42   :  { %783 = vmatmul.mubr.bf16.vlgmr.msra.gmra.mrb[8].mxu0 %v55_v29 }
  0x43   :  { %1126 = vmatpush3.bf16.msra.mxu0 %v1209_v30  ;;  %790 = vmatprep.mubr.bf16.mxu0 %v65_v41 }
  0x44   :  { %1127 = vmatprep.subr.bf16.mxu0 %v1210_v37  ;;  %832 = vmatmul.mubr.bf16.vlgmr.msra.gmra.mrb[8].mxu1 %v57_v36 }
  0x45   :  { %839 = vmatprep.mubr.bf16.mxu1 %v67_v47 }
  0x47   :  { %1128 = vmatpush3.bf16.msra.mxu0 %v1210_v37 }
  0x48   :  { %1129 = vmatprep.subr.bf16.mxu0 %v1211_v43 }
  0x4a   :  { %791 = vmatmul.mubr.bf16.gmra.mrb[12].mxu0 %v64_v46 }
  0x4b   :  { %1130 = vmatpush3.bf16.msra.mxu0 %v1211_v43  ;;  %1141 = vmatprep.mubr.bf16.mxu0 %v59_v55 }
  0x4c   :  { %1131 = vmatprep.subr.bf16.mxu0 %v1212_v50  ;;  %840 = vmatmul.mubr.bf16.gmra.mrb[12].mxu1 %v66_v51 }
  0x4f   :  { %1132 = vmatpush3.bf16.msra.mxu0 %v1212_v50 }
  0x50   :  { %1133 = vmatprep.subr.bf16.mxu0 %v1213_v53 }
  0x53   :  { %1134 = vmatpush3.bf16.msra.mxu0 %v1213_v53 }
  0x54   :  { %1135 = vmatprep.subr.bf16.mxu0 %v1214_v56 }
  0x57   :  { %1136 = vmatpush3.bf16.msra.mxu0 %v1214_v56 }
  0x58   :  { %1137 = vmatprep.subr.bf16.mxu0 %v1215_v57 }
  0x5b   :  { %1138 = vmatpush3.bf16.msra.mxu0 %v1215_v57 }
  0x5c   :  { %1139 = vmatprep.subr.bf16.mxu0 %v1216_v58 }
  0x5f   :  { %1140 = vmatpush3.bf16.msra.mxu0 %v1216_v58 }
  0x62   :  { %1142 = vmatmul.mubr.bf16.vlgmr.msra.gmra.mrb[16].mxu0 %v68_v61 }
  0xf5   :  { %v1019_v62 = vpop.f32.mrb[0].mxu0 }
  0xf6   :  { %v1020_v0 = vpop.f32.mrb[1].mxu0 }
  0xf7   :  { %v1021_v1 = vadd.f32 %v1020_v0, %v1019_v62  ;;  %v1022_v2 = vpop.f32.mrb[2].mxu0  ;;  %v1047_v3 = vpop.f32.mrb[0].mxu1 }
  0xf8   :  { %v1023_v4 = vpop.f32.mrb[3].mxu0  ;;  %v1048_v7 = vpop.f32.mrb[1].mxu1 }
  0xf9   :  { %v687_v5 = vadd.f32 %v1021_v1, %v922_v63  ;;  %v1024_v6 = vadd.f32 %v1023_v4, %v1022_v2  ;;  %v1049_v8 = vadd.f32 %v1048_v7, %v1047_v3  ;;  %v1050_v9 = vpop.f32.mrb[2].mxu1 }
  0xfa   :  { %v1051_v11 = vpop.f32.mrb[3].mxu1 }
  0xfb   :  { %v690_v10 = vadd.f32 %v1024_v6, %v922_v63  ;;  %v736_v12 = vadd.f32 %v1049_v8, %v687_v5  ;;  %v1052_v13 = vadd.f32 %v1051_v11, %v1050_v9 }
  0xfd   :  { %v739_v14 = vadd.f32 %v1052_v13, %v690_v10  ;;  %v1025_v15 = vpop.f32.mrb[4].mxu0 }
  0xfe   :  { %v1026_v16 = vpop.f32.mrb[5].mxu0 }
  0xff   :  { %v1027_v17 = vadd.f32 %v1026_v16, %v1025_v15  ;;  %v1028_v18 = vpop.f32.mrb[6].mxu0  ;;  %v1053_v21 = vpop.f32.mrb[4].mxu1 }
 0x100   :  { %v1029_v19 = vpop.f32.mrb[7].mxu0  ;;  %v1054_v23 = vpop.f32.mrb[5].mxu1 }
 0x101   :  { %v695_v20 = vadd.f32 %v1027_v17, %v922_v63  ;;  %v1030_v22 = vadd.f32 %v1029_v19, %v1028_v18  ;;  %v1055_v25 = vadd.f32 %v1054_v23, %v1053_v21  ;;  %v1056_v26 = vpop.f32.mrb[6].mxu1 }
 0x102   :  { %v1057_v27 = vpop.f32.mrb[7].mxu1 }
 0x103   :  { %v698_v24 = vadd.f32 %v1030_v22, %v922_v63  ;;  %v744_v28 = vadd.f32 %v1055_v25, %v695_v20  ;;  %v1058_v29 = vadd.f32 %v1057_v27, %v1056_v26 }
 0x105   :  { %v747_v30 = vadd.f32 %v1058_v29, %v698_v24 }
 0x115   :  { %v1075_v31 = vpop.f32.mrb[8].mxu0 }
 0x116   :  { %v1076_v32 = vpop.f32.mrb[9].mxu0 }
 0x117   :  { %v1077_v33 = vadd.f32 %v1076_v32, %v1075_v31  ;;  %v1078_v34 = vpop.f32.mrb[10].mxu0  ;;  %v1103_v35 = vpop.f32.mrb[8].mxu1 }
 0x118   :  { %v1079_v36 = vpop.f32.mrb[11].mxu0  ;;  %v1104_v39 = vpop.f32.mrb[9].mxu1 }
 0x119   :  { %v785_v37 = vadd.f32 %v1077_v33, %v736_v12  ;;  %v1080_v38 = vadd.f32 %v1079_v36, %v1078_v34  ;;  %v1105_v40 = vadd.f32 %v1104_v39, %v1103_v35  ;;  %v1106_v41 = vpop.f32.mrb[10].mxu1 }
 0x11a   :  { %v1107_v43 = vpop.f32.mrb[11].mxu1 }
 0x11b   :  { %v788_v42 = vadd.f32 %v1080_v38, %v739_v14  ;;  %v1108_v44 = vadd.f32 %v1107_v43, %v1106_v41  ;;  %v834_v45 = vadd.f32 %v1105_v40, %v785_v37 }
 0x11d   :  { %v1081_v46 = vpop.f32.mrb[12].mxu0  ;;  %v837_v48 = vadd.f32 %v1108_v44, %v788_v42 }
 0x11e   :  { %v1082_v47 = vpop.f32.mrb[13].mxu0 }
 0x11f   :  { %v1083_v49 = vadd.f32 %v1082_v47, %v1081_v46  ;;  %v1084_v50 = vpop.f32.mrb[14].mxu0  ;;  %v1109_v51 = vpop.f32.mrb[12].mxu1 }
 0x120   :  { %v1085_v52 = vpop.f32.mrb[15].mxu0  ;;  %v1110_v55 = vpop.f32.mrb[13].mxu1 }
 0x121   :  { %v793_v53 = vadd.f32 %v1083_v49, %v744_v28  ;;  %v1086_v54 = vadd.f32 %v1085_v52, %v1084_v50  ;;  %v1111_v56 = vadd.f32 %v1110_v55, %v1109_v51  ;;  %v1112_v57 = vpop.f32.mrb[14].mxu1 }
 0x122   :  { %v1113_v59 = vpop.f32.mrb[15].mxu1 }
 0x123   :  { %v796_v58 = vadd.f32 %v1086_v54, %v747_v30  ;;  %v1114_v60 = vadd.f32 %v1113_v59, %v1112_v57  ;;  %v842_v61 = vadd.f32 %v1111_v56, %v793_v53 }
 0x125   :  { %v845_v62 = vadd.f32 %v1114_v60, %v796_v58 }
 0x135   :  { %v1143_v63 = vpop.f32.mrb[16].mxu0 }
 0x136   :  { %v891_v0 = vadd.f32 %v1143_v63, %v842_v61  ;;  %v882_v1 = vpop.f32.mrb[17].mxu0 }
 0x137   :  { %v883_v2 = vadd.f32 %v882_v1, %v834_v45  ;;  %v1144_v3 = vpop.f32.mrb[18].mxu0 }
 0x138   :  { %v1001_v4 = vpack.c.bf16 %v891_v0, %v891_v0  ;;  %v894_v5 = vadd.f32 %v1144_v3, %v845_v62  ;;  %v885_v6 = vpop.f32.mrb[19].mxu0 }
 0x139   :  { %v999_v7 = vpack.c.bf16 %v883_v2, %v883_v2  ;;  %v886_v8 = vadd.f32 %v885_v6, %v837_v48 }
 0x13a   :  { %916 = vst.msk [vmem:[%s1579_s3 + $0x8] sm:$0xf] %vm913_vm0, %v1001_v4  ;;  %v1002_v9 = vpack.c.bf16 %v894_v5, %v894_v5 }
 0x13b   :  { %914 = vst.msk [vmem:[%s1579_s3] sm:$0xf] %vm913_vm0, %v999_v7  ;;  %v1000_v10 = vpack.c.bf16 %v886_v8, %v886_v8 }
 0x13c   :  { %917 = vst.msk [vmem:[%s1579_s3 + $0xc] sm:$0xf] %vm913_vm0, %v1002_v9 }
 0x13d   :  { %915 = vst.msk [vmem:[%s1579_s3 + $0x4] sm:$0xf] %vm913_vm0, %v1000_v10 }

// kernel: evoformer_lite_msa_seq.20
= control target key start
LH: loop header
LB: loop body
LE: loop exit
PB: predicated region body
PF: predicated region fallthrough
CT: control target
= control target key end

     0   :  { %s1201_s27 = smov 0   ;;  %s1203_s28 = smov 0   ;;  %s1308_s0 = inlined_call_operand.vmem [shape: bf16[2,8,16,32], index: 0, kind: input, shape index: {}]   ;;  %s1309_s1 = inlined_call_operand.vmem [shape: f32[2,8,1,1], index: 1, kind: input, shape index: {}]   ;;  %s1310_s2 = inlined_call_operand.vmem [shape: f32[2,1,1], index: 2, kind: input, shape index: {}]   ;;  %s1311_s3 = inlined_call_operand.vmem [shape: bf16[2,16,32], index: 3, kind: input, shape index: {}]   ;;  %s1312_s4 = inlined_call_operand.vmem [shape: f32[1,32], index: 4, kind: input, shape index: {}]   ;;  %s1313_s5 = inlined_call_operand.vmem [shape: f32[1,32], index: 5, kind: input, shape index: {}]   ;;  %s1314_s6 = inlined_call_operand.vmem [shape: bf16[32,64], index: 6, kind: input, shape index: {}]   ;;  %s1315_s7 = inlined_call_operand.vmem [shape: f32[1,64], index: 7, kind: input, shape index: {}]   ;;  %s1316_s8 = inlined_call_operand.vmem [shape: bf16[2,16,32], index: 8, kind: output, shape index: {}]  }
   0x1   :  { %s1205_s29 = smov 0  }
   0x2 LB: > { %s37_s30 = sadd.s32 1, %s1145_s28  ;;  %p994_p0 = scmp.ge.s32.totalorder %s1149_s29, 1  ;;  %s1149_s29 = sphi %s1205_s29, %s18_s29   ;;  %s1145_s28 = sphi %s1203_s28, %s1318_s28   ;;  %s1141_s27 = sphi %s1201_s27, %s1317_s27  }
   0x3   : > { %p39_p1 = scmp.ge.s32.totalorder %s37_s30, 2  ;;  %p339_p2 = scmp.lt.s32.totalorder %s1149_s29, 3 }
   0x5   : > { %s1320_s30 = smov (%p39_p1, %s37_s30), 0  ;;  %p340_p3 = pnand %p994_p0, %p339_p2 }
   0x6   : > { %p408_p4 = scmp.lt.s32.totalorder (!%p340_p3), %s1141_s27, 1  ;;  %v1151_v0 = vmov (!%p340_p3), 0   ;;  %vm459_vm0 = vcmask (!%p340_p3), 261120   ;;  %v1152_v10 = vmov (!%p340_p3), 0.0   ;;  %vm1153_vm1 = vmmov (!%p340_p3), 0   ;;  %s1155_s13 = smov (!%p340_p3), 96  }
   0x7   : > { %343 = sbr.rel (%p340_p3) target bundleno = 948 (0x3b4), region = 52  ;;  %1110 = vset.pattern.permute.xlu1 (!%p340_p3), %v1151_v0  ;;  %1109 = vset.pattern.permute.xlu0 (!%p340_p3), %v1151_v0  ;;  %460 = vst.msk [vmem:[#allocation2] sm:$0xff] (!%p340_p3), %vm459_vm0, %v1152_v10  ;;  %461 = vst.msk [vmem:[#allocation2 + $0x8] sm:$0xff] (!%p340_p3), %vm459_vm0, %v1152_v10  ;;  %vm849_vm2 = vcmask (!%p340_p3), 257024  }
   0x8   : > { %1072 = vmatprep.subr.bf16.mxu0 (!%p340_p3), %v1152_v10  ;;  %1076 = vmatprep.mubr.msk.bf16.mxu0 (!%p340_p3), %vm1153_vm1, %v1152_v10 }
   0xe   : > { %s1322_s27 = smov (!%p408_p4, %s1141_s27), 1 }
   0xf   : > { %s1222_s9 = sshll.u32 %s1322_s27, 3  ;;  %s433_s15 = scalar_lea.vmem %s1310_s2, %s1322_s27 }
  0x10   : > { %s429_s12 = scalar_lea.vmem %s1309_s1, %s1222_s9  ;;  %v1010_v9 = vld [vmem:[%s433_s15] ss:$0 sm:$0xff]  ;;  %s1021_s16 = sshll.u32 %s1322_s27, 6 }
  0x11   : > { %v1004_v1 = vld [vmem:[%s429_s12 + $0x2] ss:$0 sm:$0xff]  ;;  %v1002_v2 = vld [vmem:[%s429_s12] ss:$0 sm:$0xff]  ;;  %v1005_v3 = vld [vmem:[%s429_s12 + $0x3] ss:$0 sm:$0xff]  ;;  %s1241_s19 = scalar_lea.vmem %s1308_s0, %s1021_s16  ;;  %s442_s16 = scalar_lea.vmem %s1311_s3, %s1222_s9 }
  0x12   : > { %568 = vperm.xlu1 %1110, %v1004_v1   ;;  %560 = vperm.xlu0 %1109, %v1002_v2   ;;  %v1003_v4 = vld [vmem:[%s429_s12 + $0x1] ss:$0 sm:$0xff]  ;;  %v1007_v5 = vld [vmem:[%s429_s12 + $0x5] ss:$0 sm:$0xff]  ;;  %v1006_v6 = vld [vmem:[%s429_s12 + $0x4] ss:$0 sm:$0xff] }
  0x13   : > { %v1009_v7 = vld [vmem:[%s429_s12 + $0x7] ss:$0 sm:$0xff]  ;;  %v1008_v8 = vld [vmem:[%s429_s12 + $0x6] ss:$0 sm:$0xff]  ;;  %v1063_v12 = vld [vmem:[%s1241_s19 + $0x10] sm:$0xff]   ;;  %s1154_s12 = smov 32  }
  0x14   : > { %v1027_v11 = vld [vmem:[%s1241_s19] sm:$0xff]   ;;  %v1062_v15 = vld [vmem:[%s1241_s19 + $0x8] sm:$0xff]   ;;  %v1064_v18 = vld [vmem:[%s1241_s19 + $0x18] sm:$0xff]   ;;  %v1036_v19 = vunpack.c.l.bf16 %v1063_v12  ;;  %v1037_v20 = vunpack.c.h.bf16 %v1063_v12 }
  0x15   : > { %v1028_v13 = vunpack.c.l.bf16 %v1027_v11  ;;  %v1029_v14 = vunpack.c.h.bf16 %v1027_v11  ;;  %v1032_v21 = vunpack.c.l.bf16 %v1062_v15  ;;  %v1033_v22 = vunpack.c.h.bf16 %v1062_v15  ;;  %v1065_v23 = vld [vmem:[%s1241_s19 + $0x20] sm:$0xff]   ;;  %v1066_v28 = vld [vmem:[%s1241_s19 + $0x28] sm:$0xff]   ;;  %v1067_v37 = vld [vmem:[%s1241_s19 + $0x30] sm:$0xff]  }
  0x16   : > { %572 = vperm.xlu1 %1110, %v1005_v3   ;;  %564 = vperm.xlu0 %1109, %v1003_v4   ;;  %v1040_v26 = vunpack.c.l.bf16 %v1064_v18  ;;  %v1041_v27 = vunpack.c.h.bf16 %v1064_v18  ;;  %v1044_v31 = vunpack.c.l.bf16 %v1065_v23  ;;  %v1045_v32 = vunpack.c.h.bf16 %v1065_v23  ;;  %v1068_v46 = vld [vmem:[%s1241_s19 + $0x38] sm:$0xff]   ;;  %s452_s19 = scalar_lea.vmem %s1316_s8, %s1222_s9 }
  0x17   : > { %v1048_v40 = vunpack.c.l.bf16 %v1066_v28  ;;  %v1049_v41 = vunpack.c.h.bf16 %v1066_v28  ;;  %v1052_v51 = vunpack.c.l.bf16 %v1067_v37  ;;  %v1053_v52 = vunpack.c.h.bf16 %v1067_v37 }
  0x18   : > { %v1056_v59 = vunpack.c.l.bf16 %v1068_v46  ;;  %v1057_v60 = vunpack.c.h.bf16 %v1068_v46 }
  0x1a   : > { %580 = vperm.xlu1 %1110, %v1007_v5   ;;  %576 = vperm.xlu0 %1109, %v1006_v6  }
  0x1e   : > { %588 = vperm.xlu1 %1110, %v1009_v7   ;;  %584 = vperm.xlu0 %1109, %v1008_v8  }
  0x22   : > { %688 = vperm.xlu0 %1109, %v1010_v9  }
  0x91   : > { %v569_v16 = vpop.permute.xlu1 %568  ;;  %v561_v17 = vpop.permute.xlu0 %560 }
  0x92   : > { %v591_v24 = vmul.f32 %v1028_v13, %v561_v17  ;;  %v592_v25 = vmul.f32 %v1029_v14, %v561_v17  ;;  %v595_v33 = vmul.f32 %v1036_v19, %v569_v16  ;;  %v596_v34 = vmul.f32 %v1037_v20, %v569_v16 }
  0x94   : > { %v642_v38 = vsel %vm459_vm0, %v591_v24, 0.0  ;;  %v657_v39 = vsel %vm459_vm0, %v592_v25, 0.0  ;;  %v645_v53 = vsel %vm459_vm0, %v595_v33, 0.0  ;;  %v660_v54 = vsel %vm459_vm0, %v596_v34, 0.0  ;;  %v639_v25 = vld [vmem:[#allocation2] sm:$0xff] }
  0x95   : > { %v573_v29 = vpop.permute.xlu1 %572  ;;  %v565_v30 = vpop.permute.xlu0 %564 }
  0x96   : > { %v593_v35 = vmul.f32 %v1032_v21, %v565_v30  ;;  %v594_v36 = vmul.f32 %v1033_v22, %v565_v30  ;;  %v597_v42 = vmul.f32 %v1040_v26, %v573_v29  ;;  %v598_v43 = vmul.f32 %v1041_v27, %v573_v29  ;;  %v640_v26 = vld [vmem:[#allocation2 + $0x8] sm:$0xff] }
  0x98   : > { %v643_v44 = vsel %vm459_vm0, %v593_v35, 0.0  ;;  %v658_v45 = vsel %vm459_vm0, %v594_v36, 0.0  ;;  %v647_v61 = vsel %vm459_vm0, %v597_v42, 0.0  ;;  %v662_v62 = vsel %vm459_vm0, %v598_v43, 0.0 }
  0x99   : > { %v644_v47 = vadd.f32 %v643_v44, %v642_v38  ;;  %v659_v48 = vadd.f32 %v658_v45, %v657_v39  ;;  %v581_v49 = vpop.permute.xlu1 %580  ;;  %v577_v50 = vpop.permute.xlu0 %576 }
  0x9a   : > { %v599_v55 = vmul.f32 %v1044_v31, %v577_v50  ;;  %v600_v56 = vmul.f32 %v1045_v32, %v577_v50  ;;  %v601_v63 = vmul.f32 %v1048_v40, %v581_v49  ;;  %v602_v0 = vmul.f32 %v1049_v41, %v581_v49  ;;  %v1112_v49 = vld [vmem:[%s1314_s6 + $0x8] sm:$0xff]  }
  0x9b   : > { %v646_v57 = vadd.f32 %v645_v53, %v644_v47  ;;  %v661_v58 = vadd.f32 %v660_v54, %v659_v48  ;;  %v1111_v48 = vld [vmem:[%s1314_s6] sm:$0xff]  }
  0x9c   : > { %v649_v5 = vsel %vm459_vm0, %v599_v55, 0.0  ;;  %v664_v6 = vsel %vm459_vm0, %v600_v56, 0.0  ;;  %v651_v12 = vsel %vm459_vm0, %v601_v63, 0.0  ;;  %v666_v13 = vsel %vm459_vm0, %v602_v0, 0.0  ;;  %1073 = vmatpush3.bf16.msra.mxu0 %v1111_v48 }
  0x9d   : > { %v648_v1 = vadd.f32 %v647_v61, %v646_v57  ;;  %v663_v2 = vadd.f32 %v662_v62, %v661_v58  ;;  %v589_v3 = vpop.permute.xlu1 %588  ;;  %v585_v4 = vpop.permute.xlu0 %584  ;;  %1074 = vmatprep.subr.bf16.mxu0 %v1152_v10  ;;  %v1011_v57 = vld [vmem:[%s1312_s4] ss:$0 sm:$0xff] }
  0x9e   : > { %v603_v7 = vmul.f32 %v1052_v51, %v585_v4  ;;  %v604_v8 = vmul.f32 %v1053_v52, %v585_v4  ;;  %v605_v14 = vmul.f32 %v1056_v59, %v589_v3  ;;  %v606_v15 = vmul.f32 %v1057_v60, %v589_v3  ;;  %v1012_v10 = vld [vmem:[%s1313_s5] ss:$0 sm:$0xff] }
  0x9f   : > { %v650_v9 = vadd.f32 %v649_v5, %v648_v1  ;;  %v665_v11 = vadd.f32 %v664_v6, %v663_v2  ;;  %v1013_v2 = vld [vmem:[%s1315_s7] ss:$0 sm:$0xff] }
  0xa0   : > { %v653_v18 = vsel %vm459_vm0, %v603_v7, 0.0  ;;  %v668_v19 = vsel %vm459_vm0, %v604_v8, 0.0  ;;  %v655_v23 = vsel %vm459_vm0, %v605_v14, 0.0  ;;  %v670_v24 = vsel %vm459_vm0, %v606_v15, 0.0  ;;  %1075 = vmatpush3.bf16.msra.mxu0 %v1112_v49 }
  0xa1   : > { %v652_v16 = vadd.f32 %v651_v12, %v650_v9  ;;  %v667_v17 = vadd.f32 %v666_v13, %v665_v11  ;;  %v689_v22 = vpop.permute.xlu0 %688 }
  0xa2   : > { %1113 = vrcp.f32 %v689_v22 }
  0xa3   : > { %v654_v20 = vadd.f32 %v653_v18, %v652_v16  ;;  %v669_v21 = vadd.f32 %v668_v19, %v667_v17 }
  0xa5   : > { %v656_v27 = vadd.f32 %v655_v23, %v654_v20  ;;  %v671_v28 = vadd.f32 %v670_v24, %v669_v21  ;;  %v1059_v24 = vld [vmem:[%s442_s16] sm:$0xff]  }
  0xa7   : > { %v672_v29 = vadd.f32 %v656_v27, %v639_v25  ;;  %v673_v30 = vadd.f32 %v671_v28, %v640_v26  ;;  %v1060_v25 = vunpack.c.l.bf16 %v1059_v24  ;;  %v1061_v26 = vunpack.c.h.bf16 %v1059_v24 }
  0xa9   : > { %674 = vst.msk [vmem:[#allocation2] sm:$0xff] %vm459_vm0, %v672_v29  ;;  %675 = vst.msk [vmem:[#allocation2 + $0x8] sm:$0xff] %vm459_vm0, %v673_v30 }
  0xac   : > { %v1114_v31 = vpop.eup %1113 }
  0xb0   : > { %v680_v32 = vld [vmem:[#allocation2 + $0x8] sm:$0xff]  ;;  %v679_v33 = vld [vmem:[#allocation2] sm:$0xff] }
  0xb1   : > { %v693_v34 = vmul.f32 %v1114_v31, %v680_v32  ;;  %v692_v35 = vmul.f32 %v1114_v31, %v679_v33 }
  0xb3   : > { %v699_v36 = vsel %vm459_vm0, %v693_v34, 0.0  ;;  %v696_v37 = vsel %vm459_vm0, %v692_v35, 0.0 }
  0xb4   : > { %700 = vadd.xlane.f32.xlu0 %v699_v36  ;;  %697 = vadd.xlane.f32.xlu1 %v696_v37 }
 0x141   : > { %v701_v38 = vpop.xlane.xlu0 %700  ;;  %v698_v39 = vpop.xlane.xlu1 %697 }
 0x142   : > { %v704_v40 = vmul.f32 0.03125, %v701_v38  ;;  %v703_v41 = vmul.f32 0.03125, %v698_v39 }
 0x144   : > { %v706_v42 = vsub.f32 %v693_v34, %v704_v40  ;;  %v705_v43 = vsub.f32 %v692_v35, %v703_v41 }
 0x146   : > { %v708_v44 = vmul.f32 %v706_v42, %v706_v42  ;;  %v707_v45 = vmul.f32 %v705_v43, %v705_v43 }
 0x148   : > { %v712_v46 = vsel %vm459_vm0, %v708_v44, 0.0  ;;  %v709_v47 = vsel %vm459_vm0, %v707_v45, 0.0 }
 0x149   : > { %713 = vadd.xlane.f32.xlu1 %v712_v46  ;;  %710 = vadd.xlane.f32.xlu0 %v709_v47 }
 0x1d6   : > { %v711_v50 = vpop.xlane.xlu0 %710  ;;  %v714_v51 = vpop.xlane.xlu1 %713 }
 0x1d7   : > { %v715_v52 = vmul.f32 0.03125, %v711_v50  ;;  %v716_v53 = vmul.f32 0.03125, %v714_v51 }
 0x1d9   : > { %v717_v54 = vadd.f32 1e-05, %v715_v52  ;;  %v718_v55 = vadd.f32 1e-05, %v716_v53 }
 0x1db   : > { %1115 = vrsqrt.f32 %v717_v54 }
 0x1dc   : > { %1117 = vrsqrt.f32 %v718_v55 }
 0x1e5   : > { %v1116_v56 = vpop.eup %1115 }
 0x1e6   : > { %v1118_v58 = vpop.eup %1117  ;;  %v721_v59 = vmul.f32 %v1116_v56, %v705_v43 }
 0x1e7   : > { %v722_v60 = vmul.f32 %v1118_v58, %v706_v42 }
 0x1e8   : > { %v729_v61 = vmul.f32 %v1011_v57, %v721_v59 }
 0x1e9   : > { %v730_v62 = vmul.f32 %v1011_v57, %v722_v60 }
 0x1ea   : > { %v737_v63 = vadd.f32 %v1012_v10, %v729_v61 }
 0x1eb   : > { %v738_v0 = vadd.f32 %v1012_v10, %v730_v62 }
 0x1ed   : > { %v739_v1 = vpack.c.bf16 %v738_v0, %v737_v63 }
 0x1ef   : > { %1077 = vmatmul.mubr.msk.bf16.vlgmr.msra.gmra.mrb[0].mxu0 %vm459_vm0, %v739_v1 }
 0x2c2   : > { %v800_v3 = vpop.f32.mrb[0].mxu0 }
 0x2c3   : > { %v801_v4 = vadd.f32 %v1013_v2, %v800_v3  ;;  %v1078_v5 = vpop.f32.mrb[1].mxu0 }
 0x2c4   : > { %v803_v6 = vpop.f32.mrb[2].mxu0 }
 0x2c5   : > { %v804_v7 = vadd.f32 %v1013_v2, %v803_v6  ;;  %819 = vrot.lane.b32.xlu0 %v801_v4, %s1154_s12  ;;  %v1079_v8 = vpop.f32.mrb[3].mxu0  ;;  %v807_v9 = vsub.f32 0.0, %v801_v4 }
 0x2c7   : > { %821 = vrot.lane.b32.xlu1 %v804_v7, %s1154_s12  ;;  %v808_v11 = vsub.f32 0.0, %v804_v7  ;;  %v809_v12 = vmul.f32 1.442695, %v807_v9 }
 0x2c9   : > { %v811_v13 = vmul.f32 1.442695, %v808_v11  ;;  %1119 = vpow2.f32 %v809_v12 }
 0x2cb   : > { %1121 = vpow2.f32 %v811_v13 }
 0x2d3   : > { %v1120_v14 = vpop.eup %1119 }
 0x2d4   : > { %v813_v16 = vadd.f32 1.0, %v1120_v14 }
 0x2d5   : > { %v1122_v15 = vpop.eup %1121 }
 0x2d6   : > { %v814_v17 = vadd.f32 1.0, %v1122_v15  ;;  %1123 = vrcp.f32 %v813_v16 }
 0x2d8   : > { %1125 = vrcp.f32 %v814_v17 }
 0x2e0   : > { %v1124_v18 = vpop.eup %1123 }
 0x2e2   : > { %v1126_v21 = vpop.eup %1125 }
 0x337   : > { %v820_v19 = vpop.permute.xlu0 %819 }
 0x338   : > { %v825_v20 = vmul.f32 %v1124_v18, %v820_v19 }
 0x339   : > { %v822_v22 = vpop.permute.xlu1 %821 }
 0x33a   : > { %v826_v23 = vmul.f32 %v1126_v21, %v822_v22  ;;  %833 = vrot.lane.b32.xlu1 %v825_v20, %s1155_s13 }
 0x33c   : > { %835 = vrot.lane.b32.xlu0 %v826_v23, %s1155_s13 }
 0x3ac   : > { %v834_v27 = vpop.permute.xlu1 %833 }
 0x3ad   : > { %v839_v28 = vadd.f32 %v1060_v25, %v834_v27 }
 0x3ae   : > { %v836_v29 = vpop.permute.xlu0 %835 }
 0x3af   : > { %v1024_v30 = vpack.c.bf16 %v839_v28, %v839_v28  ;;  %v840_v31 = vadd.f32 %v1061_v26, %v836_v29 }
 0x3b1   : > { %850 = vst.msk [vmem:[%s452_s19] sm:$0xf] %vm849_vm2, %v1024_v30  ;;  %v1025_v32 = vpack.c.bf16 %v840_v31, %v840_v31 }
 0x3b3   : > { %851 = vst.msk [vmem:[%s452_s19 + $0x4] sm:$0xf] %vm849_vm2, %v1025_v32 }
 0x3b4 PF: > { %s18_s29 = sadd.s32 1, %s1149_s29   ;;  %s1317_s27 = smov %s1145_s28 }
 0x3b5   : > { %p15_p5 = scmp.ge.s32.totalorder %s18_s29, 4   ;;  %s1318_s28 = smov %s1320_s30 }
 0x3b7   :  { %17 = sbr.rel (!%p15_p5) target bundleno = 2 (0x2), region = 99 }

// kernel: evoformer_lite_msa_seq.21
= control target key start
LH: loop header
LB: loop body
LE: loop exit
PB: predicated region body
PF: predicated region fallthrough
CT: control target
= control target key end

     0   :  { %s1911_s29 = smov 0   ;;  %s2127_s0 = inlined_call_operand.vmem [shape: bf16[2,16,32], index: 0, kind: input, shape index: {}]   ;;  %s2128_s1 = inlined_call_operand.vmem [shape: f32[2,1,16], index: 1, kind: input, shape index: {}]   ;;  %s2129_s2 = inlined_call_operand.vmem [shape: f32[1,32], index: 2, kind: input, shape index: {}]   ;;  %s2130_s3 = inlined_call_operand.vmem [shape: f32[1,32], index: 3, kind: input, shape index: {}]   ;;  %s2131_s4 = inlined_call_operand.vmem [shape: bf16[32,96], index: 4, kind: input, shape index: {}]   ;;  %s2132_s5 = inlined_call_operand.vmem [shape: f32[1,96], index: 5, kind: input, shape index: {}]   ;;  %s2133_s6 = inlined_call_operand.vmem [shape: bf16[32,32], index: 6, kind: input, shape index: {}]   ;;  %s2134_s7 = inlined_call_operand.vmem [shape: f32[1,32], index: 7, kind: input, shape index: {}]   ;;  %s2135_s8 = inlined_call_operand.vmem [shape: f32[1,32], index: 8, kind: input, shape index: {}]   ;;  %s2136_s9 = inlined_call_operand.vmem [shape: f32[1,32], index: 9, kind: input, shape index: {}]   ;;  %s2137_s10 = inlined_call_operand.vmem [shape: bf16[32,128], index: 10, kind: input, shape index: {}]   ;;  %s2138_s11 = inlined_call_operand.vmem [shape: f32[1,128], index: 11, kind: input, shape index: {}]   ;;  %s2139_s12 = inlined_call_operand.vmem [shape: bf16[128,32], index: 12, kind: input, shape index: {}]   ;;  %s2140_s13 = inlined_call_operand.vmem [shape: f32[1,32], index: 13, kind: input, shape index: {}]   ;;  %s2141_s14 = inlined_call_operand.vmem [shape: bf16[2,16,32], index: 14, kind: output, shape index: {}]  }
   0x1 LB: > { %s1535_s30 = sadd.s32 4294967295, %s1818_s29   ;;  %p1539_p0 = scmp.ge.s32.totalorder %s1818_s29, 1  ;;  %s1818_s29 = sphi %s1911_s29, %s24_s29  }
   0x2   : > { %p420_p1 = scmp.lt.s32.totalorder %s1818_s29, 3 }
   0x4   : > { %p421_p2 = pnand %p1539_p0, %p420_p1 }
   0x5   : > { %p469_p3 = scmp.lt.s32.totalorder (!%p421_p2), %s1535_s30, 1  ;;  %v1820_v0 = vmov (!%p421_p2), 0.0   ;;  %vm489_vm0 = vcmask (!%p421_p2), 261120   ;;  %v1754_v16 = vld [vmem:[%s2131_s4] sm:$0xff] (!%p421_p2)   ;;  %v1755_v17 = vld [vmem:[%s2131_s4 + $0x8] sm:$0xff] (!%p421_p2)   ;;  %vm1821_vm1 = vmmov (!%p421_p2), 0   ;;  %v659_v54 = vlaneseq (!%p421_p2) }
   0x6   : > { %424 = sbr.rel (%p421_p2) target bundleno = 2572 (0xa0c), region = 76  ;;  %1623 = vmatprep.subr.bf16.mxu0 (!%p421_p2), %v1820_v0  ;;  %1643 = vmatprep.subr.bf16.mxu1 (!%p421_p2), %v1820_v0  ;;  %v1544_v26 = vld [vmem:[%s2129_s2] ss:$0 sm:$0xff] (!%p421_p2)  ;;  %s1822_s16 = smov (!%p421_p2), 88   ;;  %vm608_vm2 = vcmask (!%p421_p2), 64512   ;;  %vm666_vm4 = vcmask (!%p421_p2), 130048  }
   0x7   : > { %1624 = vmatpush3.bf16.msra.mxu0 (!%p421_p2), %v1754_v16  ;;  %1627 = vmatprep.mubr.msk.bf16.mxu0 (!%p421_p2), %vm1821_vm1, %v1820_v0  ;;  %v1545_v30 = vld [vmem:[%s2130_s3] ss:$0 sm:$0xff] (!%p421_p2)  ;;  %s1823_s17 = smov (!%p421_p2), 96   ;;  %s1825_s19 = smov (!%p421_p2), 112   ;;  %v660_v56 = vshrl.u32 (!%p421_p2), %v659_v54, 7  ;;  %vm1140_vm5 = vcmask (!%p421_p2), 195584  }
   0x8   : > { %1625 = vmatprep.subr.bf16.mxu0 (!%p421_p2), %v1820_v0  ;;  %1645 = vmatprep.mubr.msk.bf16.mxu1 (!%p421_p2), %vm1821_vm1, %v1820_v0  ;;  %v1546_v35 = vld [vmem:[%s2132_s5] ss:$0 sm:$0xff] (!%p421_p2)  ;;  %s1826_s20 = smov (!%p421_p2), 80   ;;  %s1827_s21 = smov (!%p421_p2), 104   ;;  %vm1468_vm6 = vcmask (!%p421_p2), 257024  }
   0x9   : > { %s1828_s22 = smov (!%p421_p2), 72   ;;  %v661_v57 = vsub.s32 (!%p421_p2), 0, %v660_v56  ;;  %s1829_s26 = smov (!%p421_p2), 64  }
   0xa   : > { %s1830_s27 = smov (!%p421_p2), 48   ;;  %s1831_s28 = smov (!%p421_p2), 40  }
   0xb   : > { %1626 = vmatpush3.bf16.msra.mxu0 (!%p421_p2), %v1755_v17  ;;  %s1835_s23 = smov (!%p421_p2), 24  }
   0xc   : > { %1631 = vmatprep.subr.bf16.mxu0 (!%p421_p2), %v1820_v0 }
   0xd   : > { %s2143_s30 = smov (!%p469_p3, %s1535_s30), 1 }
   0xe   : > { %s1581_s15 = sshll.u32 %s2143_s30, 3  ;;  %s476_s25 = scalar_lea.vmem %s2128_s1, %s2143_s30 }
   0xf   : > { %s473_s18 = scalar_lea.vmem %s2127_s0, %s1581_s15  ;;  %v601_v55 = vld [vmem:[%s476_s25] sm:$0x1] }
  0x10   : > { %v1586_v1 = vld [vmem:[%s473_s18] sm:$0xff]   ;;  %s1824_s18 = smov 120   ;;  %vm602_vm3 = vcmp.gt.f32.partialorder %v601_v55, 0.5 }
  0x11   : > { %v1587_v2 = vunpack.c.l.bf16 %v1586_v1  ;;  %v1588_v3 = vunpack.c.h.bf16 %v1586_v1  ;;  %v603_v58 = vsel %vm602_vm3, -1e+30, %v1820_v0 }
  0x12   : > { %v662_v59 = vrot.slane %v603_v58, %v661_v57 }
  0x13   : > { %v490_v4 = vsel %vm489_vm0, %v1587_v2, 0.0  ;;  %v493_v5 = vsel %vm489_vm0, %v1588_v3, 0.0 }
  0x14   : > { %491 = vadd.xlane.f32.xlu0 %v490_v4 }
  0x18   : > { %494 = vadd.xlane.f32.xlu0 %v493_v5 }
  0xa1   : > { %v492_v6 = vpop.xlane.xlu0 %491 }
  0xa2   : > { %v497_v7 = vmul.f32 0.03125, %v492_v6 }
  0xa4   : > { %v499_v8 = vsub.f32 %v1587_v2, %v497_v7 }
  0xa5   : > { %v495_v9 = vpop.xlane.xlu0 %494 }
  0xa6   : > { %v498_v10 = vmul.f32 0.03125, %v495_v9  ;;  %v501_v11 = vmul.f32 %v499_v8, %v499_v8 }
  0xa8   : > { %v500_v12 = vsub.f32 %v1588_v3, %v498_v10  ;;  %v503_v13 = vsel %vm489_vm0, %v501_v11, 0.0 }
  0xa9   : > { %504 = vadd.xlane.f32.xlu1 %v503_v13 }
  0xaa   : > { %v502_v14 = vmul.f32 %v500_v12, %v500_v12 }
  0xac   : > { %v506_v15 = vsel %vm489_vm0, %v502_v14, 0.0 }
  0xad   : > { %507 = vadd.xlane.f32.xlu1 %v506_v15 }
 0x136   : > { %v505_v18 = vpop.xlane.xlu1 %504 }
 0x137   : > { %v509_v19 = vmul.f32 0.03125, %v505_v18 }
 0x139   : > { %v511_v20 = vadd.f32 1e-05, %v509_v19 }
 0x13a   : > { %v508_v21 = vpop.xlane.xlu1 %507 }
 0x13b   : > { %1768 = vrsqrt.f32 %v511_v20  ;;  %v510_v22 = vmul.f32 0.03125, %v508_v21 }
 0x13d   : > { %v512_v23 = vadd.f32 1e-05, %v510_v22 }
 0x13f   : > { %1770 = vrsqrt.f32 %v512_v23 }
 0x145   : > { %v1769_v24 = vpop.eup %1768 }
 0x146   : > { %v515_v25 = vmul.f32 %v1769_v24, %v499_v8 }
 0x148   : > { %v523_v29 = vmul.f32 %v1544_v26, %v515_v25 }
 0x149   : > { %v1771_v27 = vpop.eup %1770 }
 0x14a   : > { %v516_v28 = vmul.f32 %v1771_v27, %v500_v12  ;;  %v1951_v32 = vadd.f32 %v1545_v30, %v523_v29 }
 0x14c   : > { %v524_v31 = vmul.f32 %v1544_v26, %v516_v28 }
 0x14e   : > { %v1953_v33 = vadd.f32 %v1545_v30, %v524_v31 }
 0x150   : > { %v533_v34 = vpack.c.bf16 %v1953_v33, %v1951_v32 }
 0x152   : > { %1628 = vmatmul.mubr.msk.bf16.vlgmr.msra.gmra.mrb[0].mxu0 %vm489_vm0, %v533_v34 }
 0x153   : > { %1633 = vmatprep.mubr.msk.bf16.mxu0 %vm1821_vm1, %v1820_v0 }
 0x225   : > { %v594_v36 = vpop.f32.mrb[0].mxu0 }
 0x226   : > { %v1629_v37 = vpop.f32.mrb[1].mxu0  ;;  %v595_v39 = vadd.f32 %v1546_v35, %v594_v36 }
 0x227   : > { %v597_v38 = vpop.f32.mrb[2].mxu0 }
 0x228   : > { %v598_v40 = vadd.f32 %v1546_v35, %v597_v38  ;;  %v1630_v41 = vpop.f32.mrb[3].mxu0 }
 0x22a   : > { %v1963_v42 = vpack.c.bf16 %v598_v40, %v595_v39 }
 0x22c   : > { %739 = vrot.lane.b32.xlu1 %v1963_v42, %s1822_s16  ;;  %606 = vrot.lane.b32.xlu0 %v1963_v42, %s1823_s17  ;;  %s1832_s16 = smov 56   ;;  %s481_s17 = scalar_lea.vmem %s2141_s14, %s1581_s15 }
 0x230   : > { %737 = vrot.lane.b32.xlu1 %v1963_v42, %s1824_s18  ;;  %862 = vrot.lane.b32.xlu0 %v1963_v42, %s1825_s19  ;;  %s1833_s19 = smov 8  }
 0x234   : > { %864 = vrot.lane.b32.xlu1 %v1963_v42, %s1826_s20  ;;  %987 = vrot.lane.b32.xlu0 %v1963_v42, %s1827_s21 }
 0x238   : > { %989 = vrot.lane.b32.xlu1 %v1963_v42, %s1828_s22  ;;  %s1834_s22 = smov 16  }
 0x29e   : > { %v740_v43 = vpop.permute.xlu1 %739  ;;  %v607_v44 = vpop.permute.xlu0 %606 }
 0x29f   : > { %v613_v45 = vsel %vm608_vm2, %v607_v44, 0  ;;  %v745_v46 = vsel %vm608_vm2, %v740_v43, 0 }
 0x2a0   : > { %1632 = vmatpush3.bf16.xpose.msra.mxu0 %v613_v45  ;;  %1644 = vmatpush3.bf16.xpose.msra.mxu1 %v745_v46 }
 0x2a1   : > { %1655 = vmatprep.subr.bf16.mxu1 %v1820_v0  ;;  %1637 = vmatprep.subr.bf16.mxu0 %v1820_v0 }
 0x2a2   : > { %v738_v47 = vpop.permute.xlu1 %737  ;;  %v863_v51 = vpop.permute.xlu0 %862 }
 0x2a6   : > { %v865_v48 = vpop.permute.xlu1 %864  ;;  %v988_v53 = vpop.permute.xlu0 %987 }
 0x2a7   : > { %v870_v49 = vsel %vm608_vm2, %v865_v48, 0  ;;  %1634 = vmatmul.mubr.msk.bf16.vlgmr.msra.gmra.mrb[4].mxu0 %vm608_vm2, %v1963_v42  ;;  %1646 = vmatmul.mubr.msk.bf16.vlgmr.msra.gmra.mrb[0].mxu1 %vm608_vm2, %v738_v47 }
 0x2a8   : > { %1656 = vmatpush3.bf16.xpose.msra.mxu1 %v870_v49  ;;  %1657 = vmatprep.mubr.msk.bf16.mxu1 %vm1821_vm1, %v1820_v0 }
 0x2a9   : > { %1667 = vmatprep.subr.bf16.mxu1 %v1820_v0  ;;  %1639 = vmatprep.mubr.msk.bf16.mxu0 %vm1821_vm1, %v1820_v0 }
 0x2aa   : > { %v990_v50 = vpop.permute.xlu1 %989 }
 0x2ab   : > { %v995_v52 = vsel %vm608_vm2, %v990_v50, 0 }
 0x2af   : > { %1658 = vmatmul.mubr.msk.bf16.vlgmr.msra.gmra.mrb[4].mxu1 %vm608_vm2, %v863_v51 }
 0x2b0   : > { %1668 = vmatpush3.bf16.xpose.msra.mxu1 %v995_v52  ;;  %1669 = vmatprep.mubr.msk.bf16.mxu1 %vm1821_vm1, %v1820_v0 }
 0x2b1   : > { %1679 = vmatprep.subr.bf16.mxu1 %v1820_v0 }
 0x2b7   : > { %1670 = vmatmul.mubr.msk.bf16.vlgmr.msra.gmra.mrb[8].mxu1 %vm608_vm2, %v988_v53 }
 0x2b8   : > { %1683 = vmatprep.mubr.msk.bf16.mxu1 %vm1821_vm1, %v1820_v0 }
 0x37a   : > { %v649_v60 = vpop.f32.mrb[4].mxu0  ;;  %v781_v61 = vpop.f32.mrb[0].mxu1 }
 0x37b   : > { %v656_v62 = vmul.f32 0.35355338, %v649_v60  ;;  %v788_v63 = vmul.f32 0.35355338, %v781_v61  ;;  %v1635_v1 = vpop.f32.mrb[5].mxu0  ;;  %v1647_v2 = vpop.f32.mrb[1].mxu1 }
 0x37c   : > { %v652_v3 = vpop.f32.mrb[6].mxu0  ;;  %v784_v4 = vpop.f32.mrb[2].mxu1 }
 0x37d   : > { %v657_v5 = vmul.f32 0.35355338, %v652_v3  ;;  %v789_v6 = vmul.f32 0.35355338, %v784_v4  ;;  %v1636_v7 = vpop.f32.mrb[7].mxu0  ;;  %v1648_v8 = vpop.f32.mrb[3].mxu1  ;;  %v664_v9 = vadd.f32 %v662_v59, %v656_v62  ;;  %v790_v10 = vadd.f32 %v788_v63, %v662_v59 }
 0x37f   : > { %v667_v11 = vsel %vm666_vm4, %v664_v9, -inf  ;;  %v665_v12 = vadd.f32 %v662_v59, %v657_v5  ;;  %v791_v13 = vadd.f32 %v789_v6, %v662_v59  ;;  %v792_v21 = vsel %vm666_vm4, %v790_v10, -inf }
 0x380   : > { %668 = vmax.xlane.f32.xlu1 %v667_v11 }
 0x381   : > { %v670_v14 = vsel %vm666_vm4, %v665_v12, -inf  ;;  %v795_v25 = vsel %vm666_vm4, %v791_v13, -inf }
 0x382   : > { %v906_v15 = vpop.f32.mrb[4].mxu1  ;;  %671 = vmax.xlane.f32.xlu0 %v670_v14 }
 0x383   : > { %v913_v16 = vmul.f32 0.35355338, %v906_v15  ;;  %v1659_v17 = vpop.f32.mrb[5].mxu1 }
 0x384   : > { %v909_v18 = vpop.f32.mrb[6].mxu1 }
 0x385   : > { %v914_v19 = vmul.f32 0.35355338, %v909_v18  ;;  %v1660_v20 = vpop.f32.mrb[7].mxu1  ;;  %v915_v22 = vadd.f32 %v913_v16, %v662_v59 }
 0x386   : > { %793 = vmax.xlane.f32.xlu0 %v792_v21 }
 0x387   : > { %v917_v23 = vsel %vm666_vm4, %v915_v22, -inf  ;;  %v916_v24 = vadd.f32 %v914_v19, %v662_v59 }
 0x388   : > { %918 = vmax.xlane.f32.xlu1 %v917_v23 }
 0x389   : > { %v920_v34 = vsel %vm666_vm4, %v916_v24, -inf }
 0x38a   : > { %v1031_v26 = vpop.f32.mrb[8].mxu1  ;;  %796 = vmax.xlane.f32.xlu0 %v795_v25 }
 0x38b   : > { %v1038_v27 = vmul.f32 0.35355338, %v1031_v26  ;;  %v1671_v28 = vpop.f32.mrb[9].mxu1 }
 0x38c   : > { %v1034_v29 = vpop.f32.mrb[10].mxu1 }
 0x38d   : > { %v1039_v30 = vmul.f32 0.35355338, %v1034_v29  ;;  %v1672_v31 = vpop.f32.mrb[11].mxu1  ;;  %v1040_v35 = vadd.f32 %v1038_v27, %v662_v59 }
 0x38e   : > { %921 = vmax.xlane.f32.xlu0 %v920_v34 }
 0x38f   : > { %v1042_v36 = vsel %vm666_vm4, %v1040_v35, -inf  ;;  %v1041_v37 = vadd.f32 %v1039_v30, %v662_v59 }
 0x390   : > { %1043 = vmax.xlane.f32.xlu1 %v1042_v36 }
 0x391   : > { %v1045_v38 = vsel %vm666_vm4, %v1041_v37, -inf }
 0x392   : > { %1046 = vmax.xlane.f32.xlu0 %v1045_v38 }
 0x3a1   : > { %690 = vrot.lane.b32.xlu1 %v1963_v42, %s1829_s26 }
 0x40d   : > { %v669_v39 = vpop.xlane.xlu1 %668 }
 0x40e   : > { %v673_v40 = vsub.f32 %v664_v9, %v669_v39 }
 0x40f   : > { %v672_v41 = vpop.xlane.xlu0 %671 }
 0x410   : > { %v675_v43 = vmul.f32 1.442695, %v673_v40  ;;  %v674_v44 = vsub.f32 %v665_v12, %v672_v41 }
 0x412   : > { %1772 = vpow2.f32 %v675_v43  ;;  %v677_v45 = vmul.f32 1.442695, %v674_v44 }
 0x413   : > { %v794_v46 = vpop.xlane.xlu0 %793 }
 0x414   : > { %1774 = vpow2.f32 %v677_v45  ;;  %v798_v47 = vsub.f32 %v790_v10, %v794_v46 }
 0x415   : > { %v919_v48 = vpop.xlane.xlu1 %918 }
 0x416   : > { %v800_v49 = vmul.f32 1.442695, %v798_v47  ;;  %v923_v50 = vsub.f32 %v915_v22, %v919_v48 }
 0x417   : > { %v797_v51 = vpop.xlane.xlu0 %796 }
 0x418   : > { %1776 = vpow2.f32 %v800_v49  ;;  %v925_v52 = vmul.f32 1.442695, %v923_v50  ;;  %v799_v53 = vsub.f32 %v791_v13, %v797_v51 }
 0x41a   : > { %1778 = vpow2.f32 %v925_v52  ;;  %v802_v54 = vmul.f32 1.442695, %v799_v53 }
 0x41b   : > { %v922_v55 = vpop.xlane.xlu0 %921 }
 0x41c   : > { %v1773_v56 = vpop.eup %1772  ;;  %1780 = vpow2.f32 %v802_v54  ;;  %v924_v57 = vsub.f32 %v916_v24, %v922_v55 }
 0x41d   : > { %v1044_v58 = vpop.xlane.xlu1 %1043  ;;  %v679_v59 = vsel %vm666_vm4, %v1773_v56, 0.0 }
 0x41e   : > { %v1775_v60 = vpop.eup %1774  ;;  %v927_v61 = vmul.f32 1.442695, %v924_v57  ;;  %v1048_v62 = vsub.f32 %v1040_v35, %v1044_v58  ;;  %680 = vadd.xlane.f32.xlu1 %v679_v59  ;;  %v1756_v58 = vld [vmem:[%s2133_s6] sm:$0xff]  }
 0x41f   : > { %v1047_v63 = vpop.xlane.xlu0 %1046  ;;  %v682_v1 = vsel %vm666_vm4, %v1775_v60, 0.0  ;;  %1680 = vmatpush3.bf16.msra.mxu1 %v1756_v58 }
 0x420   : > { %1782 = vpow2.f32 %v927_v61  ;;  %v1050_v2 = vmul.f32 1.442695, %v1048_v62  ;;  %v1049_v3 = vsub.f32 %v1041_v37, %v1047_v63  ;;  %683 = vadd.xlane.f32.xlu0 %v682_v1  ;;  %1681 = vmatprep.subr.bf16.mxu1 %v1820_v0  ;;  %v1757_v63 = vld [vmem:[%s2133_s6 + $0x8] sm:$0xff]  }
 0x421   : > { %v691_v4 = vpop.permute.xlu1 %690 }
 0x422   : > { %v1777_v5 = vpop.eup %1776  ;;  %1784 = vpow2.f32 %v1050_v2  ;;  %v1052_v6 = vmul.f32 1.442695, %v1049_v3  ;;  %1638 = vmatpush3.bf16.msra.mxu0 %v691_v4 }
 0x423   : > { %v804_v7 = vsel %vm666_vm4, %v1777_v5, 0.0  ;;  %1649 = vmatprep.subr.bf16.mxu0 %v1820_v0  ;;  %1682 = vmatpush3.bf16.msra.mxu1 %v1757_v63 }
 0x424   : > { %v1779_v8 = vpop.eup %1778  ;;  %1786 = vpow2.f32 %v1052_v6  ;;  %805 = vadd.xlane.f32.xlu1 %v804_v7  ;;  %1695 = vmatprep.subr.bf16.mxu1 %v1820_v0 }
 0x425   : > { %v929_v10 = vsel %vm666_vm4, %v1779_v8, 0.0 }
 0x426   : > { %v1781_v9 = vpop.eup %1780 }
 0x427   : > { %v807_v11 = vsel %vm666_vm4, %v1781_v9, 0.0 }
 0x428   : > { %930 = vadd.xlane.f32.xlu1 %v929_v10  ;;  %808 = vadd.xlane.f32.xlu0 %v807_v11 }
 0x42a   : > { %v1783_v12 = vpop.eup %1782 }
 0x42b   : > { %v932_v13 = vsel %vm666_vm4, %v1783_v12, 0.0 }
 0x42c   : > { %v1785_v14 = vpop.eup %1784  ;;  %933 = vadd.xlane.f32.xlu0 %v932_v13 }
 0x42d   : > { %v1054_v15 = vsel %vm666_vm4, %v1785_v14, 0.0 }
 0x42e   : > { %v1787_v16 = vpop.eup %1786  ;;  %1055 = vadd.xlane.f32.xlu1 %v1054_v15 }
 0x42f   : > { %v1057_v17 = vsel %vm666_vm4, %v1787_v16, 0.0 }
 0x430   : > { %1058 = vadd.xlane.f32.xlu0 %v1057_v17 }
 0x43f   : > { %940 = vrot.lane.b32.xlu1 %v1963_v42, %s1830_s27 }
 0x443   : > { %1065 = vrot.lane.b32.xlu1 %v1963_v42, %s1831_s28 }
 0x446   : > { %815 = vrot.lane.b32.xlu0 %v1963_v42, %s1832_s16 }
 0x4ab   : > { %v681_v18 = vpop.xlane.xlu1 %680 }
 0x4ac   : > { %1788 = vrcp.f32 %v681_v18 }
 0x4ad   : > { %v684_v19 = vpop.xlane.xlu0 %683 }
 0x4ae   : > { %1790 = vrcp.f32 %v684_v19 }
 0x4b1   : > { %v806_v20 = vpop.xlane.xlu1 %805 }
 0x4b2   : > { %1792 = vrcp.f32 %v806_v20 }
 0x4b5   : > { %v809_v21 = vpop.xlane.xlu0 %808  ;;  %v931_v27 = vpop.xlane.xlu1 %930 }
 0x4b6   : > { %v1789_v22 = vpop.eup %1788  ;;  %1794 = vrcp.f32 %v809_v21 }
 0x4b7   : > { %v687_v24 = vmul.f32 %v1789_v22, %v1773_v56 }
 0x4b8   : > { %v1791_v23 = vpop.eup %1790 }
 0x4b9   : > { %v688_v25 = vmul.f32 %v1791_v23, %v1775_v60  ;;  %v934_v26 = vpop.xlane.xlu0 %933 }
 0x4ba   : > { %1796 = vrcp.f32 %v934_v26 }
 0x4bb   : > { %v689_v28 = vpack.c.bf16 %v688_v25, %v687_v24  ;;  %1798 = vrcp.f32 %v931_v27  ;;  %v1056_v30 = vpop.xlane.xlu1 %1055  ;;  %v1558_v25 = vld [vmem:[%s2134_s7] ss:$0 sm:$0xff] }
 0x4bc   : > { %v1793_v29 = vpop.eup %1792 }
 0x4bd   : > { %1640 = vmatmul.mubr.msk.bf16.vlgmr.msra.gmra.mrb[8].mxu0 %vm666_vm4, %v689_v28  ;;  %v1059_v42 = vpop.xlane.xlu0 %1058  ;;  %v812_v35 = vmul.f32 %v1793_v29, %v1777_v5 }
 0x4be   : > { %1651 = vmatprep.mubr.msk.bf16.mxu0 %vm1821_vm1, %v1820_v0  ;;  %1800 = vrcp.f32 %v1059_v42 }
 0x4bf   : > { %1802 = vrcp.f32 %v1056_v30  ;;  %v941_v39 = vpop.permute.xlu1 %940 }
 0x4c0   : > { %v1795_v31 = vpop.eup %1794 }
 0x4c1   : > { %v816_v34 = vpop.permute.xlu0 %815  ;;  %v813_v36 = vmul.f32 %v1795_v31, %v1781_v9 }
 0x4c2   : > { %1650 = vmatpush3.bf16.msra.mxu0 %v816_v34 }
 0x4c3   : > { %1661 = vmatprep.subr.bf16.mxu0 %v1820_v0  ;;  %v814_v37 = vpack.c.bf16 %v813_v36, %v812_v35  ;;  %v1066_v46 = vpop.permute.xlu1 %1065 }
 0x4c4   : > { %v1797_v38 = vpop.eup %1796 }
 0x4c5   : > { %1652 = vmatmul.mubr.msk.bf16.vlgmr.msra.gmra.mrb[12].mxu0 %vm666_vm4, %v814_v37  ;;  %v1799_v40 = vpop.eup %1798  ;;  %v938_v41 = vmul.f32 %v1797_v38, %v1783_v12 }
 0x4c6   : > { %1662 = vmatpush3.bf16.msra.mxu0 %v941_v39  ;;  %1663 = vmatprep.mubr.msk.bf16.mxu0 %vm1821_vm1, %v1820_v0  ;;  %v937_v43 = vmul.f32 %v1799_v40, %v1779_v8 }
 0x4c7   : > { %1673 = vmatprep.subr.bf16.mxu0 %v1820_v0 }
 0x4c8   : > { %v939_v44 = vpack.c.bf16 %v938_v41, %v937_v43  ;;  %v1801_v45 = vpop.eup %1800 }
 0x4c9   : > { %v1803_v47 = vpop.eup %1802  ;;  %v1063_v48 = vmul.f32 %v1801_v45, %v1787_v16 }
 0x4ca   : > { %v1062_v49 = vmul.f32 %v1803_v47, %v1785_v14  ;;  %v1759_v47 = vld [vmem:[%s2137_s10 + $0x8] sm:$0xff]  }
 0x4cc   : > { %v1064_v50 = vpack.c.bf16 %v1063_v48, %v1062_v49 }
 0x4cd   : > { %1664 = vmatmul.mubr.msk.bf16.vlgmr.msra.gmra.mrb[16].mxu0 %vm666_vm4, %v939_v44 }
 0x4ce   : > { %1674 = vmatpush3.bf16.msra.mxu0 %v1066_v46  ;;  %1675 = vmatprep.mubr.msk.bf16.mxu0 %vm1821_vm1, %v1820_v0  ;;  %v1758_v46 = vld [vmem:[%s2137_s10] sm:$0xff]  }
 0x4cf   : > { %1687 = vmatprep.subr.bf16.mxu0 %v1820_v0 }
 0x4d5   : > { %1676 = vmatmul.mubr.msk.bf16.vlgmr.msra.gmra.mrb[20].mxu0 %vm666_vm4, %v1064_v50 }
 0x4d6   : > { %1691 = vmatprep.mubr.msk.bf16.mxu0 %vm1821_vm1, %v1820_v0  ;;  %1688 = vmatpush3.bf16.msra.mxu0 %v1758_v46 }
 0x4d7   : > { %1689 = vmatprep.subr.bf16.mxu0 %v1820_v0 }
 0x4da   : > { %1690 = vmatpush3.bf16.msra.mxu0 %v1759_v47 }
 0x590   : > { %v730_v51 = vpop.f32.mrb[8].mxu0 }
 0x591   : > { %v1641_v52 = vpop.f32.mrb[9].mxu0 }
 0x592   : > { %v733_v53 = vpop.f32.mrb[10].mxu0 }
 0x593   : > { %v1642_v54 = vpop.f32.mrb[11].mxu0 }
 0x598   : > { %v855_v55 = vpop.f32.mrb[12].mxu0 }
 0x599   : > { %v1653_v56 = vpop.f32.mrb[13].mxu0 }
 0x59a   : > { %v858_v57 = vpop.f32.mrb[14].mxu0  ;;  %v1562_v56 = vld [vmem:[%s2135_s8] ss:$0 sm:$0xff] }
 0x59b   : > { %v1739_v59 = vpack.i.bf16 %v858_v57, %v855_v55  ;;  %v1654_v60 = vpop.f32.mrb[15].mxu0 }
 0x59c   : > { %v1563_v60 = vld [vmem:[%s2136_s9] ss:$0 sm:$0xff] }
 0x59d   : > { %1740 = vrot.lane.b32.xlu1 %v1739_v59, %s1833_s19 }
 0x5a0   : > { %v980_v61 = vpop.f32.mrb[16].mxu0 }
 0x5a1   : > { %v1665_v62 = vpop.f32.mrb[17].mxu0 }
 0x5a2   : > { %v983_v1 = vpop.f32.mrb[18].mxu0 }
 0x5a3   : > { %v1744_v2 = vpack.i.bf16 %v983_v1, %v980_v61  ;;  %v1666_v3 = vpop.f32.mrb[19].mxu0 }
 0x5a4   : > { %v1761_v3 = vld [vmem:[%s2139_s12 + $0x8] sm:$0xff]  }
 0x5a5   : > { %1745 = vrot.lane.b32.xlu0 %v1744_v2, %s1834_s22  ;;  %v1760_v2 = vld [vmem:[%s2139_s12] sm:$0xff]  }
 0x5a8   : > { %v1105_v4 = vpop.f32.mrb[20].mxu0 }
 0x5a9   : > { %v1677_v5 = vpop.f32.mrb[21].mxu0 }
 0x5aa   : > { %v1108_v6 = vpop.f32.mrb[22].mxu0  ;;  %v1763_v5 = vld [vmem:[%s2139_s12 + $0x18] sm:$0xff]  }
 0x5ab   : > { %v1749_v7 = vpack.i.bf16 %v1108_v6, %v1105_v4  ;;  %v1678_v8 = vpop.f32.mrb[23].mxu0  ;;  %v1762_v4 = vld [vmem:[%s2139_s12 + $0x10] sm:$0xff]   ;;  %v1764_v6 = vld [vmem:[%s2139_s12 + $0x20] sm:$0xff]  }
 0x5ac   : > { %v1766_v8 = vld [vmem:[%s2139_s12 + $0x30] sm:$0xff]  }
 0x5ad   : > { %1750 = vrot.lane.b32.xlu1 %v1749_v7, %s1835_s23  ;;  %v1765_v7 = vld [vmem:[%s2139_s12 + $0x28] sm:$0xff]  }
 0x60f   : > { %v1741_v9 = vpop.permute.xlu1 %1740 }
 0x610   : > { %v1743_v11 = vunpack.i.h.bf16 %v1741_v9  ;;  %v1742_v12 = vunpack.i.l.bf16 %v1741_v9  ;;  %v1767_v9 = vld [vmem:[%s2139_s12 + $0x38] sm:$0xff]  }
 0x612   : > { %v1137_v16 = vsel %vm608_vm2, %v733_v53, %v1743_v11  ;;  %v1136_v17 = vsel %vm608_vm2, %v730_v51, %v1742_v12 }
 0x617   : > { %v1746_v10 = vpop.permute.xlu0 %1745 }
 0x618   : > { %v1748_v13 = vunpack.i.h.bf16 %v1746_v10  ;;  %v1747_v14 = vunpack.i.l.bf16 %v1746_v10  ;;  %v1564_v10 = vld [vmem:[%s2138_s11] ss:$0 sm:$0xff] }
 0x61a   : > { %v1139_v20 = vsel %vm666_vm4, %v1137_v16, %v1748_v13  ;;  %v1138_v21 = vsel %vm666_vm4, %v1136_v17, %v1747_v14 }
 0x61f   : > { %v1751_v15 = vpop.permute.xlu1 %1750 }
 0x620   : > { %v1753_v18 = vunpack.i.h.bf16 %v1751_v15  ;;  %v1752_v19 = vunpack.i.l.bf16 %v1751_v15 }
 0x622   : > { %v1142_v22 = vsel %vm1140_vm5, %v1139_v20, %v1753_v18  ;;  %v1141_v23 = vsel %vm1140_vm5, %v1138_v21, %v1752_v19 }
 0x623   : > { %v1143_v24 = vpack.c.bf16 %v1142_v22, %v1141_v23 }
 0x625   : > { %1684 = vmatmul.mubr.msk.bf16.vlgmr.msra.gmra.mrb[12].mxu1 %vm489_vm0, %v1143_v24 }
 0x626   : > { %1711 = vmatprep.mubr.msk.bf16.mxu1 %vm1821_vm1, %v1820_v0  ;;  %1696 = vmatpush3.bf16.msra.mxu1 %v1760_v2 }
 0x627   : > { %1697 = vmatprep.subr.bf16.mxu1 %v1820_v0 }
 0x62a   : > { %1698 = vmatpush3.bf16.msra.mxu1 %v1761_v3 }
 0x62b   : > { %1699 = vmatprep.subr.bf16.mxu1 %v1820_v0 }
 0x62e   : > { %1700 = vmatpush3.bf16.msra.mxu1 %v1762_v4 }
 0x62f   : > { %1701 = vmatprep.subr.bf16.mxu1 %v1820_v0 }
 0x632   : > { %1702 = vmatpush3.bf16.msra.mxu1 %v1763_v5 }
 0x633   : > { %1703 = vmatprep.subr.bf16.mxu1 %v1820_v0 }
 0x636   : > { %1704 = vmatpush3.bf16.msra.mxu1 %v1764_v6 }
 0x637   : > { %1705 = vmatprep.subr.bf16.mxu1 %v1820_v0 }
 0x63a   : > { %1706 = vmatpush3.bf16.msra.mxu1 %v1765_v7 }
 0x63b   : > { %1707 = vmatprep.subr.bf16.mxu1 %v1820_v0 }
 0x63e   : > { %1708 = vmatpush3.bf16.msra.mxu1 %v1766_v8 }
 0x63f   : > { %1709 = vmatprep.subr.bf16.mxu1 %v1820_v0 }
 0x642   : > { %1710 = vmatpush3.bf16.msra.mxu1 %v1767_v9 }
 0x6f8   : > { %v1204_v26 = vpop.f32.mrb[12].mxu1 }
 0x6f9   : > { %v1205_v27 = vadd.f32 %v1558_v25, %v1204_v26  ;;  %v1685_v28 = vpop.f32.mrb[13].mxu1 }
 0x6fa   : > { %v1207_v42 = vpop.f32.mrb[14].mxu1 }
 0x6fb   : > { %v2053_v29 = vadd.f32 %v1205_v27, %v1951_v32  ;;  %v1208_v30 = vadd.f32 %v1558_v25, %v1207_v42  ;;  %v1686_v31 = vpop.f32.mrb[15].mxu1 }
 0x6fd   : > { %v2056_v34 = vadd.f32 %v1208_v30, %v1953_v33  ;;  %v1215_v35 = vsel %vm489_vm0, %v2053_v29, 0.0 }
 0x6fe   : > { %1216 = vadd.xlane.f32.xlu0 %v1215_v35 }
 0x6ff   : > { %v1218_v36 = vsel %vm489_vm0, %v2056_v34, 0.0 }
 0x700   : > { %1219 = vadd.xlane.f32.xlu1 %v1218_v36 }
 0x78b   : > { %v1217_v37 = vpop.xlane.xlu0 %1216 }
 0x78c   : > { %v1221_v38 = vmul.f32 0.03125, %v1217_v37 }
 0x78d   : > { %v1220_v39 = vpop.xlane.xlu1 %1219 }
 0x78e   : > { %v1223_v40 = vsub.f32 %v2053_v29, %v1221_v38  ;;  %v1222_v32 = vmul.f32 0.03125, %v1220_v39  ;;  %v1576_v39 = vld [vmem:[%s2140_s13] ss:$0 sm:$0xff] }
 0x790   : > { %v1224_v41 = vsub.f32 %v2056_v34, %v1222_v32  ;;  %v1225_v43 = vmul.f32 %v1223_v40, %v1223_v40 }
 0x792   : > { %v1227_v33 = vsel %vm489_vm0, %v1225_v43, 0.0  ;;  %v1226_v44 = vmul.f32 %v1224_v41, %v1224_v41 }
 0x793   : > { %1228 = vadd.xlane.f32.xlu0 %v1227_v33 }
 0x794   : > { %v1230_v45 = vsel %vm489_vm0, %v1226_v44, 0.0 }
 0x797   : > { %1231 = vadd.xlane.f32.xlu0 %v1230_v45 }
 0x820   : > { %v1229_v48 = vpop.xlane.xlu0 %1228 }
 0x821   : > { %v1233_v49 = vmul.f32 0.03125, %v1229_v48 }
 0x823   : > { %v1235_v50 = vadd.f32 1e-05, %v1233_v49 }
 0x824   : > { %v1232_v51 = vpop.xlane.xlu0 %1231 }
 0x825   : > { %1804 = vrsqrt.f32 %v1235_v50  ;;  %v1234_v52 = vmul.f32 0.03125, %v1232_v51 }
 0x827   : > { %v1236_v53 = vadd.f32 1e-05, %v1234_v52 }
 0x829   : > { %1806 = vrsqrt.f32 %v1236_v53 }
 0x82f   : > { %v1805_v54 = vpop.eup %1804 }
 0x830   : > { %v1239_v55 = vmul.f32 %v1805_v54, %v1223_v40 }
 0x832   : > { %v1247_v58 = vmul.f32 %v1562_v56, %v1239_v55 }
 0x833   : > { %v1807_v57 = vpop.eup %1806 }
 0x834   : > { %v1240_v59 = vmul.f32 %v1807_v57, %v1224_v41  ;;  %v1255_v62 = vadd.f32 %v1563_v60, %v1247_v58 }
 0x836   : > { %v1248_v61 = vmul.f32 %v1562_v56, %v1240_v59 }
 0x838   : > { %v1256_v63 = vadd.f32 %v1563_v60, %v1248_v61 }
 0x83a   : > { %v1257_v1 = vpack.c.bf16 %v1256_v63, %v1255_v62 }
 0x83c   : > { %1692 = vmatmul.mubr.msk.bf16.vlgmr.msra.gmra.mrb[24].mxu0 %vm489_vm0, %v1257_v1 }
 0x90f   : > { %v1318_v11 = vpop.f32.mrb[24].mxu0 }
 0x910   : > { %v1319_v12 = vadd.f32 %v1564_v10, %v1318_v11  ;;  %v1693_v13 = vpop.f32.mrb[25].mxu0 }
 0x911   : > { %v1321_v14 = vpop.f32.mrb[26].mxu0 }
 0x912   : > { %v1327_v15 = vmul.f32 0.044715, %v1319_v12  ;;  %v1322_v16 = vadd.f32 %v1564_v10, %v1321_v14  ;;  %v1694_v17 = vpop.f32.mrb[27].mxu0  ;;  %v1325_v42 = vmul.f32 0.5, %v1319_v12 }
 0x914   : > { %v1329_v18 = vmul.f32 %v1327_v15, %v1319_v12  ;;  %v1328_v19 = vmul.f32 0.044715, %v1322_v16  ;;  %v1326_v30 = vmul.f32 0.5, %v1322_v16 }
 0x916   : > { %v1331_v20 = vmul.f32 %v1329_v18, %v1319_v12  ;;  %v1330_v21 = vmul.f32 %v1328_v19, %v1322_v16 }
 0x918   : > { %v1333_v22 = vadd.f32 %v1331_v20, %v1319_v12  ;;  %v1332_v23 = vmul.f32 %v1330_v21, %v1322_v16 }
 0x91a   : > { %v1335_v24 = vmul.f32 0.7978846, %v1333_v22  ;;  %v1334_v0 = vadd.f32 %v1332_v23, %v1322_v16 }
 0x91c   : > { %1808 = vtanh.f32 %v1335_v24  ;;  %v1336_v25 = vmul.f32 0.7978846, %v1334_v0 }
 0x91e   : > { %1810 = vtanh.f32 %v1336_v25 }
 0x926   : > { %v1809_v26 = vpop.eup %1808 }
 0x927   : > { %v1339_v27 = vadd.f32 1.0, %v1809_v26 }
 0x928   : > { %v1811_v28 = vpop.eup %1810 }
 0x929   : > { %v1340_v31 = vadd.f32 1.0, %v1811_v28  ;;  %v1341_v35 = vmul.f32 %v1339_v27, %v1325_v42 }
 0x92b   : > { %v1342_v36 = vmul.f32 %v1340_v31, %v1326_v30 }
 0x92d   : > { %v1343_v37 = vpack.c.bf16 %v1342_v36, %v1341_v35 }
 0x92f   : > { %1712 = vmatmul.mubr.bf16.vlgmr.msra.gmra.mrb[16].mxu1 %v1343_v37 }
 0xa02   : > { %v1442_v38 = vpop.f32.mrb[16].mxu1 }
 0xa03   : > { %v1449_v40 = vadd.f32 %v1442_v38, %v2053_v29  ;;  %v1713_v32 = vpop.f32.mrb[17].mxu1 }
 0xa04   : > { %v1445_v41 = vpop.f32.mrb[18].mxu1 }
 0xa05   : > { %v1458_v43 = vadd.f32 %v1576_v39, %v1449_v40  ;;  %v1450_v33 = vadd.f32 %v1445_v41, %v2056_v34  ;;  %v1714_v44 = vpop.f32.mrb[19].mxu1 }
 0xa07   : > { %v1583_v45 = vpack.c.bf16 %v1458_v43, %v1458_v43  ;;  %v1459_v46 = vadd.f32 %v1576_v39, %v1450_v33 }
 0xa09   : > { %1469 = vst.msk [vmem:[%s481_s17] sm:$0xf] %vm1468_vm6, %v1583_v45  ;;  %v1584_v47 = vpack.c.bf16 %v1459_v46, %v1459_v46 }
 0xa0b   : > { %1470 = vst.msk [vmem:[%s481_s17 + $0x4] sm:$0xf] %vm1468_vm6, %v1584_v47 }
 0xa0c PF: > { %s24_s29 = sadd.s32 1, %s1818_s29  }
 0xa0d   : > { %p21_p4 = scmp.ge.s32.totalorder %s24_s29, 4  }
 0xa0f   :  { %23 = sbr.rel (!%p21_p4) target bundleno = 1 (0x1), region = 109 }

</bundles_post_ra>
